<compile_context>
chip_gen: v7x
topology: tpu7x:2x2x1
jax: 0.10.0
libtpu: 0.0.40
codegen_flags: <defaults>
</compile_context>

<pallas_src>
import math
import functools

import jax
import jax.numpy as jnp
from jax.experimental import pallas as pl
from jax.experimental.pallas import tpu as pltpu


def gpt_block_kernel(x_ref,
                     w_attn_ref, b_attn_ref,
                     w_proj_ref, b_proj_ref,
                     w_fc_ref, b_fc_ref,
                     w_proj2_ref, b_proj2_ref,
                     out_ref,
                     *, n_head, approx_recip):
    f32 = jnp.float32
    cd = w_attn_ref.dtype                       # MXU operand dtype (bf16 / f32)

    xb = x_ref[...]                             # (Bblk, T, C) fp32
    Bblk, T, C = xb.shape
    M = Bblk * T
    H = n_head
    hd = C // H
    eps = 1e-5                                  # torch.nn.LayerNorm default
    inv_sqrt2 = 1.0 / math.sqrt(2.0)

    x = xb.reshape(M, C)                        # leading-dim merge: free

    # LayerNorm gamma/beta are folded into the following matmul's weight/bias
    # (done once in prepare_block_params), so only normalization remains here.
    def normalize(h):
        mu = jnp.mean(h, axis=-1, keepdims=True)
        var = jnp.mean((h - mu) ** 2, axis=-1, keepdims=True)
        return (h - mu) * jax.lax.rsqrt(var + eps)

    # ---- attention branch ---------------------------------------------------
    h1 = normalize(x)
    # 1/sqrt(hd) softmax scale is pre-folded into the q columns of w_attn/b_attn.
    qkv = jnp.dot(h1.astype(cd), w_attn_ref[...],
                  preferred_element_type=f32) + b_attn_ref[...]      # (M, 3C)

    q = qkv[:, 0:C].astype(cd)
    k = qkv[:, C:2 * C].astype(cd)
    v = qkv[:, 2 * C:3 * C].astype(cd)

    # batched (Bblk*H, T, hd) layout: static slices + ONE leading-axis stack
    # per tensor (the hd<128 lane split itself is unavoidable).
    def to_heads(t):
        return jnp.stack([t[b * T:(b + 1) * T, h * hd:(h + 1) * hd]
                          for b in range(Bblk) for h in range(H)], axis=0)

    qh, kh, vh = to_heads(q), to_heads(k), to_heads(v)

    # additive causal bias, built once, finite (no inf-inf NaN risk),
    # broadcast across all (batch, head) pairs.
    row = jax.lax.broadcasted_iota(jnp.int32, (T, T), 0)
    col = jax.lax.broadcasted_iota(jnp.int32, (T, T), 1)
    bias = jnp.where(row >= col, f32(0.0), f32(-1e30))               # (T, T)

    # ONE batched score matmul + ONE batched p@v matmul for all (batch, head)
    s = jnp.einsum('hqd,hkd->hqk', qh, kh,
                   preferred_element_type=f32) + bias                # (BH, T, T)
    m = jnp.max(s, axis=-1, keepdims=True)
    p = jnp.exp(s - m)
    denom = jnp.sum(p, axis=-1, keepdims=True)                       # (BH, T, 1)
    y = jnp.einsum('hqk,hkd->hqd', p.astype(cd), vh,
                   preferred_element_type=f32)                       # (BH, T, hd)
    # normalize the small (BH,T,hd) output, not the (BH,T,T) probabilities
    if approx_recip:
        y = y * pl.reciprocal(denom, approx=True)                    # EUP slot
    else:
        y = y / denom                                                # exact path

    # merge heads back to (M, C) and do ONE K=C output-projection matmul
    # (replaces H K=hd MXU pushes + an fp32 VPU accumulation chain).
    ym = jnp.concatenate(
        [jnp.concatenate([y[b * H + h] for h in range(H)], axis=-1)
         for b in range(Bblk)], axis=0)                              # (M, C)
    attn_out = jnp.dot(ym.astype(cd), w_proj_ref[...],
                       preferred_element_type=f32) + b_proj_ref[...]
    x1 = x + attn_out                                                # residual 1

    # ---- MLP branch ---------------------------------------------------------
    h2 = normalize(x1)
    up = jnp.dot(h2.astype(cd), w_fc_ref[...],
                 preferred_element_type=f32) + b_fc_ref[...]         # (M, 4C)
    # exact GELU (approximate='none'): 0.5 * x * (1 + erf(x / sqrt(2)))
    up = 0.5 * up * (1.0 + jax.lax.erf(up * inv_sqrt2))
    mlp_out = jnp.dot(up.astype(cd), w_proj2_ref[...],
                      preferred_element_type=f32) + b_proj2_ref[...]

    out_ref[...] = (x1 + mlp_out).reshape(Bblk, T, C).astype(out_ref.dtype)


def prepare_block_params(params, n_head, matmul_dtype=jnp.bfloat16):
    """One-time parameter prep (call OUTSIDE the per-step path):
      * folds LayerNorm gamma/beta into the following matmul weight/bias,
      * folds the 1/sqrt(head_dim) attention scale into the q weight columns,
      * pre-casts the large matmul weights to the MXU operand dtype once
        (biases and all accumulation stay fp32)."""
    f32 = jnp.float32
    w_attn = params["w_attn"].astype(f32)                 # (C, 3C)
    w_fc = params["w_fc"].astype(f32)                     # (C, 4C)
    C = w_attn.shape[0]
    hd = C // n_head
    scale = 1.0 / math.sqrt(hd)

    ln1_g = params["ln1_g"].astype(f32).reshape(C)
    ln1_b = params["ln1_b"].astype(f32).reshape(1, C)
    ln2_g = params["ln2_g"].astype(f32).reshape(C)
    ln2_b = params["ln2_b"].astype(f32).reshape(1, C)

    # LN1 affine -> attention qkv matmul
    w_attn_f = w_attn * ln1_g[:, None]
    b_attn_f = params["b_attn"].astype(f32).reshape(1, 3 * C) + ln1_b @ w_attn
    # softmax scale -> q third of the qkv projection
    qcol = jnp.concatenate([jnp.full((C,), scale, f32),
                            jnp.ones((2 * C,), f32)], axis=0)
    w_attn_f = w_attn_f * qcol[None, :]
    b_attn_f = b_attn_f * qcol[None, :]

    # LN2 affine -> MLP up-projection matmul
    w_fc_f = w_fc * ln2_g[:, None]
    b_fc_f = params["b_fc"].astype(f32).reshape(1, 4 * C) + ln2_b @ w_fc

    return {
        "w_attn":  w_attn_f.astype(matmul_dtype),
        "b_attn":  b_attn_f,
        "w_proj":  params["w_proj"].astype(matmul_dtype),
        "b_proj":  params["b_proj"].astype(f32).reshape(1, C),
        "w_fc":    w_fc_f.astype(matmul_dtype),
        "b_fc":    b_fc_f,
        "w_proj2": params["w_proj2"].astype(matmul_dtype),
        "b_proj2": params["b_proj2"].astype(f32).reshape(1, C),
    }


def gpt_block(x, prm, n_head, block_b=None):
    B, T, C = x.shape
    assert C % n_head == 0

    if block_b is None:
        # Pack sequences per grid step so the dense matmuls see M = block_b*T
        # rows (>=256 fills the 256-deep v6e/v7x MXU), while keeping the grid
        # length >= 2 so both v7x TensorCores receive work.
        block_b = 1
        for cand in range(min(B, 8), 0, -1):
            if B % cand != 0:
                continue
            if B // cand >= 2 and cand * T >= 256:
                block_b = cand
                break
    assert B % block_b == 0
    grid = (B // block_b,)

    matmul_dtype = prm["w_attn"].dtype
    approx_recip = (matmul_dtype == jnp.bfloat16)

    def full_spec(shape):
        nd = len(shape)
        return pl.BlockSpec(shape, lambda b, _nd=nd: (0,) * _nd)

    weight_keys = ["w_attn", "b_attn", "w_proj", "b_proj",
                   "w_fc", "b_fc", "w_proj2", "b_proj2"]

    in_specs = [pl.BlockSpec((block_b, T, C), lambda b: (b, 0, 0))]
    in_specs += [full_spec(prm[kname].shape) for kname in weight_keys]

    kernel = functools.partial(gpt_block_kernel, n_head=n_head,
                               approx_recip=approx_recip)

    # TODO(synk): at GPT scale (C>=768, T>=1024) switch attention to a KV-tiled
    # flash loop (never materialize the (BH,T,T) scores, build the causal mask
    # per KV tile), tile the MLP hidden dim with an fp32 VMEM accumulator +
    # pl.when init/finalize, single-buffer the weight inputs
    # (pipeline_mode=pl.Buffered(1) or persistent VMEM scratch), and set
    # vmem_limit_bytes explicitly for v7x's 64 MiB VMEM.
    return pl.pallas_call(
        kernel,
        out_shape=jax.ShapeDtypeStruct((B, T, C), jnp.float32),
        grid_spec=pltpu.PrefetchScalarGridSpec(
            num_scalar_prefetch=0,
            grid=grid,
            in_specs=in_specs,
            out_specs=pl.BlockSpec((block_b, T, C), lambda b: (b, 0, 0)),
        ),
        compiler_params=pltpu.CompilerParams(
            dimension_semantics=("parallel",)),
    )(x, *[prm[kname] for kname in weight_keys])


def gpt_block_ref(x, params, n_head):
    """Pure-JAX reference mirroring the PyTorch Block forward (fp32 params)."""
    B, T, C = x.shape
    hd = C // n_head
    eps = 1e-5

    def ln(h, g, b):
        mu = jnp.mean(h, axis=-1, keepdims=True)
        var = jnp.mean((h - mu) ** 2, axis=-1, keepdims=True)
        return (h - mu) * jax.lax.rsqrt(var + eps) * g + b

    h = ln(x, params["ln1_g"][0], params["ln1_b"][0])
    qkv = h @ params["w_attn"] + params["b_attn"][0]
    q, k, v = jnp.split(qkv, 3, axis=-1)
    q = q.reshape(B, T, n_head, hd).transpose(0, 2, 1, 3)
    k = k.reshape(B, T, n_head, hd).transpose(0, 2, 1, 3)
    v = v.reshape(B, T, n_head, hd).transpose(0, 2, 1, 3)
    s = jnp.einsum("bhqd,bhkd->bhqk", q, k) / math.sqrt(hd)
    mask = jnp.tril(jnp.ones((T, T), bool))
    s = jnp.where(mask, s, -jnp.inf)
    p = jax.nn.softmax(s, axis=-1)
    y = jnp.einsum("bhqk,bhkd->bhqd", p, v)
    y = y.transpose(0, 2, 1, 3).reshape(B, T, C)
    y = y @ params["w_proj"] + params["b_proj"][0]
    x1 = x + y

    h2 = ln(x1, params["ln2_g"][0], params["ln2_b"][0])
    up = h2 @ params["w_fc"] + params["b_fc"][0]
    up = 0.5 * up * (1.0 + jax.lax.erf(up / math.sqrt(2.0)))
    out = up @ params["w_proj2"] + params["b_proj2"][0]
    return x1 + out


if __name__ == "__main__":
    # Small-but-TPU-friendly config: n_embd=128, n_head=4, T=128, B=4
    # (B=4 exercises the sequence-packing path: block_b=2 -> grid=(2,), M=256).
    B, T, C, n_head = 4, 128, 128, 4

    key = jax.random.PRNGKey(0)
    keys = jax.random.split(key, 8)
    std = 0.02
    params = {
        "ln1_g":   jnp.ones((1, C), jnp.float32),
        "ln1_b":   jnp.zeros((1, C), jnp.float32),
        "w_attn":  std * jax.random.normal(keys[0], (C, 3 * C), jnp.float32),
        "b_attn":  jnp.zeros((1, 3 * C), jnp.float32),
        "w_proj":  std * jax.random.normal(keys[1], (C, C), jnp.float32),
        "b_proj":  jnp.zeros((1, C), jnp.float32),
        "ln2_g":   jnp.ones((1, C), jnp.float32),
        "ln2_b":   jnp.zeros((1, C), jnp.float32),
        "w_fc":    std * jax.random.normal(keys[2], (C, 4 * C), jnp.float32),
        "b_fc":    jnp.zeros((1, 4 * C), jnp.float32),
        "w_proj2": std * jax.random.normal(keys[3], (4 * C, C), jnp.float32),
        "b_proj2": jnp.zeros((1, C), jnp.float32),
    }

    x = jax.random.normal(keys[4], (B, T, C), jnp.float32)

    # ONE-TIME parameter prep (LN folding + bf16 cast) hoisted out of the step.
    prm_bf16 = prepare_block_params(params, n_head, jnp.bfloat16)
    prm_f32 = prepare_block_params(params, n_head, jnp.float32)

    # perf path: bf16 MXU operands, fp32 accumulation, approximate reciprocal
    out_bf16 = jax.block_until_ready(gpt_block(x, prm_bf16, n_head))
    # exact path: fp32 operands, exact divide (golden check)
    out_f32 = jax.block_until_ready(gpt_block(x, prm_f32, n_head))

    ref = gpt_block_ref(x, params, n_head)
    assert out_bf16.shape == (B, T, C)

    err_f32 = float(jnp.max(jnp.abs(out_f32 - ref)))
    err_bf16 = float(jnp.max(jnp.abs(out_bf16 - ref)))
    assert jnp.allclose(out_f32, ref, atol=2e-3, rtol=2e-3), err_f32
    assert jnp.allclose(out_bf16, ref, atol=5e-2, rtol=5e-2), err_bf16

    print("KERNEL_OK")
</pallas_src>

<mosaic_0001>
module attributes {stable_mosaic.version = 11 : i64} {
  func.func @gpt_block_kernel(%arg0: i32, %arg1: memref<2x128x128xf32, #tpu.memory_space<vmem>>, %arg2: memref<128x384xbf16, #tpu.memory_space<vmem>>, %arg3: memref<1x384xf32, #tpu.memory_space<vmem>>, %arg4: memref<128x128xbf16, #tpu.memory_space<vmem>>, %arg5: memref<1x128xf32, #tpu.memory_space<vmem>>, %arg6: memref<128x512xbf16, #tpu.memory_space<vmem>>, %arg7: memref<1x512xf32, #tpu.memory_space<vmem>>, %arg8: memref<512x128xbf16, #tpu.memory_space<vmem>>, %arg9: memref<1x128xf32, #tpu.memory_space<vmem>>, %arg10: memref<2x128x128xf32, #tpu.memory_space<vmem>>) attributes {dimension_semantics = [#tpu.dimension_semantics<parallel>], iteration_bounds = array<i64: 2>, scalar_prefetch = 0 : i64, scratch_operands = 0 : i64, tpu.core_type = #tpu.core_type<tc>, window_params = [{transform_indices = @transform_0, window_bounds = array<i64: 2, 128, 128>}, {pipeline_mode = #tpu.pipeline_mode<synchronous>, transform_indices = @transform_1, window_bounds = array<i64: 128, 384>}, {pipeline_mode = #tpu.pipeline_mode<synchronous>, transform_indices = @transform_2, window_bounds = array<i64: 1, 384>}, {pipeline_mode = #tpu.pipeline_mode<synchronous>, transform_indices = @transform_3, window_bounds = array<i64: 128, 128>}, {pipeline_mode = #tpu.pipeline_mode<synchronous>, transform_indices = @transform_4, window_bounds = array<i64: 1, 128>}, {pipeline_mode = #tpu.pipeline_mode<synchronous>, transform_indices = @transform_5, window_bounds = array<i64: 128, 512>}, {pipeline_mode = #tpu.pipeline_mode<synchronous>, transform_indices = @transform_6, window_bounds = array<i64: 1, 512>}, {pipeline_mode = #tpu.pipeline_mode<synchronous>, transform_indices = @transform_7, window_bounds = array<i64: 512, 128>}, {pipeline_mode = #tpu.pipeline_mode<synchronous>, transform_indices = @transform_8, window_bounds = array<i64: 1, 128>}, {transform_indices = @transform_9, window_bounds = array<i64: 2, 128, 128>}]} {
    %c0 = arith.constant 0 : index
    %c0_0 = arith.constant 0 : index
    %c0_1 = arith.constant 0 : index
    %0 = vector.load %arg1[%c0, %c0_0, %c0_1] : memref<2x128x128xf32, #tpu.memory_space<vmem>>, vector<2x128x128xf32>
    %1 = vector.shape_cast %0 : vector<2x128x128xf32> to vector<256x128xf32>
    %cst = arith.constant dense<0.000000e+00> : vector<256xf32>
    %2 = vector.multi_reduction <add>, %1, %cst [1] : vector<256x128xf32> to vector<256xf32>
    %3 = vector.shape_cast %2 : vector<256xf32> to vector<256x1xf32>
    %cst_2 = arith.constant 1.280000e+02 : f32
    %4 = vector.broadcast %cst_2 : f32 to vector<256x1xf32>
    %5 = arith.divf %3, %4 : vector<256x1xf32>
    %6 = vector.broadcast %5 : vector<256x1xf32> to vector<256x128xf32>
    %7 = arith.subf %1, %6 : vector<256x128xf32>
    %8 = arith.mulf %7, %7 : vector<256x128xf32>
    %cst_3 = arith.constant dense<0.000000e+00> : vector<256xf32>
    %9 = vector.multi_reduction <add>, %8, %cst_3 [1] : vector<256x128xf32> to vector<256xf32>
    %10 = vector.shape_cast %9 : vector<256xf32> to vector<256x1xf32>
    %cst_4 = arith.constant 1.280000e+02 : f32
    %11 = vector.broadcast %cst_4 : f32 to vector<256x1xf32>
    %12 = arith.divf %10, %11 : vector<256x1xf32>
    %13 = vector.broadcast %5 : vector<256x1xf32> to vector<256x128xf32>
    %14 = arith.subf %1, %13 : vector<256x128xf32>
    %cst_5 = arith.constant 9.99999974E-6 : f32
    %15 = vector.broadcast %cst_5 : f32 to vector<256x1xf32>
    %16 = arith.addf %12, %15 : vector<256x1xf32>
    %17 = math.rsqrt %16 : vector<256x1xf32>
    %18 = vector.broadcast %17 : vector<256x1xf32> to vector<256x128xf32>
    %19 = arith.mulf %14, %18 : vector<256x128xf32>
    %20 = arith.truncf %19 : vector<256x128xf32> to vector<256x128xbf16>
    %c0_6 = arith.constant 0 : index
    %c0_7 = arith.constant 0 : index
    %21 = vector.load %arg2[%c0_6, %c0_7] : memref<128x384xbf16, #tpu.memory_space<vmem>>, vector<128x384xbf16>
    %cst_8 = arith.constant dense<0.000000e+00> : vector<256x384xf32>
    %22 = tpu.matmul %20, %21, %cst_8 {dimension_numbers = #tpu.dot_dimension_numbers<[1], [0], [0], [1], [0, 0, 1, 1], [], []>} : vector<256x128xbf16>, vector<128x384xbf16>, vector<256x384xf32> -> vector<256x384xf32>
    %c0_9 = arith.constant 0 : index
    %c0_10 = arith.constant 0 : index
    %23 = vector.load %arg3[%c0_9, %c0_10] : memref<1x384xf32, #tpu.memory_space<vmem>>, vector<1x384xf32>
    %24 = vector.broadcast %23 : vector<1x384xf32> to vector<256x384xf32>
    %25 = arith.addf %22, %24 : vector<256x384xf32>
    %26 = vector.extract_strided_slice %25 {offsets = [0, 0], sizes = [256, 128], strides = [1, 1]} : vector<256x384xf32> to vector<256x128xf32>
    %27 = arith.truncf %26 : vector<256x128xf32> to vector<256x128xbf16>
    %28 = vector.extract_strided_slice %25 {offsets = [0, 128], sizes = [256, 128], strides = [1, 1]} : vector<256x384xf32> to vector<256x128xf32>
    %29 = arith.truncf %28 : vector<256x128xf32> to vector<256x128xbf16>
    %30 = vector.extract_strided_slice %25 {offsets = [0, 256], sizes = [256, 128], strides = [1, 1]} : vector<256x384xf32> to vector<256x128xf32>
    %31 = arith.truncf %30 : vector<256x128xf32> to vector<256x128xbf16>
    %32 = vector.extract_strided_slice %27 {offsets = [0, 0], sizes = [128, 32], strides = [1, 1]} : vector<256x128xbf16> to vector<128x32xbf16>
    %33 = vector.extract_strided_slice %27 {offsets = [0, 32], sizes = [128, 32], strides = [1, 1]} : vector<256x128xbf16> to vector<128x32xbf16>
    %34 = vector.extract_strided_slice %27 {offsets = [0, 64], sizes = [128, 32], strides = [1, 1]} : vector<256x128xbf16> to vector<128x32xbf16>
    %35 = vector.extract_strided_slice %27 {offsets = [0, 96], sizes = [128, 32], strides = [1, 1]} : vector<256x128xbf16> to vector<128x32xbf16>
    %36 = vector.extract_strided_slice %27 {offsets = [128, 0], sizes = [128, 32], strides = [1, 1]} : vector<256x128xbf16> to vector<128x32xbf16>
    %37 = vector.extract_strided_slice %27 {offsets = [128, 32], sizes = [128, 32], strides = [1, 1]} : vector<256x128xbf16> to vector<128x32xbf16>
    %38 = vector.extract_strided_slice %27 {offsets = [128, 64], sizes = [128, 32], strides = [1, 1]} : vector<256x128xbf16> to vector<128x32xbf16>
    %39 = vector.extract_strided_slice %27 {offsets = [128, 96], sizes = [128, 32], strides = [1, 1]} : vector<256x128xbf16> to vector<128x32xbf16>
    %40 = vector.shape_cast %32 : vector<128x32xbf16> to vector<1x128x32xbf16>
    %41 = vector.shape_cast %33 : vector<128x32xbf16> to vector<1x128x32xbf16>
    %42 = vector.shape_cast %34 : vector<128x32xbf16> to vector<1x128x32xbf16>
    %43 = vector.shape_cast %35 : vector<128x32xbf16> to vector<1x128x32xbf16>
    %44 = vector.shape_cast %36 : vector<128x32xbf16> to vector<1x128x32xbf16>
    %45 = vector.shape_cast %37 : vector<128x32xbf16> to vector<1x128x32xbf16>
    %46 = vector.shape_cast %38 : vector<128x32xbf16> to vector<1x128x32xbf16>
    %47 = vector.shape_cast %39 : vector<128x32xbf16> to vector<1x128x32xbf16>
    %48 = tpu.concatenate %40, %41, %42, %43, %44, %45, %46, %47 in 0 : vector<1x128x32xbf16>, vector<1x128x32xbf16>, vector<1x128x32xbf16>, vector<1x128x32xbf16>, vector<1x128x32xbf16>, vector<1x128x32xbf16>, vector<1x128x32xbf16>, vector<1x128x32xbf16> -> vector<8x128x32xbf16>
    %49 = vector.extract_strided_slice %29 {offsets = [0, 0], sizes = [128, 32], strides = [1, 1]} : vector<256x128xbf16> to vector<128x32xbf16>
    %50 = vector.extract_strided_slice %29 {offsets = [0, 32], sizes = [128, 32], strides = [1, 1]} : vector<256x128xbf16> to vector<128x32xbf16>
    %51 = vector.extract_strided_slice %29 {offsets = [0, 64], sizes = [128, 32], strides = [1, 1]} : vector<256x128xbf16> to vector<128x32xbf16>
    %52 = vector.extract_strided_slice %29 {offsets = [0, 96], sizes = [128, 32], strides = [1, 1]} : vector<256x128xbf16> to vector<128x32xbf16>
    %53 = vector.extract_strided_slice %29 {offsets = [128, 0], sizes = [128, 32], strides = [1, 1]} : vector<256x128xbf16> to vector<128x32xbf16>
    %54 = vector.extract_strided_slice %29 {offsets = [128, 32], sizes = [128, 32], strides = [1, 1]} : vector<256x128xbf16> to vector<128x32xbf16>
    %55 = vector.extract_strided_slice %29 {offsets = [128, 64], sizes = [128, 32], strides = [1, 1]} : vector<256x128xbf16> to vector<128x32xbf16>
    %56 = vector.extract_strided_slice %29 {offsets = [128, 96], sizes = [128, 32], strides = [1, 1]} : vector<256x128xbf16> to vector<128x32xbf16>
    %57 = vector.shape_cast %49 : vector<128x32xbf16> to vector<1x128x32xbf16>
    %58 = vector.shape_cast %50 : vector<128x32xbf16> to vector<1x128x32xbf16>
    %59 = vector.shape_cast %51 : vector<128x32xbf16> to vector<1x128x32xbf16>
    %60 = vector.shape_cast %52 : vector<128x32xbf16> to vector<1x128x32xbf16>
    %61 = vector.shape_cast %53 : vector<128x32xbf16> to vector<1x128x32xbf16>
    %62 = vector.shape_cast %54 : vector<128x32xbf16> to vector<1x128x32xbf16>
    %63 = vector.shape_cast %55 : vector<128x32xbf16> to vector<1x128x32xbf16>
    %64 = vector.shape_cast %56 : vector<128x32xbf16> to vector<1x128x32xbf16>
    %65 = tpu.concatenate %57, %58, %59, %60, %61, %62, %63, %64 in 0 : vector<1x128x32xbf16>, vector<1x128x32xbf16>, vector<1x128x32xbf16>, vector<1x128x32xbf16>, vector<1x128x32xbf16>, vector<1x128x32xbf16>, vector<1x128x32xbf16>, vector<1x128x32xbf16> -> vector<8x128x32xbf16>
    %66 = vector.extract_strided_slice %31 {offsets = [0, 0], sizes = [128, 32], strides = [1, 1]} : vector<256x128xbf16> to vector<128x32xbf16>
    %67 = vector.extract_strided_slice %31 {offsets = [0, 32], sizes = [128, 32], strides = [1, 1]} : vector<256x128xbf16> to vector<128x32xbf16>
    %68 = vector.extract_strided_slice %31 {offsets = [0, 64], sizes = [128, 32], strides = [1, 1]} : vector<256x128xbf16> to vector<128x32xbf16>
    %69 = vector.extract_strided_slice %31 {offsets = [0, 96], sizes = [128, 32], strides = [1, 1]} : vector<256x128xbf16> to vector<128x32xbf16>
    %70 = vector.extract_strided_slice %31 {offsets = [128, 0], sizes = [128, 32], strides = [1, 1]} : vector<256x128xbf16> to vector<128x32xbf16>
    %71 = vector.extract_strided_slice %31 {offsets = [128, 32], sizes = [128, 32], strides = [1, 1]} : vector<256x128xbf16> to vector<128x32xbf16>
    %72 = vector.extract_strided_slice %31 {offsets = [128, 64], sizes = [128, 32], strides = [1, 1]} : vector<256x128xbf16> to vector<128x32xbf16>
    %73 = vector.extract_strided_slice %31 {offsets = [128, 96], sizes = [128, 32], strides = [1, 1]} : vector<256x128xbf16> to vector<128x32xbf16>
    %74 = vector.shape_cast %66 : vector<128x32xbf16> to vector<1x128x32xbf16>
    %75 = vector.shape_cast %67 : vector<128x32xbf16> to vector<1x128x32xbf16>
    %76 = vector.shape_cast %68 : vector<128x32xbf16> to vector<1x128x32xbf16>
    %77 = vector.shape_cast %69 : vector<128x32xbf16> to vector<1x128x32xbf16>
    %78 = vector.shape_cast %70 : vector<128x32xbf16> to vector<1x128x32xbf16>
    %79 = vector.shape_cast %71 : vector<128x32xbf16> to vector<1x128x32xbf16>
    %80 = vector.shape_cast %72 : vector<128x32xbf16> to vector<1x128x32xbf16>
    %81 = vector.shape_cast %73 : vector<128x32xbf16> to vector<1x128x32xbf16>
    %82 = tpu.concatenate %74, %75, %76, %77, %78, %79, %80, %81 in 0 : vector<1x128x32xbf16>, vector<1x128x32xbf16>, vector<1x128x32xbf16>, vector<1x128x32xbf16>, vector<1x128x32xbf16>, vector<1x128x32xbf16>, vector<1x128x32xbf16>, vector<1x128x32xbf16> -> vector<8x128x32xbf16>
    %83 = tpu.iota {dimensions = array<i32: 0>} : vector<128x128xi32>
    %84 = tpu.iota {dimensions = array<i32: 1>} : vector<128x128xi32>
    %85 = arith.cmpi sge, %83, %84 : vector<128x128xi32>
    %cst_11 = arith.constant 0.000000e+00 : f32
    %cst_12 = arith.constant -1.000000e+30 : f32
    %86 = vector.broadcast %cst_11 : f32 to vector<128x128xf32>
    %87 = vector.broadcast %cst_12 : f32 to vector<128x128xf32>
    %88 = arith.select %85, %86, %87 : vector<128x128xi1>, vector<128x128xf32>
    "tpu.trace_start"() <{level = 10 : i32, message = "hqd,hkd->hqk"}> : () -> ()
    %cst_13 = arith.constant dense<0.000000e+00> : vector<8x128x128xf32>
    %89 = tpu.matmul %48, %65, %cst_13 {dimension_numbers = #tpu.dot_dimension_numbers<[2], [2], [1], [1], [0, 0, 0, 1, 1, 1], [0], [0]>} : vector<8x128x32xbf16>, vector<8x128x32xbf16>, vector<8x128x128xf32> -> vector<8x128x128xf32>
    "tpu.trace_stop"() : () -> ()
    %90 = vector.shape_cast %88 : vector<128x128xf32> to vector<1x128x128xf32>
    %91 = vector.broadcast %90 : vector<1x128x128xf32> to vector<8x128x128xf32>
    %92 = arith.addf %89, %91 : vector<8x128x128xf32>
    %cst_14 = arith.constant dense<0xFF800000> : vector<8x128xf32>
    %93 = vector.multi_reduction <maximumf>, %92, %cst_14 [2] : vector<8x128x128xf32> to vector<8x128xf32>
    %94 = vector.shape_cast %93 : vector<8x128xf32> to vector<8x128x1xf32>
    %95 = vector.broadcast %94 : vector<8x128x1xf32> to vector<8x128x128xf32>
    %96 = arith.subf %92, %95 : vector<8x128x128xf32>
    %97 = math.exp %96 : vector<8x128x128xf32>
    %cst_15 = arith.constant dense<0.000000e+00> : vector<8x128xf32>
    %98 = vector.multi_reduction <add>, %97, %cst_15 [2] : vector<8x128x128xf32> to vector<8x128xf32>
    %99 = vector.shape_cast %98 : vector<8x128xf32> to vector<8x128x1xf32>
    %100 = arith.truncf %97 : vector<8x128x128xf32> to vector<8x128x128xbf16>
    "tpu.trace_start"() <{level = 10 : i32, message = "hqk,hkd->hqd"}> : () -> ()
    %cst_16 = arith.constant dense<0.000000e+00> : vector<8x128x32xf32>
    %101 = tpu.matmul %100, %82, %cst_16 {dimension_numbers = #tpu.dot_dimension_numbers<[2], [1], [1], [2], [0, 0, 0, 1, 1, 2], [0], [0]>} : vector<8x128x128xbf16>, vector<8x128x32xbf16>, vector<8x128x32xf32> -> vector<8x128x32xf32>
    "tpu.trace_stop"() : () -> ()
    %102 = tpu.reciprocal %99 {approx = true} : vector<8x128x1xf32> -> vector<8x128x1xf32>
    %103 = vector.broadcast %102 : vector<8x128x1xf32> to vector<8x128x32xf32>
    %104 = arith.mulf %101, %103 : vector<8x128x32xf32>
    %105 = vector.extract_strided_slice %104 {offsets = [0, 0, 0], sizes = [1, 128, 32], strides = [1, 1, 1]} : vector<8x128x32xf32> to vector<1x128x32xf32>
    %106 = vector.shape_cast %105 : vector<1x128x32xf32> to vector<128x32xf32>
    %107 = vector.extract_strided_slice %104 {offsets = [1, 0, 0], sizes = [1, 128, 32], strides = [1, 1, 1]} : vector<8x128x32xf32> to vector<1x128x32xf32>
    %108 = vector.shape_cast %107 : vector<1x128x32xf32> to vector<128x32xf32>
    %109 = vector.extract_strided_slice %104 {offsets = [2, 0, 0], sizes = [1, 128, 32], strides = [1, 1, 1]} : vector<8x128x32xf32> to vector<1x128x32xf32>
    %110 = vector.shape_cast %109 : vector<1x128x32xf32> to vector<128x32xf32>
    %111 = vector.extract_strided_slice %104 {offsets = [3, 0, 0], sizes = [1, 128, 32], strides = [1, 1, 1]} : vector<8x128x32xf32> to vector<1x128x32xf32>
    %112 = vector.shape_cast %111 : vector<1x128x32xf32> to vector<128x32xf32>
    %113 = tpu.concatenate %106, %108, %110, %112 in 1 : vector<128x32xf32>, vector<128x32xf32>, vector<128x32xf32>, vector<128x32xf32> -> vector<128x128xf32>
    %114 = vector.extract_strided_slice %104 {offsets = [4, 0, 0], sizes = [1, 128, 32], strides = [1, 1, 1]} : vector<8x128x32xf32> to vector<1x128x32xf32>
    %115 = vector.shape_cast %114 : vector<1x128x32xf32> to vector<128x32xf32>
    %116 = vector.extract_strided_slice %104 {offsets = [5, 0, 0], sizes = [1, 128, 32], strides = [1, 1, 1]} : vector<8x128x32xf32> to vector<1x128x32xf32>
    %117 = vector.shape_cast %116 : vector<1x128x32xf32> to vector<128x32xf32>
    %118 = vector.extract_strided_slice %104 {offsets = [6, 0, 0], sizes = [1, 128, 32], strides = [1, 1, 1]} : vector<8x128x32xf32> to vector<1x128x32xf32>
    %119 = vector.shape_cast %118 : vector<1x128x32xf32> to vector<128x32xf32>
    %120 = vector.extract_strided_slice %104 {offsets = [7, 0, 0], sizes = [1, 128, 32], strides = [1, 1, 1]} : vector<8x128x32xf32> to vector<1x128x32xf32>
    %121 = vector.shape_cast %120 : vector<1x128x32xf32> to vector<128x32xf32>
    %122 = tpu.concatenate %115, %117, %119, %121 in 1 : vector<128x32xf32>, vector<128x32xf32>, vector<128x32xf32>, vector<128x32xf32> -> vector<128x128xf32>
    %123 = tpu.concatenate %113, %122 in 0 : vector<128x128xf32>, vector<128x128xf32> -> vector<256x128xf32>
    %124 = arith.truncf %123 : vector<256x128xf32> to vector<256x128xbf16>
    %c0_17 = arith.constant 0 : index
    %c0_18 = arith.constant 0 : index
    %125 = vector.load %arg4[%c0_17, %c0_18] : memref<128x128xbf16, #tpu.memory_space<vmem>>, vector<128x128xbf16>
    %cst_19 = arith.constant dense<0.000000e+00> : vector<256x128xf32>
    %126 = tpu.matmul %124, %125, %cst_19 {dimension_numbers = #tpu.dot_dimension_numbers<[1], [0], [0], [1], [0, 0, 1, 1], [], []>} : vector<256x128xbf16>, vector<128x128xbf16>, vector<256x128xf32> -> vector<256x128xf32>
    %c0_20 = arith.constant 0 : index
    %c0_21 = arith.constant 0 : index
    %127 = vector.load %arg5[%c0_20, %c0_21] : memref<1x128xf32, #tpu.memory_space<vmem>>, vector<1x128xf32>
    %128 = vector.broadcast %127 : vector<1x128xf32> to vector<256x128xf32>
    %129 = arith.addf %126, %128 : vector<256x128xf32>
    %130 = arith.addf %1, %129 : vector<256x128xf32>
    %cst_22 = arith.constant dense<0.000000e+00> : vector<256xf32>
    %131 = vector.multi_reduction <add>, %130, %cst_22 [1] : vector<256x128xf32> to vector<256xf32>
    %132 = vector.shape_cast %131 : vector<256xf32> to vector<256x1xf32>
    %cst_23 = arith.constant 1.280000e+02 : f32
    %133 = vector.broadcast %cst_23 : f32 to vector<256x1xf32>
    %134 = arith.divf %132, %133 : vector<256x1xf32>
    %135 = vector.broadcast %134 : vector<256x1xf32> to vector<256x128xf32>
    %136 = arith.subf %130, %135 : vector<256x128xf32>
    %137 = arith.mulf %136, %136 : vector<256x128xf32>
    %cst_24 = arith.constant dense<0.000000e+00> : vector<256xf32>
    %138 = vector.multi_reduction <add>, %137, %cst_24 [1] : vector<256x128xf32> to vector<256xf32>
    %139 = vector.shape_cast %138 : vector<256xf32> to vector<256x1xf32>
    %cst_25 = arith.constant 1.280000e+02 : f32
    %140 = vector.broadcast %cst_25 : f32 to vector<256x1xf32>
    %141 = arith.divf %139, %140 : vector<256x1xf32>
    %142 = vector.broadcast %134 : vector<256x1xf32> to vector<256x128xf32>
    %143 = arith.subf %130, %142 : vector<256x128xf32>
    %cst_26 = arith.constant 9.99999974E-6 : f32
    %144 = vector.broadcast %cst_26 : f32 to vector<256x1xf32>
    %145 = arith.addf %141, %144 : vector<256x1xf32>
    %146 = math.rsqrt %145 : vector<256x1xf32>
    %147 = vector.broadcast %146 : vector<256x1xf32> to vector<256x128xf32>
    %148 = arith.mulf %143, %147 : vector<256x128xf32>
    %149 = arith.truncf %148 : vector<256x128xf32> to vector<256x128xbf16>
    %c0_27 = arith.constant 0 : index
    %c0_28 = arith.constant 0 : index
    %150 = vector.load %arg6[%c0_27, %c0_28] : memref<128x512xbf16, #tpu.memory_space<vmem>>, vector<128x512xbf16>
    %cst_29 = arith.constant dense<0.000000e+00> : vector<256x512xf32>
    %151 = tpu.matmul %149, %150, %cst_29 {dimension_numbers = #tpu.dot_dimension_numbers<[1], [0], [0], [1], [0, 0, 1, 1], [], []>} : vector<256x128xbf16>, vector<128x512xbf16>, vector<256x512xf32> -> vector<256x512xf32>
    %c0_30 = arith.constant 0 : index
    %c0_31 = arith.constant 0 : index
    %152 = vector.load %arg7[%c0_30, %c0_31] : memref<1x512xf32, #tpu.memory_space<vmem>>, vector<1x512xf32>
    %153 = vector.broadcast %152 : vector<1x512xf32> to vector<256x512xf32>
    %154 = arith.addf %151, %153 : vector<256x512xf32>
    %cst_32 = arith.constant 5.000000e-01 : f32
    %155 = vector.broadcast %cst_32 : f32 to vector<256x512xf32>
    %156 = arith.mulf %155, %154 : vector<256x512xf32>
    %cst_33 = arith.constant 0.707106769 : f32
    %157 = vector.broadcast %cst_33 : f32 to vector<256x512xf32>
    %158 = arith.mulf %154, %157 : vector<256x512xf32>
    %159 = math.erf %158 : vector<256x512xf32>
    %cst_34 = arith.constant 1.000000e+00 : f32
    %160 = vector.broadcast %cst_34 : f32 to vector<256x512xf32>
    %161 = arith.addf %160, %159 : vector<256x512xf32>
    %162 = arith.mulf %156, %161 : vector<256x512xf32>
    %163 = arith.truncf %162 : vector<256x512xf32> to vector<256x512xbf16>
    %c0_35 = arith.constant 0 : index
    %c0_36 = arith.constant 0 : index
    %164 = vector.load %arg8[%c0_35, %c0_36] : memref<512x128xbf16, #tpu.memory_space<vmem>>, vector<512x128xbf16>
    %cst_37 = arith.constant dense<0.000000e+00> : vector<256x128xf32>
    %165 = tpu.matmul %163, %164, %cst_37 {dimension_numbers = #tpu.dot_dimension_numbers<[1], [0], [0], [1], [0, 0, 1, 1], [], []>} : vector<256x512xbf16>, vector<512x128xbf16>, vector<256x128xf32> -> vector<256x128xf32>
    %c0_38 = arith.constant 0 : index
    %c0_39 = arith.constant 0 : index
    %166 = vector.load %arg9[%c0_38, %c0_39] : memref<1x128xf32, #tpu.memory_space<vmem>>, vector<1x128xf32>
    %167 = vector.broadcast %166 : vector<1x128xf32> to vector<256x128xf32>
    %168 = arith.addf %165, %167 : vector<256x128xf32>
    %169 = arith.addf %130, %168 : vector<256x128xf32>
    %170 = vector.shape_cast %169 : vector<256x128xf32> to vector<2x128x128xf32>
    %c0_40 = arith.constant 0 : index
    %c0_41 = arith.constant 0 : index
    %c0_42 = arith.constant 0 : index
    %171 = vector.load %arg10[%c0_40, %c0_41, %c0_42] : memref<2x128x128xf32, #tpu.memory_space<vmem>>, vector<2x128x128xf32>
    tpu.vector_store %arg10[%c0_40, %c0_41, %c0_42], %170 {strides = array<i32>} : memref<2x128x128xf32, #tpu.memory_space<vmem>>, vector<2x128x128xf32>,
    return
  }
  func.func @transform_0(%arg0: i32) -> (i32, i32, i32) {
    %c0_i32 = arith.constant 0 : i32
    %c0_i32_0 = arith.constant 0 : i32
    %c0_i32_1 = arith.constant 0 : i32
    return %arg0, %c0_i32, %c0_i32_0 : i32, i32, i32
  }
  func.func @transform_1(%arg0: i32) -> (i32, i32) {
    %c0_i32 = arith.constant 0 : i32
    %c0_i32_0 = arith.constant 0 : i32
    %c0_i32_1 = arith.constant 0 : i32
    return %c0_i32, %c0_i32_0 : i32, i32
  }
  func.func @transform_2(%arg0: i32) -> (i32, i32) {
    %c0_i32 = arith.constant 0 : i32
    %c0_i32_0 = arith.constant 0 : i32
    %c0_i32_1 = arith.constant 0 : i32
    return %c0_i32, %c0_i32_0 : i32, i32
  }
  func.func @transform_3(%arg0: i32) -> (i32, i32) {
    %c0_i32 = arith.constant 0 : i32
    %c0_i32_0 = arith.constant 0 : i32
    %c0_i32_1 = arith.constant 0 : i32
    return %c0_i32, %c0_i32_0 : i32, i32
  }
  func.func @transform_4(%arg0: i32) -> (i32, i32) {
    %c0_i32 = arith.constant 0 : i32
    %c0_i32_0 = arith.constant 0 : i32
    %c0_i32_1 = arith.constant 0 : i32
    return %c0_i32, %c0_i32_0 : i32, i32
  }
  func.func @transform_5(%arg0: i32) -> (i32, i32) {
    %c0_i32 = arith.constant 0 : i32
    %c0_i32_0 = arith.constant 0 : i32
    %c0_i32_1 = arith.constant 0 : i32
    return %c0_i32, %c0_i32_0 : i32, i32
  }
  func.func @transform_6(%arg0: i32) -> (i32, i32) {
    %c0_i32 = arith.constant 0 : i32
    %c0_i32_0 = arith.constant 0 : i32
    %c0_i32_1 = arith.constant 0 : i32
    return %c0_i32, %c0_i32_0 : i32, i32
  }
  func.func @transform_7(%arg0: i32) -> (i32, i32) {
    %c0_i32 = arith.constant 0 : i32
    %c0_i32_0 = arith.constant 0 : i32
    %c0_i32_1 = arith.constant 0 : i32
    return %c0_i32, %c0_i32_0 : i32, i32
  }
  func.func @transform_8(%arg0: i32) -> (i32, i32) {
    %c0_i32 = arith.constant 0 : i32
    %c0_i32_0 = arith.constant 0 : i32
    %c0_i32_1 = arith.constant 0 : i32
    return %c0_i32, %c0_i32_0 : i32, i32
  }
  func.func @transform_9(%arg0: i32) -> (i32, i32, i32) {
    %c0_i32 = arith.constant 0 : i32
    %c0_i32_0 = arith.constant 0 : i32
    %c0_i32_1 = arith.constant 0 : i32
    return %arg0, %c0_i32, %c0_i32_0 : i32, i32, i32
  }
}

</mosaic_0001>

<bundles_post_ra>
// kernel: tpu_custom_call.1
= control target key start
LH: loop header
LB: loop body
LE: loop exit
PB: predicated region body
PF: predicated region fallthrough
CT: control target
= control target key end

     0   :  { %s16793_s0 = inlined_call_operand.hbm [shape: f32[4,128,128], index: 0, kind: input, shape index: {}]   ;;  %s16794_s1 = inlined_call_operand.hbm [shape: bf16[128,384], index: 1, kind: input, shape index: {}]   ;;  %s16795_s2 = inlined_call_operand.vmem [shape: f32[1,384], index: 2, kind: input, shape index: {}]   ;;  %s16796_s3 = inlined_call_operand.hbm [shape: bf16[128,128], index: 3, kind: input, shape index: {}]   ;;  %s16797_s4 = inlined_call_operand.vmem [shape: f32[1,128], index: 4, kind: input, shape index: {}]   ;;  %s16798_s5 = inlined_call_operand.hbm [shape: bf16[128,512], index: 5, kind: input, shape index: {}]   ;;  %s16799_s6 = inlined_call_operand.vmem [shape: f32[1,512], index: 6, kind: input, shape index: {}]   ;;  %s16800_s7 = inlined_call_operand.hbm [shape: bf16[512,128], index: 7, kind: input, shape index: {}]   ;;  %s16801_s8 = inlined_call_operand.vmem [shape: f32[1,128], index: 8, kind: input, shape index: {}]   ;;  %s16802_s9 = inlined_call_operand.hbm [shape: f32[4,128,128], index: 9, kind: output, shape index: {}]  }
   0x1   :  { %17110 = sst [smem:[#allocation167_spill]] %s16794_s1 }
   0x2   :  { %14 = vsyncpa [#allocation3], 0 }
   0x3   :  { %16 = vsyncpa [#allocation3 + $0x1], 0 }
   0x4   :  { %17 = vsyncpa [#allocation6], 0 }
   0x5   :  { %18 = vsyncpa [#allocation9], 0 }
   0x6   :  { %19 = vsyncpa [#allocation4], 0 }
   0x7   :  { %21 = vsyncpa [#allocation4 + $0x1], 0  ;;  %s11275_s30 = smov 0   ;;  %s11277_s10 = smov 0  }
   0x8   :  { %s11279_s11 = smov 0   ;;  %s11281_s12 = smov 0  }
   0x9 LB: > { %17111 = sst [smem:[#allocation16_spill]] %s11190_s30  ;;  %s11296_s13 = sadd.s32 4294967295, %s11202_s12   ;;  %s11202_s12 = sphi %s11281_s12, %s17955_s12   ;;  %s11198_s11 = sphi %s11279_s11, %s17954_s11   ;;  %s11194_s10 = sphi %s11277_s10, %s17953_s10   ;;  %s11190_s30 = sphi %s11275_s30, %s17952_s30  }
   0xa   : > { %s8190_s14 = sadd.s32 4294967294, %s11202_s12   ;;  %p47_p0 = scmp.ne.s32.totalorder %s11194_s10, %s11190_s30 }
   0xb   : > { %p16803_p1 = scmp.eq.s32.totalorder %s11296_s13, 0  ;;  %p245_p3 = scmp.eq.s32.totalorder %s8190_s14, 1 }
   0xc   : > { %p8191_p5 = scmp.ge.s32.totalorder %s11202_s12, 1  ;;  %p252_p7 = scmp.lt.s32.totalorder %s11202_s12, 3 }
   0xd   : > { %p11305_p4 = por %p16803_p1, %p47_p0  ;;  %p11310_p6 = por %p245_p3, %p47_p0 }
   0xe   : > { %p11315_p8 = pnand %p8191_p5, %p252_p7  ;;  %s11204_s18 = smov [#allocation5]  }
   0xf   : > { %s17112_s15 = scalar_select %p11305_p4, 1, 0 }
  0x10   : > { %s17113_s16 = scalar_select %p11310_p6, 1, 0 }
  0x11   : > { %s17115_s17 = scalar_select %p11315_p8, 1, 0 }
  0x12   : > { %17114 = sst [smem:[#allocation17_spill]] %s17113_s16  ;;  %s264_s19 = sshll.u32 %s11204_s18, 4  ;;  %s11319_s19 = int_to_ptr.vmem [resolvable:$true] %s264_s19 }
  0x13   : > { %p9616_p9 = pneg %p11315_p8  ;;  %s11205_s21 = smov [#allocation8]  }
  0x14   : > { %s296_s22 = sshll.u32 %s11205_s21, 4  ;;  %s17117_s1 = sld [smem:[#allocation167_spill]]  ;;  %s11330_s22 = int_to_ptr.vmem [resolvable:$true] %s296_s22 }
  0x15   : > { %p11326_p11 = pnand %p9616_p9, %p16803_p1 }
  0x17   : > { %p11340_p13 = pneg %p11326_p11 }
  0x1a   : > { %s10986_s25 = scalar_lea.hbm %s17117_s1, 3072 }
  0x1b   : > { %p10987_p12 = scmp.ne.s32.totalorder %s17117_s1, %s10986_s25  ;;  %p10993_p5 = scmp.lt.u32.totalorder %s10986_s25, %s17117_s1 }
  0x1d   : > { %p10989_p0 = pnand %p11340_p13, %p10987_p12 }
  0x1f   : > { %p10990_p3 = pneg %p10989_p0 }
  0x21   : > { %p10995_p7 = pnand %p10993_p5, %p10990_p3 }
  0x23   : > { %10998 = shalt.err (!%p10995_p7)
}
  0x24   : > { %s10999_s18 = scalar_lea.vmem %s11319_s19, 3072  ;;  %p11007_p2 = scmp.lt.s32.totalorder %s11319_s19, %s11319_s19 }
  0x25   : > { %p11000_p9 = scmp.ne.s32.totalorder %s11319_s19, %s10999_s18  ;;  %p11008_p6 = scmp.lt.s32.totalorder %s10999_s18, %s10999_s18 }
  0x27   : > { %p11002_p10 = pnand %p11000_p9, %p11340_p13  ;;  %p11009_p12 = por %p11008_p6, %p11007_p2 }
  0x29   : > { %p11003_p1 = pneg %p11002_p10 }
  0x2b   : > { %p11010_p0 = pnand %p11009_p12, %p11003_p1 }
  0x2d   : > { %11013 = shalt.err (!%p11010_p0)
}
  0x2e   : > { %s11206_s21 = smov 192   ;;  %s11207_s23 = smov 12  }
  0x2f   : > { %9619 = dma.hbm_to_vmem [thread:$0]  (!%p11326_p11), %s17117_s1, 3072, %s11319_s19, [#allocation6], %s11206_s21, %s11206_s21, %s11207_s23  }
  0x30   : > { %s11014_s29 = scalar_lea.hbm %s16798_s5, 4096 }
  0x31   : > { %p11015_p2 = scmp.ne.s32.totalorder %s16798_s5, %s11014_s29  ;;  %p11021_p10 = scmp.lt.u32.totalorder %s11014_s29, %s16798_s5 }
  0x33   : > { %p11017_p1 = pnand %p11015_p2, %p11340_p13 }
  0x35   : > { %p11018_p6 = pneg %p11017_p1 }
  0x37   : > { %p11023_p3 = pnand %p11021_p10, %p11018_p6 }
  0x39   : > { %11026 = shalt.err (!%p11023_p3)
}
  0x3a   : > { %s11027_s19 = scalar_lea.vmem %s11330_s22, 4096  ;;  %p11035_p12 = scmp.lt.s32.totalorder %s11330_s22, %s11330_s22 }
  0x3b   : > { %p11028_p5 = scmp.ne.s32.totalorder %s11330_s22, %s11027_s19  ;;  %p11036_p0 = scmp.lt.s32.totalorder %s11027_s19, %s11027_s19 }
  0x3d   : > { %p11030_p7 = pnand %p11028_p5, %p11340_p13  ;;  %p11037_p2 = por %p11036_p0, %p11035_p12 }
  0x3f   : > { %p11031_p9 = pneg %p11030_p7 }
  0x41   : > { %p11038_p1 = pnand %p11037_p2, %p11031_p9 }
  0x43   : > { %11041 = shalt.err (!%p11038_p1)
}
  0x44   : > { %s11208_s16 = smov 256   ;;  %s11209_s30 = smov 16  }
  0x45   : > { %9625 = dma.hbm_to_vmem [thread:$0]  (!%p11326_p11), %s16798_s5, 4096, %s11330_s22, [#allocation9], %s11208_s16, %s11208_s16, %s11209_s30  }
  0x46   : > { %s11210_s24 = smov [#allocation7]   ;;  %s11042_s29 = scalar_lea.hbm %s16796_s3, 1024 }
  0x47   : > { %s280_s25 = sshll.u32 %s11210_s24, 4  ;;  %p11043_p6 = scmp.ne.s32.totalorder %s16796_s3, %s11042_s29  ;;  %s281_s25 = int_to_ptr.vmem [resolvable:$true] %s280_s25 }
  0x48   : > { %p11049_p5 = scmp.lt.u32.totalorder %s11042_s29, %s16796_s3 }
  0x49   : > { %p11045_p10 = pnand %p11043_p6, %p11340_p13 }
  0x4b   : > { %p11046_p3 = pneg %p11045_p10 }
  0x4d   : > { %p11051_p7 = pnand %p11049_p5, %p11046_p3 }
  0x4f   : > { %11054 = shalt.err (!%p11051_p7)
}
  0x50   : > { %s11055_s22 = scalar_lea.vmem %s281_s25, 1024  ;;  %p11063_p2 = scmp.lt.s32.totalorder %s281_s25, %s281_s25 }
  0x51   : > { %p11056_p9 = scmp.ne.s32.totalorder %s281_s25, %s11055_s22  ;;  %p11064_p1 = scmp.lt.s32.totalorder %s11055_s22, %s11055_s22 }
  0x53   : > { %p11058_p12 = pnand %p11056_p9, %p11340_p13  ;;  %p11065_p4 = por %p11064_p1, %p11063_p2 }
  0x55   : > { %p11059_p0 = pneg %p11058_p12 }
  0x57   : > { %p11066_p8 = pnand %p11065_p4, %p11059_p0 }
  0x59   : > { %11069 = shalt.err (!%p11066_p8)
}
  0x5a   : > { %s11211_s16 = smov 64   ;;  %s11212_s30 = smov 4  }
  0x5b   : > { %9622 = dma.hbm_to_vmem [thread:$0]  (!%p11326_p11), %s16796_s3, 1024, %s281_s25, [#allocation6], %s11211_s16, %s11211_s16, %s11212_s30  }
  0x5c   : > { %s11213_s23 = smov [#allocation10]   ;;  %s11070_s29 = scalar_lea.hbm %s16800_s7, 4096 }
  0x5d   : > { %s312_s24 = sshll.u32 %s11213_s23, 4  ;;  %p11071_p4 = scmp.ne.s32.totalorder %s16800_s7, %s11070_s29  ;;  %s313_s24 = int_to_ptr.vmem [resolvable:$true] %s312_s24 }
  0x5e   : > { %p11077_p10 = scmp.lt.u32.totalorder %s11070_s29, %s16800_s7 }
  0x5f   : > { %p11073_p8 = pnand %p11071_p4, %p11340_p13 }
  0x61   : > { %p11074_p6 = pneg %p11073_p8 }
  0x63   : > { %p11079_p3 = pnand %p11077_p10, %p11074_p6 }
  0x65   : > { %11082 = shalt.err (!%p11079_p3)
}
  0x66   : > { %s11083_s25 = scalar_lea.vmem %s313_s24, 4096  ;;  %p11091_p12 = scmp.lt.s32.totalorder %s313_s24, %s313_s24 }
  0x67   : > { %p11084_p5 = scmp.ne.s32.totalorder %s313_s24, %s11083_s25  ;;  %p11092_p0 = scmp.lt.s32.totalorder %s11083_s25, %s11083_s25 }
  0x69   : > { %p11086_p7 = pnand %p11084_p5, %p11340_p13  ;;  %p11093_p2 = por %p11092_p0, %p11091_p12 }
  0x6b   : > { %p11087_p9 = pneg %p11086_p7 }
  0x6d   : > { %p11094_p1 = pnand %p11093_p2, %p11087_p9 }
  0x6f   : > { %11097 = shalt.err (!%p11094_p1)
}
  0x70   : > { %9628 = dma.hbm_to_vmem [thread:$0]  (!%p11326_p11), %s16800_s7, 4096, %s313_s24, [#allocation9], %s11211_s16, %s11211_s16, %s11212_s30  }
  0x71   : > { %s11421_s28 = sadd.s32 1, %s11202_s12   ;;  %s34_s23 = sadd.s32 1, %s11198_s11 }
  0x72   : > { %s31_s20 = ssub.s32 %s11202_s12, %s11421_s28  ;;  %p41_p13 = scmp.ne.s32.totalorder %s11198_s11, %s11194_s10 }
  0x73   : > { %p32_p4 = scmp.eq.s32.totalorder %s31_s20, 0  ;;  %p42_p8 = scmp.eq.s32.totalorder %s11202_s12, 0 }
  0x74   : > { %p17119_p6 = scmp.eq.s32.totalorder %s11296_s13, 1  ;;  %p9641_p3 = scmp.lt.s32.totalorder %s11202_s12, 2 }
  0x75   : > { %s11437_s27 = scalar_select %p32_p4, %s11198_s11, %s34_s23  }
  0x76   : > { %p11431_p10 = por %p17119_p6, %p41_p13  ;;  %p43_p5 = por %p42_p8, %p41_p13 }
  0x77   : > { %s329_s29 = sand.u32 1, %s11198_s11   ;;  %s8377_s16 = sshll.u32 %s11202_s12, 12 }
  0x78   : > { %s8197_s14 = sshll.u32 %s329_s29, 8  ;;  %s11444_s18 = scalar_lea.hbm %s16793_s0, %s8377_s16 }
  0x79   : > { %s333_s19 = scalar_lea.vmem [#allocation2], %s8197_s14  ;;  %p11448_p11 = pnand %p9641_p3, %p43_p5 }
  0x7a   : > { %s341_s22 = sshll.u32 %s333_s19, 4  ;;  %s11452_s1 = scalar_lea.sflag [#allocation3], %s329_s29  ;;  %s11446_s22 = int_to_ptr.vmem [resolvable:$true] %s341_s22 }
  0x7b   : > { %s11098_s21 = scalar_lea.hbm %s11444_s18, 4096  ;;  %p11100_p9 = pneg %p11448_p11 }
  0x7c   : > { %p11099_p7 = scmp.ne.s32.totalorder %s11444_s18, %s11098_s21  ;;  %s11103_s14 = scalar_lea.hbm %s16793_s0, 8192 }
  0x7d   : > { %p11104_p2 = scmp.lt.u32.totalorder %s11444_s18, %s16793_s0  ;;  %p11105_p1 = scmp.lt.u32.totalorder %s11103_s14, %s11098_s21 }
  0x7e   : > { %p11101_p12 = pnand %p11100_p9, %p11099_p7  ;;  %p11107_p4 = scmp.lt.u32.totalorder %s11098_s21, %s11444_s18 }
  0x7f   : > { %p11106_p13 = por %p11105_p1, %p11104_p2 }
  0x80   : > { %p11102_p0 = pneg %p11101_p12 }
  0x81   : > { %p11108_p8 = por %p11107_p4, %p11106_p13 }
  0x83   : > { %p11109_p6 = pnand %p11108_p8, %p11102_p0 }
  0x85   : > { %11112 = shalt.err (!%p11109_p6)
}
  0x86   : > { %s11113_s29 = scalar_lea.vmem %s11446_s22, 4096  ;;  %s11214_s24 = smov [#allocation2]  }
  0x87   : > { %p11114_p3 = scmp.ne.s32.totalorder %s11446_s22, %s11113_s29  ;;  %s11118_s19 = sshll.u32 %s11214_s24, 4  ;;  %s11119_s19 = int_to_ptr.vmem [resolvable:$false] %s11118_s19 }
  0x88   : > { %s11120_s23 = scalar_lea.vmem %s11119_s19, 8192  ;;  %p11121_p12 = scmp.lt.s32.totalorder %s11446_s22, %s11119_s19 }
  0x89   : > { %p11116_p5 = pnand %p11114_p3, %p11100_p9  ;;  %p11122_p2 = scmp.lt.s32.totalorder %s11120_s23, %s11113_s29 }
  0x8b   : > { %p11117_p7 = pneg %p11116_p5  ;;  %p11123_p1 = por %p11122_p2, %p11121_p12 }
  0x8d   : > { %p11124_p13 = pnand %p11123_p1, %p11117_p7 }
  0x8f   : > { %11127 = shalt.err (!%p11124_p13)
}
  0x90   : > { %s11215_s21 = smov 128   ;;  %s11216_s20 = smov 8  }
  0x91   : > { %9632 = dma.hbm_to_vmem [thread:$0]  (!%p11448_p11), %s11444_s18, 4096, %s11446_s22, %s11452_s1, %s11215_s21, %s11215_s21, %s11216_s20  }
  0x92   : > { %p17122_p9 = scmp.ne.s32.totalorder %s17115_s17, 0 }
  0x94   : > { %353 = sbr.rel (%p17122_p9) target bundleno = 3543 (0xdd7), region = 56 }
  0x9b   : > { %s11483_s14 = sand.u32 1, %s11194_s10   ;;  %p17123_p0 = scmp.ne.s32.totalorder %s17112_s15, 0 }
  0x9c   : > { %s8202_s16 = sshll.u32 %s11483_s14, 8  ;;  %s356_s30 = scalar_lea.sflag [#allocation3], %s11483_s14 }
  0x9d   : > { %s11489_s29 = scalar_lea.vmem [#allocation2], %s8202_s16 }
  0x9e   : > { %11173 = dma.done.wait (%p17123_p0), %s356_s30, 4096  }
  0x9f   : > { %11175 = vsyncadd (%p17123_p0), %s356_s30, 4294963200  ;;  %p17124_p11 = scmp.eq.s32.totalorder %s11296_s13, 0 }
  0xa1   : > { %11177 = dma.done.wait (%p17124_p11), [#allocation6], 4096   ;;  %p17125_p4 = pmov %p17124_p11 }
  0xa3   : > { %11179 = vsyncadd (%p17125_p4), [#allocation6], 4294963200  ;;  %p17126_p8 = pmov %p17125_p4 }
  0xa4   : > { %p17127_p6 = pmov %p17125_p4 }
  0xa5   : > { %11181 = dma.done.wait (%p17126_p8), [#allocation9], 8192  }
  0xa6   : > { %11183 = vsyncadd (%p17127_p6), [#allocation9], 4294959104  ;;  %v11504_v0 = vld [vmem:[%s11489_s29] sm:$0xff]  ;;  %v11507_v1 = vld [vmem:[%s11489_s29 + $0x10] sm:$0xff]  ;;  %vm1828_vm0 = vcmask 261120   ;;  %s11218_s18 = smov 64  }
  0xa7   : > { %445 = vadd.xlane.f32.xlu0 %v11504_v0  ;;  %449 = vadd.xlane.f32.xlu1 %v11507_v1  ;;  %v11512_v2 = vld [vmem:[%s11489_s29 + $0x8] sm:$0xff]  ;;  %v11515_v3 = vld [vmem:[%s11489_s29 + $0x18] sm:$0xff]  ;;  %v11520_v4 = vld [vmem:[%s11489_s29 + $0x20] sm:$0xff]  ;;  %s11219_s22 = smov 96   ;;  %s11220_s25 = smov 32  }
  0xa8   : > { %v11523_v5 = vld [vmem:[%s11489_s29 + $0x28] sm:$0xff]  ;;  %v11528_v6 = vld [vmem:[%s11489_s29 + $0x30] sm:$0xff]  ;;  %v11531_v7 = vld [vmem:[%s11489_s29 + $0x38] sm:$0xff]  ;;  %s16637_s30 = scalar_lea.vmem [#allocation11], %s8202_s16  ;;  %s8379_s16 = sshll.u32 %s11296_s13, 12 }
  0xa9   : > { %v11534_v8 = vld [vmem:[%s11489_s29 + $0x40] sm:$0xff]  ;;  %v11537_v9 = vld [vmem:[%s11489_s29 + $0x48] sm:$0xff]  ;;  %v11542_v10 = vld [vmem:[%s11489_s29 + $0x50] sm:$0xff] }
  0xaa   : > { %v11545_v11 = vld [vmem:[%s11489_s29 + $0x58] sm:$0xff]  ;;  %v11550_v12 = vld [vmem:[%s11489_s29 + $0x60] sm:$0xff]  ;;  %v11553_v13 = vld [vmem:[%s11489_s29 + $0x68] sm:$0xff] }
  0xab   : > { %447 = vadd.xlane.f32.xlu0 %v11512_v2  ;;  %451 = vadd.xlane.f32.xlu1 %v11515_v3  ;;  %v11558_v14 = vld [vmem:[%s11489_s29 + $0x70] sm:$0xff]  ;;  %v11561_v15 = vld [vmem:[%s11489_s29 + $0x78] sm:$0xff]  ;;  %v11566_v16 = vld [vmem:[%s11489_s29 + $0x80] sm:$0xff] }
  0xac   : > { %v11569_v17 = vld [vmem:[%s11489_s29 + $0x88] sm:$0xff]  ;;  %v11574_v18 = vld [vmem:[%s11489_s29 + $0x90] sm:$0xff]  ;;  %v11577_v19 = vld [vmem:[%s11489_s29 + $0x98] sm:$0xff] }
  0xad   : > { %v11582_v20 = vld [vmem:[%s11489_s29 + $0xa0] sm:$0xff]  ;;  %v11585_v21 = vld [vmem:[%s11489_s29 + $0xa8] sm:$0xff]  ;;  %v11590_v22 = vld [vmem:[%s11489_s29 + $0xb0] sm:$0xff] }
  0xae   : > { %v11593_v23 = vld [vmem:[%s11489_s29 + $0xb8] sm:$0xff]  ;;  %v11598_v24 = vld [vmem:[%s11489_s29 + $0xc0] sm:$0xff]  ;;  %v11601_v25 = vld [vmem:[%s11489_s29 + $0xc8] sm:$0xff] }
  0xaf   : > { %453 = vadd.xlane.f32.xlu0 %v11520_v4  ;;  %455 = vadd.xlane.f32.xlu1 %v11523_v5  ;;  %v11606_v26 = vld [vmem:[%s11489_s29 + $0xd0] sm:$0xff]  ;;  %v11609_v27 = vld [vmem:[%s11489_s29 + $0xd8] sm:$0xff]  ;;  %v11614_v28 = vld [vmem:[%s11489_s29 + $0xe0] sm:$0xff] }
  0xb0   : > { %v11617_v29 = vld [vmem:[%s11489_s29 + $0xe8] sm:$0xff]  ;;  %v11622_v30 = vld [vmem:[%s11489_s29 + $0xf0] sm:$0xff]  ;;  %v11627_v31 = vld [vmem:[%s11489_s29 + $0xf8] sm:$0xff] }
  0xb1   : > { %v9938_v32 = vld [vmem:[#allocation5 + $0x4] ss:$12 sps:$4 sm:$0xff]   ;;  %v9940_v33 = vld [vmem:[#allocation5] ss:$12 sps:$4 sm:$0xff]   ;;  %v9941_v34 = vld [vmem:[#allocation5 + $0x1c] ss:$12 sps:$4 sm:$0xff]  }
  0xb2   : > { %991 = vmatprep.subr.bf16.mxu0 %v9938_v32  ;;  %9516 = vmatprep.subr.bf16.mxu1 %v9938_v32  ;;  %v9943_v35 = vld [vmem:[#allocation5 + $0x18] ss:$12 sps:$4 sm:$0xff]   ;;  %v9944_v36 = vld [vmem:[#allocation5 + $0x34] ss:$12 sps:$4 sm:$0xff]  }
  0xb3   : > { %457 = vadd.xlane.f32.xlu0 %v11528_v6  ;;  %459 = vadd.xlane.f32.xlu1 %v11531_v7 }
  0xb4   : > { %992 = vmatpush1.bf16.msra.mxu0 %v9940_v33  ;;  %9524 = vmatpush1.bf16.msra.mxu1 %v9940_v33 }
  0xb5   : > { %993 = vmatprep.subr.bf16.mxu0 %v9941_v34  ;;  %9517 = vmatprep.subr.bf16.mxu1 %v9941_v34 }
  0xb7   : > { %461 = vadd.xlane.f32.xlu0 %v11534_v8  ;;  %463 = vadd.xlane.f32.xlu1 %v11537_v9 }
  0xb8   : > { %994 = vmatpush1.bf16.msra.mxu0 %v9943_v35  ;;  %9525 = vmatpush1.bf16.msra.mxu1 %v9943_v35 }
  0xb9   : > { %995 = vmatprep.subr.bf16.mxu0 %v9944_v36  ;;  %9518 = vmatprep.subr.bf16.mxu1 %v9944_v36 }
  0xbb   : > { %465 = vadd.xlane.f32.xlu0 %v11542_v10  ;;  %467 = vadd.xlane.f32.xlu1 %v11545_v11 }
  0xbf   : > { %469 = vadd.xlane.f32.xlu0 %v11550_v12  ;;  %471 = vadd.xlane.f32.xlu1 %v11553_v13 }
  0xc3   : > { %473 = vadd.xlane.f32.xlu0 %v11558_v14  ;;  %475 = vadd.xlane.f32.xlu1 %v11561_v15 }
  0xc7   : > { %477 = vadd.xlane.f32.xlu0 %v11566_v16  ;;  %479 = vadd.xlane.f32.xlu1 %v11569_v17 }
  0xcb   : > { %481 = vadd.xlane.f32.xlu0 %v11574_v18  ;;  %483 = vadd.xlane.f32.xlu1 %v11577_v19 }
  0xcf   : > { %485 = vadd.xlane.f32.xlu0 %v11582_v20  ;;  %487 = vadd.xlane.f32.xlu1 %v11585_v21 }
  0xd3   : > { %489 = vadd.xlane.f32.xlu0 %v11590_v22  ;;  %491 = vadd.xlane.f32.xlu1 %v11593_v23 }
  0xd7   : > { %493 = vadd.xlane.f32.xlu0 %v11598_v24  ;;  %495 = vadd.xlane.f32.xlu1 %v11601_v25 }
  0xdb   : > { %497 = vadd.xlane.f32.xlu0 %v11606_v26  ;;  %499 = vadd.xlane.f32.xlu1 %v11609_v27 }
  0xdf   : > { %501 = vadd.xlane.f32.xlu0 %v11614_v28  ;;  %503 = vadd.xlane.f32.xlu1 %v11617_v29 }
  0xe3   : > { %505 = vadd.xlane.f32.xlu0 %v11622_v30  ;;  %507 = vadd.xlane.f32.xlu1 %v11627_v31 }
 0x134   : > { %v446_v37 = vpop.xlane.xlu0 %445  ;;  %v450_v38 = vpop.xlane.xlu1 %449 }
 0x135   : > { %v510_v39 = vmul.f32 0.0078125, %v446_v37  ;;  %v512_v40 = vmul.f32 0.0078125, %v450_v38 }
 0x137   : > { %v11632_v41 = vsub.f32 %v11504_v0, %v510_v39  ;;  %v11635_v42 = vsub.f32 %v11507_v1, %v512_v40 }
 0x138   : > { %v448_v43 = vpop.xlane.xlu0 %447  ;;  %v452_v44 = vpop.xlane.xlu1 %451 }
 0x139   : > { %v511_v45 = vmul.f32 0.0078125, %v448_v43  ;;  %v574_v46 = vmul.f32 %v11632_v41, %v11632_v41  ;;  %v513_v47 = vmul.f32 0.0078125, %v452_v44  ;;  %v576_v48 = vmul.f32 %v11635_v42, %v11635_v42  ;;  %v9947_v43 = vld [vmem:[#allocation5 + $0x4c] ss:$12 sps:$4 sm:$0xff]  }
 0x13b   : > { %606 = vadd.xlane.f32.xlu0 %v574_v46  ;;  %v11642_v49 = vsub.f32 %v11512_v2, %v511_v45  ;;  %v11645_v50 = vsub.f32 %v11515_v3, %v513_v47  ;;  %v9949_v47 = vld [vmem:[#allocation5 + $0x48] ss:$12 sps:$4 sm:$0xff]  }
 0x13c   : > { %v454_v51 = vpop.xlane.xlu0 %453  ;;  %v456_v52 = vpop.xlane.xlu1 %455 }
 0x13d   : > { %v514_v53 = vmul.f32 0.0078125, %v454_v51  ;;  %v575_v54 = vmul.f32 %v11642_v49, %v11642_v49  ;;  %v515_v55 = vmul.f32 0.0078125, %v456_v52  ;;  %v577_v56 = vmul.f32 %v11645_v50, %v11645_v50 }
 0x13f   : > { %610 = vadd.xlane.f32.xlu0 %v576_v48  ;;  %608 = vadd.xlane.f32.xlu1 %v575_v54  ;;  %v11652_v57 = vsub.f32 %v11520_v4, %v514_v53  ;;  %v11655_v58 = vsub.f32 %v11523_v5, %v515_v55  ;;  %v9950_v54 = vld [vmem:[#allocation5 + $0x64] ss:$12 sps:$4 sm:$0xff]  }
 0x140   : > { %v458_v59 = vpop.xlane.xlu0 %457  ;;  %v460_v60 = vpop.xlane.xlu1 %459 }
 0x141   : > { %v516_v61 = vmul.f32 0.0078125, %v458_v59  ;;  %v578_v62 = vmul.f32 %v11652_v57, %v11652_v57  ;;  %v517_v63 = vmul.f32 0.0078125, %v460_v60  ;;  %v579_v0 = vmul.f32 %v11655_v58, %v11655_v58  ;;  %v9952_v59 = vld [vmem:[#allocation5 + $0x60] ss:$12 sps:$4 sm:$0xff]  }
 0x143   : > { %612 = vadd.xlane.f32.xlu1 %v577_v56  ;;  %614 = vadd.xlane.f32.xlu0 %v578_v62  ;;  %v11662_v1 = vsub.f32 %v11528_v6, %v516_v61  ;;  %v11665_v2 = vsub.f32 %v11531_v7, %v517_v63  ;;  %v9946_v7 = vld [vmem:[#allocation5 + $0x30] ss:$12 sps:$4 sm:$0xff]  }
 0x144   : > { %v462_v3 = vpop.xlane.xlu0 %461  ;;  %v464_v4 = vpop.xlane.xlu1 %463  ;;  %996 = vmatpush1.bf16.msra.mxu0 %v9946_v7  ;;  %9526 = vmatpush1.bf16.msra.mxu1 %v9946_v7 }
 0x145   : > { %v518_v5 = vmul.f32 0.0078125, %v462_v3  ;;  %v580_v32 = vmul.f32 %v11662_v1, %v11662_v1  ;;  %v519_v33 = vmul.f32 0.0078125, %v464_v4  ;;  %v581_v34 = vmul.f32 %v11665_v2, %v11665_v2  ;;  %997 = vmatprep.subr.bf16.mxu0 %v9947_v43  ;;  %9519 = vmatprep.subr.bf16.mxu1 %v9947_v43 }
 0x147   : > { %616 = vadd.xlane.f32.xlu1 %v579_v0  ;;  %618 = vadd.xlane.f32.xlu0 %v580_v32  ;;  %v11672_v35 = vsub.f32 %v11534_v8, %v518_v5  ;;  %v11675_v6 = vsub.f32 %v11537_v9, %v519_v33  ;;  %v9953_v0 = vld [vmem:[#allocation5 + $0x7c] ss:$12 sps:$4 sm:$0xff]   ;;  %v9955_v5 = vld [vmem:[#allocation5 + $0x78] ss:$12 sps:$4 sm:$0xff]  }
 0x148   : > { %v466_v36 = vpop.xlane.xlu0 %465  ;;  %v468_v37 = vpop.xlane.xlu1 %467  ;;  %998 = vmatpush1.bf16.msra.mxu0 %v9949_v47  ;;  %9527 = vmatpush1.bf16.msra.mxu1 %v9949_v47 }
 0x149   : > { %v520_v38 = vmul.f32 0.0078125, %v466_v36  ;;  %v582_v39 = vmul.f32 %v11672_v35, %v11672_v35  ;;  %v521_v40 = vmul.f32 0.0078125, %v468_v37  ;;  %v583_v8 = vmul.f32 %v11675_v6, %v11675_v6  ;;  %999 = vmatprep.subr.bf16.mxu0 %v9950_v54  ;;  %9520 = vmatprep.subr.bf16.mxu1 %v9950_v54  ;;  %v9956_v36 = vld [vmem:[#allocation5 + $0x94] ss:$12 sps:$4 sm:$0xff]  }
 0x14b   : > { %620 = vadd.xlane.f32.xlu1 %v581_v34  ;;  %622 = vadd.xlane.f32.xlu0 %v582_v39  ;;  %v11682_v44 = vsub.f32 %v11542_v10, %v520_v38  ;;  %v11685_v9 = vsub.f32 %v11545_v11, %v521_v40  ;;  %v9958_v39 = vld [vmem:[#allocation5 + $0x90] ss:$12 sps:$4 sm:$0xff]  }
 0x14c   : > { %v470_v45 = vpop.xlane.xlu0 %469  ;;  %v472_v46 = vpop.xlane.xlu1 %471  ;;  %1000 = vmatpush1.bf16.msra.mxu0 %v9952_v59  ;;  %9528 = vmatpush1.bf16.msra.mxu1 %v9952_v59 }
 0x14d   : > { %v522_v48 = vmul.f32 0.0078125, %v470_v45  ;;  %v584_v51 = vmul.f32 %v11682_v44, %v11682_v44  ;;  %v523_v52 = vmul.f32 0.0078125, %v472_v46  ;;  %v585_v10 = vmul.f32 %v11685_v9, %v11685_v9  ;;  %1001 = vmatprep.subr.bf16.mxu0 %v9953_v0  ;;  %9521 = vmatprep.subr.bf16.mxu1 %v9953_v0  ;;  %v9959_v46 = vld [vmem:[#allocation5 + $0xac] ss:$12 sps:$4 sm:$0xff]  }
 0x14f   : > { %624 = vadd.xlane.f32.xlu1 %v583_v8  ;;  %626 = vadd.xlane.f32.xlu0 %v584_v51  ;;  %v11692_v11 = vsub.f32 %v11550_v12, %v522_v48  ;;  %v11695_v53 = vsub.f32 %v11553_v13, %v523_v52  ;;  %v9961_v51 = vld [vmem:[#allocation5 + $0xa8] ss:$12 sps:$4 sm:$0xff]  }
 0x150   : > { %v474_v55 = vpop.xlane.xlu0 %473  ;;  %v476_v56 = vpop.xlane.xlu1 %475  ;;  %1002 = vmatpush1.bf16.msra.mxu0 %v9955_v5  ;;  %9529 = vmatpush1.bf16.msra.mxu1 %v9955_v5 }
 0x151   : > { %v524_v60 = vmul.f32 0.0078125, %v474_v55  ;;  %v586_v61 = vmul.f32 %v11692_v11, %v11692_v11  ;;  %v525_v62 = vmul.f32 0.0078125, %v476_v56  ;;  %v587_v12 = vmul.f32 %v11695_v53, %v11695_v53  ;;  %1003 = vmatprep.subr.bf16.mxu0 %v9956_v36  ;;  %9522 = vmatprep.subr.bf16.mxu1 %v9956_v36 }
 0x153   : > { %628 = vadd.xlane.f32.xlu1 %v585_v10  ;;  %630 = vadd.xlane.f32.xlu0 %v586_v61  ;;  %v11702_v13 = vsub.f32 %v11558_v14, %v524_v60  ;;  %v11705_v63 = vsub.f32 %v11561_v15, %v525_v62  ;;  %v16811_v60 = vmov 0  }
 0x154   : > { %v478_v3 = vpop.xlane.xlu0 %477  ;;  %v480_v4 = vpop.xlane.xlu1 %479  ;;  %1004 = vmatpush1.bf16.msra.mxu0 %v9958_v39  ;;  %9530 = vmatpush1.bf16.msra.mxu1 %v9958_v39 }
 0x155   : > { %v526_v32 = vmul.f32 0.0078125, %v478_v3  ;;  %v588_v33 = vmul.f32 %v11702_v13, %v11702_v13  ;;  %v527_v34 = vmul.f32 0.0078125, %v480_v4  ;;  %v589_v14 = vmul.f32 %v11705_v63, %v11705_v63  ;;  %1005 = vmatprep.subr.bf16.mxu0 %v9959_v46  ;;  %9523 = vmatprep.subr.bf16.mxu1 %v9959_v46 }
 0x156   : > { %1023 = vmatprep.mubr.bf16.mxu0 %v16811_v60  ;;  %1143 = vmatprep.mubr.bf16.mxu1 %v16811_v60 }
 0x157   : > { %632 = vadd.xlane.f32.xlu1 %v587_v12  ;;  %634 = vadd.xlane.f32.xlu0 %v588_v33  ;;  %v11712_v15 = vsub.f32 %v11566_v16, %v526_v32  ;;  %v11715_v7 = vsub.f32 %v11569_v17, %v527_v34 }
 0x158   : > { %v482_v37 = vpop.xlane.xlu0 %481  ;;  %v484_v38 = vpop.xlane.xlu1 %483  ;;  %1006 = vmatpush1.bf16.msra.mxu0 %v9961_v51  ;;  %9531 = vmatpush1.bf16.msra.mxu1 %v9961_v51 }
 0x159   : > { %v528_v40 = vmul.f32 0.0078125, %v482_v37  ;;  %v590_v43 = vmul.f32 %v11712_v15, %v11712_v15  ;;  %v529_v8 = vmul.f32 0.0078125, %v484_v38  ;;  %v591_v16 = vmul.f32 %v11715_v7, %v11715_v7 }
 0x15b   : > { %636 = vadd.xlane.f32.xlu1 %v589_v14  ;;  %638 = vadd.xlane.f32.xlu0 %v590_v43  ;;  %v11722_v17 = vsub.f32 %v11574_v18, %v528_v40  ;;  %v11725_v45 = vsub.f32 %v11577_v19, %v529_v8 }
 0x15c   : > { %v486_v47 = vpop.xlane.xlu0 %485  ;;  %v488_v48 = vpop.xlane.xlu1 %487 }
 0x15d   : > { %v530_v52 = vmul.f32 0.0078125, %v486_v47  ;;  %v592_v10 = vmul.f32 %v11722_v17, %v11722_v17  ;;  %v531_v54 = vmul.f32 0.0078125, %v488_v48  ;;  %v593_v18 = vmul.f32 %v11725_v45, %v11725_v45 }
 0x15f   : > { %640 = vadd.xlane.f32.xlu1 %v591_v16  ;;  %642 = vadd.xlane.f32.xlu0 %v592_v10  ;;  %v11732_v19 = vsub.f32 %v11582_v20, %v530_v52  ;;  %v11735_v55 = vsub.f32 %v11585_v21, %v531_v54 }
 0x160   : > { %v490_v56 = vpop.xlane.xlu0 %489  ;;  %v492_v59 = vpop.xlane.xlu1 %491 }
 0x161   : > { %v532_v61 = vmul.f32 0.0078125, %v490_v56  ;;  %v594_v62 = vmul.f32 %v11732_v19, %v11732_v19  ;;  %v533_v12 = vmul.f32 0.0078125, %v492_v59  ;;  %v595_v20 = vmul.f32 %v11735_v55, %v11735_v55 }
 0x163   : > { %644 = vadd.xlane.f32.xlu1 %v593_v18  ;;  %646 = vadd.xlane.f32.xlu0 %v594_v62  ;;  %v11744_v21 = vsub.f32 %v11590_v22, %v532_v61  ;;  %v11747_v0 = vsub.f32 %v11593_v23, %v533_v12  ;;  %v11793_v62 = vld [vmem:[#allocation5 + $0x8] ss:$12 sps:$4 sm:$0xff]  }
 0x164   : > { %v494_v3 = vpop.xlane.xlu0 %493  ;;  %v496_v4 = vpop.xlane.xlu1 %495  ;;  %8908 = vmatprep.subr.bf16.mxu1 %v11793_v62 }
 0x165   : > { %v534_v5 = vmul.f32 0.0078125, %v494_v3  ;;  %v596_v32 = vmul.f32 %v11744_v21, %v11744_v21  ;;  %v535_v33 = vmul.f32 0.0078125, %v496_v4  ;;  %v597_v34 = vmul.f32 %v11747_v0, %v11747_v0 }
 0x167   : > { %648 = vadd.xlane.f32.xlu1 %v595_v20  ;;  %650 = vadd.xlane.f32.xlu0 %v596_v32  ;;  %v11754_v14 = vsub.f32 %v11598_v24, %v534_v5  ;;  %v11757_v22 = vsub.f32 %v11601_v25, %v535_v33 }
 0x168   : > { %v498_v23 = vpop.xlane.xlu0 %497  ;;  %v500_v36 = vpop.xlane.xlu1 %499 }
 0x169   : > { %v536_v37 = vmul.f32 0.0078125, %v498_v23  ;;  %v598_v38 = vmul.f32 %v11754_v14, %v11754_v14  ;;  %v537_v39 = vmul.f32 0.0078125, %v500_v36  ;;  %v599_v40 = vmul.f32 %v11757_v22, %v11757_v22 }
 0x16b   : > { %652 = vadd.xlane.f32.xlu1 %v597_v34  ;;  %654 = vadd.xlane.f32.xlu0 %v598_v38  ;;  %v11764_v43 = vsub.f32 %v11606_v26, %v536_v37  ;;  %v11767_v24 = vsub.f32 %v11609_v27, %v537_v39 }
 0x16c   : > { %v502_v25 = vpop.xlane.xlu0 %501  ;;  %v504_v8 = vpop.xlane.xlu1 %503 }
 0x16d   : > { %v538_v16 = vmul.f32 0.0078125, %v502_v25  ;;  %v600_v46 = vmul.f32 %v11764_v43, %v11764_v43  ;;  %v539_v47 = vmul.f32 0.0078125, %v504_v8  ;;  %v601_v48 = vmul.f32 %v11767_v24, %v11767_v24 }
 0x16f   : > { %656 = vadd.xlane.f32.xlu1 %v599_v40  ;;  %658 = vadd.xlane.f32.xlu0 %v600_v46  ;;  %v11774_v51 = vsub.f32 %v11614_v28, %v538_v16  ;;  %v11777_v26 = vsub.f32 %v11617_v29, %v539_v47 }
 0x170   : > { %v506_v27 = vpop.xlane.xlu0 %505  ;;  %v508_v52 = vpop.xlane.xlu1 %507 }
 0x171   : > { %v540_v10 = vmul.f32 0.0078125, %v506_v27  ;;  %v602_v54 = vmul.f32 %v11774_v51, %v11774_v51  ;;  %v541_v18 = vmul.f32 0.0078125, %v508_v52  ;;  %v603_v56 = vmul.f32 %v11777_v26, %v11777_v26 }
 0x173   : > { %660 = vadd.xlane.f32.xlu1 %v601_v48  ;;  %662 = vadd.xlane.f32.xlu0 %v602_v54  ;;  %v11784_v59 = vsub.f32 %v11622_v30, %v540_v10  ;;  %v11787_v28 = vsub.f32 %v11627_v31, %v541_v18 }
 0x175   : > { %v604_v29 = vmul.f32 %v11784_v59, %v11784_v59  ;;  %v605_v61 = vmul.f32 %v11787_v28, %v11787_v28 }
 0x177   : > { %664 = vadd.xlane.f32.xlu1 %v603_v56  ;;  %666 = vadd.xlane.f32.xlu0 %v604_v29 }
 0x17b   : > { %668 = vadd.xlane.f32.xlu1 %v605_v61 }
 0x1c8   : > { %v607_v12 = vpop.xlane.xlu0 %606 }
 0x1c9   : > { %v670_v20 = vmul.f32 0.0078125, %v607_v12 }
 0x1cb   : > { %v702_v30 = vadd.f32 1e-05, %v670_v20 }
 0x1cc   : > { %v609_v3 = vpop.xlane.xlu1 %608  ;;  %v611_v4 = vpop.xlane.xlu0 %610 }
 0x1cd   : > { %v671_v31 = vmul.f32 0.0078125, %v609_v3  ;;  %10058 = vrsqrt.f32 %v702_v30  ;;  %v672_v32 = vmul.f32 0.0078125, %v611_v4 }
 0x1cf   : > { %v703_v5 = vadd.f32 1e-05, %v671_v31  ;;  %v704_v36 = vadd.f32 1e-05, %v672_v32 }
 0x1d0   : > { %v613_v33 = vpop.xlane.xlu1 %612  ;;  %v615_v34 = vpop.xlane.xlu0 %614 }
 0x1d1   : > { %10060 = vrsqrt.f32 %v703_v5  ;;  %v673_v23 = vmul.f32 0.0078125, %v613_v33  ;;  %v674_v25 = vmul.f32 0.0078125, %v615_v34 }
 0x1d3   : > { %v705_v37 = vadd.f32 1e-05, %v673_v23  ;;  %v706_v27 = vadd.f32 1e-05, %v674_v25 }
 0x1d4   : > { %v617_v38 = vpop.xlane.xlu1 %616  ;;  %v619_v39 = vpop.xlane.xlu0 %618 }
 0x1d5   : > { %10062 = vrsqrt.f32 %v705_v37  ;;  %v675_v40 = vmul.f32 0.0078125, %v617_v38  ;;  %v676_v12 = vmul.f32 0.0078125, %v619_v39 }
 0x1d6   : > { %10064 = vrsqrt.f32 %v704_v36 }
 0x1d7   : > { %v10059_v46 = vpop.eup %10058  ;;  %v707_v47 = vadd.f32 1e-05, %v675_v40 }
 0x1d8   : > { %v621_v8 = vpop.xlane.xlu1 %620  ;;  %v623_v16 = vpop.xlane.xlu0 %622  ;;  %v766_v54 = vmul.f32 %v10059_v46, %v11632_v41  ;;  %v708_v41 = vadd.f32 1e-05, %v676_v12 }
 0x1d9   : > { %10066 = vrsqrt.f32 %v707_v47  ;;  %v677_v56 = vmul.f32 0.0078125, %v621_v8  ;;  %v678_v36 = vmul.f32 0.0078125, %v623_v16 }
 0x1da   : > { %10068 = vrsqrt.f32 %v706_v27 }
 0x1db   : > { %v10061_v48 = vpop.eup %10060  ;;  %v709_v4 = vadd.f32 1e-05, %v677_v56  ;;  %v710_v25 = vadd.f32 1e-05, %v678_v36 }
 0x1dc   : > { %v625_v52 = vpop.xlane.xlu1 %624  ;;  %v627_v10 = vpop.xlane.xlu0 %626  ;;  %v767_v18 = vmul.f32 %v10061_v48, %v11642_v49 }
 0x1dd   : > { %10070 = vrsqrt.f32 %v709_v4  ;;  %v679_v33 = vmul.f32 0.0078125, %v625_v52  ;;  %v680_v27 = vmul.f32 0.0078125, %v627_v10 }
 0x1de   : > { %v11798_v29 = vpack.c.bf16 %v767_v18, %v766_v54  ;;  %10072 = vrsqrt.f32 %v708_v41 }
 0x1df   : > { %v10063_v61 = vpop.eup %10062  ;;  %v711_v40 = vadd.f32 1e-05, %v679_v33 }
 0x1e0   : > { %v629_v20 = vpop.xlane.xlu1 %628  ;;  %1024 = vmatmul.mubr.bf16.vlgmr.msra.gmra.mrb[0].mxu0 %v11798_v29  ;;  %v631_v30 = vpop.xlane.xlu0 %630  ;;  %v769_v31 = vmul.f32 %v10063_v61, %v11645_v50 }
 0x1e1   : > { %v10065_v3 = vpop.eup %10064  ;;  %1033 = vmatprep.mubr.bf16.mxu0 %v16811_v60  ;;  %10074 = vrsqrt.f32 %v711_v40  ;;  %v681_v47 = vmul.f32 0.0078125, %v629_v20 }
 0x1e2   : > { %v768_v32 = vmul.f32 %v10065_v3, %v11635_v42  ;;  %10076 = vrsqrt.f32 %v710_v25  ;;  %v682_v3 = vmul.f32 0.0078125, %v631_v30 }
 0x1e3   : > { %v10067_v23 = vpop.eup %10066  ;;  %v713_v18 = vadd.f32 1e-05, %v681_v47 }
 0x1e4   : > { %v633_v5 = vpop.xlane.xlu1 %632  ;;  %v635_v49 = vpop.xlane.xlu0 %634  ;;  %v11804_v34 = vpack.c.bf16 %v769_v31, %v768_v32  ;;  %v771_v50 = vmul.f32 %v10067_v23, %v11655_v58  ;;  %v714_v36 = vadd.f32 1e-05, %v682_v3 }
 0x1e5   : > { %v10069_v39 = vpop.eup %10068  ;;  %10078 = vrsqrt.f32 %v713_v18  ;;  %v683_v10 = vmul.f32 0.0078125, %v633_v5 }
 0x1e6   : > { %v770_v46 = vmul.f32 %v10069_v39, %v11652_v57  ;;  %v712_v57 = vadd.f32 1e-05, %v680_v27 }
 0x1e7   : > { %v10071_v48 = vpop.eup %10070  ;;  %v715_v33 = vadd.f32 1e-05, %v683_v10 }
 0x1e8   : > { %v637_v37 = vpop.xlane.xlu1 %636  ;;  %1034 = vmatmul.mubr.bf16.gmra.mrb[4].mxu0 %v11804_v34  ;;  %v11807_v38 = vpop.xlane.xlu0 %638  ;;  %v11814_v16 = vpack.c.bf16 %v771_v50, %v770_v46  ;;  %v773_v56 = vmul.f32 %v10071_v48, %v11665_v2  ;;  %10080 = vrsqrt.f32 %v712_v57  ;;  %v684_v46 = vmul.f32 0.0078125, %v635_v49 }
 0x1e9   : > { %1043 = vmatprep.mubr.bf16.mxu0 %v16811_v60  ;;  %v10073_v58 = vpop.eup %10072  ;;  %v685_v5 = vmul.f32 0.0078125, %v637_v37  ;;  %10082 = vrsqrt.f32 %v715_v33  ;;  %v686_v33 = vmul.f32 0.0078125, %v11807_v38 }
 0x1ea   : > { %v772_v20 = vmul.f32 %v10073_v58, %v11662_v1  ;;  %10084 = vrsqrt.f32 %v714_v36 }
 0x1eb   : > { %v10075_v31 = vpop.eup %10074  ;;  %v717_v18 = vadd.f32 1e-05, %v685_v5 }
 0x1ec   : > { %v641_v42 = vpop.xlane.xlu1 %640  ;;  %v11811_v8 = vpop.xlane.xlu0 %642  ;;  %v11828_v4 = vpack.c.bf16 %v773_v56, %v772_v20  ;;  %v775_v1 = vmul.f32 %v10075_v31, %v11675_v6 }
 0x1ed   : > { %v10077_v2 = vpop.eup %10076  ;;  %v687_v20 = vmul.f32 0.0078125, %v641_v42 }
 0x1ee   : > { %v774_v50 = vmul.f32 %v10077_v2, %v11672_v35  ;;  %v716_v35 = vadd.f32 1e-05, %v684_v46 }
 0x1ef   : > { %v10079_v48 = vpop.eup %10078 }
 0x1f0   : > { %v11816_v52 = vpop.xlane.xlu1 %644  ;;  %1044 = vmatmul.mubr.bf16.gmra.mrb[8].mxu0 %v11814_v16  ;;  %v11819_v54 = vpop.xlane.xlu0 %646  ;;  %v11836_v47 = vpack.c.bf16 %v775_v1, %v774_v50  ;;  %v777_v57 = vmul.f32 %v10079_v48, %v11685_v9  ;;  %v719_v1 = vadd.f32 1e-05, %v687_v20 }
 0x1f1   : > { %1053 = vmatprep.mubr.bf16.mxu0 %v16811_v60 }
 0x1f2   : > { %v10081_v6 = vpop.eup %10080 }
 0x1f3   : > { %v10083_v36 = vpop.eup %10082 }
 0x1f4   : > { %v11823_v61 = vpop.xlane.xlu1 %648  ;;  %v11825_v12 = vpop.xlane.xlu0 %650 }
 0x1f5   : > { %v10085_v9 = vpop.eup %10084 }
 0x1f6   : > { %v778_v48 = vmul.f32 %v10085_v9, %v11692_v11 }
 0x1f8   : > { %v11830_v41 = vpop.xlane.xlu1 %652  ;;  %1054 = vmatmul.mubr.bf16.gmra.mrb[12].mxu0 %v11828_v4  ;;  %v655_v32 = vpop.xlane.xlu0 %654 }
 0x1f9   : > { %v694_v23 = vmul.f32 0.0078125, %v655_v32  ;;  %1063 = vmatprep.mubr.bf16.mxu0 %v16811_v60  ;;  %v776_v32 = vmul.f32 %v10081_v6, %v11682_v44  ;;  %v688_v6 = vmul.f32 0.0078125, %v11811_v8 }
 0x1fb   : > { %v726_v39 = vadd.f32 1e-05, %v694_v23  ;;  %v11843_v23 = vpack.c.bf16 %v777_v57, %v776_v32  ;;  %v720_v8 = vadd.f32 1e-05, %v688_v6 }
 0x1fc   : > { %v657_v30 = vpop.xlane.xlu1 %656  ;;  %v659_v40 = vpop.xlane.xlu0 %658 }
 0x1fd   : > { %v695_v25 = vmul.f32 0.0078125, %v657_v30  ;;  %10086 = vrsqrt.f32 %v726_v39  ;;  %v696_v58 = vmul.f32 0.0078125, %v659_v40  ;;  %v718_v30 = vadd.f32 1e-05, %v686_v33 }
 0x1fe   : > { %v779_v40 = vmul.f32 %v10083_v36, %v11695_v53 }
 0x1ff   : > { %v727_v27 = vadd.f32 1e-05, %v695_v25  ;;  %v728_v49 = vadd.f32 1e-05, %v696_v58  ;;  %v689_v25 = vmul.f32 0.0078125, %v11816_v52 }
 0x200   : > { %v661_v56 = vpop.xlane.xlu1 %660  ;;  %1064 = vmatmul.mubr.bf16.gmra.mrb[16].mxu0 %v11836_v47  ;;  %v663_v3 = vpop.xlane.xlu0 %662 }
 0x201   : > { %10088 = vrsqrt.f32 %v727_v27  ;;  %v697_v37 = vmul.f32 0.0078125, %v661_v56  ;;  %1073 = vmatprep.mubr.bf16.mxu0 %v16811_v60  ;;  %v698_v39 = vmul.f32 0.0078125, %v663_v3  ;;  %v721_v11 = vadd.f32 1e-05, %v689_v25  ;;  %v9964_v3 = vld [vmem:[#allocation5 + $0x38] ss:$12 sps:$4 sm:$0xff]  }
 0x202   : > { %10090 = vrsqrt.f32 %v717_v18 }
 0x203   : > { %v729_v10 = vadd.f32 1e-05, %v697_v37  ;;  %v730_v38 = vadd.f32 1e-05, %v698_v39  ;;  %v11853_v37 = vpack.c.bf16 %v779_v40, %v778_v48  ;;  %v690_v39 = vmul.f32 0.0078125, %v11819_v54 }
 0x204   : > { %v665_v31 = vpop.xlane.xlu1 %664  ;;  %v667_v46 = vpop.xlane.xlu0 %666  ;;  %v693_v40 = vmul.f32 0.0078125, %v11830_v41 }
 0x205   : > { %10092 = vrsqrt.f32 %v729_v10  ;;  %v699_v2 = vmul.f32 0.0078125, %v665_v31  ;;  %v700_v52 = vmul.f32 0.0078125, %v667_v46  ;;  %v722_v54 = vadd.f32 1e-05, %v690_v39  ;;  %v9967_v46 = vld [vmem:[#allocation5 + $0x80] ss:$12 sps:$4 sm:$0xff]  }
 0x206   : > { %10094 = vrsqrt.f32 %v716_v35  ;;  %v9963_v35 = vld [vmem:[#allocation5 + $0x20] ss:$12 sps:$4 sm:$0xff]  }
 0x207   : > { %10096 = vrsqrt.f32 %v728_v49  ;;  %v10087_v42 = vpop.eup %10086  ;;  %v731_v5 = vadd.f32 1e-05, %v699_v2  ;;  %v732_v31 = vadd.f32 1e-05, %v700_v52 }
 0x208   : > { %1074 = vmatmul.mubr.bf16.gmra.mrb[20].mxu0 %v11843_v23  ;;  %v669_v44 = vpop.xlane.xlu1 %668  ;;  %10098 = vrsqrt.f32 %v719_v1  ;;  %v790_v27 = vmul.f32 %v10087_v42, %v11754_v14 }
 0x209   : > { %1083 = vmatprep.mubr.bf16.mxu0 %v16811_v60  ;;  %10100 = vrsqrt.f32 %v731_v5  ;;  %v701_v18 = vmul.f32 0.0078125, %v669_v44  ;;  %v9966_v5 = vld [vmem:[#allocation5 + $0x68] ss:$12 sps:$4 sm:$0xff]  }
 0x20a   : > { %10102 = vrsqrt.f32 %v718_v30 }
 0x20b   : > { %v10089_v50 = vpop.eup %10088  ;;  %10104 = vrsqrt.f32 %v730_v38 }
 0x20c   : > { %v791_v58 = vmul.f32 %v10089_v50, %v11757_v22  ;;  %v10091_v56 = vpop.eup %10090  ;;  %v733_v22 = vadd.f32 1e-05, %v701_v18  ;;  %10106 = vrsqrt.f32 %v721_v11 }
 0x20d   : > { %v781_v49 = vmul.f32 %v10091_v56, %v11705_v63  ;;  %v9965_v63 = vld [vmem:[#allocation5 + $0x50] ss:$12 sps:$4 sm:$0xff]  }
 0x20e   : > { %v11855_v53 = vpack.c.bf16 %v791_v58, %v790_v27  ;;  %10108 = vrsqrt.f32 %v733_v22  ;;  %v9968_v58 = vld [vmem:[#allocation5 + $0x98] ss:$12 sps:$4 sm:$0xff]  }
 0x20f   : > { %v10093_v57 = vpop.eup %10092  ;;  %10110 = vrsqrt.f32 %v720_v8 }
 0x210   : > { %v10095_v20 = vpop.eup %10094  ;;  %1084 = vmatmul.mubr.bf16.gmra.mrb[24].mxu0 %v11853_v37  ;;  %1144 = vmatmul.mubr.bf16.vlgmr.msra.gmra.mrb[0].mxu1 %v11855_v53  ;;  %v793_v10 = vmul.f32 %v10093_v57, %v11767_v24  ;;  %10112 = vrsqrt.f32 %v732_v31  ;;  %v9969_v57 = vld [vmem:[#allocation5 + $0xb0] ss:$12 sps:$4 sm:$0xff]  }
 0x211   : > { %v10097_v14 = vpop.eup %10096  ;;  %8909 = vmatpush3.bf16.msra.mxu1 %v11793_v62  ;;  %1093 = vmatprep.mubr.bf16.mxu0 %v16811_v60  ;;  %v780_v32 = vmul.f32 %v10095_v20, %v11702_v13  ;;  %v691_v62 = vmul.f32 0.0078125, %v11823_v61 }
 0x212   : > { %8910 = vmatprep.subr.bf16.mxu1 %v9963_v35  ;;  %1153 = vmatprep.mubr.bf16.mxu1 %v16811_v60  ;;  %v792_v2 = vmul.f32 %v10097_v14, %v11764_v43  ;;  %v10099_v33 = vpop.eup %10098 }
 0x213   : > { %v11867_v36 = vpack.c.bf16 %v781_v49, %v780_v32  ;;  %v10101_v24 = vpop.eup %10100  ;;  %v723_v43 = vadd.f32 1e-05, %v691_v62  ;;  %v783_v61 = vmul.f32 %v10099_v33, %v11715_v7  ;;  %v692_v7 = vmul.f32 0.0078125, %v11825_v12 }
 0x214   : > { %v11869_v1 = vpack.c.bf16 %v793_v10, %v792_v2  ;;  %v10103_v9 = vpop.eup %10102  ;;  %v795_v42 = vmul.f32 %v10101_v24, %v11777_v26 }
 0x215   : > { %8911 = vmatpush3.bf16.msra.mxu1 %v9963_v35  ;;  %v10105_v13 = vpop.eup %10104  ;;  %v782_v30 = vmul.f32 %v10103_v9, %v11712_v15  ;;  %10114 = vrsqrt.f32 %v723_v43  ;;  %v725_v15 = vadd.f32 1e-05, %v693_v40  ;;  %v724_v18 = vadd.f32 1e-05, %v692_v7 }
 0x216   : > { %8912 = vmatprep.subr.bf16.mxu1 %v9964_v3  ;;  %v794_v44 = vmul.f32 %v10105_v13, %v11774_v51  ;;  %v10107_v50 = vpop.eup %10106  ;;  %10116 = vrsqrt.f32 %v722_v54 }
 0x217   : > { %v806_v38 = vpack.c.bf16 %v783_v61, %v782_v30  ;;  %v785_v51 = vmul.f32 %v10107_v50, %v11725_v45  ;;  %10118 = vrsqrt.f32 %v725_v15 }
 0x218   : > { %1094 = vmatmul.mubr.bf16.gmra.mrb[28].mxu0 %v11867_v36  ;;  %1154 = vmatmul.mubr.bf16.gmra.mrb[4].mxu1 %v11869_v1  ;;  %v812_v25 = vpack.c.bf16 %v795_v42, %v794_v44  ;;  %v10109_v48 = vpop.eup %10108  ;;  %10120 = vrsqrt.f32 %v724_v18 }
 0x219   : > { %8913 = vmatpush3.bf16.msra.mxu1 %v9964_v3  ;;  %1103 = vmatprep.mubr.bf16.mxu0 %v16811_v60  ;;  %v10111_v26 = vpop.eup %10110  ;;  %v797_v41 = vmul.f32 %v10109_v48, %v11787_v28 }
 0x21a   : > { %8914 = vmatprep.subr.bf16.mxu1 %v9965_v63  ;;  %1163 = vmatprep.mubr.bf16.mxu1 %v16811_v60  ;;  %v10113_v27 = vpop.eup %10112  ;;  %v784_v56 = vmul.f32 %v10111_v26, %v11722_v17 }
 0x21b   : > { %v796_v12 = vmul.f32 %v10113_v27, %v11784_v59 }
 0x21c   : > { %v807_v6 = vpack.c.bf16 %v785_v51, %v784_v56 }
 0x21d   : > { %8915 = vmatpush3.bf16.msra.mxu1 %v9965_v63  ;;  %v813_v35 = vpack.c.bf16 %v797_v41, %v796_v12 }
 0x21e   : > { %8916 = vmatprep.subr.bf16.mxu1 %v9966_v5 }
 0x21f   : > { %v10115_v52 = vpop.eup %10114 }
 0x220   : > { %1104 = vmatmul.mubr.bf16.gmra.mrb[32].mxu0 %v806_v38  ;;  %1164 = vmatmul.mubr.bf16.gmra.mrb[8].mxu1 %v812_v25  ;;  %v10117_v20 = vpop.eup %10116  ;;  %v787_v17 = vmul.f32 %v10115_v52, %v11735_v55 }
 0x221   : > { %8917 = vmatpush3.bf16.msra.mxu1 %v9966_v5  ;;  %1113 = vmatprep.mubr.bf16.mxu0 %v16811_v60  ;;  %v786_v45 = vmul.f32 %v10117_v20, %v11732_v19  ;;  %v10119_v28 = vpop.eup %10118  ;;  %v16813_v19 = vlaneseq }
 0x222   : > { %8918 = vmatprep.subr.bf16.mxu1 %v9967_v46  ;;  %1173 = vmatprep.mubr.bf16.mxu1 %v16811_v60  ;;  %v10121_v11 = vpop.eup %10120 }
 0x223   : > { %v808_v59 = vpack.c.bf16 %v787_v17, %v786_v45  ;;  %v788_v14 = vmul.f32 %v10121_v11, %v11744_v21  ;;  %v11905_v55 = vshrl.u32 %v16813_v19, 7 }
 0x225   : > { %8919 = vmatpush3.bf16.msra.mxu1 %v9967_v46  ;;  %17128 = vst [vmem:[#allocation18_spill] sm:$0xff] %v11905_v55  ;;  %v16810_v21 = vsub.s32 0, %v11905_v55 }
 0x226   : > { %8920 = vmatprep.subr.bf16.mxu1 %v9968_v58 }
 0x228   : > { %1114 = vmatmul.mubr.bf16.gmra.mrb[36].mxu0 %v807_v6  ;;  %1174 = vmatmul.mubr.bf16.gmra.mrb[12].mxu1 %v813_v35 }
 0x229   : > { %8921 = vmatpush3.bf16.msra.mxu1 %v9968_v58  ;;  %8924 = vmatprep.mubr.bf16.mxu1 %v11798_v29  ;;  %v789_v29 = vmul.f32 %v10119_v28, %v11747_v0  ;;  %v11911_v0 = vld [vmem:[%s16795_s2] sm:$0x7] }
 0x22a   : > { %8922 = vmatprep.subr.bf16.mxu1 %v9969_v57  ;;  %1123 = vmatprep.mubr.bf16.mxu0 %v16811_v60 }
 0x22b   : > { %v809_v22 = vpack.c.bf16 %v789_v29, %v788_v14 }
 0x22d   : > { %8923 = vmatpush3.bf16.msra.mxu1 %v9969_v57 }
 0x230   : > { %1124 = vmatmul.mubr.bf16.gmra.mrb[40].mxu0 %v808_v59  ;;  %8925 = vmatmul.mubr.bf16.vlgmr.msra.gmra.mrb[16].mxu1 %v11804_v34  ;;  %v16808_v34 = vsub.s32 1, %v11905_v55 }
 0x231   : > { %8928 = vmatprep.mubr.bf16.mxu1 %v11814_v16  ;;  %1133 = vmatprep.mubr.bf16.mxu0 %v16811_v60  ;;  %v11917_v16 = vrot.slane %v11911_v0, %v16810_v21 }
 0x238   : > { %1134 = vmatmul.mubr.bf16.gmra.mrb[44].mxu0 %v809_v22  ;;  %8929 = vmatmul.mubr.bf16.gmra.mrb[20].mxu1 %v11828_v4 }
 0x239   : > { %8932 = vmatprep.mubr.bf16.mxu1 %v11836_v47  ;;  %v11922_v47 = vrot.slane %v11911_v0, %v16808_v34 }
 0x240   : > { %8933 = vmatmul.mubr.bf16.gmra.mrb[24].mxu1 %v11843_v23 }
 0x241   : > { %8936 = vmatprep.mubr.bf16.mxu1 %v11853_v37 }
 0x248   : > { %8937 = vmatmul.mubr.bf16.gmra.mrb[28].mxu1 %v11867_v36 }
 0x249   : > { %8940 = vmatprep.mubr.bf16.mxu1 %v806_v38 }
 0x250   : > { %8941 = vmatmul.mubr.bf16.gmra.mrb[32].mxu1 %v807_v6 }
 0x251   : > { %8944 = vmatprep.mubr.bf16.mxu1 %v808_v59 }
 0x258   : > { %8945 = vmatmul.mubr.bf16.gmra.mrb[36].mxu1 %v809_v22 }
 0x259   : > { %8948 = vmatprep.mubr.bf16.mxu1 %v11855_v53 }
 0x260   : > { %8949 = vmatmul.mubr.bf16.gmra.mrb[40].mxu1 %v11869_v1 }
 0x261   : > { %8952 = vmatprep.mubr.bf16.mxu1 %v812_v25 }
 0x268   : > { %8953 = vmatmul.mubr.bf16.gmra.mrb[44].mxu1 %v813_v35 }
 0x2b3   : > { %v1025_v4 = vpop.f32.mrb[0].mxu0 }
 0x2b4   : > { %v1027_v23 = vpop.f32.mrb[1].mxu0  ;;  %v1026_v53 = vadd.f32 %v1025_v4, %v11917_v16 }
 0x2b5   : > { %v1029_v37 = vpop.f32.mrb[2].mxu0  ;;  %v1028_v10 = vadd.f32 %v1027_v23, %v11922_v47 }
 0x2b6   : > { %v1030_v8 = vadd.f32 %v1029_v37, %v11917_v16  ;;  %v1031_v49 = vpop.f32.mrb[3].mxu0 }
 0x2b7   : > { %v1032_v3 = vadd.f32 %v1031_v49, %v11922_v47 }
 0x2b8   : > { %v1345_v31 = vpack.c.bf16 %v1030_v8, %v1026_v53 }
 0x2b9   : > { %v11928_v32 = vpack.c.bf16 %v1032_v3, %v1028_v10 }
 0x2ba   : > { %1417 = vrot.lane.b32.xlu0 %v1345_v31, %s11218_s18  ;;  %1401 = vrot.lane.b32.xlu1 %v1345_v31, %s11219_s22 }
 0x2bb   : > { %8972 = vmatprep.mubr.msk.bf16.mxu1 %vm1828_vm0, %v1345_v31  ;;  %v1035_v2 = vpop.f32.mrb[4].mxu0  ;;  %9532 = vmatprep.subr.msk.bf16.mxu1 %vm1828_vm0, %v11928_v32  ;;  %v1854_v33 = vsel %vm1828_vm0, %v11928_v32, 0 }
 0x2bc   : > { %v1037_v62 = vpop.f32.mrb[5].mxu0  ;;  %8957 = vmatpush3.bf16.xpose.msra.mxu1 %v1854_v33  ;;  %v1036_v1 = vadd.f32 %v1035_v2, %v11917_v16 }
 0x2bd   : > { %v1039_v36 = vpop.f32.mrb[6].mxu0  ;;  %v1038_v39 = vadd.f32 %v1037_v62, %v11922_v47 }
 0x2be   : > { %v1040_v63 = vadd.f32 %v1039_v36, %v11917_v16  ;;  %1433 = vrot.lane.b32.xlu0 %v1345_v31, %s11220_s25  ;;  %v1041_v24 = vpop.f32.mrb[7].mxu0 }
 0x2bf   : > { %v1042_v9 = vadd.f32 %v1041_v24, %v11922_v47 }
 0x2c0   : > { %v11942_v13 = vpack.c.bf16 %v1040_v63, %v1036_v1 }
 0x2c1   : > { %v11944_v43 = vpack.c.bf16 %v1042_v9, %v1038_v39 }
 0x2c3   : > { %v1045_v61 = vpop.f32.mrb[8].mxu0  ;;  %9533 = vmatprep.subr.msk.bf16.mxu1 %vm1828_vm0, %v11944_v43  ;;  %v1857_v42 = vsel %vm1828_vm0, %v11944_v43, 0 }
 0x2c4   : > { %v1047_v5 = vpop.f32.mrb[9].mxu0  ;;  %8959 = vmatpush3.bf16.xpose.msra.mxu1 %v1857_v42  ;;  %v1046_v30 = vadd.f32 %v1045_v61, %v11917_v16 }
 0x2c5   : > { %v1049_v54 = vpop.f32.mrb[10].mxu0  ;;  %v1048_v50 = vadd.f32 %v1047_v5, %v11922_v47 }
 0x2c6   : > { %v1050_v44 = vadd.f32 %v1049_v54, %v11917_v16  ;;  %v1051_v40 = vpop.f32.mrb[11].mxu0 }
 0x2c7   : > { %v1052_v38 = vadd.f32 %v1051_v40, %v11922_v47 }
 0x2c8   : > { %v11954_v25 = vpack.c.bf16 %v1050_v44, %v1046_v30 }
 0x2c9   : > { %v11956_v46 = vpack.c.bf16 %v1052_v38, %v1048_v50 }
 0x2cb   : > { %v1055_v48 = vpop.f32.mrb[12].mxu0  ;;  %9534 = vmatprep.subr.msk.bf16.mxu1 %vm1828_vm0, %v11956_v46  ;;  %v1860_v7 = vsel %vm1828_vm0, %v11956_v46, 0 }
 0x2cc   : > { %v1057_v26 = vpop.f32.mrb[13].mxu0  ;;  %8961 = vmatpush3.bf16.xpose.msra.mxu1 %v1860_v7  ;;  %v1056_v15 = vadd.f32 %v1055_v48, %v11917_v16 }
 0x2cd   : > { %v1059_v27 = vpop.f32.mrb[14].mxu0  ;;  %v1058_v58 = vadd.f32 %v1057_v26, %v11922_v47 }
 0x2ce   : > { %v1060_v51 = vadd.f32 %v1059_v27, %v11917_v16  ;;  %v1061_v41 = vpop.f32.mrb[15].mxu0 }
 0x2cf   : > { %v1062_v18 = vadd.f32 %v1061_v41, %v11922_v47 }
 0x2d0   : > { %v11966_v56 = vpack.c.bf16 %v1060_v51, %v1056_v15 }
 0x2d1   : > { %v11968_v12 = vpack.c.bf16 %v1062_v18, %v1058_v58 }
 0x2d3   : > { %v1065_v6 = vpop.f32.mrb[16].mxu0  ;;  %9535 = vmatprep.subr.msk.bf16.mxu1 %vm1828_vm0, %v11968_v12  ;;  %v1863_v35 = vsel %vm1828_vm0, %v11968_v12, 0 }
 0x2d4   : > { %v1067_v57 = vpop.f32.mrb[17].mxu0  ;;  %8963 = vmatpush3.bf16.xpose.msra.mxu1 %v1863_v35  ;;  %v1066_v20 = vadd.f32 %v1065_v6, %v11917_v16 }
 0x2d5   : > { %v1069_v52 = vpop.f32.mrb[18].mxu0  ;;  %v1068_v59 = vadd.f32 %v1067_v57, %v11922_v47 }
 0x2d6   : > { %v1070_v17 = vadd.f32 %v1069_v52, %v11917_v16  ;;  %v1071_v45 = vpop.f32.mrb[19].mxu0 }
 0x2d7   : > { %v1072_v28 = vadd.f32 %v1071_v45, %v11922_v47 }
 0x2d8   : > { %v11978_v11 = vpack.c.bf16 %v1070_v17, %v1066_v20 }
 0x2d9   : > { %v11980_v29 = vpack.c.bf16 %v1072_v28, %v1068_v59 }
 0x2db   : > { %v1075_v14 = vpop.f32.mrb[20].mxu0  ;;  %9536 = vmatprep.subr.msk.bf16.mxu1 %vm1828_vm0, %v11980_v29  ;;  %v1866_v22 = vsel %vm1828_vm0, %v11980_v29, 0 }
 0x2dc   : > { %v1077_v4 = vpop.f32.mrb[21].mxu0  ;;  %8965 = vmatpush3.bf16.xpose.msra.mxu1 %v1866_v22  ;;  %v1076_v37 = vadd.f32 %v1075_v14, %v11917_v16 }
 0x2dd   : > { %v1079_v23 = vpop.f32.mrb[22].mxu0  ;;  %v1078_v49 = vadd.f32 %v1077_v4, %v11922_v47 }
 0x2de   : > { %v1080_v53 = vadd.f32 %v1079_v23, %v11917_v16  ;;  %v1081_v8 = vpop.f32.mrb[23].mxu0 }
 0x2df   : > { %v1082_v10 = vadd.f32 %v1081_v8, %v11922_v47 }
 0x2e0   : > { %v11990_v3 = vpack.c.bf16 %v1080_v53, %v1076_v37 }
 0x2e1   : > { %v11992_v31 = vpack.c.bf16 %v1082_v10, %v1078_v49 }
 0x2e3   : > { %v1085_v2 = vpop.f32.mrb[24].mxu0  ;;  %v1145_v33 = vpop.f32.mrb[0].mxu1  ;;  %9537 = vmatprep.subr.msk.bf16.mxu1 %vm1828_vm0, %v11992_v31  ;;  %v1869_v62 = vsel %vm1828_vm0, %v11992_v31, 0 }
 0x2e4   : > { %v1087_v36 = vpop.f32.mrb[25].mxu0  ;;  %v1147_v1 = vpop.f32.mrb[1].mxu1  ;;  %8967 = vmatpush3.bf16.xpose.msra.mxu1 %v1869_v62  ;;  %v1086_v39 = vadd.f32 %v1085_v2, %v11917_v16  ;;  %v1146_v9 = vadd.f32 %v1145_v33, %v11917_v16 }
 0x2e5   : > { %v1089_v63 = vpop.f32.mrb[26].mxu0  ;;  %v1149_v24 = vpop.f32.mrb[2].mxu1  ;;  %v1088_v30 = vadd.f32 %v1087_v36, %v11922_v47  ;;  %v1148_v44 = vadd.f32 %v1147_v1, %v11922_v47 }
 0x2e6   : > { %v1090_v61 = vadd.f32 %v1089_v63, %v11917_v16  ;;  %v1150_v42 = vadd.f32 %v1149_v24, %v11917_v16  ;;  %v1091_v5 = vpop.f32.mrb[27].mxu0  ;;  %v1151_v54 = vpop.f32.mrb[3].mxu1 }
 0x2e7   : > { %v1092_v40 = vadd.f32 %v1091_v5, %v11922_v47  ;;  %v1152_v50 = vadd.f32 %v1151_v54, %v11922_v47 }
 0x2e8   : > { %v12006_v38 = vpack.c.bf16 %v1090_v61, %v1086_v39  ;;  %v12008_v48 = vpack.c.bf16 %v1150_v42, %v1146_v9 }
 0x2e9   : > { %v12010_v7 = vpack.c.bf16 %v1092_v40, %v1088_v30  ;;  %v12012_v26 = vpack.c.bf16 %v1152_v50, %v1148_v44 }
 0x2ea   : > { %1465 = vrot.lane.b32.xlu0 %v12008_v48, %s11219_s22 }
 0x2eb   : > { %v1095_v27 = vpop.f32.mrb[28].mxu0  ;;  %1609 = vrot.lane.b32.xlu1 %v12012_v26, %s11220_s25  ;;  %v1155_v15 = vpop.f32.mrb[4].mxu1  ;;  %9538 = vmatprep.subr.msk.bf16.mxu1 %vm1828_vm0, %v12010_v7  ;;  %v1872_v51 = vsel %vm1828_vm0, %v12010_v7, 0 }
 0x2ec   : > { %v1097_v41 = vpop.f32.mrb[29].mxu0  ;;  %v1157_v58 = vpop.f32.mrb[5].mxu1  ;;  %8969 = vmatpush3.bf16.xpose.msra.mxu1 %v1872_v51  ;;  %v1096_v35 = vadd.f32 %v1095_v27, %v11917_v16  ;;  %v1156_v57 = vadd.f32 %v1155_v15, %v11917_v16 }
 0x2ed   : > { %v1099_v18 = vpop.f32.mrb[30].mxu0  ;;  %v1159_v6 = vpop.f32.mrb[6].mxu1  ;;  %v1098_v59 = vadd.f32 %v1097_v41, %v11922_v47  ;;  %v1158_v28 = vadd.f32 %v1157_v58, %v11922_v47 }
 0x2ee   : > { %v1100_v52 = vadd.f32 %v1099_v18, %v11917_v16  ;;  %v1160_v20 = vadd.f32 %v1159_v6, %v11917_v16  ;;  %v1101_v17 = vpop.f32.mrb[31].mxu0  ;;  %1481 = vrot.lane.b32.xlu0 %v12008_v48, %s11218_s18  ;;  %v1161_v45 = vpop.f32.mrb[7].mxu1 }
 0x2ef   : > { %v1102_v14 = vadd.f32 %v1101_v17, %v11922_v47  ;;  %v1162_v22 = vadd.f32 %v1161_v45, %v11922_v47  ;;  %1403 = vrot.lane.b32.xlu1 %v11942_v13, %s11219_s22 }
 0x2f0   : > { %v12034_v4 = vpack.c.bf16 %v1100_v52, %v1096_v35  ;;  %v12036_v23 = vpack.c.bf16 %v1160_v20, %v1156_v57  ;;  %v16809_v35 = vsub.s32 2, %v11905_v55 }
 0x2f1   : > { %v12038_v37 = vpack.c.bf16 %v1102_v14, %v1098_v59  ;;  %v12040_v53 = vpack.c.bf16 %v1162_v22, %v1158_v28 }
 0x2f2   : > { %17129 = vst [vmem:[#allocation19_spill] sm:$0xff] %v12036_v23  ;;  %1497 = vrot.lane.b32.xlu0 %v12008_v48, %s11220_s25 }
 0x2f3   : > { %v1105_v8 = vpop.f32.mrb[32].mxu0  ;;  %1419 = vrot.lane.b32.xlu1 %v11942_v13, %s11218_s18  ;;  %v1165_v49 = vpop.f32.mrb[8].mxu1  ;;  %9539 = vmatprep.subr.msk.bf16.mxu1 %vm1828_vm0, %v12038_v37  ;;  %v1875_v10 = vsel %vm1828_vm0, %v12038_v37, 0 }
 0x2f4   : > { %v1107_v2 = vpop.f32.mrb[33].mxu0  ;;  %v1167_v33 = vpop.f32.mrb[9].mxu1  ;;  %8971 = vmatpush3.bf16.xpose.msra.mxu1 %v1875_v10  ;;  %v1106_v1 = vadd.f32 %v1105_v8, %v11917_v16  ;;  %v1166_v63 = vadd.f32 %v1165_v49, %v11917_v16 }
 0x2f5   : > { %v1109_v62 = vpop.f32.mrb[34].mxu0  ;;  %v1169_v36 = vpop.f32.mrb[10].mxu1  ;;  %v1108_v42 = vadd.f32 %v1107_v2, %v11922_v47  ;;  %v1168_v5 = vadd.f32 %v1167_v33, %v11922_v47 }
 0x2f6   : > { %v1110_v24 = vadd.f32 %v1109_v62, %v11917_v16  ;;  %v1170_v39 = vadd.f32 %v1169_v36, %v11917_v16  ;;  %v1111_v9 = vpop.f32.mrb[35].mxu0  ;;  %1513 = vrot.lane.b32.xlu0 %v11928_v32, %s11219_s22  ;;  %v1171_v61 = vpop.f32.mrb[11].mxu1 }
 0x2f7   : > { %v1112_v54 = vadd.f32 %v1111_v9, %v11922_v47  ;;  %v1172_v30 = vadd.f32 %v1171_v61, %v11922_v47  ;;  %1483 = vrot.lane.b32.xlu1 %v12036_v23, %s11218_s18 }
 0x2f8   : > { %v12062_v44 = vpack.c.bf16 %v1110_v24, %v1106_v1  ;;  %v12064_v40 = vpack.c.bf16 %v1170_v39, %v1166_v63 }
 0x2f9   : > { %v12066_v50 = vpack.c.bf16 %v1112_v54, %v1108_v42  ;;  %v12068_v27 = vpack.c.bf16 %v1172_v30, %v1168_v5 }
 0x2fa   : > { %17130 = vst [vmem:[#allocation20_spill] sm:$0xff] %v12064_v40  ;;  %1529 = vrot.lane.b32.xlu0 %v11928_v32, %s11218_s18 }
 0x2fb   : > { %v1115_v15 = vpop.f32.mrb[36].mxu0  ;;  %1499 = vrot.lane.b32.xlu1 %v12036_v23, %s11220_s25  ;;  %v1175_v51 = vpop.f32.mrb[12].mxu1  ;;  %8973 = vmatmul.mubr.msk.bf16.vlgmr.msra.gmra.mrb[48].mxu1 %vm1828_vm0, %v11942_v13 }
 0x2fc   : > { %v1117_v41 = vpop.f32.mrb[37].mxu0  ;;  %v1177_v58 = vpop.f32.mrb[13].mxu1  ;;  %8976 = vmatprep.mubr.msk.bf16.mxu1 %vm1828_vm0, %v11954_v25  ;;  %v1116_v57 = vadd.f32 %v1115_v15, %v11917_v16  ;;  %v1176_v52 = vadd.f32 %v1175_v51, %v11917_v16 }
 0x2fd   : > { %v1119_v18 = vpop.f32.mrb[38].mxu0  ;;  %v1179_v6 = vpop.f32.mrb[14].mxu1  ;;  %v1118_v28 = vadd.f32 %v1117_v41, %v11922_v47  ;;  %v1178_v14 = vadd.f32 %v1177_v58, %v11922_v47 }
 0x2fe   : > { %v1120_v20 = vadd.f32 %v1119_v18, %v11917_v16  ;;  %v1180_v17 = vadd.f32 %v1179_v6, %v11917_v16  ;;  %v1121_v45 = vpop.f32.mrb[39].mxu0  ;;  %1545 = vrot.lane.b32.xlu0 %v11928_v32, %s11220_s25  ;;  %v1181_v59 = vpop.f32.mrb[15].mxu1  ;;  %v12104_v32 = vrot.slane %v11911_v0, %v16809_v35 }
 0x2ff   : > { %v1122_v22 = vadd.f32 %v1121_v45, %v11922_v47  ;;  %v1182_v8 = vadd.f32 %v1181_v59, %v11922_v47  ;;  %1515 = vrot.lane.b32.xlu1 %v11944_v43, %s11219_s22 }
 0x300   : > { %v12091_v49 = vpack.c.bf16 %v1120_v20, %v1116_v57  ;;  %v12093_v10 = vpack.c.bf16 %v1180_v17, %v1176_v52 }
 0x301   : > { %v12095_v2 = vpack.c.bf16 %v1122_v22, %v1118_v28  ;;  %v12097_v33 = vpack.c.bf16 %v1182_v8, %v1178_v14 }
 0x302   : > { %17131 = vst [vmem:[#allocation21_spill] sm:$0xff] %v12093_v10  ;;  %1577 = vrot.lane.b32.xlu0 %v12012_v26, %s11219_s22 }
 0x303   : > { %v1125_v62 = vpop.f32.mrb[40].mxu0  ;;  %1547 = vrot.lane.b32.xlu1 %v11944_v43, %s11220_s25  ;;  %v8926_v36 = vpop.f32.mrb[16].mxu1  ;;  %8977 = vmatmul.mubr.msk.bf16.gmra.mrb[52].mxu1 %vm1828_vm0, %v11966_v56 }
 0x304   : > { %v1127_v1 = vpop.f32.mrb[41].mxu0  ;;  %v1218_v63 = vpop.f32.mrb[17].mxu1  ;;  %8980 = vmatprep.mubr.msk.bf16.mxu1 %vm1828_vm0, %v11978_v11  ;;  %v1126_v9 = vadd.f32 %v1125_v62, %v11917_v16  ;;  %v1227_v0 = vadd.f32 %v8926_v36, %v12104_v32 }
 0x305   : > { %v1129_v24 = vpop.f32.mrb[42].mxu0  ;;  %v8927_v39 = vpop.f32.mrb[18].mxu1  ;;  %v1128_v30 = vadd.f32 %v1127_v1, %v11922_v47  ;;  %v1219_v15 = vadd.f32 %v1218_v63, %v12104_v32 }
 0x306   : > { %v1130_v61 = vadd.f32 %v1129_v24, %v11917_v16  ;;  %v1230_v42 = vadd.f32 %v8927_v39, %v12104_v32  ;;  %v1131_v5 = vpop.f32.mrb[43].mxu0  ;;  %1593 = vrot.lane.b32.xlu0 %v12012_v26, %s11218_s18  ;;  %v1221_v54 = vpop.f32.mrb[19].mxu1 }
 0x307   : > { %v1132_v51 = vadd.f32 %v1131_v5, %v11922_v47  ;;  %v1222_v41 = vadd.f32 %v1221_v54, %v12104_v32  ;;  %1595 = vrot.lane.b32.xlu1 %v12040_v53, %s11218_s18 }
 0x308   : > { %v12124_v58 = vpack.c.bf16 %v1130_v61, %v1126_v9  ;;  %v12126_v18 = vpack.c.bf16 %v1230_v42, %v1227_v0 }
 0x309   : > { %v12128_v6 = vpack.c.bf16 %v1132_v51, %v1128_v30  ;;  %v12130_v57 = vpack.c.bf16 %v1222_v41, %v1219_v15 }
 0x30a   : > { %17132 = vst [vmem:[#allocation22_spill] sm:$0xff] %v12126_v18  ;;  %1435 = vrot.lane.b32.xlu0 %v11942_v13, %s11220_s25 }
 0x30b   : > { %17133 = vst [vmem:[#allocation23_spill] sm:$0xff] %v12130_v57  ;;  %v1135_v52 = vpop.f32.mrb[44].mxu0  ;;  %1611 = vrot.lane.b32.xlu1 %v12040_v53, %s11220_s25  ;;  %v8930_v20 = vpop.f32.mrb[20].mxu1  ;;  %8981 = vmatmul.mubr.msk.bf16.gmra.mrb[56].mxu1 %vm1828_vm0, %v11990_v3 }
 0x30c   : > { %v1137_v17 = vpop.f32.mrb[45].mxu0  ;;  %v1234_v45 = vpop.f32.mrb[21].mxu1  ;;  %8984 = vmatprep.mubr.msk.bf16.mxu1 %vm1828_vm0, %v12006_v38  ;;  %v1136_v14 = vadd.f32 %v1135_v52, %v11917_v16  ;;  %v1243_v22 = vadd.f32 %v8930_v20, %v12104_v32 }
 0x30d   : > { %v1139_v59 = vpop.f32.mrb[46].mxu0  ;;  %v8931_v28 = vpop.f32.mrb[22].mxu1  ;;  %v1138_v1 = vadd.f32 %v1137_v17, %v11922_v47  ;;  %v1235_v63 = vadd.f32 %v1234_v45, %v12104_v32 }
 0x30e   : > { %v1140_v13 = vadd.f32 %v1139_v59, %v11917_v16  ;;  %v1246_v8 = vadd.f32 %v8931_v28, %v12104_v32  ;;  %v1141_v62 = vpop.f32.mrb[47].mxu0  ;;  %1467 = vrot.lane.b32.xlu0 %v12036_v23, %s11219_s22  ;;  %v1237_v36 = vpop.f32.mrb[23].mxu1  ;;  %v16901_v23 = vmov -1e+30  }
 0x30f   : > { %v1142_v24 = vadd.f32 %v1141_v62, %v11922_v47  ;;  %v1238_v39 = vadd.f32 %v1237_v36, %v12104_v32  ;;  %1405 = vrot.lane.b32.xlu1 %v11954_v25, %s11219_s22 }
 0x310   : > { %v12152_v9 = vpack.c.bf16 %v1140_v13, %v1136_v14  ;;  %v12154_v16 = vpack.c.bf16 %v1246_v8, %v1243_v22 }
 0x311   : > { %v12156_v0 = vpack.c.bf16 %v1142_v24, %v1138_v1  ;;  %v12158_v61 = vpack.c.bf16 %v1238_v39, %v1235_v63 }
 0x312   : > { %17134 = vst [vmem:[#allocation24_spill] sm:$0xff] %v12154_v16  ;;  %1531 = vrot.lane.b32.xlu0 %v11944_v43, %s11218_s18 }
 0x313   : > { %17135 = vst [vmem:[#allocation25_spill] sm:$0xff] %v12158_v61  ;;  %1421 = vrot.lane.b32.xlu1 %v11954_v25, %s11218_s18  ;;  %v8934_v47 = vpop.f32.mrb[24].mxu1  ;;  %8985 = vmatmul.mubr.msk.bf16.gmra.mrb[60].mxu1 %vm1828_vm0, %v12034_v4 }
 0x314   : > { %v1250_v42 = vpop.f32.mrb[25].mxu1  ;;  %v1259_v30 = vadd.f32 %v8934_v47, %v12104_v32 }
 0x315   : > { %v1251_v5 = vadd.f32 %v1250_v42, %v12104_v32  ;;  %v8935_v54 = vpop.f32.mrb[26].mxu1 }
 0x316   : > { %v1262_v15 = vadd.f32 %v8935_v54, %v12104_v32  ;;  %1579 = vrot.lane.b32.xlu0 %v12040_v53, %s11219_s22  ;;  %v1253_v51 = vpop.f32.mrb[27].mxu1 }
 0x317   : > { %v1254_v43 = vadd.f32 %v1253_v51, %v12104_v32  ;;  %1437 = vrot.lane.b32.xlu1 %v11954_v25, %s11220_s25 }
 0x318   : > { %v12174_v41 = vpack.c.bf16 %v1262_v15, %v1259_v30 }
 0x319   : > { %v12176_v52 = vpack.c.bf16 %v1254_v43, %v1251_v5 }
 0x31a   : > { %17136 = vst [vmem:[#allocation26_spill] sm:$0xff] %v12174_v41  ;;  %1469 = vrot.lane.b32.xlu0 %v12064_v40, %s11219_s22 }
 0x31b   : > { %17137 = vst [vmem:[#allocation27_spill] sm:$0xff] %v12176_v52  ;;  %1517 = vrot.lane.b32.xlu1 %v11956_v46, %s11219_s22  ;;  %v8938_v20 = vpop.f32.mrb[28].mxu1 }
 0x31c   : > { %v1275_v17 = vadd.f32 %v8938_v20, %v12104_v32  ;;  %v1266_v45 = vpop.f32.mrb[29].mxu1 }
 0x31d   : > { %v1267_v59 = vadd.f32 %v1266_v45, %v12104_v32  ;;  %v8939_v28 = vpop.f32.mrb[30].mxu1 }
 0x31e   : > { %v1278_v14 = vadd.f32 %v8939_v28, %v12104_v32  ;;  %1485 = vrot.lane.b32.xlu0 %v12064_v40, %s11218_s18  ;;  %v1269_v25 = vpop.f32.mrb[31].mxu1 }
 0x31f   : > { %v1270_v22 = vadd.f32 %v1269_v25, %v12104_v32  ;;  %1549 = vrot.lane.b32.xlu1 %v11956_v46, %s11220_s25 }
 0x320   : > { %v12190_v13 = vpack.c.bf16 %v1278_v14, %v1275_v17 }
 0x321   : > { %v12192_v8 = vpack.c.bf16 %v1270_v22, %v1267_v59 }
 0x322   : > { %17138 = vst [vmem:[#allocation28_spill] sm:$0xff] %v12190_v13  ;;  %1501 = vrot.lane.b32.xlu0 %v12064_v40, %s11220_s25 }
 0x323   : > { %17139 = vst [vmem:[#allocation29_spill] sm:$0xff] %v12192_v8  ;;  %1581 = vrot.lane.b32.xlu1 %v12068_v27, %s11219_s22  ;;  %v8942_v62 = vpop.f32.mrb[32].mxu1 }
 0x324   : > { %v1291_v36 = vadd.f32 %v8942_v62, %v12104_v32  ;;  %v1282_v1 = vpop.f32.mrb[33].mxu1 }
 0x325   : > { %v1283_v63 = vadd.f32 %v1282_v1, %v12104_v32  ;;  %v8943_v24 = vpop.f32.mrb[34].mxu1 }
 0x326   : > { %v1294_v39 = vadd.f32 %v8943_v24, %v12104_v32  ;;  %1533 = vrot.lane.b32.xlu0 %v11956_v46, %s11218_s18  ;;  %v1285_v47 = vpop.f32.mrb[35].mxu1 }
 0x327   : > { %v1286_v42 = vadd.f32 %v1285_v47, %v12104_v32  ;;  %1597 = vrot.lane.b32.xlu1 %v12068_v27, %s11218_s18 }
 0x328   : > { %v12206_v5 = vpack.c.bf16 %v1294_v39, %v1291_v36 }
 0x329   : > { %v12208_v54 = vpack.c.bf16 %v1286_v42, %v1283_v63 }
 0x32a   : > { %17140 = vst [vmem:[#allocation30_spill] sm:$0xff] %v12206_v5  ;;  %1423 = vrot.lane.b32.xlu0 %v11966_v56, %s11218_s18 }
 0x32b   : > { %17141 = vst [vmem:[#allocation31_spill] sm:$0xff] %v12208_v54  ;;  %1613 = vrot.lane.b32.xlu1 %v12068_v27, %s11220_s25  ;;  %v8946_v30 = vpop.f32.mrb[36].mxu1 }
 0x32c   : > { %v1307_v15 = vadd.f32 %v8946_v30, %v12104_v32  ;;  %v1402_v46 = vpop.permute.xlu1 %1401  ;;  %v1298_v51 = vpop.f32.mrb[37].mxu1 }
 0x32d   : > { %v1299_v43 = vadd.f32 %v1298_v51, %v12104_v32  ;;  %v1418_v20 = vpop.permute.xlu0 %1417  ;;  %v8947_v17 = vpop.f32.mrb[38].mxu1  ;;  %9004 = vmatprep.mubr.msk.bf16.mxu0 %vm1828_vm0, %v1402_v46 }
 0x32e   : > { %v1310_v45 = vadd.f32 %v8947_v17, %v12104_v32  ;;  %9036 = vmatprep.mubr.msk.bf16.mxu1 %vm1828_vm0, %v1418_v20  ;;  %v1301_v59 = vpop.f32.mrb[39].mxu1  ;;  %1471 = vrot.lane.b32.xlu0 %v12093_v10, %s11219_s22 }
 0x32f   : > { %v1302_v28 = vadd.f32 %v1301_v59, %v12104_v32  ;;  %1407 = vrot.lane.b32.xlu1 %v11966_v56, %s11219_s22 }
 0x330   : > { %v12224_v14 = vpack.c.bf16 %v1310_v45, %v1307_v15 }
 0x331   : > { %v12226_v25 = vpack.c.bf16 %v1302_v28, %v1299_v43 }
 0x332   : > { %17142 = vst [vmem:[#allocation32_spill] sm:$0xff] %v12224_v14  ;;  %1535 = vrot.lane.b32.xlu0 %v11968_v12, %s11218_s18 }
 0x333   : > { %17143 = vst [vmem:[#allocation33_spill] sm:$0xff] %v12226_v25  ;;  %1439 = vrot.lane.b32.xlu1 %v11966_v56, %s11220_s25  ;;  %v8950_v22 = vpop.f32.mrb[40].mxu1 }
 0x334   : > { %v1323_v62 = vadd.f32 %v8950_v22, %v12104_v32  ;;  %v1314_v36 = vpop.f32.mrb[41].mxu1 }
 0x335   : > { %v1315_v1 = vadd.f32 %v1314_v36, %v12104_v32  ;;  %v8951_v63 = vpop.f32.mrb[42].mxu1 }
 0x336   : > { %v1326_v24 = vadd.f32 %v8951_v63, %v12104_v32  ;;  %v1317_v39 = vpop.f32.mrb[43].mxu1  ;;  %1583 = vrot.lane.b32.xlu0 %v12097_v33, %s11219_s22 }
 0x337   : > { %v1318_v47 = vadd.f32 %v1317_v39, %v12104_v32  ;;  %1487 = vrot.lane.b32.xlu1 %v12093_v10, %s11218_s18 }
 0x338   : > { %v12240_v42 = vpack.c.bf16 %v1326_v24, %v1323_v62 }
 0x339   : > { %v12242_v56 = vpack.c.bf16 %v1318_v47, %v1315_v1 }
 0x33a   : > { %17144 = vst [vmem:[#allocation34_spill] sm:$0xff] %v12240_v42  ;;  %1425 = vrot.lane.b32.xlu0 %v11978_v11, %s11218_s18 }
 0x33b   : > { %17145 = vst [vmem:[#allocation35_spill] sm:$0xff] %v12242_v56  ;;  %v8954_v30 = vpop.f32.mrb[44].mxu1  ;;  %1503 = vrot.lane.b32.xlu1 %v12093_v10, %s11220_s25 }
 0x33c   : > { %v1339_v15 = vadd.f32 %v8954_v30, %v12104_v32  ;;  %v1330_v46 = vpop.f32.mrb[45].mxu1 }
 0x33d   : > { %v1331_v51 = vadd.f32 %v1330_v46, %v12104_v32  ;;  %v8955_v43 = vpop.f32.mrb[46].mxu1 }
 0x33e   : > { %v1342_v20 = vadd.f32 %v8955_v43, %v12104_v32  ;;  %v1333_v17 = vpop.f32.mrb[47].mxu1  ;;  %1441 = vrot.lane.b32.xlu0 %v11978_v11, %s11220_s25 }
 0x33f   : > { %v1334_v45 = vadd.f32 %v1333_v17, %v12104_v32  ;;  %1519 = vrot.lane.b32.xlu1 %v11968_v12, %s11219_s22 }
 0x340   : > { %v12256_v59 = vpack.c.bf16 %v1342_v20, %v1339_v15 }
 0x341   : > { %v12258_v28 = vpack.c.bf16 %v1334_v45, %v1331_v51 }
 0x342   : > { %17146 = vst [vmem:[#allocation36_spill] sm:$0xff] %v12256_v59  ;;  %1651 = vrot.lane.b32.xlu0 %v12126_v18, %s11218_s18 }
 0x343   : > { %17147 = vst [vmem:[#allocation37_spill] sm:$0xff] %v12258_v28  ;;  %1551 = vrot.lane.b32.xlu1 %v11968_v12, %s11220_s25  ;;  %v12284_v12 = vpop.permute.xlu0 %1433 }
 0x346   : > { %1675 = vrot.lane.b32.xlu0 %v12126_v18, %s11220_s25 }
 0x347   : > { %1599 = vrot.lane.b32.xlu1 %v12097_v33, %s11218_s18 }
 0x34a   : > { %1521 = vrot.lane.b32.xlu0 %v11980_v29, %s11219_s22 }
 0x34b   : > { %1615 = vrot.lane.b32.xlu1 %v12097_v33, %s11220_s25 }
 0x34e   : > { %1537 = vrot.lane.b32.xlu0 %v11980_v29, %s11218_s18 }
 0x34f   : > { %1409 = vrot.lane.b32.xlu1 %v11978_v11, %s11219_s22 }
 0x352   : > { %1625 = vrot.lane.b32.xlu0 %v12130_v57, %s11219_s22 }
 0x353   : > { %1627 = vrot.lane.b32.xlu1 %v12126_v18, %s11219_s22 }
 0x356   : > { %1649 = vrot.lane.b32.xlu0 %v12130_v57, %s11218_s18 }
 0x357   : > { %1553 = vrot.lane.b32.xlu1 %v11980_v29, %s11220_s25 }
 0x35a   : > { %1443 = vrot.lane.b32.xlu0 %v11990_v3, %s11220_s25 }
 0x35b   : > { %1673 = vrot.lane.b32.xlu1 %v12130_v57, %s11220_s25 }
 0x35c   : > { %v12290_v11 = vpop.permute.xlu0 %1465 }
 0x35d   : > { %17148 = vst [vmem:[#allocation38_spill] sm:$0xff] %v12290_v11  ;;  %v12292_v32 = vpop.permute.xlu1 %1609 }
 0x35e   : > { %17149 = vst [vmem:[#allocation39_spill] sm:$0xff] %v12292_v32  ;;  %1631 = vrot.lane.b32.xlu0 %v12154_v16, %s11219_s22 }
 0x35f   : > { %1411 = vrot.lane.b32.xlu1 %v11990_v3, %s11219_s22 }
 0x360   : > { %v12298_v22 = vpop.permute.xlu0 %1481 }
 0x361   : > { %17150 = vst [vmem:[#allocation40_spill] sm:$0xff] %v12298_v22  ;;  %v12300_v29 = vpop.permute.xlu1 %1403 }
 0x362   : > { %1655 = vrot.lane.b32.xlu0 %v12154_v16, %s11218_s18 }
 0x363   : > { %1427 = vrot.lane.b32.xlu1 %v11990_v3, %s11218_s18 }
 0x364   : > { %v12306_v62 = vpop.permute.xlu0 %1497 }
 0x365   : > { %17151 = vst [vmem:[#allocation41_spill] sm:$0xff] %v12306_v62  ;;  %v12308_v36 = vpop.permute.xlu1 %1419 }
 0x366   : > { %1539 = vrot.lane.b32.xlu0 %v11992_v31, %s11218_s18 }
 0x367   : > { %1679 = vrot.lane.b32.xlu1 %v12154_v16, %s11220_s25 }
 0x368   : > { %v1514_v1 = vpop.permute.xlu0 %1513 }
 0x369   : > { %v12314_v63 = vpop.permute.xlu1 %1483  ;;  %9540 = vmatprep.subr.msk.bf16.mxu0 %vm1828_vm0, %v1514_v1  ;;  %v1999_v24 = vsel %vm1828_vm0, %v1514_v1, 0 }
 0x36a   : > { %17152 = vst [vmem:[#allocation42_spill] sm:$0xff] %v12314_v63  ;;  %1555 = vrot.lane.b32.xlu0 %v11992_v31, %s11220_s25  ;;  %8989 = vmatpush3.bf16.xpose.msra.mxu0 %v1999_v24 }
 0x36b   : > { %1523 = vrot.lane.b32.xlu1 %v11992_v31, %s11219_s22 }
 0x36c   : > { %v1530_v3 = vpop.permute.xlu0 %1529 }
 0x36d   : > { %v12322_v39 = vpop.permute.xlu1 %1499  ;;  %9548 = vmatprep.subr.msk.bf16.mxu1 %vm1828_vm0, %v1530_v3  ;;  %v2144_v47 = vsel %vm1828_vm0, %v1530_v3, 0 }
 0x36e   : > { %17153 = vst [vmem:[#allocation43_spill] sm:$0xff] %v12322_v39  ;;  %1629 = vrot.lane.b32.xlu0 %v12158_v61, %s11219_s22  ;;  %9021 = vmatpush3.bf16.xpose.msra.mxu1 %v2144_v47 }
 0x36f   : > { %1677 = vrot.lane.b32.xlu1 %v12158_v61, %s11220_s25 }
 0x370   : > { %v12330_v30 = vpop.permute.xlu0 %1545 }
 0x371   : > { %v1516_v15 = vpop.permute.xlu1 %1515 }
 0x372   : > { %1653 = vrot.lane.b32.xlu0 %v12158_v61, %s11218_s18  ;;  %9541 = vmatprep.subr.msk.bf16.mxu0 %vm1828_vm0, %v1516_v15  ;;  %v2002_v31 = vsel %vm1828_vm0, %v1516_v15, 0 }
 0x373   : > { %1413 = vrot.lane.b32.xlu1 %v12006_v38, %s11219_s22  ;;  %8991 = vmatpush3.bf16.xpose.msra.mxu0 %v2002_v31 }
 0x374   : > { %v12338_v46 = vpop.permute.xlu0 %1577 }
 0x375   : > { %17154 = vst [vmem:[#allocation44_spill] sm:$0xff] %v12338_v46  ;;  %v12340_v51 = vpop.permute.xlu1 %1547 }
 0x376   : > { %1659 = vrot.lane.b32.xlu0 %v12174_v41, %s11218_s18 }
 0x377   : > { %1429 = vrot.lane.b32.xlu1 %v12006_v38, %s11218_s18 }
 0x378   : > { %v12346_v43 = vpop.permute.xlu0 %1593 }
 0x379   : > { %17155 = vst [vmem:[#allocation45_spill] sm:$0xff] %v12346_v43  ;;  %v12348_v20 = vpop.permute.xlu1 %1595 }
 0x37a   : > { %17156 = vst [vmem:[#allocation46_spill] sm:$0xff] %v12348_v20  ;;  %1525 = vrot.lane.b32.xlu0 %v12010_v7, %s11219_s22 }
 0x37b   : > { %1445 = vrot.lane.b32.xlu1 %v12006_v38, %s11220_s25 }
 0x37c   : > { %v12354_v17 = vpop.permute.xlu0 %1435 }
 0x37d   : > { %v12356_v45 = vpop.permute.xlu1 %1611 }
 0x37e   : > { %17157 = vst [vmem:[#allocation47_spill] sm:$0xff] %v12356_v45  ;;  %1541 = vrot.lane.b32.xlu0 %v12010_v7, %s11218_s18 }
 0x37f   : > { %1635 = vrot.lane.b32.xlu1 %v12174_v41, %s11219_s22 }
 0x380   : > { %v12362_v1 = vpop.permute.xlu0 %1467 }
 0x381   : > { %17158 = vst [vmem:[#allocation48_spill] sm:$0xff] %v12362_v1  ;;  %v12364_v24 = vpop.permute.xlu1 %1405 }
 0x382   : > { %1557 = vrot.lane.b32.xlu0 %v12010_v7, %s11220_s25 }
 0x383   : > { %1683 = vrot.lane.b32.xlu1 %v12174_v41, %s11220_s25 }
 0x384   : > { %v1532_v38 = vpop.permute.xlu0 %1531 }
 0x385   : > { %v12370_v3 = vpop.permute.xlu1 %1421  ;;  %9549 = vmatprep.subr.msk.bf16.mxu1 %vm1828_vm0, %v1532_v38  ;;  %v2147_v47 = vsel %vm1828_vm0, %v1532_v38, 0 }
 0x386   : > { %1657 = vrot.lane.b32.xlu0 %v12176_v52, %s11218_s18  ;;  %9023 = vmatpush3.bf16.xpose.msra.mxu1 %v2147_v47 }
 0x387   : > { %1633 = vrot.lane.b32.xlu1 %v12176_v52, %s11219_s22 }
 0x388   : > { %v12378_v15 = vpop.permute.xlu0 %1579 }
 0x389   : > { %17159 = vst [vmem:[#allocation49_spill] sm:$0xff] %v12378_v15  ;;  %v12380_v7 = vpop.permute.xlu1 %1437 }
 0x38a   : > { %1681 = vrot.lane.b32.xlu0 %v12176_v52, %s11220_s25 }
 0x38b   : > { %1415 = vrot.lane.b32.xlu1 %v12034_v4, %s11219_s22 }
 0x38c   : > { %v12386_v31 = vpop.permute.xlu0 %1469 }
 0x38d   : > { %17160 = vst [vmem:[#allocation50_spill] sm:$0xff] %v12386_v31  ;;  %v1518_v38 = vpop.permute.xlu1 %1517 }
 0x38e   : > { %1431 = vrot.lane.b32.xlu0 %v12034_v4, %s11218_s18  ;;  %9542 = vmatprep.subr.msk.bf16.mxu0 %vm1828_vm0, %v1518_v38  ;;  %v2005_v47 = vsel %vm1828_vm0, %v1518_v38, 0 }
 0x38f   : > { %1447 = vrot.lane.b32.xlu1 %v12034_v4, %s11220_s25  ;;  %8993 = vmatpush3.bf16.xpose.msra.mxu0 %v2005_v47 }
 0x390   : > { %v12394_v34 = vpop.permute.xlu0 %1485 }
 0x391   : > { %17161 = vst [vmem:[#allocation51_spill] sm:$0xff] %v12394_v34  ;;  %v12396_v35 = vpop.permute.xlu1 %1549 }
 0x392   : > { %1687 = vrot.lane.b32.xlu0 %v12190_v13, %s11220_s25 }
 0x393   : > { %1639 = vrot.lane.b32.xlu1 %v12190_v13, %s11219_s22 }
 0x394   : > { %v12402_v21 = vpop.permute.xlu0 %1501 }
 0x395   : > { %17162 = vst [vmem:[#allocation52_spill] sm:$0xff] %v12402_v21  ;;  %v12404_v60 = vpop.permute.xlu1 %1581 }
 0x396   : > { %17163 = vst [vmem:[#allocation53_spill] sm:$0xff] %v12404_v60  ;;  %1543 = vrot.lane.b32.xlu0 %v12038_v37, %s11218_s18 }
 0x397   : > { %1663 = vrot.lane.b32.xlu1 %v12190_v13, %s11218_s18 }
 0x398   : > { %v1534_v4 = vpop.permute.xlu0 %1533 }
 0x399   : > { %v12410_v38 = vpop.permute.xlu1 %1597  ;;  %9550 = vmatprep.subr.msk.bf16.mxu1 %vm1828_vm0, %v1534_v4  ;;  %v2150_v47 = vsel %vm1828_vm0, %v1534_v4, 0 }
 0x39a   : > { %17164 = vst [vmem:[#allocation54_spill] sm:$0xff] %v12410_v38  ;;  %1559 = vrot.lane.b32.xlu0 %v12038_v37, %s11220_s25  ;;  %9025 = vmatpush3.bf16.xpose.msra.mxu1 %v2150_v47 }
 0x39b   : > { %1527 = vrot.lane.b32.xlu1 %v12038_v37, %s11219_s22 }
 0x39c   : > { %v12418_v19 = vpop.permute.xlu0 %1423 }
 0x39d   : > { %v12420_v59 = vpop.permute.xlu1 %1613 }
 0x39e   : > { %17165 = vst [vmem:[#allocation55_spill] sm:$0xff] %v12420_v59  ;;  %1637 = vrot.lane.b32.xlu0 %v12192_v8, %s11219_s22 }
 0x39f   : > { %1457 = vrot.lane.b32.xlu1 %v12062_v44, %s11219_s22 }
 0x3a0   : > { %v12426_v28 = vpop.permute.xlu0 %1471 }
 0x3a1   : > { %17166 = vst [vmem:[#allocation56_spill] sm:$0xff] %v12426_v28  ;;  %v12428_v4 = vpop.permute.xlu1 %1407 }
 0x3a2   : > { %1661 = vrot.lane.b32.xlu0 %v12192_v8, %s11218_s18 }
 0x3a3   : > { %1569 = vrot.lane.b32.xlu1 %v12066_v50, %s11219_s22 }
 0x3a4   : > { %v1536_v37 = vpop.permute.xlu0 %1535 }
 0x3a5   : > { %v12434_v47 = vpop.permute.xlu1 %1439  ;;  %9551 = vmatprep.subr.msk.bf16.mxu1 %vm1828_vm0, %v1536_v37  ;;  %v2153_v42 = vsel %vm1828_vm0, %v1536_v37, 0 }
 0x3a6   : > { %1685 = vrot.lane.b32.xlu0 %v12192_v8, %s11220_s25  ;;  %9027 = vmatpush3.bf16.xpose.msra.mxu1 %v2153_v42 }
 0x3a7   : > { %1705 = vrot.lane.b32.xlu1 %v12208_v54, %s11219_s22 }
 0x3a8   : > { %v12442_v56 = vpop.permute.xlu0 %1583 }
 0x3a9   : > { %17167 = vst [vmem:[#allocation57_spill] sm:$0xff] %v12442_v56  ;;  %v12444_v21 = vpop.permute.xlu1 %1487 }
 0x3aa   : > { %17168 = vst [vmem:[#allocation58_spill] sm:$0xff] %v12444_v21  ;;  %1473 = vrot.lane.b32.xlu0 %v12062_v44, %s11218_s18 }
 0x3ab   : > { %1459 = vrot.lane.b32.xlu1 %v12091_v49, %s11219_s22 }
 0x3ac   : > { %v12450_v39 = vpop.permute.xlu0 %1425 }
 0x3ad   : > { %v12452_v37 = vpop.permute.xlu1 %1503 }
 0x3ae   : > { %17169 = vst [vmem:[#allocation59_spill] sm:$0xff] %v12452_v37  ;;  %1489 = vrot.lane.b32.xlu0 %v12062_v44, %s11220_s25 }
 0x3af   : > { %1475 = vrot.lane.b32.xlu1 %v12091_v49, %s11218_s18 }
 0x3b0   : > { %v12458_v42 = vpop.permute.xlu0 %1441 }
 0x3b1   : > { %17170 = vst [vmem:[#allocation60_spill] sm:$0xff] %v12458_v42  ;;  %v1520_v54 = vpop.permute.xlu1 %1519 }
 0x3b2   : > { %1707 = vrot.lane.b32.xlu0 %v12206_v5, %s11219_s22  ;;  %9543 = vmatprep.subr.msk.bf16.mxu0 %vm1828_vm0, %v1520_v54  ;;  %v2008_v62 = vsel %vm1828_vm0, %v1520_v54, 0 }
 0x3b3   : > { %1491 = vrot.lane.b32.xlu1 %v12091_v49, %s11220_s25  ;;  %8995 = vmatpush3.bf16.xpose.msra.mxu0 %v2008_v62 }
 0x3b4   : > { %v12466_v37 = vpop.permute.xlu0 %1651 }
 0x3b5   : > { %17171 = vst [vmem:[#allocation61_spill] sm:$0xff] %v12466_v37  ;;  %v12468_v59 = vpop.permute.xlu1 %1551 }
 0x3b6   : > { %1585 = vrot.lane.b32.xlu0 %v12066_v50, %s11218_s18 }
 0x3b7   : > { %1711 = vrot.lane.b32.xlu1 %v12224_v14, %s11219_s22 }
 0x3b8   : > { %v12474_v45 = vpop.permute.xlu0 %1675 }
 0x3b9   : > { %17172 = vst [vmem:[#allocation62_spill] sm:$0xff] %v12474_v45  ;;  %v12476_v5 = vpop.permute.xlu1 %1599 }
 0x3ba   : > { %17173 = vst [vmem:[#allocation63_spill] sm:$0xff] %v12476_v5  ;;  %1601 = vrot.lane.b32.xlu0 %v12066_v50, %s11220_s25 }
 0x3bb   : > { %1571 = vrot.lane.b32.xlu1 %v12095_v2, %s11219_s22 }
 0x3bc   : > { %v1522_v54 = vpop.permute.xlu0 %1521 }
 0x3bd   : > { %v12482_v62 = vpop.permute.xlu1 %1615  ;;  %9544 = vmatprep.subr.msk.bf16.mxu0 %vm1828_vm0, %v1522_v54  ;;  %v2011_v37 = vsel %vm1828_vm0, %v1522_v54, 0 }
 0x3be   : > { %17174 = vst [vmem:[#allocation64_spill] sm:$0xff] %v12482_v62  ;;  %1587 = vrot.lane.b32.xlu0 %v12095_v2, %s11218_s18  ;;  %8997 = vmatpush3.bf16.xpose.msra.mxu0 %v2011_v37 }
 0x3bf   : > { %1603 = vrot.lane.b32.xlu1 %v12095_v2, %s11220_s25 }
 0x3c0   : > { %v1538_v14 = vpop.permute.xlu0 %1537 }
 0x3c1   : > { %v12490_v45 = vpop.permute.xlu1 %1409  ;;  %9552 = vmatprep.subr.msk.bf16.mxu1 %vm1828_vm0, %v1538_v14  ;;  %v2156_v32 = vsel %vm1828_vm0, %v1538_v14, 0 }
 0x3c2   : > { %1709 = vrot.lane.b32.xlu0 %v12226_v25, %s11219_s22  ;;  %9029 = vmatpush3.bf16.xpose.msra.mxu1 %v2156_v32 }
 0x3c3   : > { %1605 = vrot.lane.b32.xlu1 %v12128_v6, %s11220_s25 }
 0x3c4   : > { %v12498_v54 = vpop.permute.xlu0 %1625 }
 0x3c5   : > { %17175 = vst [vmem:[#allocation65_spill] sm:$0xff] %v12498_v54  ;;  %v12500_v37 = vpop.permute.xlu1 %1627 }
 0x3c6   : > { %17176 = vst [vmem:[#allocation66_spill] sm:$0xff] %v12500_v37  ;;  %1461 = vrot.lane.b32.xlu0 %v12124_v58, %s11219_s22 }
 0x3c7   : > { %1479 = vrot.lane.b32.xlu1 %v12152_v9, %s11218_s18 }
 0x3c8   : > { %v12506_v62 = vpop.permute.xlu0 %1649 }
 0x3c9   : > { %17177 = vst [vmem:[#allocation67_spill] sm:$0xff] %v12506_v62  ;;  %v12508_v14 = vpop.permute.xlu1 %1553 }
 0x3ca   : > { %1477 = vrot.lane.b32.xlu0 %v12124_v58, %s11218_s18 }
 0x3cb   : > { %1495 = vrot.lane.b32.xlu1 %v12152_v9, %s11220_s25 }
 0x3cc   : > { %v12514_v32 = vpop.permute.xlu0 %1443 }
 0x3cd   : > { %17178 = vst [vmem:[#allocation68_spill] sm:$0xff] %v12514_v32  ;;  %v12516_v25 = vpop.permute.xlu1 %1673  ;;  %v1780_v32 = vadd.s32 16, %v11905_v55 }
 0x3ce   : > { %17179 = vst [vmem:[#allocation69_spill] sm:$0xff] %v12516_v25  ;;  %v12518_v37 = vpop.f32.mrb[48].mxu1  ;;  %1493 = vrot.lane.b32.xlu0 %v12124_v58, %s11220_s25 }
 0x3cf   : > { %v12522_v54 = vpop.f32.mrb[49].mxu1  ;;  %1575 = vrot.lane.b32.xlu1 %v12156_v0, %s11219_s22 }
 0x3d0   : > { %v12526_v62 = vpop.f32.mrb[50].mxu1  ;;  %v12528_v28 = vpop.permute.xlu0 %1631 }
 0x3d1   : > { %17180 = vst [vmem:[#allocation70_spill] sm:$0xff] %v12528_v28  ;;  %v1914_v13 = vpop.f32.mrb[51].mxu1  ;;  %v12530_v21 = vpop.permute.xlu1 %1411 }
 0x3d2   : > { %1573 = vrot.lane.b32.xlu0 %v12128_v6, %s11219_s22 }
 0x3d3   : > { %1607 = vrot.lane.b32.xlu1 %v12156_v0, %s11220_s25 }
 0x3d4   : > { %v12536_v25 = vpop.permute.xlu0 %1655 }
 0x3d5   : > { %17181 = vst [vmem:[#allocation71_spill] sm:$0xff] %v12536_v25  ;;  %v12538_v8 = vpop.permute.xlu1 %1427 }
 0x3d6   : > { %v12540_v31 = vpop.f32.mrb[52].mxu1  ;;  %1589 = vrot.lane.b32.xlu0 %v12128_v6, %s11218_s18 }
 0x3d7   : > { %v12544_v1 = vpop.f32.mrb[53].mxu1 }
 0x3d8   : > { %v8979_v28 = vpop.f32.mrb[54].mxu1  ;;  %v1540_v41 = vpop.permute.xlu0 %1539 }
 0x3d9   : > { %v12546_v34 = vpop.f32.mrb[55].mxu1  ;;  %v12548_v63 = vpop.permute.xlu1 %1679  ;;  %9553 = vmatprep.subr.msk.bf16.mxu1 %vm1828_vm0, %v1540_v41  ;;  %v2159_v52 = vsel %vm1828_vm0, %v1540_v41, 0 }
 0x3da   : > { %17182 = vst [vmem:[#allocation72_spill] sm:$0xff] %v12548_v63  ;;  %1463 = vrot.lane.b32.xlu0 %v12152_v9, %s11219_s22  ;;  %9031 = vmatpush3.bf16.xpose.msra.mxu1 %v2159_v52 }
 0x3dc   : > { %v12554_v25 = vpop.permute.xlu0 %1555 }
 0x3dd   : > { %v1524_v11 = vpop.permute.xlu1 %1523 }
 0x3de   : > { %v12556_v16 = vpop.f32.mrb[56].mxu1  ;;  %1591 = vrot.lane.b32.xlu0 %v12156_v0, %s11218_s18  ;;  %9545 = vmatprep.subr.msk.bf16.mxu0 %vm1828_vm0, %v1524_v11  ;;  %v2014_v63 = vsel %vm1828_vm0, %v1524_v11, 0 }
 0x3df   : > { %v12562_v22 = vpop.f32.mrb[57].mxu1  ;;  %8999 = vmatpush3.bf16.xpose.msra.mxu0 %v2014_v63 }
 0x3e0   : > { %v12564_v41 = vpop.f32.mrb[58].mxu1  ;;  %v12566_v61 = vpop.permute.xlu0 %1629 }
 0x3e1   : > { %17183 = vst [vmem:[#allocation73_spill] sm:$0xff] %v12566_v61  ;;  %v12568_v52 = vpop.f32.mrb[59].mxu1  ;;  %v12570_v18 = vpop.permute.xlu1 %1677  ;;  %v1779_v61 = vadd.s32 8, %v11905_v55 }
 0x3e2   : > { %17184 = vst [vmem:[#allocation74_spill] sm:$0xff] %v12570_v18  ;;  %v17187_v18 = vlaneseq }
 0x3e4   : > { %v12572_v57 = vpop.permute.xlu0 %1653  ;;  %v12590_v46 = vand.u32 127, %v17187_v18 }
 0x3e5   : > { %17185 = vst [vmem:[#allocation75_spill] sm:$0xff] %v12572_v57  ;;  %v12574_v56 = vpop.permute.xlu1 %1413 }
 0x3e6   : > { %v12576_v5 = vpop.f32.mrb[60].mxu1  ;;  %vm1797_vm1 = vcmp.ge.s32.totalorder %v1779_v61, %v12590_v46  ;;  %v1783_v61 = vadd.s32 40, %v11905_v55  ;;  %vm1798_vm3 = vcmp.ge.s32.totalorder %v1780_v32, %v12590_v46  ;;  %vm1796_vm5 = vcmp.ge.s32.totalorder %v11905_v55, %v12590_v46 }
 0x3e7   : > { %v12578_v60 = vpop.f32.mrb[61].mxu1 }
 0x3e8   : > { %v12580_v11 = vpop.f32.mrb[62].mxu1  ;;  %v12582_v38 = vpop.permute.xlu0 %1659  ;;  %vm1801_vm4 = vcmp.ge.s32.totalorder %v1783_v61, %v12590_v46 }
 0x3e9   : > { %17186 = vst [vmem:[#allocation76_spill] sm:$0xff] %v12582_v38  ;;  %v12584_v63 = vpop.f32.mrb[63].mxu1  ;;  %v12586_v15 = vpop.permute.xlu1 %1429  ;;  %v1785_v38 = vadd.s32 56, %v11905_v55  ;;  %v12636_v61 = vsel %vm1801_vm4, 0.0, %v16901_v23 }
 0x3ea   : > { %17198 = vst [vmem:[#allocation87_spill] sm:$0xff] %v12636_v61 }
 0x3eb   : > { %vm1803_vm2 = vcmp.ge.s32.totalorder %v1785_v38, %v12590_v46  ;;  %v12623_v38 = vsel %vm1798_vm3, 0.0, %v16901_v23  ;;  %vm5206_vm3 = vcmask 785408  }
 0x3ec   : > { %v1526_v20 = vpop.permute.xlu0 %1525  ;;  %17194 = vst [vmem:[#allocation83_spill] sm:$0xff] %v12623_v38 }
 0x3ed   : > { %v12592_v57 = vpop.permute.xlu1 %1445  ;;  %9546 = vmatprep.subr.msk.bf16.mxu0 %vm1828_vm0, %v1526_v20  ;;  %v2017_v43 = vsel %vm1828_vm0, %v1526_v20, 0 }
 0x3ee   : > { %17188 = vst [vmem:[#allocation77_spill] sm:$0xff] %v12592_v57  ;;  %9001 = vmatpush3.bf16.xpose.msra.mxu0 %v2017_v43  ;;  %v12604_v57 = vsel %vm1797_vm1, 0.0, %v16901_v23 }
 0x3ef   : > { %17190 = vst [vmem:[#allocation79_spill] sm:$0xff] %v12604_v57  ;;  %v12612_v20 = vadd.f32 %v1914_v13, %v12604_v57  ;;  %v1781_v13 = vadd.s32 24, %v11905_v55  ;;  %v12640_v57 = vadd.f32 %v12518_v37, %v12623_v38 }
 0x3f0   : > { %v1542_v10 = vpop.permute.xlu0 %1541 }
 0x3f1   : > { %v12599_v40 = vpop.permute.xlu1 %1635  ;;  %9554 = vmatprep.subr.msk.bf16.mxu1 %vm1828_vm0, %v1542_v10  ;;  %v2162_v18 = vsel %vm1828_vm0, %v1542_v10, 0  ;;  %17191 = vst [vmem:[#allocation80_spill] sm:$0xff] %v12612_v20  ;;  %v12617_v10 = vsel %vm1803_vm2, 0.0, %v16901_v23  ;;  %17199 = vst [vmem:[#allocation88_spill] sm:$0xff] %v12640_v57  ;;  %vm1799_vm7 = vcmp.ge.s32.totalorder %v1781_v13, %v12590_v46  ;;  %v1793_v13 = vadd.s32 120, %v11905_v55 }
 0x3f2   : > { %17189 = vst [vmem:[#allocation78_spill] sm:$0xff] %v12599_v40  ;;  %9033 = vmatpush3.bf16.xpose.msra.mxu1 %v2162_v18  ;;  %17193 = vst [vmem:[#allocation82_spill] sm:$0xff] %v12617_v10  ;;  %v1789_v18 = vadd.s32 88, %v11905_v55  ;;  %v12631_v32 = vadd.f32 %v8979_v28, %v12617_v10  ;;  %v1784_v10 = vadd.s32 48, %v11905_v55  ;;  %vm5189_vm2 = vcmask 523264  }
 0x3f3   : > { %vm1811_vm10 = vcmp.ge.s32.totalorder %v1793_v13, %v12590_v46 }
 0x3f4   : > { %v12608_v43 = vpop.permute.xlu0 %1557  ;;  %17196 = vst [vmem:[#allocation85_spill] sm:$0xff] %v12631_v32  ;;  %vm1807_vm6 = vcmp.ge.s32.totalorder %v1789_v18, %v12590_v46  ;;  %vm1802_vm9 = vcmp.ge.s32.totalorder %v1784_v10, %v12590_v46  ;;  %v1791_v10 = vadd.s32 104, %v11905_v55  ;;  %v12708_v13 = vsel %vm1811_vm10, 0.0, %v16901_v23 }
 0x3f5   : > { %v12614_v40 = vpop.permute.xlu1 %1683  ;;  %v12660_v18 = vsel %vm1807_vm6, 0.0, %v16901_v23  ;;  %17209 = vst [vmem:[#allocation98_spill] sm:$0xff] %v12708_v13 }
 0x3f6   : > { %17192 = vst [vmem:[#allocation81_spill] sm:$0xff] %v12614_v40  ;;  %17203 = vst [vmem:[#allocation92_spill] sm:$0xff] %v12660_v18  ;;  %vm1809_vm12 = vcmp.ge.s32.totalorder %v1791_v10, %v12590_v46 }
 0x3f7   : > { %2991 = vmax.xlane.f32.xlu1 %v12612_v20  ;;  %v12646_v20 = vsel %vm1796_vm5, 0.0, %v16901_v23  ;;  %v12731_v10 = vsel %vm1809_vm12, 0.0, %v16901_v23 }
 0x3f8   : > { %v12625_v42 = vpop.permute.xlu0 %1657  ;;  %17200 = vst [vmem:[#allocation89_spill] sm:$0xff] %v12646_v20  ;;  %v12664_v38 = vadd.f32 %v12522_v54, %v12646_v20  ;;  %17211 = vst [vmem:[#allocation100_spill] sm:$0xff] %v12731_v10 }
 0x3f9   : > { %17195 = vst [vmem:[#allocation84_spill] sm:$0xff] %v12625_v42  ;;  %v12633_v40 = vpop.permute.xlu1 %1633  ;;  %v1787_v42 = vadd.s32 72, %v11905_v55 }
 0x3fa   : > { %17197 = vst [vmem:[#allocation86_spill] sm:$0xff] %v12633_v40  ;;  %v12654_v40 = vadd.f32 %v12546_v34, %v12636_v61  ;;  %v12670_v34 = vsel %vm1799_vm7, 0.0, %v16901_v23  ;;  %v1782_v61 = vadd.s32 32, %v11905_v55 }
 0x3fb   : > { %3003 = vmax.xlane.f32.xlu1 %v12631_v32  ;;  %vm1805_vm8 = vcmp.ge.s32.totalorder %v1787_v42, %v12590_v46  ;;  %17204 = vst [vmem:[#allocation93_spill] sm:$0xff] %v12670_v34  ;;  %v12678_v32 = vadd.f32 %v12564_v41, %v12660_v18  ;;  %v12688_v20 = vadd.f32 %v12526_v62, %v12670_v34  ;;  %v12694_v41 = vsel %vm1802_vm9, 0.0, %v16901_v23 }
 0x3fc   : > { %v12648_v28 = vpop.permute.xlu0 %1681  ;;  %17202 = vst [vmem:[#allocation91_spill] sm:$0xff] %v12654_v40  ;;  %v12684_v42 = vsel %vm1805_vm8, 0.0, %v16901_v23  ;;  %17206 = vst [vmem:[#allocation95_spill] sm:$0xff] %v12694_v41  ;;  %vm1800_vm11 = vcmp.ge.s32.totalorder %v1782_v61, %v12590_v46  ;;  %v12712_v34 = vadd.f32 %v12540_v31, %v12694_v41 }
 0x3fd   : > { %17201 = vst [vmem:[#allocation90_spill] sm:$0xff] %v12648_v28  ;;  %v12656_v37 = vpop.permute.xlu1 %1415  ;;  %2993 = vmax.xlane.f32.xlu0 %v12640_v57  ;;  %17205 = vst [vmem:[#allocation94_spill] sm:$0xff] %v12684_v42  ;;  %v12702_v57 = vadd.f32 %v12568_v52, %v12684_v42  ;;  %v12717_v61 = vsel %vm1800_vm11, 0.0, %v16901_v23  ;;  %v12723_v42 = vadd.f32 %v12580_v11, %v12708_v13 }
 0x3fe   : > { %17210 = vst [vmem:[#allocation99_spill] sm:$0xff] %v12717_v61 }
 0x3ff   : > { %2999 = vmax.xlane.f32.xlu1 %v12654_v40  ;;  %v1788_v40 = vadd.s32 80, %v11905_v55 }
 0x400   : > { %v12672_v28 = vpop.permute.xlu0 %1431 }
 0x401   : > { %v12680_v54 = vpop.permute.xlu1 %1447  ;;  %2989 = vmax.xlane.f32.xlu0 %v12664_v38  ;;  %vm1806_vm13 = vcmp.ge.s32.totalorder %v1788_v40, %v12590_v46  ;;  %v12735_v40 = vadd.f32 %v12544_v1, %v12717_v61 }
 0x402   : > { %v12741_v11 = vsel %vm1806_vm13, 0.0, %v16901_v23 }
 0x403   : > { %3011 = vmax.xlane.f32.xlu1 %v12678_v32  ;;  %17212 = vst [vmem:[#allocation101_spill] sm:$0xff] %v12741_v11  ;;  %v12756_v23 = vadd.f32 %v12556_v16, %v12741_v11  ;;  %v2434_v16 = vsel %vm1828_vm0, %v12066_v50, 0 }
 0x404   : > { %v12696_v18 = vpop.permute.xlu0 %1687 }
 0x405   : > { %17207 = vst [vmem:[#allocation96_spill] sm:$0xff] %v12696_v18  ;;  %v12704_v62 = vpop.permute.xlu1 %1639  ;;  %2995 = vmax.xlane.f32.xlu0 %v12688_v20  ;;  %v1786_v18 = vadd.s32 64, %v11905_v55 }
 0x406   : > { %17208 = vst [vmem:[#allocation97_spill] sm:$0xff] %v12704_v62 }
 0x407   : > { %3007 = vmax.xlane.f32.xlu1 %v12702_v57  ;;  %vm1804_vm14 = vcmp.ge.s32.totalorder %v1786_v18, %v12590_v46  ;;  %v17213_v18 = vmov -1e+30  }
 0x408   : > { %v1544_v52 = vpop.permute.xlu0 %1543  ;;  %v12760_v41 = vsel %vm1804_vm14, 0.0, %v17213_v18 }
 0x409   : > { %v12725_v62 = vpop.permute.xlu1 %1663  ;;  %3001 = vmax.xlane.f32.xlu0 %v12712_v34  ;;  %9555 = vmatprep.subr.msk.bf16.mxu1 %vm1828_vm0, %v1544_v52  ;;  %v2165_v31 = vsel %vm1828_vm0, %v1544_v52, 0  ;;  %v1792_v52 = vadd.s32 112, %v11905_v55  ;;  %17214 = vst [vmem:[#allocation102_spill] sm:$0xff] %v12760_v41 }
 0x40a   : > { %9035 = vmatpush3.bf16.xpose.msra.mxu1 %v2165_v31  ;;  %v12749_v31 = vadd.f32 %v12584_v63, %v12731_v10  ;;  %v1790_v10 = vadd.s32 96, %v11905_v55 }
 0x40b   : > { %3019 = vmax.xlane.f32.xlu1 %v12723_v42  ;;  %9564 = vmatprep.subr.msk.bf16.mxu1 %vm1828_vm0, %v12066_v50  ;;  %vm1810_vm15 = vcmp.ge.s32.totalorder %v1792_v52, %v12590_v46  ;;  %v2289_v50 = vsel %vm1828_vm0, %v12330_v30, 0 }
 0x40c   : > { %v12743_v13 = vpop.permute.xlu0 %1559  ;;  %v12782_v52 = vsel %vm1810_vm15, 0.0, %v17213_v18  ;;  %vm1808_vm1 = vcmp.ge.s32.totalorder %v1790_v10, %v12590_v46 }
 0x40d   : > { %v1528_v1 = vpop.permute.xlu1 %1527  ;;  %2997 = vmax.xlane.f32.xlu0 %v12735_v40  ;;  %17215 = vst [vmem:[#allocation103_spill] sm:$0xff] %v12782_v52 }
 0x40e   : > { %9547 = vmatprep.subr.msk.bf16.mxu0 %vm1828_vm0, %v1528_v1  ;;  %v2020_v61 = vsel %vm1828_vm0, %v1528_v1, 0 }
 0x40f   : > { %3015 = vmax.xlane.f32.xlu1 %v12749_v31  ;;  %9003 = vmatpush3.bf16.xpose.msra.mxu0 %v2020_v61  ;;  %v12777_v61 = vadd.f32 %v12562_v22, %v12760_v41  ;;  %v12794_v22 = vadd.f32 %v12576_v5, %v12782_v52  ;;  %v2437_v5 = vsel %vm1828_vm0, %v12095_v2, 0 }
 0x410   : > { %9556 = vmatprep.subr.msk.bf16.mxu0 %vm1828_vm0, %v12330_v30  ;;  %v12764_v63 = vpop.permute.xlu0 %1637 }
 0x411   : > { %3009 = vmax.xlane.f32.xlu0 %v12756_v23  ;;  %9037 = vmatmul.mubr.msk.bf16.vlgmr.msra.gmra.mrb[64].mxu1 %vm1828_vm0, %v12308_v36  ;;  %v12799_v36 = vsel %vm1808_vm1, 0.0, %v17213_v18  ;;  %v2307_v18 = vsel %vm1828_vm0, %v12608_v43, 0 }
 0x412   : > { %9040 = vmatprep.mubr.msk.bf16.mxu1 %vm1828_vm0, %v12370_v3  ;;  %9085 = vmatpush3.bf16.xpose.msra.mxu1 %v2434_v16  ;;  %17216 = vst [vmem:[#allocation104_spill] sm:$0xff] %v12799_v36  ;;  %v2455_v16 = vsel %vm1828_vm0, %v12097_v33, 0 }
 0x413   : > { %9565 = vmatprep.subr.msk.bf16.mxu1 %vm1828_vm0, %v12095_v2  ;;  %v12825_v2 = vpop.permute.xlu1 %1457 }
 0x414   : > { %v12784_v1 = vpop.permute.xlu0 %1661 }
 0x415   : > { %3005 = vmax.xlane.f32.xlu0 %v12777_v61 }
 0x416   : > { %9005 = vmatmul.mubr.msk.bf16.vlgmr.msra.gmra.mrb[48].mxu0 %vm1828_vm0, %v12300_v29  ;;  %v12814_v29 = vadd.f32 %v12578_v60, %v12799_v36 }
 0x417   : > { %9008 = vmatprep.mubr.msk.bf16.mxu0 %vm1828_vm0, %v12364_v24  ;;  %9053 = vmatpush3.bf16.xpose.msra.mxu0 %v2289_v50  ;;  %v2443_v24 = vsel %vm1828_vm0, %v12156_v0, 0  ;;  %v2310_v50 = vsel %vm1828_vm0, %v12743_v13, 0 }
 0x418   : > { %9557 = vmatprep.subr.msk.bf16.mxu0 %vm1828_vm0, %v12340_v51  ;;  %v12803_v46 = vpop.permute.xlu0 %1685 }
 0x419   : > { %17217 = vst [vmem:[#allocation105_spill] sm:$0xff] %v12803_v46  ;;  %3017 = vmax.xlane.f32.xlu0 %v12794_v22  ;;  %9041 = vmatmul.mubr.msk.bf16.gmra.mrb[68].mxu1 %vm1828_vm0, %v12418_v19  ;;  %v2292_v19 = vsel %vm1828_vm0, %v12340_v51, 0 }
 0x41a   : > { %9044 = vmatprep.mubr.msk.bf16.mxu1 %vm1828_vm0, %v12450_v39  ;;  %9087 = vmatpush3.bf16.xpose.msra.mxu1 %v2437_v5  ;;  %v2440_v39 = vsel %vm1828_vm0, %v12128_v6, 0 }
 0x41b   : > { %9566 = vmatprep.subr.msk.bf16.mxu1 %vm1828_vm0, %v12128_v6 }
 0x41c   : > { %v12818_v30 = vpop.permute.xlu0 %1473 }
 0x41d   : > { %3013 = vmax.xlane.f32.xlu0 %v12814_v29 }
 0x41e   : > { %9009 = vmatmul.mubr.msk.bf16.gmra.mrb[52].mxu0 %vm1828_vm0, %v12428_v4  ;;  %v2449_v4 = vsel %vm1828_vm0, %v12040_v53, 0 }
 0x41f   : > { %9012 = vmatprep.mubr.msk.bf16.mxu0 %vm1828_vm0, %v12490_v45  ;;  %9055 = vmatpush3.bf16.xpose.msra.mxu0 %v2292_v19  ;;  %v12843_v45 = vpop.permute.xlu1 %1569 }
 0x420   : > { %9558 = vmatprep.subr.msk.bf16.mxu0 %vm1828_vm0, %v12396_v35  ;;  %v12831_v60 = vpop.permute.xlu0 %1489 }
 0x421   : > { %9045 = vmatmul.mubr.msk.bf16.gmra.mrb[72].mxu1 %vm1828_vm0, %v12538_v8  ;;  %v2295_v8 = vsel %vm1828_vm0, %v12396_v35, 0 }
 0x422   : > { %9048 = vmatprep.mubr.msk.bf16.mxu1 %vm1828_vm0, %v12586_v15  ;;  %9089 = vmatpush3.bf16.xpose.msra.mxu1 %v2440_v39  ;;  %v2579_v39 = vsel %vm1828_vm0, %v12843_v45, 0 }
 0x423   : > { %9567 = vmatprep.subr.msk.bf16.mxu1 %vm1828_vm0, %v12156_v0  ;;  %v2446_v0 = vsel %vm1828_vm0, %v12012_v26, 0 }
 0x424   : > { %v12841_v51 = vpop.permute.xlu0 %1707 }
 0x425   : > { %17218 = vst [vmem:[#allocation106_spill] sm:$0xff] %v12841_v51 }
 0x426   : > { %9013 = vmatmul.mubr.msk.bf16.gmra.mrb[56].mxu0 %vm1828_vm0, %v12530_v21  ;;  %v12859_v21 = vpop.permute.xlu1 %1705 }
 0x427   : > { %9016 = vmatprep.mubr.msk.bf16.mxu0 %vm1828_vm0, %v12574_v56  ;;  %9057 = vmatpush3.bf16.xpose.msra.mxu0 %v2295_v8  ;;  %17219 = vst [vmem:[#allocation107_spill] sm:$0xff] %v12859_v21  ;;  %v2298_v56 = vsel %vm1828_vm0, %v12468_v59, 0 }
 0x428   : > { %9559 = vmatprep.subr.msk.bf16.mxu0 %vm1828_vm0, %v12468_v59  ;;  %v1586_v6 = vpop.permute.xlu0 %1585  ;;  %v2301_v59 = vsel %vm1828_vm0, %v12508_v14, 0 }
 0x429   : > { %9049 = vmatmul.mubr.msk.bf16.gmra.mrb[76].mxu1 %vm1828_vm0, %v12672_v28 }
 0x42a   : > { %9091 = vmatpush3.bf16.xpose.msra.mxu1 %v2443_v24  ;;  %9100 = vmatprep.mubr.msk.bf16.mxu1 %vm1828_vm0, %v12062_v44  ;;  %v12873_v44 = vpop.permute.xlu1 %1459  ;;  %v17224_v24 = vld [vmem:[#allocation20_spill] sm:$0xff] }
 0x42b   : > { %9568 = vmatprep.subr.msk.bf16.mxu1 %vm1828_vm0, %v12012_v26 }
 0x42c   : > { %v12863_v35 = vpop.permute.xlu0 %1601 }
 0x42e   : > { %9017 = vmatmul.mubr.msk.bf16.gmra.mrb[60].mxu0 %vm1828_vm0, %v12656_v37  ;;  %v12881_v15 = vpop.permute.xlu1 %1475  ;;  %v2452_v37 = vsel %vm1828_vm0, %v12068_v27, 0 }
 0x42f   : > { %9059 = vmatpush3.bf16.xpose.msra.mxu0 %v2298_v56  ;;  %9068 = vmatprep.mubr.msk.bf16.mxu0 %vm1828_vm0, %v12284_v12 }
 0x430   : > { %9560 = vmatprep.subr.msk.bf16.mxu0 %vm1828_vm0, %v12508_v14  ;;  %v1588_v3 = vpop.permute.xlu0 %1587  ;;  %v2304_v14 = vsel %vm1828_vm0, %v12554_v25, 0 }
 0x432   : > { %9093 = vmatpush3.bf16.xpose.msra.mxu1 %v2446_v0  ;;  %v12891_v26 = vpop.permute.xlu1 %1491 }
 0x433   : > { %9569 = vmatprep.subr.msk.bf16.mxu1 %vm1828_vm0, %v12040_v53 }
 0x434   : > { %v12883_v12 = vpop.permute.xlu0 %1709 }
 0x435   : > { %17220 = vst [vmem:[#allocation108_spill] sm:$0xff] %v12883_v12 }
 0x436   : > { %v12901_v53 = vpop.permute.xlu1 %1711 }
 0x437   : > { %9061 = vmatpush3.bf16.xpose.msra.mxu0 %v2301_v59  ;;  %17221 = vst [vmem:[#allocation109_spill] sm:$0xff] %v12901_v53  ;;  %v17227_v59 = vld [vmem:[#allocation21_spill] sm:$0xff] }
 0x438   : > { %9561 = vmatprep.subr.msk.bf16.mxu0 %vm1828_vm0, %v12554_v25  ;;  %v12893_v28 = vpop.permute.xlu0 %1461 }
 0x43a   : > { %9095 = vmatpush3.bf16.xpose.msra.mxu1 %v2449_v4  ;;  %v1572_v25 = vpop.permute.xlu1 %1571 }
 0x43b   : > { %9570 = vmatprep.subr.msk.bf16.mxu1 %vm1828_vm0, %v12068_v27 }
 0x43c   : > { %v12905_v10 = vpop.permute.xlu0 %1477 }
 0x43e   : > { %v12918_v5 = vpop.permute.xlu1 %1603 }
 0x43f   : > { %9063 = vmatpush3.bf16.xpose.msra.mxu0 %v2304_v14  ;;  %v17228_v14 = vld [vmem:[#allocation45_spill] sm:$0xff] }
 0x440   : > { %9562 = vmatprep.subr.msk.bf16.mxu0 %vm1828_vm0, %v12608_v43  ;;  %v12913_v27 = vpop.permute.xlu0 %1493 }
 0x442   : > { %9097 = vmatpush3.bf16.xpose.msra.mxu1 %v2452_v37  ;;  %v12928_v19 = vpop.permute.xlu1 %1605 }
 0x443   : > { %9571 = vmatprep.subr.msk.bf16.mxu1 %vm1828_vm0, %v12097_v33  ;;  %v2724_v33 = vsel %vm1828_vm0, %v1586_v6, 0 }
 0x444   : > { %v1574_v43 = vpop.permute.xlu0 %1573 }
 0x445   : > { %v2585_v56 = vsel %vm1828_vm0, %v1574_v43, 0 }
 0x447   : > { %9065 = vmatpush3.bf16.xpose.msra.mxu0 %v2307_v18  ;;  %v17229_v18 = vld [vmem:[#allocation44_spill] sm:$0xff] }
 0x448   : > { %9563 = vmatprep.subr.msk.bf16.mxu0 %vm1828_vm0, %v12743_v13  ;;  %v1590_v13 = vpop.permute.xlu0 %1589 }
 0x449   : > { %v2730_v8 = vsel %vm1828_vm0, %v1590_v13, 0 }
 0x44a   : > { %9099 = vmatpush3.bf16.xpose.msra.mxu1 %v2455_v16  ;;  %v2591_v16 = vsel %vm1828_vm0, %v17229_v18, 0 }
 0x44b   : > { %9580 = vmatprep.subr.msk.bf16.mxu1 %vm1828_vm0, %v1586_v6 }
 0x44f   : > { %9067 = vmatpush3.bf16.xpose.msra.mxu0 %v2310_v50  ;;  %v17232_v50 = vld [vmem:[#allocation54_spill] sm:$0xff] }
 0x450   : > { %9572 = vmatprep.subr.msk.bf16.mxu0 %vm1828_vm0, %v12843_v45  ;;  %v17222_v45 = vld [vmem:[#allocation60_spill] sm:$0xff] }
 0x451   : > { %9101 = vmatmul.mubr.msk.bf16.vlgmr.msra.gmra.mrb[80].mxu1 %vm1828_vm0, %v12091_v49  ;;  %v2727_v49 = vsel %vm1828_vm0, %v1588_v3, 0 }
 0x452   : > { %9104 = vmatprep.mubr.msk.bf16.mxu1 %vm1828_vm0, %v12124_v58  ;;  %9149 = vmatpush3.bf16.xpose.msra.mxu1 %v2724_v33  ;;  %v12942_v58 = vpop.permute.xlu1 %1479  ;;  %v17233_v33 = vld [vmem:[#allocation53_spill] sm:$0xff] }
 0x453   : > { %9581 = vmatprep.subr.msk.bf16.mxu1 %vm1828_vm0, %v1588_v3  ;;  %v17226_v3 = vld [vmem:[#allocation77_spill] sm:$0xff] }
 0x456   : > { %9069 = vmatmul.mubr.msk.bf16.vlgmr.msra.gmra.mrb[64].mxu0 %vm1828_vm0, %v12354_v17  ;;  %v12945_v17 = vpop.permute.xlu0 %1463 }
 0x457   : > { %9072 = vmatprep.mubr.msk.bf16.mxu0 %vm1828_vm0, %v12380_v7  ;;  %9117 = vmatpush3.bf16.xpose.msra.mxu0 %v2579_v39  ;;  %v2582_v7 = vsel %vm1828_vm0, %v1572_v25, 0 }
 0x458   : > { %9573 = vmatprep.subr.msk.bf16.mxu0 %vm1828_vm0, %v1572_v25  ;;  %v2736_v25 = vsel %vm1828_vm0, %v17228_v14, 0 }
 0x459   : > { %9105 = vmatmul.mubr.msk.bf16.gmra.mrb[84].mxu1 %vm1828_vm0, %v12152_v9  ;;  %v12953_v9 = vpop.permute.xlu1 %1495 }
 0x45a   : > { %9108 = vmatprep.mubr.msk.bf16.mxu1 %vm1828_vm0, %v12008_v48  ;;  %9151 = vmatpush3.bf16.xpose.msra.mxu1 %v2727_v49  ;;  %v17223_v48 = vld [vmem:[#allocation19_spill] sm:$0xff]  ;;  %v1592_v6 = vpop.permute.xlu0 %1591 }
 0x45b   : > { %9582 = vmatprep.subr.msk.bf16.mxu1 %vm1828_vm0, %v1590_v13  ;;  %v2733_v4 = vsel %vm1828_vm0, %v1592_v6, 0  ;;  %v2742_v13 = vsel %vm1828_vm0, %v17232_v50, 0  ;;  %v17234_v49 = vld [vmem:[#allocation63_spill] sm:$0xff] }
 0x45d   : > { %v1576_v0 = vpop.permute.xlu1 %1575 }
 0x45e   : > { %9073 = vmatmul.mubr.msk.bf16.gmra.mrb[68].mxu0 %vm1828_vm0, %v12434_v47  ;;  %v17225_v47 = vld [vmem:[#allocation68_spill] sm:$0xff]  ;;  %v2588_v37 = vsel %vm1828_vm0, %v1576_v0, 0 }
 0x45f   : > { %9076 = vmatprep.mubr.msk.bf16.mxu0 %vm1828_vm0, %v17222_v45  ;;  %9119 = vmatpush3.bf16.xpose.msra.mxu0 %v2582_v7  ;;  %v2597_v45 = vsel %vm1828_vm0, %v17233_v33, 0 }
 0x460   : > { %9574 = vmatprep.subr.msk.bf16.mxu0 %vm1828_vm0, %v1574_v43 }
 0x461   : > { %9109 = vmatmul.mubr.msk.bf16.gmra.mrb[88].mxu1 %vm1828_vm0, %v17223_v48  ;;  %v12999_v39 = vpop.permute.xlu1 %1607  ;;  %v17235_v48 = vld [vmem:[#allocation57_spill] sm:$0xff] }
 0x462   : > { %9112 = vmatprep.mubr.msk.bf16.mxu1 %vm1828_vm0, %v17224_v24  ;;  %9153 = vmatpush3.bf16.xpose.msra.mxu1 %v2730_v8  ;;  %v2745_v8 = vsel %vm1828_vm0, %v17234_v49, 0  ;;  %v17236_v24 = vld [vmem:[#allocation23_spill] sm:$0xff] }
 0x463   : > { %9583 = vmatprep.subr.msk.bf16.mxu1 %vm1828_vm0, %v1592_v6 }
 0x466   : > { %9077 = vmatmul.mubr.msk.bf16.gmra.mrb[72].mxu0 %vm1828_vm0, %v17225_v47 }
 0x467   : > { %9080 = vmatprep.mubr.msk.bf16.mxu0 %vm1828_vm0, %v17226_v3  ;;  %9121 = vmatpush3.bf16.xpose.msra.mxu0 %v2585_v56 }
 0x468   : > { %9575 = vmatprep.subr.msk.bf16.mxu0 %vm1828_vm0, %v1576_v0  ;;  %v2600_v0 = vsel %vm1828_vm0, %v17235_v48, 0 }
 0x469   : > { %9113 = vmatmul.mubr.msk.bf16.gmra.mrb[92].mxu1 %vm1828_vm0, %v17227_v59 }
 0x46a   : > { %9155 = vmatpush3.bf16.xpose.msra.mxu1 %v2733_v4  ;;  %9164 = vmatprep.mubr.msk.bf16.mxu1 %vm1828_vm0, %v12818_v30  ;;  %v17230_v30 = vld [vmem:[#allocation46_spill] sm:$0xff] }
 0x46b   : > { %9584 = vmatprep.subr.msk.bf16.mxu1 %vm1828_vm0, %v17228_v14  ;;  %v17237_v14 = vld [vmem:[#allocation22_spill] sm:$0xff] }
 0x46e   : > { %9081 = vmatmul.mubr.msk.bf16.gmra.mrb[76].mxu0 %vm1828_vm0, %v12680_v54  ;;  %v17231_v54 = vld [vmem:[#allocation49_spill] sm:$0xff] }
 0x46f   : > { %9123 = vmatpush3.bf16.xpose.msra.mxu0 %v2588_v37  ;;  %9132 = vmatprep.mubr.msk.bf16.mxu0 %vm1828_vm0, %v12825_v2  ;;  %v2739_v2 = vsel %vm1828_vm0, %v17230_v30, 0  ;;  %v2594_v43 = vsel %vm1828_vm0, %v17231_v54, 0  ;;  %v17238_v37 = vld [vmem:[#allocation80_spill] sm:$0xff] }
 0x470   : > { %9576 = vmatprep.subr.msk.bf16.mxu0 %vm1828_vm0, %v17229_v18 }
 0x472   : > { %9157 = vmatpush3.bf16.xpose.msra.mxu1 %v2736_v25 }
 0x473   : > { %9585 = vmatprep.subr.msk.bf16.mxu1 %vm1828_vm0, %v17230_v30 }
 0x477   : > { %9125 = vmatpush3.bf16.xpose.msra.mxu0 %v2591_v16 }
 0x478   : > { %9577 = vmatprep.subr.msk.bf16.mxu0 %vm1828_vm0, %v17231_v54  ;;  %v17240_v54 = vld [vmem:[#allocation40_spill] sm:$0xff] }
 0x47a   : > { %9159 = vmatpush3.bf16.xpose.msra.mxu1 %v2739_v2  ;;  %v17241_v2 = vld [vmem:[#allocation24_spill] sm:$0xff] }
 0x47b   : > { %9586 = vmatprep.subr.msk.bf16.mxu1 %vm1828_vm0, %v17232_v50  ;;  %v17242_v50 = vld [vmem:[#allocation88_spill] sm:$0xff] }
 0x47f   : > { %9127 = vmatpush3.bf16.xpose.msra.mxu0 %v2594_v43 }
 0x480   : > { %9578 = vmatprep.subr.msk.bf16.mxu0 %vm1828_vm0, %v17233_v33  ;;  %v17243_v33 = vld [vmem:[#allocation91_spill] sm:$0xff] }
 0x482   : > { %9161 = vmatpush3.bf16.xpose.msra.mxu1 %v2742_v13 }
 0x483   : > { %9587 = vmatprep.subr.msk.bf16.mxu1 %vm1828_vm0, %v17234_v49 }
 0x484   : > { %v2992_v7 = vpop.xlane.xlu1 %2991 }
 0x485   : > { %v3246_v18 = vsub.f32 %v17238_v37, %v2992_v7  ;;  %v2872_v7 = vsel %vm1828_vm0, %v12918_v5, 0 }
 0x487   : > { %9129 = vmatpush3.bf16.xpose.msra.mxu0 %v2597_v45  ;;  %v3375_v16 = vmul.f32 1.442695, %v3246_v18 }
 0x488   : > { %9579 = vmatprep.subr.msk.bf16.mxu0 %vm1828_vm0, %v17235_v48  ;;  %v13010_v47 = vpop.xlane.xlu1 %3003 }
 0x48a   : > { %9163 = vmatpush3.bf16.xpose.msra.mxu1 %v2745_v8  ;;  %v2994_v6 = vpop.xlane.xlu0 %2993  ;;  %v17245_v8 = vld [vmem:[#allocation27_spill] sm:$0xff] }
 0x48b   : > { %9212 = vmatprep.subr.bf16.mxu1 %v17236_v24  ;;  %v3247_v43 = vsub.f32 %v17242_v50, %v2994_v6 }
 0x48c   : > { %v3000_v3 = vpop.xlane.xlu1 %2999 }
 0x48d   : > { %v3250_v13 = vsub.f32 %v17243_v33, %v3000_v3  ;;  %v3377_v48 = vmul.f32 1.442695, %v3247_v43  ;;  %v17248_v3 = vld [vmem:[#allocation26_spill] sm:$0xff]  ;;  %v17256_v43 = vld [vmem:[#allocation28_spill] sm:$0xff] }
 0x48e   : > { %v2990_v56 = vpop.xlane.xlu0 %2989 }
 0x48f   : > { %9131 = vmatpush3.bf16.xpose.msra.mxu0 %v2600_v0  ;;  %v3245_v4 = vsub.f32 %v12664_v38, %v2990_v56  ;;  %v17239_v38 = vld [vmem:[#allocation25_spill] sm:$0xff]  ;;  %v3383_v6 = vmul.f32 1.442695, %v3250_v13  ;;  %v17247_v56 = vld [vmem:[#allocation51_spill] sm:$0xff] }
 0x490   : > { %9588 = vmatprep.subr.msk.bf16.mxu0 %vm1828_vm0, %v12863_v35 }
 0x491   : > { %9165 = vmatmul.mubr.msk.bf16.vlgmr.msra.gmra.mrb[96].mxu1 %vm1828_vm0, %v12881_v15  ;;  %v2869_v15 = vsel %vm1828_vm0, %v12863_v35, 0  ;;  %v3373_v30 = vmul.f32 1.442695, %v3245_v4 }
 0x492   : > { %9168 = vmatprep.mubr.msk.bf16.mxu1 %vm1828_vm0, %v12905_v10  ;;  %9213 = vmatpush3.bf16.msra.mxu1 %v17236_v24  ;;  %v2996_v59 = vpop.xlane.xlu0 %2995  ;;  %v13031_v10 = vpop.xlane.xlu1 %3011  ;;  %v17246_v24 = vld [vmem:[#allocation42_spill] sm:$0xff] }
 0x493   : > { %9214 = vmatprep.subr.bf16.mxu1 %v17237_v14  ;;  %10122 = vpow2.f32 %v3373_v30  ;;  %v3256_v13 = vsub.f32 %v12678_v32, %v13031_v10  ;;  %v17262_v10 = vld [vmem:[#allocation65_spill] sm:$0xff] }
 0x494   : > { %10124 = vpow2.f32 %v3375_v16 }
 0x496   : > { %9133 = vmatmul.mubr.msk.bf16.vlgmr.msra.gmra.mrb[80].mxu0 %vm1828_vm0, %v12873_v44  ;;  %9215 = vmatpush3.bf16.msra.mxu1 %v17237_v14  ;;  %v3002_v25 = vpop.xlane.xlu0 %3001  ;;  %v3248_v44 = vsub.f32 %v12688_v20, %v2996_v59  ;;  %v17249_v59 = vld [vmem:[#allocation85_spill] sm:$0xff] }
 0x497   : > { %9136 = vmatprep.mubr.msk.bf16.mxu0 %vm1828_vm0, %v12893_v28  ;;  %9181 = vmatpush3.bf16.xpose.msra.mxu0 %v2869_v15  ;;  %v3252_v4 = vsub.f32 %v17249_v59, %v13010_v47  ;;  %v2875_v15 = vsel %vm1828_vm0, %v12928_v19, 0  ;;  %v17269_v59 = vld [vmem:[#allocation73_spill] sm:$0xff] }
 0x498   : > { %9216 = vmatprep.subr.bf16.mxu1 %v17239_v38  ;;  %9589 = vmatprep.subr.msk.bf16.mxu0 %vm1828_vm0, %v12918_v5  ;;  %v3379_v49 = vmul.f32 1.442695, %v3248_v44  ;;  %v17254_v44 = vld [vmem:[#allocation29_spill] sm:$0xff] }
 0x499   : > { %9169 = vmatmul.mubr.msk.bf16.gmra.mrb[100].mxu1 %vm1828_vm0, %v12942_v58  ;;  %v3008_v58 = vpop.xlane.xlu1 %3007  ;;  %v3387_v16 = vmul.f32 1.442695, %v3252_v4 }
 0x49a   : > { %9172 = vmatprep.mubr.msk.bf16.mxu1 %vm1828_vm0, %v17240_v54  ;;  %9217 = vmatpush3.bf16.msra.mxu1 %v17239_v38  ;;  %v2998_v35 = vpop.xlane.xlu0 %2997  ;;  %10126 = vpow2.f32 %v3379_v49  ;;  %v17253_v38 = vld [vmem:[#allocation50_spill] sm:$0xff] }
 0x49b   : > { %v3249_v28 = vsub.f32 %v12735_v40, %v2998_v35  ;;  %9218 = vmatprep.subr.bf16.mxu1 %v17241_v2  ;;  %v17244_v40 = vld [vmem:[#allocation38_spill] sm:$0xff] }
 0x49c   : > { %v17255_v35 = vld [vmem:[#allocation58_spill] sm:$0xff] }
 0x49d   : > { %v3381_v45 = vmul.f32 1.442695, %v3249_v28  ;;  %v13066_v14 = vpop.xlane.xlu1 %3019  ;;  %v13068_v37 = vpop.eup %10122 }
 0x49e   : > { %9137 = vmatmul.mubr.msk.bf16.gmra.mrb[84].mxu0 %vm1828_vm0, %v12945_v17  ;;  %9219 = vmatpush3.bf16.msra.mxu1 %v17241_v2  ;;  %v3010_v20 = vpop.xlane.xlu0 %3009  ;;  %v3251_v17 = vsub.f32 %v12712_v34, %v3002_v25  ;;  %17250 = vst [vmem:[#allocation60_spill] sm:$0xff] %v13068_v37  ;;  %v3254_v34 = vsub.f32 %v12702_v57, %v3008_v58  ;;  %v17251_v25 = vld [vmem:[#allocation48_spill] sm:$0xff]  ;;  %v13076_v30 = vpop.eup %10124 }
 0x49f   : > { %9140 = vmatprep.mubr.msk.bf16.mxu0 %vm1828_vm0, %v17244_v40  ;;  %9183 = vmatpush3.bf16.xpose.msra.mxu0 %v2872_v7  ;;  %10128 = vpow2.f32 %v3381_v45  ;;  %17252 = vst [vmem:[#allocation19_spill] sm:$0xff] %v13076_v30  ;;  %v3885_v57 = vpack.c.bf16 %v13076_v30, %v13068_v37  ;;  %v3255_v28 = vsub.f32 %v12756_v23, %v3010_v20  ;;  %v17260_v7 = vld [vmem:[#allocation56_spill] sm:$0xff] }
 0x4a0   : > { %9220 = vmatprep.subr.bf16.mxu1 %v17245_v8  ;;  %9590 = vmatprep.subr.msk.bf16.mxu0 %vm1828_vm0, %v12928_v19  ;;  %10130 = vpow2.f32 %v3377_v48  ;;  %v3385_v18 = vmul.f32 1.442695, %v3251_v17  ;;  %v3391_v54 = vmul.f32 1.442695, %v3254_v34  ;;  %v17263_v48 = vld [vmem:[#allocation39_spill] sm:$0xff]  ;;  %v3260_v17 = vsub.f32 %v12723_v42, %v13066_v14 }
 0x4a1   : > { %9173 = vmatmul.mubr.msk.bf16.gmra.mrb[104].mxu1 %vm1828_vm0, %v17246_v24  ;;  %10132 = vpow2.f32 %v3383_v6  ;;  %v3016_v19 = vpop.xlane.xlu1 %3015  ;;  %v3393_v20 = vmul.f32 1.442695, %v3255_v28  ;;  %v17270_v14 = vld [vmem:[#allocation47_spill] sm:$0xff] }
 0x4a2   : > { %9176 = vmatprep.mubr.msk.bf16.mxu1 %vm1828_vm0, %v17247_v56  ;;  %9221 = vmatpush3.bf16.msra.mxu1 %v17245_v8  ;;  %v3006_v5 = vpop.xlane.xlu0 %3005  ;;  %10134 = vpow2.f32 %v3385_v18  ;;  %v3258_v23 = vsub.f32 %v12749_v31, %v3016_v19  ;;  %v3395_v31 = vmul.f32 1.442695, %v3256_v13  ;;  %v3403_v42 = vmul.f32 1.442695, %v3260_v17  ;;  %v17271_v18 = vld [vmem:[#allocation70_spill] sm:$0xff]  ;;  %v17282_v13 = vld [vmem:[#allocation97_spill] sm:$0xff] }
 0x4a3   : > { %v3253_v0 = vsub.f32 %v12777_v61, %v3006_v5  ;;  %9222 = vmatprep.subr.bf16.mxu1 %v17248_v3 }
 0x4a4   : > { %v13091_v33 = vpop.eup %10126 }
 0x4a5   : > { %v3389_v47 = vmul.f32 1.442695, %v3253_v0  ;;  %17257 = vst [vmem:[#allocation20_spill] sm:$0xff] %v13091_v33 }
 0x4a6   : > { %9141 = vmatmul.mubr.msk.bf16.gmra.mrb[88].mxu0 %vm1828_vm0, %v17251_v25  ;;  %9223 = vmatpush3.bf16.msra.mxu1 %v17248_v3  ;;  %v3018_v61 = vpop.xlane.xlu0 %3017 }
 0x4a7   : > { %9144 = vmatprep.mubr.msk.bf16.mxu0 %vm1828_vm0, %v17253_v38  ;;  %9185 = vmatpush3.bf16.xpose.msra.mxu0 %v2875_v15  ;;  %10136 = vpow2.f32 %v3389_v47  ;;  %v3259_v6 = vsub.f32 %v12794_v22, %v3018_v61  ;;  %v2881_v22 = vsel %vm1828_vm0, %v17263_v48, 0  ;;  %v2884_v47 = vsel %vm1828_vm0, %v17270_v14, 0 }
 0x4a8   : > { %9224 = vmatprep.subr.bf16.mxu1 %v17254_v44  ;;  %9591 = vmatprep.subr.msk.bf16.mxu0 %vm1828_vm0, %v12999_v39  ;;  %10138 = vpow2.f32 %v3387_v16  ;;  %v17276_v16 = vld [vmem:[#allocation86_spill] sm:$0xff] }
 0x4a9   : > { %9177 = vmatmul.mubr.msk.bf16.gmra.mrb[108].mxu1 %vm1828_vm0, %v17255_v35  ;;  %v13095_v49 = vpop.eup %10128  ;;  %10140 = vpow2.f32 %v3391_v54  ;;  %v3401_v0 = vmul.f32 1.442695, %v3259_v6  ;;  %v17278_v35 = vld [vmem:[#allocation78_spill] sm:$0xff]  ;;  %v17292_v6 = vld [vmem:[#allocation52_spill] sm:$0xff] }
 0x4aa   : > { %9225 = vmatpush3.bf16.msra.mxu1 %v17254_v44  ;;  %9228 = vmatprep.mubr.bf16.mxu1 %v3885_v57  ;;  %v3014_v2 = vpop.xlane.xlu0 %3013  ;;  %17258 = vst [vmem:[#allocation68_spill] sm:$0xff] %v13095_v49  ;;  %v13098_v58 = vpop.eup %10130  ;;  %10142 = vpow2.f32 %v3393_v20  ;;  %v17277_v57 = vld [vmem:[#allocation55_spill] sm:$0xff]  ;;  %v17283_v20 = vld [vmem:[#allocation69_spill] sm:$0xff] }
 0x4ab   : > { %v3257_v50 = vsub.f32 %v12814_v29, %v3014_v2  ;;  %9226 = vmatprep.subr.bf16.mxu1 %v17256_v43  ;;  %17259 = vst [vmem:[#allocation77_spill] sm:$0xff] %v13098_v58  ;;  %v2878_v29 = vsel %vm1828_vm0, %v12999_v39, 0  ;;  %v13105_v45 = vpop.eup %10132  ;;  %v3886_v32 = vpack.c.bf16 %v13091_v33, %v13098_v58  ;;  %v3399_v39 = vmul.f32 1.442695, %v3258_v23 }
 0x4ac   : > { %17261 = vst [vmem:[#allocation21_spill] sm:$0xff] %v13105_v45  ;;  %v3887_v8 = vpack.c.bf16 %v13105_v45, %v13095_v49  ;;  %v13119_v24 = vpop.eup %10134  ;;  %v2887_v2 = vsel %vm1828_vm0, %v17277_v57, 0  ;;  %v17306_v49 = vld [vmem:[#allocation98_spill] sm:$0xff] }
 0x4ad   : > { %v3397_v40 = vmul.f32 1.442695, %v3257_v50  ;;  %17265 = vst [vmem:[#allocation45_spill] sm:$0xff] %v13119_v24 }
 0x4ae   : > { %9145 = vmatmul.mubr.msk.bf16.gmra.mrb[92].mxu0 %vm1828_vm0, %v17260_v7  ;;  %9227 = vmatpush3.bf16.msra.mxu1 %v17256_v43  ;;  %v17281_v43 = vld [vmem:[#allocation64_spill] sm:$0xff]  ;;  %v17284_v7 = vld [vmem:[#allocation67_spill] sm:$0xff] }
 0x4af   : > { %9187 = vmatpush3.bf16.xpose.msra.mxu0 %v2878_v29  ;;  %9196 = vmatprep.mubr.msk.bf16.mxu0 %vm1828_vm0, %v12831_v60  ;;  %10144 = vpow2.f32 %v3397_v40  ;;  %v17264_v60 = vld [vmem:[#allocation66_spill] sm:$0xff]  ;;  %v2890_v23 = vsel %vm1828_vm0, %v17281_v43, 0  ;;  %v17286_v29 = vld [vmem:[#allocation75_spill] sm:$0xff]  ;;  %v17287_v40 = vld [vmem:[#allocation41_spill] sm:$0xff] }
 0x4b0   : > { %9244 = vmatprep.subr.bf16.mxu1 %v17262_v10  ;;  %9592 = vmatprep.subr.msk.bf16.mxu0 %vm1828_vm0, %v17263_v48  ;;  %10146 = vpow2.f32 %v3395_v31  ;;  %v17290_v31 = vld [vmem:[#allocation83_spill] sm:$0xff] }
 0x4b1   : > { %9229 = vmatmul.mubr.bf16.vlgmr.msra.gmra.mrb[112].mxu1 %v3886_v32  ;;  %v13123_v56 = vpop.eup %10136  ;;  %10148 = vpow2.f32 %v3399_v39  ;;  %v17289_v32 = vld [vmem:[#allocation84_spill] sm:$0xff]  ;;  %v17291_v39 = vld [vmem:[#allocation43_spill] sm:$0xff] }
 0x4b2   : > { %9232 = vmatprep.mubr.bf16.mxu1 %v3887_v8  ;;  %9245 = vmatpush3.bf16.msra.mxu1 %v17262_v10  ;;  %17266 = vst [vmem:[#allocation44_spill] sm:$0xff] %v13123_v56  ;;  %v13125_v5 = vpop.eup %10138  ;;  %10150 = vpow2.f32 %v3401_v0  ;;  %v17294_v0 = vld [vmem:[#allocation76_spill] sm:$0xff] }
 0x4b3   : > { %9246 = vmatprep.subr.bf16.mxu1 %v17264_v60  ;;  %17267 = vst [vmem:[#allocation46_spill] sm:$0xff] %v13125_v5  ;;  %v13130_v3 = vpop.eup %10140  ;;  %v3888_v4 = vpack.c.bf16 %v13125_v5, %v13119_v24  ;;  %10152 = vpow2.f32 %v3403_v42  ;;  %v17304_v24 = vld [vmem:[#allocation94_spill] sm:$0xff]  ;;  %v17309_v5 = vld [vmem:[#allocation100_spill] sm:$0xff] }
 0x4b4   : > { %17268 = vst [vmem:[#allocation49_spill] sm:$0xff] %v13130_v3  ;;  %v3889_v34 = vpack.c.bf16 %v13130_v3, %v13123_v56  ;;  %v13141_v25 = vpop.eup %10142 }
 0x4b5   : > { %17272 = vst [vmem:[#allocation54_spill] sm:$0xff] %v13141_v25 }
 0x4b6   : > { %9247 = vmatpush3.bf16.msra.mxu1 %v17264_v60  ;;  %v17293_v60 = vld [vmem:[#allocation93_spill] sm:$0xff] }
 0x4b7   : > { %9189 = vmatpush3.bf16.xpose.msra.mxu0 %v2881_v22  ;;  %9248 = vmatprep.subr.bf16.mxu1 %v17269_v59 }
 0x4b8   : > { %9593 = vmatprep.subr.msk.bf16.mxu0 %vm1828_vm0, %v17270_v14 }
 0x4b9   : > { %9233 = vmatmul.mubr.bf16.gmra.mrb[116].mxu1 %v3888_v4  ;;  %v13143_v61 = vpop.eup %10144 }
 0x4ba   : > { %9236 = vmatprep.mubr.bf16.mxu1 %v3889_v34  ;;  %9249 = vmatpush3.bf16.msra.mxu1 %v17269_v59  ;;  %17273 = vst [vmem:[#allocation53_spill] sm:$0xff] %v13143_v61  ;;  %v13145_v15 = vpop.eup %10146 }
 0x4bb   : > { %9250 = vmatprep.subr.bf16.mxu1 %v17271_v18  ;;  %17274 = vst [vmem:[#allocation63_spill] sm:$0xff] %v13145_v15  ;;  %v13150_v38 = vpop.eup %10148  ;;  %v3890_v44 = vpack.c.bf16 %v13145_v15, %v13141_v25 }
 0x4bc   : > { %17275 = vst [vmem:[#allocation57_spill] sm:$0xff] %v13150_v38  ;;  %v3891_v54 = vpack.c.bf16 %v13150_v38, %v13143_v61  ;;  %v13161_v19 = vpop.eup %10150 }
 0x4bd   : > { %17279 = vst [vmem:[#allocation23_spill] sm:$0xff] %v13161_v19  ;;  %v13163_v28 = vpop.eup %10152 }
 0x4be   : > { %9251 = vmatpush3.bf16.msra.mxu1 %v17271_v18  ;;  %17280 = vst [vmem:[#allocation22_spill] sm:$0xff] %v13163_v28  ;;  %v3892_v50 = vpack.c.bf16 %v13163_v28, %v13161_v19  ;;  %v17295_v18 = vld [vmem:[#allocation79_spill] sm:$0xff] }
 0x4bf   : > { %9191 = vmatpush3.bf16.xpose.msra.mxu0 %v2884_v47  ;;  %9252 = vmatprep.subr.bf16.mxu1 %v17276_v16  ;;  %v17302_v28 = vld [vmem:[#allocation87_spill] sm:$0xff] }
 0x4c0   : > { %9594 = vmatprep.subr.msk.bf16.mxu0 %vm1828_vm0, %v17277_v57 }
 0x4c1   : > { %9237 = vmatmul.mubr.bf16.gmra.mrb[120].mxu1 %v3890_v44  ;;  %v17296_v44 = vld [vmem:[#allocation89_spill] sm:$0xff] }
 0x4c2   : > { %9240 = vmatprep.mubr.bf16.mxu1 %v3891_v54  ;;  %9253 = vmatpush3.bf16.msra.mxu1 %v17276_v16 }
 0x4c3   : > { %9254 = vmatprep.subr.bf16.mxu1 %v17278_v35 }
 0x4c6   : > { %9255 = vmatpush3.bf16.msra.mxu1 %v17278_v35  ;;  %v17297_v35 = vld [vmem:[#allocation59_spill] sm:$0xff] }
 0x4c7   : > { %9193 = vmatpush3.bf16.xpose.msra.mxu0 %v2887_v2  ;;  %9256 = vmatprep.subr.bf16.mxu1 %v12764_v63 }
 0x4c8   : > { %9595 = vmatprep.subr.msk.bf16.mxu0 %vm1828_vm0, %v17281_v43  ;;  %v17298_v43 = vld [vmem:[#allocation95_spill] sm:$0xff] }
 0x4c9   : > { %9241 = vmatmul.mubr.bf16.gmra.mrb[124].mxu1 %v3892_v50 }
 0x4ca   : > { %9257 = vmatpush3.bf16.msra.mxu1 %v12764_v63  ;;  %v17285_v63 = vld [vmem:[#allocation61_spill] sm:$0xff] }
 0x4cb   : > { %9258 = vmatprep.subr.bf16.mxu1 %v17282_v13 }
 0x4ce   : > { %9259 = vmatpush3.bf16.msra.mxu1 %v17282_v13 }
 0x4cf   : > { %9195 = vmatpush3.bf16.xpose.msra.mxu0 %v2890_v23  ;;  %9308 = vmatprep.subr.bf16.mxu1 %v17283_v20 }
 0x4d0   : > { %9276 = vmatprep.subr.bf16.mxu0 %v17284_v7 }
 0x4d6   : > { %9197 = vmatmul.mubr.msk.bf16.vlgmr.msra.gmra.mrb[96].mxu0 %vm1828_vm0, %v12891_v26  ;;  %v17288_v26 = vld [vmem:[#allocation71_spill] sm:$0xff] }
 0x4d7   : > { %9200 = vmatprep.mubr.msk.bf16.mxu0 %vm1828_vm0, %v12913_v27  ;;  %9277 = vmatpush3.bf16.msra.mxu0 %v17284_v7 }
 0x4d8   : > { %9278 = vmatprep.subr.bf16.mxu0 %v17285_v63 }
 0x4db   : > { %9279 = vmatpush3.bf16.msra.mxu0 %v17285_v63 }
 0x4dc   : > { %9280 = vmatprep.subr.bf16.mxu0 %v17286_v29 }
 0x4de   : > { %9201 = vmatmul.mubr.msk.bf16.gmra.mrb[100].mxu0 %vm1828_vm0, %v12953_v9 }
 0x4df   : > { %9204 = vmatprep.mubr.msk.bf16.mxu0 %vm1828_vm0, %v17287_v40  ;;  %9281 = vmatpush3.bf16.msra.mxu0 %v17286_v29 }
 0x4e0   : > { %9282 = vmatprep.subr.bf16.mxu0 %v17288_v26 }
 0x4e3   : > { %9283 = vmatpush3.bf16.msra.mxu0 %v17288_v26 }
 0x4e4   : > { %v9038_v27 = vpop.f32.mrb[64].mxu1  ;;  %9284 = vmatprep.subr.bf16.mxu0 %v17289_v32 }
 0x4e5   : > { %v13197_v10 = vadd.f32 %v9038_v27, %v17290_v31  ;;  %v2201_v48 = vpop.f32.mrb[65].mxu1  ;;  %v17300_v27 = vld [vmem:[#allocation99_spill] sm:$0xff] }
 0x4e6   : > { %v9039_v8 = vpop.f32.mrb[66].mxu1  ;;  %9205 = vmatmul.mubr.msk.bf16.gmra.mrb[104].mxu0 %vm1828_vm0, %v17291_v39  ;;  %v13232_v7 = vadd.f32 %v2201_v48, %v17296_v44 }
 0x4e7   : > { %3057 = vmax.xlane.f32.xlu0 %v13197_v10  ;;  %v2204_v9 = vpop.f32.mrb[67].mxu1  ;;  %9208 = vmatprep.mubr.msk.bf16.mxu0 %vm1828_vm0, %v17292_v6  ;;  %v13206_v17 = vadd.f32 %v9039_v8, %v17293_v60 }
 0x4e8   : > { %9285 = vmatpush3.bf16.msra.mxu0 %v17289_v32  ;;  %v13216_v47 = vadd.f32 %v2204_v9, %v17295_v18  ;;  %v17301_v9 = vld [vmem:[#allocation82_spill] sm:$0xff] }
 0x4e9   : > { %9286 = vmatprep.subr.bf16.mxu0 %v17294_v0  ;;  %v9006_v22 = vpop.f32.mrb[48].mxu0 }
 0x4ea   : > { %v13210_v59 = vadd.f32 %v9006_v22, %v17290_v31  ;;  %v2056_v4 = vpop.f32.mrb[49].mxu0 }
 0x4eb   : > { %v9007_v42 = vpop.f32.mrb[50].mxu0  ;;  %3059 = vmax.xlane.f32.xlu0 %v13206_v17  ;;  %v13220_v57 = vadd.f32 %v2056_v4, %v17296_v44 }
 0x4ec   : > { %9287 = vmatpush3.bf16.msra.mxu0 %v17294_v0  ;;  %3025 = vmax.xlane.f32.xlu1 %v13210_v59  ;;  %v2059_v14 = vpop.f32.mrb[51].mxu0  ;;  %v9042_v34 = vpop.f32.mrb[68].mxu1  ;;  %v13242_v39 = vadd.f32 %v9007_v42, %v17293_v60 }
 0x4ed   : > { %9288 = vmatprep.subr.bf16.mxu0 %v12784_v1  ;;  %v2217_v16 = vpop.f32.mrb[69].mxu1  ;;  %v13250_v22 = vadd.f32 %v2059_v14, %v17295_v18  ;;  %v13258_v38 = vadd.f32 %v9042_v34, %v17298_v43 }
 0x4ee   : > { %v9043_v54 = vpop.f32.mrb[70].mxu1  ;;  %9209 = vmatmul.mubr.msk.bf16.gmra.mrb[108].mxu0 %vm1828_vm0, %v17297_v35  ;;  %v13266_v3 = vadd.f32 %v2217_v16, %v17300_v27 }
 0x4ef   : > { %v2220_v2 = vpop.f32.mrb[71].mxu1  ;;  %3055 = vmax.xlane.f32.xlu0 %v13216_v47 }
 0x4f0   : > { %9289 = vmatpush3.bf16.msra.mxu0 %v12784_v1  ;;  %3021 = vmax.xlane.f32.xlu1 %v13220_v57  ;;  %v17299_v1 = vld [vmem:[#allocation31_spill] sm:$0xff]  ;;  %v13263_v19 = vadd.f32 %v2220_v2, %v17302_v28  ;;  %v17303_v2 = vld [vmem:[#allocation92_spill] sm:$0xff] }
 0x4f1   : > { %9290 = vmatprep.subr.bf16.mxu0 %v12725_v62  ;;  %v9010_v50 = vpop.f32.mrb[52].mxu0 }
 0x4f2   : > { %v13229_v13 = vadd.f32 %v9010_v50, %v17298_v43  ;;  %v2072_v23 = vpop.f32.mrb[53].mxu0 }
 0x4f3   : > { %v9011_v63 = vpop.f32.mrb[54].mxu0  ;;  %v13239_v32 = vadd.f32 %v2072_v23, %v17300_v27  ;;  %v13255_v23 = vadd.f32 %v9043_v54, %v17301_v9 }
 0x4f4   : > { %9291 = vmatpush3.bf16.msra.mxu0 %v12725_v62  ;;  %v2075_v29 = vpop.f32.mrb[55].mxu0  ;;  %v9046_v40 = vpop.f32.mrb[72].mxu1  ;;  %3033 = vmax.xlane.f32.xlu0 %v13229_v13  ;;  %v13247_v6 = vadd.f32 %v9011_v63, %v17301_v9 }
 0x4f5   : > { %3053 = vmax.xlane.f32.xlu1 %v13232_v7  ;;  %9340 = vmatprep.subr.bf16.mxu0 %v17299_v1  ;;  %v2233_v26 = vpop.f32.mrb[73].mxu1  ;;  %v13274_v25 = vadd.f32 %v2075_v29, %v17302_v28  ;;  %v13282_v16 = vadd.f32 %v9046_v40, %v12741_v11 }
 0x4f6   : > { %v9047_v8 = vpop.f32.mrb[74].mxu1  ;;  %v13298_v40 = vadd.f32 %v2233_v26, %v12760_v41 }
 0x4f7   : > { %v2236_v48 = vpop.f32.mrb[75].mxu1 }
 0x4f8   : > { %3029 = vmax.xlane.f32.xlu0 %v13239_v32 }
 0x4f9   : > { %3027 = vmax.xlane.f32.xlu1 %v13242_v39  ;;  %v9014_v62 = vpop.f32.mrb[56].mxu0 }
 0x4fa   : > { %v2088_v0 = vpop.f32.mrb[57].mxu0  ;;  %v13271_v34 = vadd.f32 %v9014_v62, %v12741_v11 }
 0x4fb   : > { %v9015_v4 = vpop.f32.mrb[58].mxu0  ;;  %v13290_v29 = vadd.f32 %v2088_v0, %v12760_v41  ;;  %v13306_v0 = vadd.f32 %v9047_v8, %v17303_v2 }
 0x4fc   : > { %v2091_v35 = vpop.f32.mrb[59].mxu0  ;;  %v9050_v50 = vpop.f32.mrb[76].mxu1  ;;  %3035 = vmax.xlane.f32.xlu0 %v13247_v6  ;;  %v13279_v56 = vadd.f32 %v9015_v4, %v17303_v2  ;;  %v13295_v4 = vadd.f32 %v2236_v48, %v17304_v24 }
 0x4fd   : > { %3023 = vmax.xlane.f32.xlu1 %v13250_v22  ;;  %v2249_v42 = vpop.f32.mrb[77].mxu1  ;;  %v13287_v62 = vadd.f32 %v2091_v35, %v17304_v24  ;;  %v13322_v8 = vadd.f32 %v9050_v50, %v12782_v52 }
 0x4fe   : > { %v9051_v55 = vpop.f32.mrb[78].mxu1  ;;  %v13303_v35 = vadd.f32 %v2249_v42, %v12799_v36 }
 0x4ff   : > { %v2252_v63 = vpop.f32.mrb[79].mxu1  ;;  %17311 = vst [vmem:[#allocation88_spill] sm:$0xff] %v13322_v8 }
 0x500   : > { %3067 = vmax.xlane.f32.xlu0 %v13255_v23  ;;  %17305 = vst [vmem:[#allocation80_spill] sm:$0xff] %v13303_v35 }
 0x501   : > { %3065 = vmax.xlane.f32.xlu1 %v13258_v38  ;;  %v9018_v14 = vpop.f32.mrb[60].mxu0 }
 0x502   : > { %v2104_v61 = vpop.f32.mrb[61].mxu0  ;;  %v13314_v26 = vadd.f32 %v9018_v14, %v12782_v52 }
 0x503   : > { %v9019_v15 = vpop.f32.mrb[62].mxu0 }
 0x504   : > { %v2107_v54 = vpop.f32.mrb[63].mxu0  ;;  %3063 = vmax.xlane.f32.xlu0 %v13263_v19  ;;  %v13311_v48 = vadd.f32 %v9019_v15, %v17306_v49  ;;  %17308 = vst [vmem:[#allocation40_spill] sm:$0xff] %v13314_v26  ;;  %v13327_v15 = vadd.f32 %v2104_v61, %v12799_v36  ;;  %v13339_v61 = vadd.f32 %v2252_v63, %v17309_v5 }
 0x505   : > { %3061 = vmax.xlane.f32.xlu1 %v13266_v3  ;;  %v13319_v42 = vadd.f32 %v2107_v54, %v17309_v5  ;;  %v13334_v54 = vadd.f32 %v9051_v55, %v17306_v49 }
 0x506   : > { %17307 = vst [vmem:[#allocation25_spill] sm:$0xff] %v13311_v48  ;;  %17312 = vst [vmem:[#allocation91_spill] sm:$0xff] %v13327_v15 }
 0x507   : > { %17310 = vst [vmem:[#allocation24_spill] sm:$0xff] %v13319_v42  ;;  %17314 = vst [vmem:[#allocation27_spill] sm:$0xff] %v13334_v54 }
 0x508   : > { %3041 = vmax.xlane.f32.xlu0 %v13271_v34  ;;  %17315 = vst [vmem:[#allocation42_spill] sm:$0xff] %v13339_v61 }
 0x509   : > { %3031 = vmax.xlane.f32.xlu1 %v13274_v25 }
 0x50c   : > { %3043 = vmax.xlane.f32.xlu0 %v13279_v56 }
 0x50d   : > { %3073 = vmax.xlane.f32.xlu1 %v13282_v16 }
 0x510   : > { %3039 = vmax.xlane.f32.xlu0 %v13287_v62 }
 0x511   : > { %3037 = vmax.xlane.f32.xlu1 %v13290_v29 }
 0x514   : > { %3071 = vmax.xlane.f32.xlu0 %v13295_v4 }
 0x515   : > { %3069 = vmax.xlane.f32.xlu1 %v13298_v40 }
 0x518   : > { %3077 = vmax.xlane.f32.xlu0 %v13303_v35 }
 0x519   : > { %3075 = vmax.xlane.f32.xlu1 %v13306_v0 }
 0x51c   : > { %3051 = vmax.xlane.f32.xlu0 %v13311_v48 }
 0x51d   : > { %3049 = vmax.xlane.f32.xlu1 %v13314_v26 }
 0x520   : > { %3047 = vmax.xlane.f32.xlu0 %v13319_v42 }
 0x521   : > { %3081 = vmax.xlane.f32.xlu1 %v13322_v8 }
 0x524   : > { %v9102_v45 = vpop.f32.mrb[80].mxu1 }
 0x525   : > { %v13330_v14 = vadd.f32 %v9102_v45, %v17290_v31  ;;  %3045 = vmax.xlane.f32.xlu1 %v13327_v15  ;;  %v2491_v58 = vpop.f32.mrb[81].mxu1 }
 0x526   : > { %v9103_v37 = vpop.f32.mrb[82].mxu1  ;;  %v13355_v35 = vadd.f32 %v2491_v58, %v17296_v44 }
 0x527   : > { %17313 = vst [vmem:[#allocation38_spill] sm:$0xff] %v13330_v14  ;;  %v2494_v50 = vpop.f32.mrb[83].mxu1  ;;  %3121 = vmax.xlane.f32.xlu0 %v13330_v14 }
 0x528   : > { %17319 = vst [vmem:[#allocation48_spill] sm:$0xff] %v13355_v35 }
 0x529   : > { %3083 = vmax.xlane.f32.xlu1 %v13334_v54  ;;  %v9070_v33 = vpop.f32.mrb[64].mxu0 }
 0x52a   : > { %v2346_v30 = vpop.f32.mrb[65].mxu0  ;;  %v13347_v14 = vadd.f32 %v9070_v33, %v17290_v31 }
 0x52b   : > { %v13342_v45 = vadd.f32 %v2346_v30, %v17296_v44  ;;  %v9071_v53 = vpop.f32.mrb[66].mxu0 }
 0x52c   : > { %v9106_v12 = vpop.f32.mrb[84].mxu1  ;;  %v2349_v51 = vpop.f32.mrb[67].mxu0  ;;  %17317 = vst [vmem:[#allocation26_spill] sm:$0xff] %v13347_v14  ;;  %v13350_v8 = vadd.f32 %v9071_v53, %v17293_v60 }
 0x52d   : > { %17316 = vst [vmem:[#allocation51_spill] sm:$0xff] %v13342_v45  ;;  %3079 = vmax.xlane.f32.xlu1 %v13339_v61  ;;  %v2507_v55 = vpop.f32.mrb[85].mxu1  ;;  %3085 = vmax.xlane.f32.xlu0 %v13342_v45  ;;  %v13358_v61 = vadd.f32 %v2349_v51, %v17295_v18 }
 0x52e   : > { %v9107_v21 = vpop.f32.mrb[86].mxu1  ;;  %17318 = vst [vmem:[#allocation85_spill] sm:$0xff] %v13350_v8 }
 0x52f   : > { %v2510_v63 = vpop.f32.mrb[87].mxu1  ;;  %17320 = vst [vmem:[#allocation50_spill] sm:$0xff] %v13358_v61 }
 0x531   : > { %3089 = vmax.xlane.f32.xlu1 %v13347_v14  ;;  %v9074_v30 = vpop.f32.mrb[68].mxu0  ;;  %3091 = vmax.xlane.f32.xlu0 %v13350_v8  ;;  %v13365_v14 = vadd.f32 %v9103_v37, %v17293_v60  ;;  %v13368_v8 = vadd.f32 %v2494_v50, %v17295_v18 }
 0x532   : > { %v2362_v54 = vpop.f32.mrb[69].mxu0 }
 0x533   : > { %v9075_v45 = vpop.f32.mrb[70].mxu0  ;;  %17321 = vst [vmem:[#allocation29_spill] sm:$0xff] %v13365_v14  ;;  %17322 = vst [vmem:[#allocation58_spill] sm:$0xff] %v13368_v8 }
 0x534   : > { %v9110_v46 = vpop.f32.mrb[88].mxu1  ;;  %v2365_v33 = vpop.f32.mrb[71].mxu0 }
 0x535   : > { %3117 = vmax.xlane.f32.xlu1 %v13355_v35  ;;  %v2523_v53 = vpop.f32.mrb[89].mxu1  ;;  %3087 = vmax.xlane.f32.xlu0 %v13358_v61  ;;  %v13373_v35 = vadd.f32 %v9106_v12, %v17298_v43  ;;  %v13376_v61 = vadd.f32 %v9074_v30, %v17298_v43  ;;  %v13390_v12 = vadd.f32 %v2362_v54, %v17300_v27 }
 0x536   : > { %v13362_v15 = vpop.f32.mrb[90].mxu1  ;;  %v13405_v54 = vadd.f32 %v9107_v21, %v17301_v9 }
 0x537   : > { %v2526_v58 = vpop.f32.mrb[91].mxu1  ;;  %17323 = vst [vmem:[#allocation28_spill] sm:$0xff] %v13373_v35  ;;  %17324 = vst [vmem:[#allocation56_spill] sm:$0xff] %v13376_v61 }
 0x538   : > { %17330 = vst [vmem:[#allocation70_spill] sm:$0xff] %v13405_v54 }
 0x539   : > { %3123 = vmax.xlane.f32.xlu1 %v13365_v14  ;;  %v9078_v51 = vpop.f32.mrb[72].mxu0  ;;  %3119 = vmax.xlane.f32.xlu0 %v13368_v8  ;;  %v13387_v8 = vadd.f32 %v2507_v55, %v17300_v27 }
 0x53a   : > { %v2378_v42 = vpop.f32.mrb[73].mxu0 }
 0x53b   : > { %v9079_v26 = vpop.f32.mrb[74].mxu0  ;;  %17328 = vst [vmem:[#allocation73_spill] sm:$0xff] %v13387_v8 }
 0x53c   : > { %v13378_v48 = vpop.f32.mrb[92].mxu1  ;;  %v2381_v37 = vpop.f32.mrb[75].mxu0  ;;  %v13421_v21 = vadd.f32 %v9079_v26, %v17303_v2  ;;  %v13437_v26 = vadd.f32 %v2526_v58, %v17304_v24 }
 0x53d   : > { %17325 = vst [vmem:[#allocation65_spill] sm:$0xff] %v13378_v48  ;;  %3129 = vmax.xlane.f32.xlu1 %v13373_v35  ;;  %v13381_v50 = vpop.f32.mrb[93].mxu1  ;;  %3097 = vmax.xlane.f32.xlu0 %v13376_v61  ;;  %v13400_v61 = vadd.f32 %v9075_v45, %v17301_v9  ;;  %v13416_v45 = vadd.f32 %v2378_v42, %v12760_v41 }
 0x53e   : > { %17326 = vst [vmem:[#allocation39_spill] sm:$0xff] %v13381_v50  ;;  %v13384_v14 = vpop.f32.mrb[94].mxu1  ;;  %v13397_v50 = vadd.f32 %v2510_v63, %v17302_v28  ;;  %v13413_v63 = vadd.f32 %v2365_v33, %v17302_v28  ;;  %17334 = vst [vmem:[#allocation64_spill] sm:$0xff] %v13421_v21  ;;  %v13429_v33 = vadd.f32 %v2523_v53, %v12760_v41 }
 0x53f   : > { %17327 = vst [vmem:[#allocation66_spill] sm:$0xff] %v13384_v14  ;;  %v13392_v30 = vpop.f32.mrb[95].mxu1  ;;  %17329 = vst [vmem:[#allocation47_spill] sm:$0xff] %v13400_v61  ;;  %v13432_v42 = vadd.f32 %v2381_v37, %v17304_v24  ;;  %v13445_v53 = vadd.f32 %v9110_v46, %v12741_v11 }
 0x540   : > { %17332 = vst [vmem:[#allocation55_spill] sm:$0xff] %v13413_v63  ;;  %17333 = vst [vmem:[#allocation78_spill] sm:$0xff] %v13416_v45 }
 0x541   : > { %3125 = vmax.xlane.f32.xlu1 %v13387_v8  ;;  %v9082_v48 = vpop.f32.mrb[76].mxu0  ;;  %3093 = vmax.xlane.f32.xlu0 %v13390_v12  ;;  %v13408_v8 = vadd.f32 %v9078_v51, %v12741_v11  ;;  %17336 = vst [vmem:[#allocation69_spill] sm:$0xff] %v13429_v33  ;;  %17337 = vst [vmem:[#allocation67_spill] sm:$0xff] %v13432_v42 }
 0x542   : > { %v2394_v35 = vpop.f32.mrb[77].mxu0  ;;  %17338 = vst [vmem:[#allocation61_spill] sm:$0xff] %v13437_v26  ;;  %17340 = vst [vmem:[#allocation41_spill] sm:$0xff] %v13445_v53 }
 0x543   : > { %v9083_v14 = vpop.f32.mrb[78].mxu0  ;;  %17331 = vst [vmem:[#allocation86_spill] sm:$0xff] %v13408_v8  ;;  %v13424_v51 = vadd.f32 %v2394_v35, %v12799_v36  ;;  %v13440_v35 = vadd.f32 %v9082_v48, %v12782_v52 }
 0x544   : > { %v2397_v55 = vpop.f32.mrb[79].mxu0  ;;  %v13448_v37 = vadd.f32 %v9083_v14, %v17306_v49 }
 0x545   : > { %3127 = vmax.xlane.f32.xlu1 %v13397_v50  ;;  %3099 = vmax.xlane.f32.xlu0 %v13400_v61  ;;  %17335 = vst [vmem:[#allocation97_spill] sm:$0xff] %v13424_v51  ;;  %17339 = vst [vmem:[#allocation75_spill] sm:$0xff] %v13440_v35  ;;  %v13453_v58 = vadd.f32 %v2397_v55, %v17309_v5 }
 0x546   : > { %17341 = vst [vmem:[#allocation71_spill] sm:$0xff] %v13448_v37 }
 0x547   : > { %17342 = vst [vmem:[#allocation84_spill] sm:$0xff] %v13453_v58 }
 0x549   : > { %3105 = vmax.xlane.f32.xlu1 %v13408_v8  ;;  %3131 = vmax.xlane.f32.xlu0 %v13405_v54 }
 0x54d   : > { %3101 = vmax.xlane.f32.xlu1 %v13416_v45  ;;  %3095 = vmax.xlane.f32.xlu0 %v13413_v63 }
 0x551   : > { %3107 = vmax.xlane.f32.xlu1 %v13421_v21  ;;  %3109 = vmax.xlane.f32.xlu0 %v13424_v51 }
 0x555   : > { %3103 = vmax.xlane.f32.xlu1 %v13432_v42  ;;  %3133 = vmax.xlane.f32.xlu0 %v13429_v33 }
 0x559   : > { %3113 = vmax.xlane.f32.xlu1 %v13440_v35  ;;  %3135 = vmax.xlane.f32.xlu0 %v13437_v26 }
 0x55d   : > { %3115 = vmax.xlane.f32.xlu1 %v13448_v37  ;;  %3137 = vmax.xlane.f32.xlu0 %v13445_v53 }
 0x561   : > { %3111 = vmax.xlane.f32.xlu1 %v13453_v58 }
 0x564   : > { %v13456_v48 = vpop.f32.mrb[96].mxu1 }
 0x565   : > { %17343 = vst [vmem:[#allocation43_spill] sm:$0xff] %v13456_v48  ;;  %v13458_v35 = vpop.f32.mrb[97].mxu1 }
 0x566   : > { %17344 = vst [vmem:[#allocation52_spill] sm:$0xff] %v13458_v35  ;;  %v13460_v51 = vpop.f32.mrb[98].mxu1 }
 0x567   : > { %17345 = vst [vmem:[#allocation76_spill] sm:$0xff] %v13460_v51  ;;  %v13462_v46 = vpop.f32.mrb[99].mxu1 }
 0x568   : > { %17346 = vst [vmem:[#allocation59_spill] sm:$0xff] %v13462_v46 }
 0x569   : > { %v9134_v26 = vpop.f32.mrb[80].mxu0 }
 0x56a   : > { %v13465_v14 = vadd.f32 %v9134_v26, %v17290_v31  ;;  %v2636_v37 = vpop.f32.mrb[81].mxu0 }
 0x56b   : > { %v9135_v33 = vpop.f32.mrb[82].mxu0  ;;  %v13473_v48 = vadd.f32 %v2636_v37, %v17296_v44 }
 0x56c   : > { %17347 = vst [vmem:[#allocation95_spill] sm:$0xff] %v13465_v14  ;;  %3153 = vmax.xlane.f32.xlu0 %v13465_v14  ;;  %v2639_v55 = vpop.f32.mrb[83].mxu0  ;;  %v13468_v53 = vpop.f32.mrb[100].mxu1  ;;  %v13483_v31 = vadd.f32 %v9135_v33, %v17293_v60  ;;  %v17354_v14 = vld [vmem:[#allocation35_spill] sm:$0xff] }
 0x56d   : > { %17348 = vst [vmem:[#allocation31_spill] sm:$0xff] %v13468_v53  ;;  %v13470_v58 = vpop.f32.mrb[101].mxu1  ;;  %17350 = vst [vmem:[#allocation82_spill] sm:$0xff] %v13473_v48  ;;  %v13499_v44 = vadd.f32 %v2639_v55, %v17295_v18 }
 0x56e   : > { %17349 = vst [vmem:[#allocation99_spill] sm:$0xff] %v13470_v58  ;;  %v13475_v35 = vpop.f32.mrb[102].mxu1  ;;  %17353 = vst [vmem:[#allocation94_spill] sm:$0xff] %v13483_v31 }
 0x56f   : > { %17351 = vst [vmem:[#allocation87_spill] sm:$0xff] %v13475_v35  ;;  %v13477_v51 = vpop.f32.mrb[103].mxu1  ;;  %17357 = vst [vmem:[#allocation110_spill] sm:$0xff] %v13499_v44 }
 0x570   : > { %17352 = vst [vmem:[#allocation92_spill] sm:$0xff] %v13477_v51  ;;  %3149 = vmax.xlane.f32.xlu0 %v13473_v48 }
 0x571   : > { %v13480_v26 = vpop.f32.mrb[84].mxu0 }
 0x572   : > { %1713 = vrot.lane.b32.xlu1 %v17354_v14, %s11219_s22  ;;  %v13487_v53 = vpop.f32.mrb[85].mxu0 }
 0x573   : > { %v13489_v58 = vpop.f32.mrb[86].mxu0 }
 0x574   : > { %3155 = vmax.xlane.f32.xlu0 %v13483_v31  ;;  %v13492_v37 = vpop.f32.mrb[87].mxu0  ;;  %v13494_v35 = vpop.f32.mrb[104].mxu1 }
 0x575   : > { %17355 = vst [vmem:[#allocation100_spill] sm:$0xff] %v13494_v35  ;;  %v3058_v51 = vpop.xlane.xlu0 %3057  ;;  %v13496_v48 = vpop.f32.mrb[105].mxu1 }
 0x576   : > { %17356 = vst [vmem:[#allocation35_spill] sm:$0xff] %v13496_v48  ;;  %v13501_v33 = vpop.f32.mrb[106].mxu1 }
 0x577   : > { %17358 = vst [vmem:[#allocation111_spill] sm:$0xff] %v13501_v33  ;;  %v13503_v60 = vpop.f32.mrb[107].mxu1 }
 0x578   : > { %17359 = vst [vmem:[#allocation112_spill] sm:$0xff] %v13503_v60  ;;  %3151 = vmax.xlane.f32.xlu0 %v13499_v44 }
 0x579   : > { %v3060_v46 = vpop.xlane.xlu0 %3059  ;;  %v3026_v42 = vpop.xlane.xlu1 %3025 }
 0x57a   : > { %v9142_v8 = vpop.f32.mrb[88].mxu0  ;;  %v3280_v48 = vsub.f32 %v13206_v17, %v3060_v46 }
 0x57b   : > { %v13507_v31 = vadd.f32 %v9142_v8, %v12741_v11  ;;  %v2668_v21 = vpop.f32.mrb[89].mxu0  ;;  %v3279_v11 = vsub.f32 %v13197_v10, %v3058_v51 }
 0x57c   : > { %v9143_v35 = vpop.f32.mrb[90].mxu0  ;;  %v13509_v45 = vpop.f32.mrb[108].mxu1  ;;  %v13517_v63 = vadd.f32 %v2668_v21, %v12760_v41 }
 0x57d   : > { %17360 = vst [vmem:[#allocation113_spill] sm:$0xff] %v13507_v31  ;;  %17361 = vst [vmem:[#allocation114_spill] sm:$0xff] %v13509_v45  ;;  %3169 = vmax.xlane.f32.xlu0 %v13507_v31  ;;  %v2671_v55 = vpop.f32.mrb[91].mxu0  ;;  %v3056_v33 = vpop.xlane.xlu0 %3055  ;;  %v3443_v45 = vmul.f32 1.442695, %v3280_v48  ;;  %v13532_v21 = vadd.f32 %v9143_v35, %v17303_v2 }
 0x57e   : > { %v3278_v60 = vsub.f32 %v13216_v47, %v3056_v33  ;;  %v3022_v18 = vpop.xlane.xlu1 %3021  ;;  %v13514_v44 = vpop.f32.mrb[109].mxu1  ;;  %17363 = vst [vmem:[#allocation116_spill] sm:$0xff] %v13517_v63  ;;  %v3441_v10 = vmul.f32 1.442695, %v3279_v11 }
 0x57f   : > { %17362 = vst [vmem:[#allocation115_spill] sm:$0xff] %v13514_v44  ;;  %v13519_v8 = vpop.f32.mrb[110].mxu1  ;;  %10154 = vpow2.f32 %v3443_v45 }
 0x580   : > { %17364 = vst [vmem:[#allocation117_spill] sm:$0xff] %v13519_v8  ;;  %v13522_v54 = vpop.f32.mrb[111].mxu1  ;;  %v3439_v47 = vmul.f32 1.442695, %v3278_v60 }
 0x581   : > { %17365 = vst [vmem:[#allocation118_spill] sm:$0xff] %v13522_v54  ;;  %3165 = vmax.xlane.f32.xlu0 %v13517_v63  ;;  %v13525_v17 = vpop.f32.mrb[92].mxu0  ;;  %v13527_v46 = vpop.xlane.xlu0 %3033  ;;  %v3261_v54 = vsub.f32 %v13220_v57, %v3022_v18  ;;  %v3263_v18 = vsub.f32 %v13210_v59, %v3026_v42 }
 0x582   : > { %v3054_v33 = vpop.xlane.xlu1 %3053  ;;  %v13529_v31 = vpop.f32.mrb[93].mxu0  ;;  %10156 = vpow2.f32 %v3439_v47 }
 0x583   : > { %v3277_v44 = vsub.f32 %v13232_v7, %v3054_v33  ;;  %v13535_v8 = vpop.f32.mrb[94].mxu0  ;;  %v13548_v7 = vadd.f32 %v2671_v55, %v17304_v24 }
 0x584   : > { %v13537_v51 = vpop.f32.mrb[95].mxu0  ;;  %v13539_v48 = vpop.f32.mrb[112].mxu1 }
 0x585   : > { %17366 = vst [vmem:[#allocation119_spill] sm:$0xff] %v13539_v48  ;;  %v3437_v41 = vmul.f32 1.442695, %v3277_v44  ;;  %3171 = vmax.xlane.f32.xlu0 %v13532_v21  ;;  %v13543_v60 = vpop.f32.mrb[113].mxu1  ;;  %v3030_v63 = vpop.xlane.xlu0 %3029  ;;  %v3405_v44 = vmul.f32 1.442695, %v3261_v54 }
 0x586   : > { %17367 = vst [vmem:[#allocation120_spill] sm:$0xff] %v13543_v60  ;;  %v3028_v35 = vpop.xlane.xlu1 %3027  ;;  %v13545_v61 = vpop.f32.mrb[114].mxu1 }
 0x587   : > { %17368 = vst [vmem:[#allocation121_spill] sm:$0xff] %v13545_v61  ;;  %10158 = vpow2.f32 %v3437_v41  ;;  %v3264_v11 = vsub.f32 %v13242_v39, %v3028_v35  ;;  %v13551_v33 = vpop.f32.mrb[115].mxu1  ;;  %v3409_v61 = vmul.f32 1.442695, %v3263_v18 }
 0x588   : > { %17369 = vst [vmem:[#allocation122_spill] sm:$0xff] %v13551_v33  ;;  %10160 = vpow2.f32 %v3441_v10  ;;  %v17412_v33 = vld [vmem:[#allocation40_spill] sm:$0xff] }
 0x589   : > { %3167 = vmax.xlane.f32.xlu0 %v13548_v7  ;;  %v3036_v57 = vpop.xlane.xlu0 %3035  ;;  %v3411_v45 = vmul.f32 1.442695, %v3264_v11  ;;  %10162 = vpow2.f32 %v3405_v44  ;;  %v13563_v42 = vpop.eup %10154  ;;  %v3265_v44 = vsub.f32 %v13239_v32, %v3030_v63  ;;  %v13584_v32 = vadd.f32 %v13480_v26, %v17298_v43 }
 0x58a   : > { %v3024_v47 = vpop.xlane.xlu1 %3023  ;;  %17373 = vst [vmem:[#allocation126_spill] sm:$0xff] %v13563_v42 }
 0x58b   : > { %v3262_v48 = vsub.f32 %v13250_v22, %v3024_v47  ;;  %10164 = vpow2.f32 %v3411_v45 }
 0x58c   : > { %v13556_v60 = vpop.f32.mrb[116].mxu1  ;;  %v13568_v11 = vpop.eup %10156 }
 0x58d   : > { %17370 = vst [vmem:[#allocation123_spill] sm:$0xff] %v13556_v60  ;;  %v3407_v41 = vmul.f32 1.442695, %v3262_v48  ;;  %v13558_v55 = vpop.f32.mrb[117].mxu1  ;;  %v3068_v39 = vpop.xlane.xlu0 %3067  ;;  %17375 = vst [vmem:[#allocation128_spill] sm:$0xff] %v13568_v11 }
 0x58e   : > { %17371 = vst [vmem:[#allocation124_spill] sm:$0xff] %v13558_v55  ;;  %v3066_v10 = vpop.xlane.xlu1 %3065  ;;  %v3284_v59 = vsub.f32 %v13255_v23, %v3068_v39  ;;  %v13561_v54 = vpop.f32.mrb[118].mxu1  ;;  %v3268_v39 = vsub.f32 %v13247_v6, %v3036_v57  ;;  %v3413_v6 = vmul.f32 1.442695, %v3265_v44 }
 0x58f   : > { %17372 = vst [vmem:[#allocation125_spill] sm:$0xff] %v13561_v54  ;;  %10166 = vpow2.f32 %v3407_v41  ;;  %v3283_v35 = vsub.f32 %v13258_v38, %v3066_v10  ;;  %v13566_v22 = vpop.f32.mrb[119].mxu1 }
 0x590   : > { %17374 = vst [vmem:[#allocation127_spill] sm:$0xff] %v13566_v22  ;;  %10168 = vpow2.f32 %v3409_v61  ;;  %v3451_v48 = vmul.f32 1.442695, %v3284_v59 }
 0x591   : > { %v13570_v18 = vpop.eup %10158  ;;  %v3449_v45 = vmul.f32 1.442695, %v3283_v35  ;;  %v3064_v47 = vpop.xlane.xlu0 %3063  ;;  %v3419_v35 = vmul.f32 1.442695, %v3268_v39  ;;  %v13606_v39 = vadd.f32 %v13487_v53, %v17300_v27 }
 0x592   : > { %17376 = vst [vmem:[#allocation129_spill] sm:$0xff] %v13570_v18  ;;  %v13573_v23 = vpop.eup %10160  ;;  %v3062_v54 = vpop.xlane.xlu1 %3061  ;;  %v3282_v41 = vsub.f32 %v13263_v19, %v3064_v47  ;;  %v3901_v38 = vpack.c.bf16 %v13568_v11, %v13570_v18  ;;  %10170 = vpow2.f32 %v3451_v48  ;;  %v3267_v19 = vsub.f32 %v13229_v13, %v13527_v46  ;;  %v17382_v46 = vld [vmem:[#allocation30_spill] sm:$0xff] }
 0x593   : > { %17377 = vst [vmem:[#allocation130_spill] sm:$0xff] %v13573_v23  ;;  %v3281_v10 = vsub.f32 %v13266_v3, %v3062_v54  ;;  %v3902_v61 = vpack.c.bf16 %v13563_v42, %v13573_v23  ;;  %10172 = vpow2.f32 %v3449_v45  ;;  %v13596_v47 = vpop.eup %10162 }
 0x594   : > { %v3447_v63 = vmul.f32 1.442695, %v3282_v41  ;;  %9292 = vmatprep.mubr.bf16.mxu0 %v3901_v38  ;;  %v13586_v59 = vpop.f32.mrb[120].mxu1  ;;  %17381 = vst [vmem:[#allocation134_spill] sm:$0xff] %v13596_v47  ;;  %v3417_v38 = vmul.f32 1.442695, %v3267_v19 }
 0x595   : > { %17378 = vst [vmem:[#allocation131_spill] sm:$0xff] %v13586_v59  ;;  %v3445_v57 = vmul.f32 1.442695, %v3281_v10  ;;  %9293 = vmatmul.mubr.bf16.vlgmr.msra.gmra.mrb[112].mxu0 %v3902_v61  ;;  %v13590_v3 = vpop.f32.mrb[121].mxu1  ;;  %v3042_v54 = vpop.xlane.xlu0 %3041 }
 0x596   : > { %17379 = vst [vmem:[#allocation132_spill] sm:$0xff] %v13590_v3  ;;  %10174 = vpow2.f32 %v3447_v63  ;;  %9341 = vmatpush3.bf16.msra.mxu0 %v17299_v1  ;;  %v3032_v26 = vpop.xlane.xlu1 %3031  ;;  %3161 = vmax.xlane.f32.xlu1 %v13584_v32  ;;  %v13594_v48 = vpop.f32.mrb[122].mxu1 }
 0x597   : > { %17380 = vst [vmem:[#allocation133_spill] sm:$0xff] %v13594_v48  ;;  %10176 = vpow2.f32 %v3445_v57  ;;  %v3266_v13 = vsub.f32 %v13274_v25, %v3032_v26  ;;  %9342 = vmatprep.subr.bf16.mxu0 %v17382_v46  ;;  %v13600_v44 = vpop.f32.mrb[123].mxu1  ;;  %v13602_v45 = vpop.eup %10164  ;;  %v17387_v26 = vld [vmem:[#allocation33_spill] sm:$0xff] }
 0x598   : > { %17383 = vst [vmem:[#allocation30_spill] sm:$0xff] %v13600_v44  ;;  %17384 = vst [vmem:[#allocation135_spill] sm:$0xff] %v13602_v45  ;;  %10178 = vpow2.f32 %v3413_v6 }
 0x599   : > { %v13608_v41 = vpop.eup %10166  ;;  %v3415_v10 = vmul.f32 1.442695, %v3266_v13  ;;  %v3044_v61 = vpop.xlane.xlu0 %3043  ;;  %10180 = vpow2.f32 %v3419_v35  ;;  %v13624_v35 = vadd.f32 %v13489_v58, %v17301_v9  ;;  %v3271_v13 = vsub.f32 %v13271_v34, %v3042_v54  ;;  %v17393_v54 = vld [vmem:[#allocation62_spill] sm:$0xff] }
 0x59a   : > { %17385 = vst [vmem:[#allocation136_spill] sm:$0xff] %v13608_v41  ;;  %v13610_v63 = vpop.eup %10168  ;;  %9343 = vmatpush3.bf16.msra.mxu0 %v17382_v46  ;;  %v3074_v25 = vpop.xlane.xlu1 %3073  ;;  %3157 = vmax.xlane.f32.xlu1 %v13606_v39  ;;  %v3272_v57 = vsub.f32 %v13279_v56, %v3044_v61  ;;  %v3893_v53 = vpack.c.bf16 %v13608_v41, %v13596_v47 }
 0x59b   : > { %17386 = vst [vmem:[#allocation137_spill] sm:$0xff] %v13610_v63  ;;  %10182 = vpow2.f32 %v3415_v10  ;;  %9344 = vmatprep.subr.bf16.mxu0 %v17387_v26  ;;  %v3894_v19 = vpack.c.bf16 %v13602_v45, %v13610_v63  ;;  %v17425_v63 = vld [vmem:[#allocation27_spill] sm:$0xff] }
 0x59c   : > { %9260 = vmatprep.mubr.bf16.mxu1 %v3893_v53  ;;  %v13620_v6 = vpop.f32.mrb[124].mxu1  ;;  %10184 = vpow2.f32 %v3417_v38  ;;  %v3427_v56 = vmul.f32 1.442695, %v3272_v57  ;;  %v13629_v48 = vpop.eup %10170 }
 0x59d   : > { %17388 = vst [vmem:[#allocation33_spill] sm:$0xff] %v13620_v6  ;;  %9261 = vmatmul.mubr.bf16.vlgmr.msra.gmra.mrb[128].mxu1 %v3894_v19  ;;  %v13627_v61 = vpop.f32.mrb[125].mxu1  ;;  %v3040_v10 = vpop.xlane.xlu0 %3039  ;;  %17390 = vst [vmem:[#allocation139_spill] sm:$0xff] %v13629_v48 }
 0x59e   : > { %17389 = vst [vmem:[#allocation138_spill] sm:$0xff] %v13627_v61  ;;  %9309 = vmatpush3.bf16.msra.mxu1 %v17283_v20  ;;  %9345 = vmatpush3.bf16.msra.mxu0 %v17387_v26  ;;  %v3038_v53 = vpop.xlane.xlu1 %3037  ;;  %v3270_v6 = vsub.f32 %v13287_v62, %v3040_v10  ;;  %v13634_v59 = vpop.f32.mrb[126].mxu1  ;;  %v17396_v20 = vld [vmem:[#allocation32_spill] sm:$0xff]  ;;  %v17397_v61 = vld [vmem:[#allocation34_spill] sm:$0xff]  ;;  %v13652_v10 = vadd.f32 %v13492_v37, %v17302_v28  ;;  %10186 = vpow2.f32 %v3427_v56  ;;  %v17402_v56 = vld [vmem:[#allocation37_spill] sm:$0xff] }
 0x59f   : > { %17391 = vst [vmem:[#allocation140_spill] sm:$0xff] %v13634_v59  ;;  %v13636_v58 = vpop.eup %10172  ;;  %v3269_v34 = vsub.f32 %v13290_v29, %v3038_v53  ;;  %3163 = vmax.xlane.f32.xlu1 %v13624_v35  ;;  %9310 = vmatprep.subr.bf16.mxu1 %v17393_v54  ;;  %v13641_v38 = vpop.f32.mrb[127].mxu1  ;;  %v3425_v29 = vmul.f32 1.442695, %v3271_v13  ;;  %v17400_v13 = vld [vmem:[#allocation74_spill] sm:$0xff] }
 0x5a0   : > { %17392 = vst [vmem:[#allocation141_spill] sm:$0xff] %v13636_v58  ;;  %17394 = vst [vmem:[#allocation62_spill] sm:$0xff] %v13641_v38  ;;  %v13643_v57 = vpop.eup %10174  ;;  %9346 = vmatprep.subr.bf16.mxu0 %v17396_v20  ;;  %v3423_v19 = vmul.f32 1.442695, %v3270_v6  ;;  %1715 = vrot.lane.b32.xlu0 %v17397_v61, %s11219_s22  ;;  %v3287_v38 = vsub.f32 %v13282_v16, %v3074_v25 }
 0x5a1   : > { %17395 = vst [vmem:[#allocation142_spill] sm:$0xff] %v13643_v57  ;;  %v13648_v62 = vpop.eup %10176  ;;  %v3421_v53 = vmul.f32 1.442695, %v3269_v34  ;;  %v3072_v59 = vpop.xlane.xlu0 %3071 }
 0x5a2   : > { %17398 = vst [vmem:[#allocation32_spill] sm:$0xff] %v13648_v62  ;;  %10188 = vpow2.f32 %v3423_v19  ;;  %9311 = vmatpush3.bf16.msra.mxu1 %v17393_v54  ;;  %9347 = vmatpush3.bf16.msra.mxu0 %v17396_v20  ;;  %v3070_v6 = vpop.xlane.xlu1 %3069  ;;  %v3286_v3 = vsub.f32 %v13295_v4, %v3072_v59  ;;  %v3903_v44 = vpack.c.bf16 %v13643_v57, %v13648_v62  ;;  %v13660_v60 = vpop.eup %10178  ;;  %v3457_v19 = vmul.f32 1.442695, %v3287_v38 }
 0x5a3   : > { %17399 = vst [vmem:[#allocation34_spill] sm:$0xff] %v13660_v60  ;;  %10190 = vpow2.f32 %v3421_v53  ;;  %v3285_v37 = vsub.f32 %v13298_v40, %v3070_v6  ;;  %3159 = vmax.xlane.f32.xlu1 %v13652_v10  ;;  %9312 = vmatprep.subr.bf16.mxu1 %v17400_v13  ;;  %v13665_v16 = vpop.eup %10180  ;;  %v3904_v4 = vpack.c.bf16 %v13629_v48, %v13636_v58 }
 0x5a4   : > { %17401 = vst [vmem:[#allocation74_spill] sm:$0xff] %v13665_v16  ;;  %9348 = vmatprep.subr.bf16.mxu0 %v17354_v14  ;;  %v3455_v25 = vmul.f32 1.442695, %v3286_v3  ;;  %1717 = vrot.lane.b32.xlu0 %v17402_v56, %s11219_s22  ;;  %v13676_v40 = vadd.f32 %v13362_v15, %v17303_v2  ;;  %10192 = vpow2.f32 %v3425_v29  ;;  %v13719_v58 = vadd.f32 %v13392_v30, %v17309_v5 }
 0x5a5   : > { %v13672_v59 = vpop.eup %10182  ;;  %v3453_v34 = vmul.f32 1.442695, %v3285_v37  ;;  %9296 = vmatprep.mubr.bf16.mxu0 %v3903_v44  ;;  %v13678_v54 = vpop.xlane.xlu0 %3077  ;;  %v17405_v44 = vld [vmem:[#allocation72_spill] sm:$0xff] }
 0x5a6   : > { %17403 = vst [vmem:[#allocation37_spill] sm:$0xff] %v13672_v59  ;;  %10194 = vpow2.f32 %v3455_v25  ;;  %9297 = vmatmul.mubr.bf16.gmra.mrb[116].mxu0 %v3904_v4  ;;  %9313 = vmatpush3.bf16.msra.mxu1 %v17400_v13  ;;  %v3076_v3 = vpop.xlane.xlu1 %3075  ;;  %v3895_v53 = vpack.c.bf16 %v13672_v59, %v13660_v60  ;;  %v13683_v6 = vpop.eup %10184  ;;  %v17406_v25 = vld [vmem:[#allocation39_spill] sm:$0xff] }
 0x5a7   : > { %17404 = vst [vmem:[#allocation143_spill] sm:$0xff] %v13683_v6  ;;  %10196 = vpow2.f32 %v3453_v34  ;;  %9349 = vmatpush3.bf16.msra.mxu0 %v17354_v14  ;;  %v3288_v15 = vsub.f32 %v13306_v0, %v3076_v3  ;;  %3139 = vmax.xlane.f32.xlu1 %v13676_v40  ;;  %v3896_v38 = vpack.c.bf16 %v13665_v16, %v13683_v6  ;;  %v17413_v6 = vld [vmem:[#allocation24_spill] sm:$0xff] }
 0x5a8   : > { %9314 = vmatprep.subr.bf16.mxu1 %v17405_v44  ;;  %9350 = vmatprep.subr.bf16.mxu0 %v17397_v61  ;;  %v13696_v4 = vadd.f32 %v17406_v25, %v12799_v36  ;;  %10198 = vpow2.f32 %v3457_v19  ;;  %v13700_v3 = vpop.eup %10186  ;;  %v17409_v25 = vld [vmem:[#allocation90_spill] sm:$0xff]  ;;  %v17410_v19 = vld [vmem:[#allocation25_spill] sm:$0xff] }
 0x5a9   : > { %v3459_v29 = vmul.f32 1.442695, %v3288_v15  ;;  %9264 = vmatprep.mubr.bf16.mxu1 %v3895_v53  ;;  %v13692_v37 = vpop.f32.mrb[96].mxu0  ;;  %v3052_v13 = vpop.xlane.xlu0 %3051  ;;  %17407 = vst [vmem:[#allocation72_spill] sm:$0xff] %v13700_v3 }
 0x5aa   : > { %9265 = vmatmul.mubr.bf16.gmra.mrb[132].mxu1 %v3896_v38  ;;  %v3050_v0 = vpop.xlane.xlu1 %3049  ;;  %v13698_v34 = vpop.f32.mrb[97].mxu0  ;;  %v3276_v38 = vsub.f32 %v17410_v19, %v3052_v13  ;;  %v17416_v19 = vld [vmem:[#allocation81_spill] sm:$0xff] }
 0x5ab   : > { %10200 = vpow2.f32 %v3459_v29  ;;  %9315 = vmatpush3.bf16.msra.mxu1 %v17405_v44  ;;  %9351 = vmatpush3.bf16.msra.mxu0 %v17397_v61  ;;  %v13704_v53 = vpop.f32.mrb[98].mxu0  ;;  %v3275_v29 = vsub.f32 %v17412_v33, %v3050_v0 }
 0x5ac   : > { %v13706_v15 = vpop.eup %10188  ;;  %3141 = vmax.xlane.f32.xlu1 %v13696_v4  ;;  %9316 = vmatprep.subr.bf16.mxu1 %v17409_v25  ;;  %v13711_v22 = vpop.f32.mrb[99].mxu0  ;;  %v3435_v0 = vmul.f32 1.442695, %v3276_v38 }
 0x5ad   : > { %17408 = vst [vmem:[#allocation39_spill] sm:$0xff] %v13706_v15  ;;  %v13713_v55 = vpop.eup %10190  ;;  %9352 = vmatprep.subr.bf16.mxu0 %v17402_v56  ;;  %v3048_v44 = vpop.xlane.xlu0 %3047 }
 0x5ae   : > { %17411 = vst [vmem:[#allocation90_spill] sm:$0xff] %v13713_v55  ;;  %v3082_v62 = vpop.xlane.xlu1 %3081  ;;  %v3274_v48 = vsub.f32 %v17413_v6, %v3048_v44  ;;  %v3897_v60 = vpack.c.bf16 %v13706_v15, %v13713_v55  ;;  %v13724_v13 = vpop.eup %10192  ;;  %v3433_v44 = vmul.f32 1.442695, %v3275_v29  ;;  %v17418_v55 = vld [vmem:[#allocation36_spill] sm:$0xff]  ;;  %v17420_v29 = vld [vmem:[#allocation91_spill] sm:$0xff]  ;;  %10202 = vpow2.f32 %v3435_v0 }
 0x5af   : > { %17414 = vst [vmem:[#allocation25_spill] sm:$0xff] %v13724_v13  ;;  %9317 = vmatpush3.bf16.msra.mxu1 %v17409_v25  ;;  %9353 = vmatpush3.bf16.msra.mxu0 %v17402_v56  ;;  %v3898_v30 = vpack.c.bf16 %v13700_v3, %v13724_v13  ;;  %v17419_v25 = vld [vmem:[#allocation65_spill] sm:$0xff] }
 0x5b0   : > { %v13728_v33 = vpop.eup %10194  ;;  %3143 = vmax.xlane.f32.xlu1 %v13719_v58  ;;  %9318 = vmatprep.subr.bf16.mxu1 %v17416_v19  ;;  %v13741_v57 = vadd.f32 %v17419_v25, %v12782_v52  ;;  %v3431_v38 = vmul.f32 1.442695, %v3274_v48  ;;  %v17422_v48 = vld [vmem:[#allocation105_spill] sm:$0xff]  ;;  %10204 = vpow2.f32 %v3433_v44 }
 0x5b1   : > { %17415 = vst [vmem:[#allocation40_spill] sm:$0xff] %v13728_v33  ;;  %v13734_v6 = vpop.eup %10196  ;;  %9354 = vmatprep.subr.bf16.mxu0 %v17418_v55  ;;  %9268 = vmatprep.mubr.bf16.mxu1 %v3897_v60  ;;  %v13737_v15 = vpop.f32.mrb[100].mxu0 }
 0x5b2   : > { %17417 = vst [vmem:[#allocation24_spill] sm:$0xff] %v13734_v6  ;;  %9269 = vmatmul.mubr.bf16.gmra.mrb[136].mxu1 %v3898_v30  ;;  %v3046_v16 = vpop.xlane.xlu1 %3045  ;;  %v13743_v59 = vpop.f32.mrb[101].mxu0  ;;  %v3905_v13 = vpack.c.bf16 %v13728_v33, %v13734_v6  ;;  %v17424_v6 = vld [vmem:[#allocation80_spill] sm:$0xff]  ;;  %10206 = vpow2.f32 %v3431_v38  ;;  %v13779_v38 = vadd.f32 %v13537_v51, %v17309_v5 }
 0x5b3   : > { %9319 = vmatpush3.bf16.msra.mxu1 %v17416_v19  ;;  %9355 = vmatpush3.bf16.msra.mxu0 %v17418_v55  ;;  %v3273_v60 = vsub.f32 %v17420_v29, %v3046_v16  ;;  %v13750_v3 = vpop.f32.mrb[102].mxu0  ;;  %v13752_v23 = vpop.eup %10198  ;;  %v3289_v19 = vsub.f32 %v17424_v6, %v13678_v54  ;;  %v13764_v16 = vadd.f32 %v13529_v31, %v12799_v36  ;;  %v17426_v54 = vld [vmem:[#allocation88_spill] sm:$0xff] }
 0x5b4   : > { %17421 = vst [vmem:[#allocation81_spill] sm:$0xff] %v13752_v23  ;;  %3145 = vmax.xlane.f32.xlu1 %v13741_v57  ;;  %9320 = vmatprep.subr.bf16.mxu1 %v17422_v48  ;;  %v13756_v30 = vpop.f32.mrb[103].mxu0  ;;  %v13769_v18 = vpop.xlane.xlu0 %3121  ;;  %v3291_v6 = vsub.f32 %v17426_v54, %v3082_v62  ;;  %v17442_v36 = vld [vmem:[#allocation48_spill] sm:$0xff] }
 0x5b5   : > { %v13758_v25 = vpop.eup %10200  ;;  %v3429_v33 = vmul.f32 1.442695, %v3273_v60  ;;  %9300 = vmatprep.mubr.bf16.mxu0 %v3905_v13  ;;  %v17427_v13 = vld [vmem:[#allocation96_spill] sm:$0xff]  ;;  %v3461_v31 = vmul.f32 1.442695, %v3289_v19  ;;  %v17431_v19 = vld [vmem:[#allocation107_spill] sm:$0xff] }
 0x5b6   : > { %17423 = vst [vmem:[#allocation36_spill] sm:$0xff] %v13758_v25  ;;  %v3084_v0 = vpop.xlane.xlu1 %3083  ;;  %v3906_v29 = vpack.c.bf16 %v13758_v25, %v13752_v23  ;;  %v3465_v23 = vmul.f32 1.442695, %v3291_v6  ;;  %v17435_v6 = vld [vmem:[#allocation26_spill] sm:$0xff] }
 0x5b7   : > { %10208 = vpow2.f32 %v3429_v33  ;;  %9321 = vmatpush3.bf16.msra.mxu1 %v17422_v48  ;;  %v3292_v42 = vsub.f32 %v17425_v63, %v3084_v0  ;;  %v17430_v63 = vld [vmem:[#allocation42_spill] sm:$0xff] }
 0x5b8   : > { %3173 = vmax.xlane.f32.xlu1 %v13764_v16  ;;  %9322 = vmatprep.subr.bf16.mxu1 %v17427_v13  ;;  %10210 = vpow2.f32 %v3461_v31  ;;  %v13792_v47 = vpop.eup %10202  ;;  %v17437_v31 = vld [vmem:[#allocation85_spill] sm:$0xff] }
 0x5b9   : > { %9301 = vmatmul.mubr.bf16.gmra.mrb[120].mxu0 %v3906_v29  ;;  %v13775_v44 = vpop.f32.mrb[104].mxu0  ;;  %v3467_v33 = vmul.f32 1.442695, %v3292_v42  ;;  %v17432_v42 = vld [vmem:[#allocation51_spill] sm:$0xff]  ;;  %17433 = vst [vmem:[#allocation105_spill] sm:$0xff] %v13792_v47 }
 0x5ba   : > { %17428 = vst [vmem:[#allocation65_spill] sm:$0xff] %v13775_v44  ;;  %v3080_v60 = vpop.xlane.xlu1 %3079  ;;  %v13781_v48 = vpop.f32.mrb[105].mxu0 }
 0x5bb   : > { %17429 = vst [vmem:[#allocation91_spill] sm:$0xff] %v13781_v48  ;;  %9323 = vmatpush3.bf16.msra.mxu1 %v17427_v13  ;;  %v3290_v62 = vsub.f32 %v17430_v63, %v3080_v60  ;;  %v3086_v0 = vpop.xlane.xlu0 %3085  ;;  %v13785_v54 = vpop.f32.mrb[106].mxu0  ;;  %v13796_v13 = vadd.f32 %v13525_v17, %v12782_v52  ;;  %10212 = vpow2.f32 %v3467_v33  ;;  %v17439_v17 = vld [vmem:[#allocation66_spill] sm:$0xff] }
 0x5bc   : > { %3175 = vmax.xlane.f32.xlu1 %v13779_v38  ;;  %9372 = vmatprep.subr.bf16.mxu1 %v17431_v19  ;;  %v13789_v29 = vpop.f32.mrb[107].mxu0  ;;  %v3293_v25 = vsub.f32 %v17432_v42, %v3086_v0  ;;  %v13798_v63 = vpop.eup %10204  ;;  %v13809_v42 = vadd.f32 %v17439_v17, %v17306_v49 }
 0x5bd   : > { %v3463_v51 = vmul.f32 1.442695, %v3290_v62  ;;  %17434 = vst [vmem:[#allocation80_spill] sm:$0xff] %v13798_v63  ;;  %v13801_v41 = vpop.eup %10206 }
 0x5be   : > { %v3090_v60 = vpop.xlane.xlu1 %3089  ;;  %17436 = vst [vmem:[#allocation27_spill] sm:$0xff] %v13801_v41  ;;  %v3469_v33 = vmul.f32 1.442695, %v3293_v25 }
 0x5bf   : > { %10214 = vpow2.f32 %v3463_v51  ;;  %v3295_v11 = vsub.f32 %v17435_v6, %v3090_v60  ;;  %v3092_v45 = vpop.xlane.xlu0 %3091  ;;  %v13815_v51 = vadd.f32 %v13535_v8, %v17306_v49  ;;  %v17444_v8 = vld [vmem:[#allocation50_spill] sm:$0xff] }
 0x5c0   : > { %10216 = vpow2.f32 %v3465_v23  ;;  %3177 = vmax.xlane.f32.xlu1 %v13796_v13  ;;  %v3296_v62 = vsub.f32 %v17437_v31, %v3092_v45 }
 0x5c1   : > { %v13805_v0 = vpop.eup %10208  ;;  %v13811_v52 = vpop.f32.mrb[108].mxu0  ;;  %v3473_v60 = vmul.f32 1.442695, %v3295_v11  ;;  %10218 = vpow2.f32 %v3469_v33 }
 0x5c2   : > { %17438 = vst [vmem:[#allocation88_spill] sm:$0xff] %v13805_v0  ;;  %17440 = vst [vmem:[#allocation96_spill] sm:$0xff] %v13811_v52  ;;  %v3118_v6 = vpop.xlane.xlu1 %3117  ;;  %v13817_v23 = vpop.f32.mrb[109].mxu0  ;;  %v3899_v45 = vpack.c.bf16 %v13801_v41, %v13805_v0  ;;  %v3475_v31 = vmul.f32 1.442695, %v3296_v62  ;;  %v3900_v52 = vpack.c.bf16 %v13792_v47, %v13798_v63  ;;  %v17445_v0 = vld [vmem:[#allocation38_spill] sm:$0xff] }
 0x5c3   : > { %17441 = vst [vmem:[#allocation42_spill] sm:$0xff] %v13817_v23  ;;  %v3309_v44 = vsub.f32 %v17442_v36, %v3118_v6  ;;  %3147 = vmax.xlane.f32.xlu0 %v13809_v42  ;;  %v3088_v17 = vpop.xlane.xlu0 %3087  ;;  %v13823_v25 = vpop.f32.mrb[110].mxu0  ;;  %v3311_v62 = vsub.f32 %v17445_v0, %v13769_v18  ;;  %10220 = vpow2.f32 %v3473_v60  ;;  %v17447_v63 = vld [vmem:[#allocation29_spill] sm:$0xff] }
 0x5c4   : > { %17443 = vst [vmem:[#allocation107_spill] sm:$0xff] %v13823_v25  ;;  %3179 = vmax.xlane.f32.xlu1 %v13815_v51  ;;  %v3294_v11 = vsub.f32 %v17444_v8, %v3088_v17  ;;  %9272 = vmatprep.mubr.bf16.mxu1 %v3899_v45  ;;  %v13829_v23 = vpop.f32.mrb[111].mxu0  ;;  %v13833_v25 = vpop.eup %10210  ;;  %10222 = vpow2.f32 %v3475_v31  ;;  %v17449_v45 = vld [vmem:[#allocation58_spill] sm:$0xff] }
 0x5c5   : > { %9273 = vmatmul.mubr.bf16.gmra.mrb[140].mxu1 %v3900_v52  ;;  %v3501_v36 = vmul.f32 1.442695, %v3309_v44  ;;  %17446 = vst [vmem:[#allocation51_spill] sm:$0xff] %v13833_v25  ;;  %v13836_v48 = vpop.eup %10212  ;;  %v3505_v18 = vmul.f32 1.442695, %v3311_v62 }
 0x5c6   : > { %v3471_v6 = vmul.f32 1.442695, %v3294_v11  ;;  %v3124_v41 = vpop.xlane.xlu1 %3123  ;;  %17448 = vst [vmem:[#allocation26_spill] sm:$0xff] %v13836_v48 }
 0x5c7   : > { %v3312_v47 = vsub.f32 %v17447_v63, %v3124_v41  ;;  %v3120_v49 = vpop.xlane.xlu0 %3119 }
 0x5c8   : > { %10224 = vpow2.f32 %v3471_v6  ;;  %v3310_v17 = vsub.f32 %v17449_v45, %v3120_v49 }
 0x5c9   : > { %v13839_v8 = vpop.eup %10214  ;;  %v3507_v0 = vmul.f32 1.442695, %v3312_v47  ;;  %10226 = vpow2.f32 %v3501_v36  ;;  %v17453_v47 = vld [vmem:[#allocation73_spill] sm:$0xff] }
 0x5ca   : > { %17450 = vst [vmem:[#allocation85_spill] sm:$0xff] %v13839_v8  ;;  %v13841_v52 = vpop.eup %10216  ;;  %v3503_v44 = vmul.f32 1.442695, %v3310_v17  ;;  %v3130_v33 = vpop.xlane.xlu1 %3129  ;;  %v3907_v60 = vpack.c.bf16 %v13839_v8, %v13833_v25  ;;  %v17456_v25 = vld [vmem:[#allocation28_spill] sm:$0xff]  ;;  %v17461_v8 = vld [vmem:[#allocation47_spill] sm:$0xff] }
 0x5cb   : > { %17451 = vst [vmem:[#allocation66_spill] sm:$0xff] %v13841_v52  ;;  %10228 = vpow2.f32 %v3507_v0  ;;  %v3098_v41 = vpop.xlane.xlu0 %3097  ;;  %v3908_v63 = vpack.c.bf16 %v13836_v48, %v13841_v52  ;;  %v13847_v31 = vpop.eup %10218  ;;  %v3315_v52 = vsub.f32 %v17456_v25, %v3130_v33 }
 0x5cc   : > { %10230 = vpow2.f32 %v3503_v44  ;;  %9304 = vmatprep.mubr.bf16.mxu0 %v3907_v60  ;;  %17452 = vst [vmem:[#allocation48_spill] sm:$0xff] %v13847_v31 }
 0x5cd   : > { %10232 = vpow2.f32 %v3505_v18  ;;  %9305 = vmatmul.mubr.bf16.gmra.mrb[124].mxu0 %v3908_v63  ;;  %v13850_v36 = vpop.eup %10220 }
 0x5ce   : > { %v3126_v49 = vpop.xlane.xlu1 %3125  ;;  %17454 = vst [vmem:[#allocation50_spill] sm:$0xff] %v13850_v36  ;;  %v13852_v6 = vpop.eup %10222 }
 0x5cf   : > { %v3313_v11 = vsub.f32 %v17453_v47, %v3126_v49  ;;  %v3094_v62 = vpop.xlane.xlu0 %3093  ;;  %17455 = vst [vmem:[#allocation38_spill] sm:$0xff] %v13852_v6  ;;  %v3910_v49 = vpack.c.bf16 %v13852_v6, %v13850_v36  ;;  %v17463_v6 = vld [vmem:[#allocation70_spill] sm:$0xff] }
 0x5d1   : > { %v3509_v17 = vmul.f32 1.442695, %v3313_v11 }
 0x5d2   : > { %v13854_v45 = vpop.eup %10224  ;;  %v3128_v0 = vpop.xlane.xlu1 %3127 }
 0x5d3   : > { %v3314_v44 = vsub.f32 %v13397_v50, %v3128_v0  ;;  %v3100_v18 = vpop.xlane.xlu0 %3099  ;;  %v3909_v60 = vpack.c.bf16 %v13854_v45, %v13847_v31  ;;  %v13860_v63 = vpop.eup %10226  ;;  %10234 = vpow2.f32 %v3509_v17  ;;  %v3297_v50 = vsub.f32 %v13390_v12, %v3094_v62  ;;  %v17464_v62 = vld [vmem:[#allocation56_spill] sm:$0xff] }
 0x5d4   : > { %17457 = vst [vmem:[#allocation29_spill] sm:$0xff] %v13860_v63  ;;  %v3513_v0 = vmul.f32 1.442695, %v3315_v52  ;;  %v3300_v36 = vsub.f32 %v17461_v8, %v3100_v18 }
 0x5d5   : > { %v13864_v47 = vpop.eup %10228  ;;  %v3511_v48 = vmul.f32 1.442695, %v3314_v44  ;;  %1719 = vrot.lane.b32.xlu1 %v17418_v55, %s11219_s22  ;;  %9324 = vmatprep.mubr.bf16.mxu1 %v3909_v60  ;;  %v17462_v60 = vld [vmem:[#allocation106_spill] sm:$0xff] }
 0x5d6   : > { %17458 = vst [vmem:[#allocation58_spill] sm:$0xff] %v13864_v47  ;;  %v13868_v11 = vpop.eup %10230  ;;  %v3106_v25 = vpop.xlane.xlu1 %3105  ;;  %9325 = vmatmul.mubr.bf16.vlgmr.msra.gmra.mrb[144].mxu1 %v3910_v49  ;;  %v3299_v49 = vsub.f32 %v17464_v62, %v3098_v41  ;;  %v3483_v52 = vmul.f32 1.442695, %v3300_v36  ;;  %v17467_v41 = vld [vmem:[#allocation78_spill] sm:$0xff] }
 0x5d7   : > { %17459 = vst [vmem:[#allocation73_spill] sm:$0xff] %v13868_v11  ;;  %v13871_v33 = vpop.eup %10232  ;;  %10236 = vpow2.f32 %v3511_v48  ;;  %9373 = vmatpush3.bf16.msra.mxu1 %v17431_v19  ;;  %v3132_v44 = vpop.xlane.xlu0 %3131  ;;  %v3917_v31 = vpack.c.bf16 %v13868_v11, %v13860_v63  ;;  %v3477_v48 = vmul.f32 1.442695, %v3297_v50  ;;  %v17468_v50 = vld [vmem:[#allocation64_spill] sm:$0xff]  ;;  %v17497_v63 = vld [vmem:[#allocation43_spill] sm:$0xff] }
 0x5d8   : > { %17460 = vst [vmem:[#allocation28_spill] sm:$0xff] %v13871_v33  ;;  %9374 = vmatprep.subr.bf16.mxu1 %v17462_v60  ;;  %v3316_v17 = vsub.f32 %v17463_v6, %v3132_v44  ;;  %v3918_v12 = vpack.c.bf16 %v13864_v47, %v13871_v33  ;;  %10238 = vpow2.f32 %v3513_v0  ;;  %v17465_v6 = vld [vmem:[#allocation108_spill] sm:$0xff]  ;;  %v17466_v44 = vld [vmem:[#allocation55_spill] sm:$0xff]  ;;  %v3481_v47 = vmul.f32 1.442695, %v3299_v49  ;;  %v17472_v49 = vld [vmem:[#allocation86_spill] sm:$0xff] }
 0x5d9   : > { %1729 = vrot.lane.b32.xlu0 %v17299_v1, %s11218_s18  ;;  %9356 = vmatprep.mubr.bf16.mxu0 %v3917_v31 }
 0x5da   : > { %v3515_v8 = vmul.f32 1.442695, %v3316_v17  ;;  %v3102_v19 = vpop.xlane.xlu1 %3101  ;;  %9357 = vmatmul.mubr.bf16.vlgmr.msra.gmra.mrb[128].mxu0 %v3918_v12 }
 0x5db   : > { %9375 = vmatpush3.bf16.msra.mxu1 %v17462_v60  ;;  %v3096_v18 = vpop.xlane.xlu0 %3095  ;;  %v3301_v62 = vsub.f32 %v17467_v41, %v3102_v19  ;;  %v17470_v60 = vld [vmem:[#allocation109_spill] sm:$0xff] }
 0x5dc   : > { %10240 = vpow2.f32 %v3515_v8  ;;  %9376 = vmatprep.subr.bf16.mxu1 %v17465_v6  ;;  %v3298_v11 = vsub.f32 %v17466_v44, %v3096_v18  ;;  %v3303_v8 = vsub.f32 %v17472_v49, %v3106_v25  ;;  %v17473_v18 = vld [vmem:[#allocation67_spill] sm:$0xff]  ;;  %v17474_v41 = vld [vmem:[#allocation69_spill] sm:$0xff] }
 0x5dd   : > { %10242 = vpow2.f32 %v3477_v48  ;;  %v13890_v0 = vpop.eup %10234  ;;  %v3485_v19 = vmul.f32 1.442695, %v3301_v62 }
 0x5de   : > { %v3479_v33 = vmul.f32 1.442695, %v3298_v11  ;;  %v3108_v31 = vpop.xlane.xlu1 %3107  ;;  %10244 = vpow2.f32 %v3483_v52  ;;  %17469 = vst [vmem:[#allocation47_spill] sm:$0xff] %v13890_v0 }
 0x5df   : > { %v3304_v17 = vsub.f32 %v17468_v50, %v3108_v31  ;;  %9377 = vmatpush3.bf16.msra.mxu1 %v17465_v6  ;;  %v3110_v36 = vpop.xlane.xlu0 %3109  ;;  %v3489_v50 = vmul.f32 1.442695, %v3303_v8  ;;  %v17480_v8 = vld [vmem:[#allocation97_spill] sm:$0xff] }
 0x5e0   : > { %10246 = vpow2.f32 %v3479_v33  ;;  %9378 = vmatprep.subr.bf16.mxu1 %v17470_v60 }
 0x5e1   : > { %v13893_v12 = vpop.eup %10236  ;;  %10248 = vpow2.f32 %v3481_v47  ;;  %v3491_v48 = vmul.f32 1.442695, %v3304_v17 }
 0x5e2   : > { %17471 = vst [vmem:[#allocation106_spill] sm:$0xff] %v13893_v12  ;;  %v3104_v11 = vpop.xlane.xlu1 %3103  ;;  %v3919_v52 = vpack.c.bf16 %v13893_v12, %v13890_v0  ;;  %v13901_v31 = vpop.eup %10238  ;;  %10250 = vpow2.f32 %v3485_v19  ;;  %v3305_v19 = vsub.f32 %v17480_v8, %v3110_v36  ;;  %v17486_v8 = vld [vmem:[#allocation84_spill] sm:$0xff] }
 0x5e3   : > { %v3302_v44 = vsub.f32 %v17473_v18, %v3104_v11  ;;  %9379 = vmatpush3.bf16.msra.mxu1 %v17470_v60  ;;  %v3134_v6 = vpop.xlane.xlu0 %3133  ;;  %17475 = vst [vmem:[#allocation70_spill] sm:$0xff] %v13901_v31  ;;  %10252 = vpow2.f32 %v3491_v48  ;;  %v17478_v18 = vld [vmem:[#allocation61_spill] sm:$0xff] }
 0x5e4   : > { %v3317_v33 = vsub.f32 %v17474_v41, %v3134_v6  ;;  %9360 = vmatprep.mubr.bf16.mxu0 %v3919_v52  ;;  %v3493_v36 = vmul.f32 1.442695, %v3305_v19 }
 0x5e5   : > { %v3487_v47 = vmul.f32 1.442695, %v3302_v44 }
 0x5e6   : > { %v13903_v25 = vpop.eup %10240  ;;  %v3114_v62 = vpop.xlane.xlu1 %3113  ;;  %v3517_v17 = vmul.f32 1.442695, %v3317_v33  ;;  %v17483_v33 = vld [vmem:[#allocation71_spill] sm:$0xff] }
 0x5e7   : > { %17476 = vst [vmem:[#allocation56_spill] sm:$0xff] %v13903_v25  ;;  %10254 = vpow2.f32 %v3487_v47  ;;  %v3136_v49 = vpop.xlane.xlu0 %3135  ;;  %v3920_v11 = vpack.c.bf16 %v13903_v25, %v13901_v31  ;;  %v13907_v60 = vpop.eup %10242  ;;  %v17484_v31 = vld [vmem:[#allocation75_spill] sm:$0xff] }
 0x5e8   : > { %17477 = vst [vmem:[#allocation108_spill] sm:$0xff] %v13907_v60  ;;  %v3318_v6 = vsub.f32 %v17478_v18, %v3136_v49  ;;  %v13910_v52 = vpop.eup %10244  ;;  %10256 = vpow2.f32 %v3489_v50  ;;  %v3307_v49 = vsub.f32 %v17484_v31, %v3114_v62 }
 0x5e9   : > { %17479 = vst [vmem:[#allocation55_spill] sm:$0xff] %v13910_v52  ;;  %9361 = vmatmul.mubr.bf16.gmra.mrb[132].mxu0 %v3920_v11  ;;  %10258 = vpow2.f32 %v3517_v17 }
 0x5ea   : > { %v13913_v44 = vpop.eup %10246  ;;  %v3519_v48 = vmul.f32 1.442695, %v3318_v6  ;;  %v3116_v41 = vpop.xlane.xlu1 %3115 }
 0x5eb   : > { %17481 = vst [vmem:[#allocation78_spill] sm:$0xff] %v13913_v44  ;;  %v13915_v47 = vpop.eup %10248  ;;  %v3308_v12 = vsub.f32 %v17483_v33, %v3116_v41  ;;  %v3911_v25 = vpack.c.bf16 %v13913_v44, %v13907_v60  ;;  %v3497_v41 = vmul.f32 1.442695, %v3307_v49  ;;  %v13938_v49 = vpop.xlane.xlu0 %3137 }
 0x5ec   : > { %17482 = vst [vmem:[#allocation64_spill] sm:$0xff] %v13915_v47  ;;  %10260 = vpow2.f32 %v3519_v48  ;;  %v3912_v50 = vpack.c.bf16 %v13910_v52, %v13915_v47  ;;  %v13923_v6 = vpop.eup %10250  ;;  %v17505_v47 = vld [vmem:[#allocation82_spill] sm:$0xff] }
 0x5ed   : > { %9328 = vmatprep.mubr.bf16.mxu1 %v3911_v25  ;;  %v3499_v11 = vmul.f32 1.442695, %v3308_v12  ;;  %17485 = vst [vmem:[#allocation109_spill] sm:$0xff] %v13923_v6  ;;  %v13926_v0 = vpop.eup %10252  ;;  %10262 = vpow2.f32 %v3493_v36  ;;  %v17492_v36 = vld [vmem:[#allocation79_spill] sm:$0xff] }
 0x5ee   : > { %v3112_v18 = vpop.xlane.xlu1 %3111  ;;  %9329 = vmatmul.mubr.bf16.gmra.mrb[148].mxu1 %v3912_v50  ;;  %17487 = vst [vmem:[#allocation86_spill] sm:$0xff] %v13926_v0  ;;  %v13983_v44 = vadd.f32 %v13711_v22, %v17492_v36 }
 0x5ef   : > { %v3306_v17 = vsub.f32 %v17486_v8, %v3112_v18  ;;  %10264 = vpow2.f32 %v3499_v11  ;;  %v17493_v11 = vld [vmem:[#allocation59_spill] sm:$0xff]  ;;  %v17494_v8 = vld [vmem:[#allocation89_spill] sm:$0xff] }
 0x5f0   : > { %v13944_v18 = vadd.f32 %v17493_v11, %v17492_v36 }
 0x5f1   : > { %v13928_v33 = vpop.eup %10254  ;;  %v3495_v31 = vmul.f32 1.442695, %v3306_v17  ;;  %v17495_v17 = vld [vmem:[#allocation52_spill] sm:$0xff] }
 0x5f2   : > { %17488 = vst [vmem:[#allocation67_spill] sm:$0xff] %v13928_v33  ;;  %v1714_v62 = vpop.permute.xlu1 %1713  ;;  %v3913_v19 = vpack.c.bf16 %v13928_v33, %v13923_v6  ;;  %v13932_v25 = vpop.eup %10256  ;;  %v17503_v6 = vld [vmem:[#allocation93_spill] sm:$0xff] }
 0x5f3   : > { %17489 = vst [vmem:[#allocation69_spill] sm:$0xff] %v13932_v25  ;;  %10266 = vpow2.f32 %v3495_v31  ;;  %9380 = vmatprep.subr.bf16.mxu1 %v1714_v62  ;;  %v3914_v12 = vpack.c.bf16 %v13926_v0, %v13932_v25  ;;  %v13936_v48 = vpop.eup %10258  ;;  %v13948_v31 = vadd.f32 %v17495_v17, %v17494_v8  ;;  %v17504_v0 = vld [vmem:[#allocation76_spill] sm:$0xff] }
 0x5f4   : > { %10268 = vpow2.f32 %v3497_v41  ;;  %9332 = vmatprep.mubr.bf16.mxu1 %v3913_v19  ;;  %9381 = vmatpush3.bf16.msra.mxu1 %v1714_v62  ;;  %17490 = vst [vmem:[#allocation61_spill] sm:$0xff] %v13936_v48  ;;  %v17496_v19 = vld [vmem:[#allocation83_spill] sm:$0xff] }
 0x5f5   : > { %v13958_v25 = vadd.f32 %v17497_v63, %v17496_v19 }
 0x5f6   : > { %v13940_v50 = vpop.eup %10260  ;;  %9333 = vmatmul.mubr.bf16.gmra.mrb[152].mxu1 %v3914_v12 }
 0x5f7   : > { %17491 = vst [vmem:[#allocation97_spill] sm:$0xff] %v13940_v50  ;;  %v3921_v41 = vpack.c.bf16 %v13940_v50, %v13936_v48  ;;  %17498 = vst [vmem:[#allocation71_spill] sm:$0xff] %v13958_v25  ;;  %v13960_v11 = vpop.eup %10262 }
 0x5f8   : > { %3183 = vmax.xlane.f32.xlu0 %v13944_v18  ;;  %17499 = vst [vmem:[#allocation75_spill] sm:$0xff] %v13960_v11 }
 0x5f9   : > { %3181 = vmax.xlane.f32.xlu1 %v13948_v31  ;;  %9364 = vmatprep.mubr.bf16.mxu0 %v3921_v41  ;;  %v13954_v62 = vpop.xlane.xlu0 %3153  ;;  %v13962_v12 = vpop.eup %10264  ;;  %v13971_v41 = vadd.f32 %v17504_v0, %v17503_v6 }
 0x5fa   : > { %17500 = vst [vmem:[#allocation84_spill] sm:$0xff] %v13962_v12 }
 0x5fc   : > { %3185 = vmax.xlane.f32.xlu0 %v13958_v25 }
 0x5fd   : > { %v13965_v17 = vpop.eup %10266  ;;  %v3150_v50 = vpop.xlane.xlu0 %3149 }
 0x5fe   : > { %17501 = vst [vmem:[#allocation79_spill] sm:$0xff] %v13965_v17  ;;  %v13967_v48 = vpop.eup %10268  ;;  %v3915_v33 = vpack.c.bf16 %v13965_v17, %v13960_v11  ;;  %v3325_v60 = vsub.f32 %v17505_v47, %v3150_v50  ;;  %v13988_v11 = vadd.f32 %v13692_v37, %v17496_v19  ;;  %v13994_v47 = vadd.f32 %v13704_v53, %v17503_v6 }
 0x5ff   : > { %17502 = vst [vmem:[#allocation59_spill] sm:$0xff] %v13967_v48  ;;  %v3916_v63 = vpack.c.bf16 %v13962_v12, %v13967_v48  ;;  %v17506_v48 = vld [vmem:[#allocation110_spill] sm:$0xff] }
 0x600   : > { %3187 = vmax.xlane.f32.xlu0 %v13971_v41  ;;  %9336 = vmatprep.mubr.bf16.mxu1 %v3915_v33  ;;  %v3533_v0 = vmul.f32 1.442695, %v3325_v60 }
 0x601   : > { %9337 = vmatmul.mubr.bf16.gmra.mrb[156].mxu1 %v3916_v63  ;;  %v13979_v52 = vpop.xlane.xlu0 %3155 }
 0x602   : > { %10270 = vpow2.f32 %v3533_v0  ;;  %v17509_v0 = vld [vmem:[#allocation41_spill] sm:$0xff] }
 0x604   : > { %3215 = vmax.xlane.f32.xlu0 %v13983_v44 }
 0x605   : > { %v3152_v25 = vpop.xlane.xlu0 %3151 }
 0x606   : > { %v3326_v12 = vsub.f32 %v17506_v48, %v3152_v25 }
 0x608   : > { %v3535_v33 = vmul.f32 1.442695, %v3326_v12  ;;  %3217 = vmax.xlane.f32.xlu0 %v13988_v11  ;;  %v14019_v12 = vadd.f32 %v13698_v34, %v17494_v8 }
 0x60a   : > { %10272 = vpow2.f32 %v3535_v33  ;;  %1753 = vrot.lane.b32.xlu1 %v17299_v1, %s11220_s25  ;;  %v13998_v22 = vpop.xlane.xlu0 %3169  ;;  %v3319_v33 = vsub.f32 %v17509_v0, %v13938_v49 }
 0x60c   : > { %3219 = vmax.xlane.f32.xlu0 %v13994_v47  ;;  %v14005_v25 = vpop.eup %10270 }
 0x60d   : > { %17507 = vst [vmem:[#allocation89_spill] sm:$0xff] %v14005_v25 }
 0x60e   : > { %v14001_v37 = vpop.xlane.xlu0 %3165 }
 0x612   : > { %v14003_v60 = vpop.xlane.xlu0 %3171 }
 0x614   : > { %v14007_v48 = vpop.eup %10272 }
 0x615   : > { %17508 = vst [vmem:[#allocation52_spill] sm:$0xff] %v14007_v48  ;;  %v3925_v53 = vpack.c.bf16 %v14007_v48, %v14005_v25 }
 0x616   : > { %v3168_v6 = vpop.xlane.xlu0 %3167 }
 0x617   : > { %9388 = vmatprep.mubr.bf16.mxu1 %v3925_v53 }
 0x61a   : > { %v1716_v50 = vpop.permute.xlu0 %1715 }
 0x61b   : > { %9382 = vmatprep.subr.bf16.mxu1 %v1716_v50 }
 0x61c   : > { %9383 = vmatpush3.bf16.msra.mxu1 %v1716_v50  ;;  %v3521_v50 = vmul.f32 1.442695, %v3319_v33 }
 0x61e   : > { %v1718_v1 = vpop.permute.xlu0 %1717  ;;  %10274 = vpow2.f32 %v3521_v50  ;;  %v17512_v50 = vld [vmem:[#allocation94_spill] sm:$0xff] }
 0x61f   : > { %9384 = vmatprep.subr.bf16.mxu1 %v1718_v1 }
 0x620   : > { %9385 = vmatpush3.bf16.msra.mxu1 %v1718_v1 }
 0x622   : > { %1731 = vrot.lane.b32.xlu0 %v17382_v46, %s11218_s18 }
 0x623   : > { %v3162_v36 = vpop.xlane.xlu1 %3161 }
 0x626   : > { %1733 = vrot.lane.b32.xlu0 %v17387_v26, %s11218_s18 }
 0x627   : > { %v3158_v19 = vpop.xlane.xlu1 %3157 }
 0x62a   : > { %1757 = vrot.lane.b32.xlu0 %v17387_v26, %s11220_s25 }
 0x62c   : > { %v3164_v63 = vpop.xlane.xlu1 %3163 }
 0x62e   : > { %3213 = vmax.xlane.f32.xlu1 %v14019_v12  ;;  %1735 = vrot.lane.b32.xlu0 %v17396_v20, %s11218_s18 }
 0x630   : > { %v3160_v53 = vpop.xlane.xlu1 %3159 }
 0x632   : > { %1759 = vrot.lane.b32.xlu0 %v17396_v20, %s11220_s25 }
 0x634   : > { %v3140_v1 = vpop.xlane.xlu1 %3139 }
 0x635   : > { %v3320_v26 = vsub.f32 %v13676_v40, %v3140_v1  ;;  %v14035_v40 = vpop.eup %10274  ;;  %v3328_v1 = vsub.f32 %v17512_v50, %v13979_v52  ;;  %v3331_v52 = vsub.f32 %v13584_v32, %v3162_v36 }
 0x636   : > { %1737 = vrot.lane.b32.xlu0 %v17354_v14, %s11218_s18  ;;  %17510 = vst [vmem:[#allocation83_spill] sm:$0xff] %v14035_v40 }
 0x637   : > { %v3523_v34 = vmul.f32 1.442695, %v3320_v26  ;;  %v3539_v26 = vmul.f32 1.442695, %v3328_v1  ;;  %v3545_v36 = vmul.f32 1.442695, %v3331_v52 }
 0x639   : > { %10276 = vpow2.f32 %v3523_v34  ;;  %v3142_v8 = vpop.xlane.xlu1 %3141 }
 0x63a   : > { %v3321_v25 = vsub.f32 %v13696_v4, %v3142_v8  ;;  %v3330_v4 = vsub.f32 %v13652_v10, %v3160_v53  ;;  %v3332_v53 = vsub.f32 %v13624_v35, %v3164_v63 }
 0x63c   : > { %v3525_v48 = vmul.f32 1.442695, %v3321_v25  ;;  %v3543_v34 = vmul.f32 1.442695, %v3330_v4  ;;  %v3547_v1 = vmul.f32 1.442695, %v3332_v53 }
 0x63d   : > { %v3144_v17 = vpop.xlane.xlu1 %3143 }
 0x63e   : > { %v3322_v49 = vsub.f32 %v13719_v58, %v3144_v17  ;;  %10278 = vpow2.f32 %v3525_v48  ;;  %v17513_v58 = vld [vmem:[#allocation95_spill] sm:$0xff]  ;;  %v3329_v48 = vsub.f32 %v13606_v39, %v3158_v19 }
 0x63f   : > { %1755 = vrot.lane.b32.xlu1 %v17382_v46, %s11220_s25  ;;  %v3327_v17 = vsub.f32 %v17513_v58, %v13954_v62 }
 0x640   : > { %v3527_v20 = vmul.f32 1.442695, %v3322_v49  ;;  %v3334_v49 = vsub.f32 %v13548_v7, %v3168_v6  ;;  %v3541_v50 = vmul.f32 1.442695, %v3329_v48  ;;  %v17516_v6 = vld [vmem:[#allocation116_spill] sm:$0xff] }
 0x641   : > { %v3146_v0 = vpop.xlane.xlu1 %3145  ;;  %v3537_v8 = vmul.f32 1.442695, %v3327_v17  ;;  %v3333_v32 = vsub.f32 %v17516_v6, %v14001_v37  ;;  %v3336_v17 = vsub.f32 %v13532_v21, %v14003_v60 }
 0x642   : > { %10280 = vpow2.f32 %v3527_v20  ;;  %v3323_v39 = vsub.f32 %v13741_v57, %v3146_v0  ;;  %v3551_v62 = vmul.f32 1.442695, %v3334_v49  ;;  %v17517_v0 = vld [vmem:[#allocation92_spill] sm:$0xff] }
 0x643   : > { %v14037_v33 = vpop.eup %10276  ;;  %10282 = vpow2.f32 %v3539_v26  ;;  %v3549_v57 = vmul.f32 1.442695, %v3333_v32  ;;  %v14062_v58 = vadd.f32 %v17517_v0, %v17302_v28 }
 0x644   : > { %17511 = vst [vmem:[#allocation43_spill] sm:$0xff] %v14037_v33  ;;  %v3922_v25 = vpack.c.bf16 %v14037_v33, %v14035_v40  ;;  %10284 = vpow2.f32 %v3543_v34  ;;  %v3529_v4 = vmul.f32 1.442695, %v3323_v39 }
 0x645   : > { %v3174_v46 = vpop.xlane.xlu1 %3173  ;;  %10286 = vpow2.f32 %v3537_v8  ;;  %v17518_v8 = vld [vmem:[#allocation113_spill] sm:$0xff] }
 0x646   : > { %9365 = vmatmul.mubr.bf16.gmra.mrb[136].mxu0 %v3922_v25  ;;  %10288 = vpow2.f32 %v3541_v50  ;;  %v3337_v21 = vsub.f32 %v13764_v16, %v3174_v46 }
 0x647   : > { %10290 = vpow2.f32 %v3551_v62 }
 0x648   : > { %v14049_v10 = vpop.eup %10278  ;;  %10292 = vpow2.f32 %v3545_v36  ;;  %v3557_v62 = vmul.f32 1.442695, %v3337_v21  ;;  %v17529_v21 = vld [vmem:[#allocation87_spill] sm:$0xff] }
 0x649   : > { %v3176_v20 = vpop.xlane.xlu1 %3175  ;;  %17514 = vst [vmem:[#allocation93_spill] sm:$0xff] %v14049_v10  ;;  %10294 = vpow2.f32 %v3547_v1 }
 0x64a   : > { %10296 = vpow2.f32 %v3529_v4  ;;  %v3338_v48 = vsub.f32 %v13779_v38, %v3176_v20  ;;  %v3555_v38 = vmul.f32 1.442695, %v3336_v17  ;;  %v17525_v17 = vld [vmem:[#allocation31_spill] sm:$0xff] }
 0x64c   : > { %v14052_v33 = vpop.eup %10280  ;;  %v3559_v50 = vmul.f32 1.442695, %v3338_v48 }
 0x64d   : > { %17515 = vst [vmem:[#allocation76_spill] sm:$0xff] %v14052_v33  ;;  %v3178_v19 = vpop.xlane.xlu1 %3177  ;;  %v3923_v7 = vpack.c.bf16 %v14052_v33, %v14049_v10  ;;  %v14067_v34 = vpop.eup %10282 }
 0x64e   : > { %v14072_v52 = vpop.eup %10284  ;;  %v3339_v32 = vsub.f32 %v13796_v13, %v3178_v19 }
 0x64f   : > { %9368 = vmatprep.mubr.bf16.mxu0 %v3923_v7  ;;  %v14075_v60 = vpop.eup %10286 }
 0x650   : > { %v3148_v35 = vpop.xlane.xlu0 %3147  ;;  %v14077_v20 = vpop.eup %10288  ;;  %v3561_v0 = vmul.f32 1.442695, %v3339_v32 }
 0x651   : > { %v3180_v63 = vpop.xlane.xlu1 %3179  ;;  %v3324_v25 = vsub.f32 %v13809_v42, %v3148_v35  ;;  %v3335_v42 = vsub.f32 %v17518_v8, %v13998_v22  ;;  %v3926_v22 = vpack.c.bf16 %v14067_v34, %v14075_v60  ;;  %v3927_v39 = vpack.c.bf16 %v14072_v52, %v14077_v20  ;;  %v14083_v7 = vpop.eup %10290 }
 0x652   : > { %17519 = vst [vmem:[#allocation82_spill] sm:$0xff] %v14083_v7  ;;  %v3340_v16 = vsub.f32 %v13815_v51, %v3180_v63  ;;  %v14086_v46 = vpop.eup %10292 }
 0x653   : > { %v3531_v37 = vmul.f32 1.442695, %v3324_v25  ;;  %v3553_v53 = vmul.f32 1.442695, %v3335_v42  ;;  %v14088_v6 = vpop.eup %10294  ;;  %v17523_v25 = vld [vmem:[#allocation99_spill] sm:$0xff] }
 0x654   : > { %v1730_v26 = vpop.permute.xlu0 %1729  ;;  %v14091_v36 = vpop.eup %10296  ;;  %v3563_v4 = vmul.f32 1.442695, %v3340_v16  ;;  %v3928_v51 = vpack.c.bf16 %v14088_v6, %v14086_v46  ;;  %v14144_v16 = vadd.f32 %v13743_v59, %v17300_v27 }
 0x655   : > { %10298 = vpow2.f32 %v3531_v37  ;;  %v1720_v49 = vpop.permute.xlu1 %1719  ;;  %3191 = vmax.xlane.f32.xlu0 %v14062_v58  ;;  %9404 = vmatprep.subr.bf16.mxu0 %v1730_v26  ;;  %17520 = vst [vmem:[#allocation110_spill] sm:$0xff] %v14091_v36  ;;  %v14112_v37 = vadd.f32 %v17525_v17, %v17298_v43 }
 0x656   : > { %10300 = vpow2.f32 %v3549_v57  ;;  %9386 = vmatprep.subr.bf16.mxu1 %v1720_v49  ;;  %9405 = vmatpush3.bf16.msra.mxu0 %v1730_v26  ;;  %v14103_v57 = vadd.f32 %v17523_v25, %v17300_v27  ;;  %v14170_v25 = vadd.f32 %v13737_v15, %v17298_v43 }
 0x657   : > { %9387 = vmatpush3.bf16.msra.mxu1 %v1720_v49  ;;  %10302 = vpow2.f32 %v3555_v38  ;;  %v14127_v38 = vadd.f32 %v17529_v21, %v17301_v9 }
 0x658   : > { %10304 = vpow2.f32 %v3559_v50 }
 0x659   : > { %10306 = vpow2.f32 %v3553_v53 }
 0x65a   : > { %9389 = vmatmul.mubr.bf16.vlgmr.msra.gmra.mrb[160].mxu1 %v3926_v22  ;;  %10308 = vpow2.f32 %v3557_v62 }
 0x65b   : > { %9392 = vmatprep.mubr.bf16.mxu1 %v3927_v39  ;;  %10310 = vpow2.f32 %v3563_v4 }
 0x65c   : > { %10312 = vpow2.f32 %v3561_v0 }
 0x65f   : > { %v14093_v1 = vpop.eup %10298 }
 0x660   : > { %17521 = vst [vmem:[#allocation41_spill] sm:$0xff] %v14093_v1  ;;  %v14095_v35 = vpop.eup %10300  ;;  %v3924_v63 = vpack.c.bf16 %v14093_v1, %v14091_v36 }
 0x661   : > { %17522 = vst [vmem:[#allocation94_spill] sm:$0xff] %v14095_v35  ;;  %v3929_v13 = vpack.c.bf16 %v14083_v7, %v14095_v35  ;;  %v14108_v19 = vpop.eup %10302  ;;  %v17553_v7 = vld [vmem:[#allocation35_spill] sm:$0xff] }
 0x662   : > { %9393 = vmatmul.mubr.bf16.gmra.mrb[164].mxu1 %v3928_v51  ;;  %9369 = vmatmul.mubr.bf16.gmra.mrb[140].mxu0 %v3924_v63  ;;  %17524 = vst [vmem:[#allocation95_spill] sm:$0xff] %v14108_v19  ;;  %v14114_v48 = vpop.eup %10304 }
 0x663   : > { %3189 = vmax.xlane.f32.xlu1 %v14103_v57  ;;  %9396 = vmatprep.mubr.bf16.mxu1 %v3929_v13  ;;  %17526 = vst [vmem:[#allocation116_spill] sm:$0xff] %v14114_v48  ;;  %v14116_v26 = vpop.eup %10306 }
 0x664   : > { %17527 = vst [vmem:[#allocation92_spill] sm:$0xff] %v14116_v26  ;;  %v14119_v8 = vpop.eup %10308  ;;  %v3930_v49 = vpack.c.bf16 %v14108_v19, %v14116_v26  ;;  %v17552_v19 = vld [vmem:[#allocation102_spill] sm:$0xff] }
 0x665   : > { %17528 = vst [vmem:[#allocation113_spill] sm:$0xff] %v14119_v8  ;;  %v3931_v22 = vpack.c.bf16 %v14114_v48, %v14119_v8  ;;  %v14140_v62 = vpop.eup %10310 }
 0x666   : > { %17530 = vst [vmem:[#allocation99_spill] sm:$0xff] %v14140_v62  ;;  %v14146_v32 = vpop.eup %10312 }
 0x667   : > { %3193 = vmax.xlane.f32.xlu1 %v14112_v37  ;;  %17531 = vst [vmem:[#allocation31_spill] sm:$0xff] %v14146_v32  ;;  %v3932_v51 = vpack.c.bf16 %v14140_v62, %v14146_v32 }
 0x668   : > { %v14121_v42 = vpop.f32.mrb[112].mxu0 }
 0x669   : > { %v14129_v50 = vpop.f32.mrb[113].mxu0 }
 0x66a   : > { %9397 = vmatmul.mubr.bf16.gmra.mrb[168].mxu1 %v3930_v49  ;;  %v14133_v53 = vpop.f32.mrb[114].mxu0 }
 0x66b   : > { %3195 = vmax.xlane.f32.xlu1 %v14127_v38  ;;  %9400 = vmatprep.mubr.bf16.mxu1 %v3931_v22  ;;  %v14136_v39 = vpop.f32.mrb[115].mxu0 }
 0x66c   : > { %1761 = vrot.lane.b32.xlu0 %v17354_v14, %s11220_s25  ;;  %v14157_v14 = vadd.f32 %v13756_v30, %v17302_v28  ;;  %v14177_v28 = vadd.f32 %v13750_v3, %v17301_v9 }
 0x66f   : > { %3221 = vmax.xlane.f32.xlu1 %v14144_v16 }
 0x670   : > { %1739 = vrot.lane.b32.xlu0 %v17397_v61, %s11218_s18  ;;  %v14151_v4 = vpop.f32.mrb[128].mxu1 }
 0x671   : > { %v14159_v63 = vpop.f32.mrb[129].mxu1 }
 0x672   : > { %9401 = vmatmul.mubr.bf16.gmra.mrb[172].mxu1 %v3932_v51  ;;  %v14161_v27 = vpop.f32.mrb[130].mxu1 }
 0x673   : > { %3223 = vmax.xlane.f32.xlu1 %v14157_v14  ;;  %v14164_v59 = vpop.f32.mrb[131].mxu1 }
 0x674   : > { %1741 = vrot.lane.b32.xlu0 %v17402_v56, %s11218_s18 }
 0x677   : > { %3225 = vmax.xlane.f32.xlu1 %v14170_v25 }
 0x678   : > { %1765 = vrot.lane.b32.xlu0 %v17402_v56, %s11220_s25 }
 0x679   : > { %v14179_v30 = vpop.f32.mrb[116].mxu0 }
 0x67a   : > { %17532 = vst [vmem:[#allocation87_spill] sm:$0xff] %v14179_v30  ;;  %v14181_v0 = vpop.f32.mrb[117].mxu0 }
 0x67b   : > { %17533 = vst [vmem:[#allocation144_spill] sm:$0xff] %v14181_v0  ;;  %3227 = vmax.xlane.f32.xlu1 %v14177_v28  ;;  %v14184_v13 = vpop.f32.mrb[118].mxu0 }
 0x67c   : > { %17534 = vst [vmem:[#allocation145_spill] sm:$0xff] %v14184_v13  ;;  %1743 = vrot.lane.b32.xlu0 %v17418_v55, %s11218_s18  ;;  %v14188_v43 = vpop.f32.mrb[119].mxu0 }
 0x67d   : > { %17535 = vst [vmem:[#allocation146_spill] sm:$0xff] %v14188_v43  ;;  %v14190_v15 = vpop.f32.mrb[132].mxu1 }
 0x67e   : > { %17536 = vst [vmem:[#allocation147_spill] sm:$0xff] %v14190_v15  ;;  %v14192_v56 = vpop.f32.mrb[133].mxu1 }
 0x67f   : > { %17537 = vst [vmem:[#allocation148_spill] sm:$0xff] %v14192_v56  ;;  %v14194_v17 = vpop.f32.mrb[134].mxu1  ;;  %v17579_v56 = vld [vmem:[#allocation114_spill] sm:$0xff] }
 0x680   : > { %17538 = vst [vmem:[#allocation149_spill] sm:$0xff] %v14194_v17  ;;  %1767 = vrot.lane.b32.xlu0 %v17418_v55, %s11220_s25  ;;  %v14198_v9 = vpop.f32.mrb[135].mxu1 }
 0x681   : > { %17539 = vst [vmem:[#allocation150_spill] sm:$0xff] %v14198_v9 }
 0x685   : > { %v14200_v3 = vpop.f32.mrb[136].mxu1  ;;  %v3184_v49 = vpop.xlane.xlu0 %3183 }
 0x686   : > { %17540 = vst [vmem:[#allocation151_spill] sm:$0xff] %v14200_v3  ;;  %v3182_v21 = vpop.xlane.xlu1 %3181  ;;  %v3342_v22 = vsub.f32 %v13944_v18, %v3184_v49  ;;  %v14203_v51 = vpop.f32.mrb[137].mxu1 }
 0x687   : > { %17541 = vst [vmem:[#allocation152_spill] sm:$0xff] %v14203_v51  ;;  %v3341_v33 = vsub.f32 %v13948_v31, %v3182_v21  ;;  %v14206_v1 = vpop.f32.mrb[138].mxu1  ;;  %v17564_v51 = vld [vmem:[#allocation112_spill] sm:$0xff] }
 0x688   : > { %17542 = vst [vmem:[#allocation153_spill] sm:$0xff] %v14206_v1  ;;  %v3567_v36 = vmul.f32 1.442695, %v3342_v22  ;;  %v14208_v10 = vpop.f32.mrb[139].mxu1  ;;  %v14286_v13 = vadd.f32 %v17564_v51, %v17304_v24  ;;  %v17571_v51 = vld [vmem:[#allocation117_spill] sm:$0xff] }
 0x689   : > { %17543 = vst [vmem:[#allocation154_spill] sm:$0xff] %v14208_v10  ;;  %v3565_v40 = vmul.f32 1.442695, %v3341_v33  ;;  %v14210_v32 = vpop.xlane.xlu0 %3185 }
 0x68a   : > { %10314 = vpow2.f32 %v3567_v36  ;;  %v1754_v55 = vpop.permute.xlu1 %1753 }
 0x68b   : > { %10316 = vpow2.f32 %v3565_v40  ;;  %9436 = vmatprep.subr.bf16.mxu1 %v1754_v55 }
 0x68c   : > { %1763 = vrot.lane.b32.xlu1 %v17397_v61, %s11220_s25  ;;  %9437 = vmatpush3.bf16.msra.mxu1 %v1754_v55  ;;  %v14214_v18 = vpop.f32.mrb[120].mxu0 }
 0x68d   : > { %17544 = vst [vmem:[#allocation155_spill] sm:$0xff] %v14214_v18  ;;  %v14216_v49 = vpop.f32.mrb[121].mxu0  ;;  %v14218_v31 = vpop.xlane.xlu0 %3187 }
 0x68e   : > { %17545 = vst [vmem:[#allocation156_spill] sm:$0xff] %v14216_v49  ;;  %v14220_v21 = vpop.f32.mrb[122].mxu0 }
 0x68f   : > { %17546 = vst [vmem:[#allocation157_spill] sm:$0xff] %v14220_v21  ;;  %v14222_v22 = vpop.f32.mrb[123].mxu0  ;;  %v14244_v21 = vadd.f32 %v17553_v7, %v17552_v19 }
 0x690   : > { %17547 = vst [vmem:[#allocation158_spill] sm:$0xff] %v14222_v22  ;;  %v17556_v22 = vld [vmem:[#allocation100_spill] sm:$0xff] }
 0x691   : > { %v3216_v33 = vpop.xlane.xlu0 %3215 }
 0x694   : > { %v14224_v8 = vpop.eup %10314 }
 0x695   : > { %v14226_v36 = vpop.eup %10316  ;;  %v14228_v40 = vpop.xlane.xlu0 %3217 }
 0x696   : > { %v3933_v61 = vpack.c.bf16 %v14224_v8, %v14226_v36 }
 0x698   : > { %9420 = vmatprep.mubr.bf16.mxu0 %v3933_v61  ;;  %v14232_v55 = vpop.f32.mrb[140].mxu1 }
 0x699   : > { %17548 = vst [vmem:[#allocation159_spill] sm:$0xff] %v14232_v55  ;;  %v14234_v62 = vpop.xlane.xlu0 %3219  ;;  %v14236_v48 = vpop.f32.mrb[141].mxu1  ;;  %v17555_v55 = vld [vmem:[#allocation101_spill] sm:$0xff] }
 0x69a   : > { %17549 = vst [vmem:[#allocation160_spill] sm:$0xff] %v14236_v48  ;;  %v14238_v26 = vpop.f32.mrb[142].mxu1  ;;  %v14251_v49 = vadd.f32 %v17556_v22, %v17555_v55  ;;  %v14267_v22 = vadd.f32 %v13789_v29, %v17304_v24  ;;  %v17570_v24 = vld [vmem:[#allocation98_spill] sm:$0xff] }
 0x69b   : > { %17550 = vst [vmem:[#allocation161_spill] sm:$0xff] %v14238_v26  ;;  %v14240_v35 = vpop.f32.mrb[143].mxu1 }
 0x69c   : > { %17551 = vst [vmem:[#allocation162_spill] sm:$0xff] %v14240_v35  ;;  %v17560_v35 = vld [vmem:[#allocation111_spill] sm:$0xff] }
 0x69d   : > { %v1732_v18 = vpop.permute.xlu0 %1731 }
 0x69e   : > { %9406 = vmatprep.subr.bf16.mxu0 %v1732_v18 }
 0x69f   : > { %3197 = vmax.xlane.f32.xlu0 %v14244_v21  ;;  %9407 = vmatpush3.bf16.msra.mxu0 %v1732_v18  ;;  %v14262_v18 = vadd.f32 %v17560_v35, %v17303_v2 }
 0x6a0   : > { %v14247_v61 = vpop.f32.mrb[124].mxu0 }
 0x6a1   : > { %17554 = vst [vmem:[#allocation102_spill] sm:$0xff] %v14247_v61  ;;  %v1734_v48 = vpop.permute.xlu0 %1733  ;;  %v14253_v1 = vpop.f32.mrb[125].mxu0 }
 0x6a2   : > { %17557 = vst [vmem:[#allocation35_spill] sm:$0xff] %v14253_v1  ;;  %9408 = vmatprep.subr.bf16.mxu0 %v1734_v48  ;;  %v14255_v26 = vpop.f32.mrb[126].mxu0 }
 0x6a3   : > { %17558 = vst [vmem:[#allocation101_spill] sm:$0xff] %v14255_v26  ;;  %3201 = vmax.xlane.f32.xlu0 %v14251_v49  ;;  %9409 = vmatpush3.bf16.msra.mxu0 %v1734_v48  ;;  %v14258_v7 = vpop.f32.mrb[127].mxu0 }
 0x6a4   : > { %17559 = vst [vmem:[#allocation100_spill] sm:$0xff] %v14258_v7  ;;  %v14280_v7 = vadd.f32 %v13785_v54, %v17303_v2  ;;  %v17568_v2 = vld [vmem:[#allocation118_spill] sm:$0xff] }
 0x6a5   : > { %v1758_v61 = vpop.permute.xlu0 %1757  ;;  %v14298_v54 = vadd.f32 %v17568_v2, %v17309_v5  ;;  %v3358_v2 = vsub.f32 %v13983_v44, %v3216_v33  ;;  %v17576_v33 = vld [vmem:[#allocation107_spill] sm:$0xff] }
 0x6a7   : > { %3203 = vmax.xlane.f32.xlu0 %v14262_v18 }
 0x6a9   : > { %v1736_v1 = vpop.permute.xlu0 %1735  ;;  %v14269_v3 = vpop.f32.mrb[144].mxu1 }
 0x6aa   : > { %17561 = vst [vmem:[#allocation111_spill] sm:$0xff] %v14269_v3  ;;  %9410 = vmatprep.subr.bf16.mxu0 %v1736_v1  ;;  %v14271_v26 = vpop.f32.mrb[145].mxu1 }
 0x6ab   : > { %3231 = vmax.xlane.f32.xlu0 %v14267_v22  ;;  %9411 = vmatpush3.bf16.msra.mxu0 %v1736_v1  ;;  %v14274_v48 = vpop.f32.mrb[146].mxu1 }
 0x6ac   : > { %17562 = vst [vmem:[#allocation163_spill] sm:$0xff] %v14274_v48  ;;  %v14276_v35 = vpop.f32.mrb[147].mxu1 }
 0x6ad   : > { %v1760_v10 = vpop.permute.xlu0 %1759  ;;  %v14282_v29 = vpop.f32.mrb[128].mxu0 }
 0x6ae   : > { %17563 = vst [vmem:[#allocation164_spill] sm:$0xff] %v14282_v29  ;;  %v14288_v30 = vpop.f32.mrb[129].mxu0  ;;  %v17569_v29 = vld [vmem:[#allocation91_spill] sm:$0xff] }
 0x6af   : > { %17565 = vst [vmem:[#allocation112_spill] sm:$0xff] %v14288_v30  ;;  %3235 = vmax.xlane.f32.xlu0 %v14280_v7  ;;  %v14291_v1 = vpop.f32.mrb[130].mxu0  ;;  %v14302_v17 = vadd.f32 %v17569_v29, %v17552_v19  ;;  %v17572_v30 = vld [vmem:[#allocation65_spill] sm:$0xff]  ;;  %v14319_v19 = vadd.f32 %v13829_v23, %v17309_v5  ;;  %v17574_v29 = vld [vmem:[#allocation115_spill] sm:$0xff] }
 0x6b0   : > { %17566 = vst [vmem:[#allocation165_spill] sm:$0xff] %v14291_v1  ;;  %3199 = vmax.xlane.f32.xlu1 %v14286_v13  ;;  %v14294_v43 = vpop.f32.mrb[131].mxu0  ;;  %v14308_v1 = vadd.f32 %v17571_v51, %v17570_v24  ;;  %v3599_v51 = vmul.f32 1.442695, %v3358_v2  ;;  %v17578_v23 = vld [vmem:[#allocation103_spill] sm:$0xff] }
 0x6b1   : > { %17567 = vst [vmem:[#allocation166_spill] sm:$0xff] %v14294_v43  ;;  %v1738_v0 = vpop.permute.xlu0 %1737  ;;  %v14312_v43 = vadd.f32 %v17572_v30, %v17555_v55  ;;  %v14332_v55 = vadd.f32 %v17576_v33, %v17570_v24  ;;  %v17583_v24 = vld [vmem:[#allocation42_spill] sm:$0xff] }
 0x6b2   : > { %9412 = vmatprep.subr.bf16.mxu0 %v1738_v0  ;;  %10318 = vpow2.f32 %v3599_v51  ;;  %v17585_v51 = vld [vmem:[#allocation136_spill] sm:$0xff] }
 0x6b3   : > { %3207 = vmax.xlane.f32.xlu0 %v14298_v54  ;;  %9413 = vmatpush3.bf16.msra.mxu0 %v1738_v0  ;;  %v17573_v0 = vld [vmem:[#allocation104_spill] sm:$0xff] }
 0x6b4   : > { %3229 = vmax.xlane.f32.xlu1 %v14302_v17  ;;  %v14323_v15 = vadd.f32 %v17574_v29, %v17573_v0  ;;  %v14338_v29 = vadd.f32 %v17579_v56, %v17578_v23  ;;  %v14350_v56 = vadd.f32 %v17583_v24, %v17573_v0 }
 0x6b7   : > { %3211 = vmax.xlane.f32.xlu0 %v14308_v1 }
 0x6b8   : > { %3233 = vmax.xlane.f32.xlu1 %v14312_v43 }
 0x6bb   : > { %v3214_v9 = vpop.xlane.xlu1 %3213  ;;  %3239 = vmax.xlane.f32.xlu0 %v14319_v19 }
 0x6bc   : > { %v3357_v30 = vsub.f32 %v14019_v12, %v3214_v9  ;;  %3205 = vmax.xlane.f32.xlu1 %v14323_v15  ;;  %v14328_v44 = vpop.f32.mrb[132].mxu0  ;;  %v14366_v0 = vpop.eup %10318 }
 0x6bd   : > { %17575 = vst [vmem:[#allocation118_spill] sm:$0xff] %v14328_v44  ;;  %v14334_v5 = vpop.f32.mrb[133].mxu0 }
 0x6be   : > { %17577 = vst [vmem:[#allocation91_spill] sm:$0xff] %v14334_v5  ;;  %v3597_v2 = vmul.f32 1.442695, %v3357_v30  ;;  %v14340_v48 = vpop.f32.mrb[134].mxu0  ;;  %v17589_v5 = vld [vmem:[#allocation135_spill] sm:$0xff] }
 0x6bf   : > { %17580 = vst [vmem:[#allocation98_spill] sm:$0xff] %v14340_v48  ;;  %v1756_v3 = vpop.permute.xlu1 %1755  ;;  %3243 = vmax.xlane.f32.xlu0 %v14332_v55  ;;  %v14343_v12 = vpop.f32.mrb[135].mxu0  ;;  %v17592_v48 = vld [vmem:[#allocation128_spill] sm:$0xff] }
 0x6c0   : > { %17581 = vst [vmem:[#allocation117_spill] sm:$0xff] %v14343_v12  ;;  %10320 = vpow2.f32 %v3597_v2  ;;  %3209 = vmax.xlane.f32.xlu1 %v14338_v29  ;;  %9438 = vmatprep.subr.bf16.mxu1 %v1756_v3 }
 0x6c1   : > { %9439 = vmatpush3.bf16.msra.mxu1 %v1756_v3  ;;  %v14346_v9 = vpop.f32.mrb[148].mxu1  ;;  %v17588_v3 = vld [vmem:[#allocation96_spill] sm:$0xff] }
 0x6c2   : > { %17582 = vst [vmem:[#allocation65_spill] sm:$0xff] %v14346_v9  ;;  %9440 = vmatprep.subr.bf16.mxu1 %v1758_v61  ;;  %v14352_v30 = vpop.f32.mrb[149].mxu1  ;;  %v14362_v44 = vadd.f32 %v17588_v3, %v17578_v23  ;;  %v17594_v3 = vld [vmem:[#allocation134_spill] sm:$0xff] }
 0x6c3   : > { %17584 = vst [vmem:[#allocation104_spill] sm:$0xff] %v14352_v30  ;;  %3663 = vadd.xlane.f32.xlu0 %v17585_v51  ;;  %v14355_v33 = vpop.f32.mrb[150].mxu1  ;;  %v17602_v9 = vld [vmem:[#allocation38_spill] sm:$0xff] }
 0x6c4   : > { %17586 = vst [vmem:[#allocation115_spill] sm:$0xff] %v14355_v33  ;;  %3237 = vmax.xlane.f32.xlu1 %v14350_v56  ;;  %v14358_v2 = vpop.f32.mrb[151].mxu1  ;;  %v17596_v33 = vld [vmem:[#allocation126_spill] sm:$0xff] }
 0x6c5   : > { %17587 = vst [vmem:[#allocation107_spill] sm:$0xff] %v14358_v2  ;;  %9441 = vmatpush3.bf16.msra.mxu1 %v1758_v61  ;;  %v17612_v2 = vld [vmem:[#allocation139_spill] sm:$0xff]  ;;  %v17614_v30 = vld [vmem:[#allocation78_spill] sm:$0xff] }
 0x6c6   : > { %9442 = vmatprep.subr.bf16.mxu1 %v1760_v10 }
 0x6c7   : > { %3667 = vadd.xlane.f32.xlu0 %v17589_v5 }
 0x6c8   : > { %3241 = vmax.xlane.f32.xlu1 %v14362_v44 }
 0x6c9   : > { %9443 = vmatpush3.bf16.msra.mxu1 %v1760_v10  ;;  %v14368_v24 = vpop.f32.mrb[152].mxu1  ;;  %v17597_v10 = vld [vmem:[#allocation137_spill] sm:$0xff] }
 0x6ca   : > { %17590 = vst [vmem:[#allocation103_spill] sm:$0xff] %v14368_v24  ;;  %v14370_v51 = vpop.eup %10320  ;;  %v14372_v12 = vpop.f32.mrb[153].mxu1  ;;  %v17598_v24 = vld [vmem:[#allocation129_spill] sm:$0xff] }
 0x6cb   : > { %17591 = vst [vmem:[#allocation114_spill] sm:$0xff] %v14372_v12  ;;  %3695 = vadd.xlane.f32.xlu0 %v17592_v48  ;;  %v14375_v61 = vpop.f32.mrb[154].mxu1  ;;  %v3941_v23 = vpack.c.bf16 %v14366_v0, %v14370_v51 }
 0x6cc   : > { %17593 = vst [vmem:[#allocation42_spill] sm:$0xff] %v14375_v61  ;;  %3661 = vadd.xlane.f32.xlu1 %v17594_v3  ;;  %v14380_v5 = vpop.f32.mrb[155].mxu1 }
 0x6cd   : > { %17595 = vst [vmem:[#allocation136_spill] sm:$0xff] %v14380_v5  ;;  %9452 = vmatprep.mubr.bf16.mxu1 %v3941_v23  ;;  %v17604_v5 = vld [vmem:[#allocation130_spill] sm:$0xff]  ;;  %v17605_v23 = vld [vmem:[#allocation37_spill] sm:$0xff] }
 0x6cf   : > { %3699 = vadd.xlane.f32.xlu0 %v17596_v33  ;;  %v17606_v33 = vld [vmem:[#allocation48_spill] sm:$0xff] }
 0x6d0   : > { %3665 = vadd.xlane.f32.xlu1 %v17597_v10  ;;  %v17607_v10 = vld [vmem:[#allocation74_spill] sm:$0xff] }
 0x6d3   : > { %3727 = vadd.xlane.f32.xlu0 %v13854_v45  ;;  %v17608_v45 = vld [vmem:[#allocation50_spill] sm:$0xff] }
 0x6d4   : > { %3693 = vadd.xlane.f32.xlu1 %v17598_v24  ;;  %v14386_v12 = vpop.f32.mrb[156].mxu1 }
 0x6d5   : > { %17599 = vst [vmem:[#allocation96_spill] sm:$0xff] %v14386_v12  ;;  %v14388_v48 = vpop.f32.mrb[157].mxu1  ;;  %v17609_v12 = vld [vmem:[#allocation142_spill] sm:$0xff] }
 0x6d6   : > { %17600 = vst [vmem:[#allocation135_spill] sm:$0xff] %v14388_v48  ;;  %v14390_v61 = vpop.f32.mrb[158].mxu1  ;;  %v17610_v48 = vld [vmem:[#allocation34_spill] sm:$0xff] }
 0x6d7   : > { %17601 = vst [vmem:[#allocation128_spill] sm:$0xff] %v14390_v61  ;;  %3731 = vadd.xlane.f32.xlu0 %v17602_v9  ;;  %v14393_v3 = vpop.f32.mrb[159].mxu1  ;;  %v3344_v61 = vsub.f32 %v13971_v41, %v14218_v31  ;;  %v17611_v9 = vld [vmem:[#allocation71_spill] sm:$0xff]  ;;  %v17615_v31 = vld [vmem:[#allocation32_spill] sm:$0xff] }
 0x6d8   : > { %17603 = vst [vmem:[#allocation134_spill] sm:$0xff] %v14393_v3  ;;  %3697 = vadd.xlane.f32.xlu1 %v17604_v5  ;;  %v3343_v3 = vsub.f32 %v17611_v9, %v14210_v32 }
 0x6db   : > { %3671 = vadd.xlane.f32.xlu0 %v17605_v23  ;;  %v3571_v23 = vmul.f32 1.442695, %v3344_v61 }
 0x6dc   : > { %3725 = vadd.xlane.f32.xlu1 %v17606_v33  ;;  %v17613_v33 = vld [vmem:[#allocation143_spill] sm:$0xff] }
 0x6dd   : > { %10322 = vpow2.f32 %v3571_v23 }
 0x6df   : > { %3675 = vadd.xlane.f32.xlu0 %v17607_v10  ;;  %v3569_v10 = vmul.f32 1.442695, %v3343_v3 }
 0x6e0   : > { %3729 = vadd.xlane.f32.xlu1 %v17608_v45 }
 0x6e1   : > { %10324 = vpow2.f32 %v3569_v10 }
 0x6e2   : > { %v3192_v24 = vpop.xlane.xlu0 %3191 }
 0x6e3   : > { %3703 = vadd.xlane.f32.xlu0 %v17609_v12  ;;  %v3346_v41 = vsub.f32 %v14062_v58, %v3192_v24  ;;  %v17616_v12 = vld [vmem:[#allocation55_spill] sm:$0xff]  ;;  %v17619_v24 = vld [vmem:[#allocation108_spill] sm:$0xff] }
 0x6e4   : > { %3669 = vadd.xlane.f32.xlu1 %v17610_v48  ;;  %v17617_v48 = vld [vmem:[#allocation141_spill] sm:$0xff] }
 0x6e6   : > { %v1762_v5 = vpop.permute.xlu0 %1761 }
 0x6e7   : > { %3707 = vadd.xlane.f32.xlu0 %v17612_v2  ;;  %9444 = vmatprep.subr.bf16.mxu1 %v1762_v5  ;;  %v3575_v2 = vmul.f32 1.442695, %v3346_v41 }
 0x6e8   : > { %3673 = vadd.xlane.f32.xlu1 %v17613_v33  ;;  %9445 = vmatpush3.bf16.msra.mxu1 %v1762_v5  ;;  %v17618_v5 = vld [vmem:[#allocation39_spill] sm:$0xff]  ;;  %v14419_v33 = vpop.eup %10322 }
 0x6e9   : > { %10326 = vpow2.f32 %v3575_v2 }
 0x6ea   : > { %v1740_v45 = vpop.permute.xlu0 %1739 }
 0x6eb   : > { %3735 = vadd.xlane.f32.xlu0 %v17614_v30  ;;  %9414 = vmatprep.subr.bf16.mxu0 %v1740_v45  ;;  %v14422_v41 = vpop.eup %10324 }
 0x6ec   : > { %3701 = vadd.xlane.f32.xlu1 %v17615_v31  ;;  %9415 = vmatpush3.bf16.msra.mxu0 %v1740_v45  ;;  %v17620_v45 = vld [vmem:[#allocation72_spill] sm:$0xff]  ;;  %v3934_v2 = vpack.c.bf16 %v14419_v33, %v14422_v41 }
 0x6ee   : > { %v1742_v32 = vpop.permute.xlu0 %1741 }
 0x6ef   : > { %3739 = vadd.xlane.f32.xlu0 %v17616_v12  ;;  %9416 = vmatprep.subr.bf16.mxu0 %v1742_v32 }
 0x6f0   : > { %v3190_v61 = vpop.xlane.xlu1 %3189  ;;  %3705 = vadd.xlane.f32.xlu1 %v17617_v48  ;;  %9417 = vmatpush3.bf16.msra.mxu0 %v1742_v32  ;;  %v17621_v32 = vld [vmem:[#allocation64_spill] sm:$0xff] }
 0x6f1   : > { %v3345_v3 = vsub.f32 %v14103_v57, %v3190_v61 }
 0x6f2   : > { %v14414_v30 = vpop.permute.xlu0 %1765 }
 0x6f3   : > { %v3573_v9 = vmul.f32 1.442695, %v3345_v3  ;;  %3679 = vadd.xlane.f32.xlu0 %v17618_v5  ;;  %v17623_v3 = vld [vmem:[#allocation90_spill] sm:$0xff] }
 0x6f4   : > { %v3194_v58 = vpop.xlane.xlu1 %3193  ;;  %3733 = vadd.xlane.f32.xlu1 %v17619_v24 }
 0x6f5   : > { %10328 = vpow2.f32 %v3573_v9  ;;  %v3347_v23 = vsub.f32 %v14112_v37, %v3194_v58  ;;  %v17622_v37 = vld [vmem:[#allocation40_spill] sm:$0xff]  ;;  %v14430_v9 = vpop.eup %10326 }
 0x6f6   : > { %v1744_v10 = vpop.permute.xlu0 %1743  ;;  %v17624_v58 = vld [vmem:[#allocation36_spill] sm:$0xff] }
 0x6f7   : > { %3683 = vadd.xlane.f32.xlu0 %v17620_v45  ;;  %9418 = vmatprep.subr.bf16.mxu0 %v1744_v10  ;;  %v3577_v57 = vmul.f32 1.442695, %v3347_v23 }
 0x6f8   : > { %v3196_v31 = vpop.xlane.xlu1 %3195  ;;  %3737 = vadd.xlane.f32.xlu1 %v17621_v32  ;;  %9419 = vmatpush3.bf16.msra.mxu0 %v1744_v10  ;;  %v3360_v10 = vsub.f32 %v13994_v47, %v14234_v62  ;;  %v17628_v47 = vld [vmem:[#allocation86_spill] sm:$0xff] }
 0x6f9   : > { %v3348_v12 = vsub.f32 %v14127_v38, %v3196_v31  ;;  %10330 = vpow2.f32 %v3577_v57  ;;  %v17625_v38 = vld [vmem:[#allocation25_spill] sm:$0xff]  ;;  %v17626_v57 = vld [vmem:[#allocation67_spill] sm:$0xff]  ;;  %v3359_v31 = vsub.f32 %v13988_v11, %v14228_v40 }
 0x6fb   : > { %v3579_v61 = vmul.f32 1.442695, %v3348_v12  ;;  %3711 = vadd.xlane.f32.xlu0 %v17622_v37  ;;  %9421 = vmatmul.mubr.bf16.vlgmr.msra.gmra.mrb[144].mxu0 %v3934_v2  ;;  %v17627_v12 = vld [vmem:[#allocation24_spill] sm:$0xff]  ;;  %v3603_v37 = vmul.f32 1.442695, %v3360_v10  ;;  %v17631_v10 = vld [vmem:[#allocation109_spill] sm:$0xff] }
 0x6fc   : > { %v3222_v48 = vpop.xlane.xlu1 %3221  ;;  %3677 = vadd.xlane.f32.xlu1 %v17623_v3  ;;  %v3601_v62 = vmul.f32 1.442695, %v3359_v31 }
 0x6fd   : > { %10332 = vpow2.f32 %v3579_v61  ;;  %v3361_v2 = vsub.f32 %v14144_v16, %v3222_v48  ;;  %v17630_v16 = vld [vmem:[#allocation27_spill] sm:$0xff] }
 0x6fe   : > { %10334 = vpow2.f32 %v3603_v37 }
 0x6ff   : > { %v14432_v5 = vpop.eup %10328  ;;  %3715 = vadd.xlane.f32.xlu0 %v17624_v58  ;;  %v3605_v40 = vmul.f32 1.442695, %v3361_v2  ;;  %v17634_v2 = vld [vmem:[#allocation85_spill] sm:$0xff] }
 0x700   : > { %v3224_v24 = vpop.xlane.xlu1 %3223  ;;  %3681 = vadd.xlane.f32.xlu1 %v17625_v38  ;;  %v3935_v23 = vpack.c.bf16 %v14430_v9, %v14432_v5 }
 0x701   : > { %v3362_v45 = vsub.f32 %v14157_v14, %v3224_v24  ;;  %v17629_v24 = vld [vmem:[#allocation81_spill] sm:$0xff] }
 0x702   : > { %9424 = vmatprep.mubr.bf16.mxu0 %v3935_v23 }
 0x703   : > { %3743 = vadd.xlane.f32.xlu0 %v17626_v57  ;;  %v14446_v61 = vpop.eup %10330  ;;  %v3607_v58 = vmul.f32 1.442695, %v3362_v45  ;;  %v17632_v57 = vld [vmem:[#allocation105_spill] sm:$0xff] }
 0x704   : > { %v3226_v32 = vpop.xlane.xlu1 %3225  ;;  %3709 = vadd.xlane.f32.xlu1 %v17627_v12  ;;  %v1768_v12 = vpop.permute.xlu0 %1767 }
 0x705   : > { %10336 = vpow2.f32 %v3607_v58  ;;  %v3363_v48 = vsub.f32 %v14170_v25, %v3226_v32  ;;  %v17635_v32 = vld [vmem:[#allocation88_spill] sm:$0xff] }
 0x706   : > { %10338 = vpow2.f32 %v3601_v62  ;;  %v17636_v62 = vld [vmem:[#allocation26_spill] sm:$0xff] }
 0x707   : > { %v14448_v3 = vpop.eup %10332  ;;  %3747 = vadd.xlane.f32.xlu0 %v17628_v47  ;;  %10340 = vpow2.f32 %v3605_v40  ;;  %v3609_v31 = vmul.f32 1.442695, %v3363_v48 }
 0x708   : > { %v3228_v14 = vpop.xlane.xlu1 %3227  ;;  %3713 = vadd.xlane.f32.xlu1 %v17629_v24  ;;  %v3936_v11 = vpack.c.bf16 %v14448_v3, %v14446_v61  ;;  %v14463_v25 = vpop.eup %10334 }
 0x709   : > { %v3364_v38 = vsub.f32 %v14177_v28, %v3228_v14  ;;  %v17633_v28 = vld [vmem:[#allocation69_spill] sm:$0xff]  ;;  %v17637_v14 = vld [vmem:[#allocation80_spill] sm:$0xff] }
 0x70a   : > { %9425 = vmatmul.mubr.bf16.gmra.mrb[148].mxu0 %v3936_v11 }
 0x70b   : > { %3687 = vadd.xlane.f32.xlu0 %v17630_v16  ;;  %v3611_v45 = vmul.f32 1.442695, %v3364_v38  ;;  %v17640_v38 = vld [vmem:[#allocation79_spill] sm:$0xff] }
 0x70c   : > { %v1764_v23 = vpop.permute.xlu1 %1763  ;;  %3741 = vadd.xlane.f32.xlu1 %v17631_v10 }
 0x70d   : > { %9446 = vmatprep.subr.bf16.mxu1 %v1764_v23  ;;  %10342 = vpow2.f32 %v3611_v45 }
 0x70e   : > { %9447 = vmatpush3.bf16.msra.mxu1 %v1764_v23  ;;  %10344 = vpow2.f32 %v3609_v31  ;;  %v17642_v23 = vld [vmem:[#allocation51_spill] sm:$0xff] }
 0x70f   : > { %3691 = vadd.xlane.f32.xlu0 %v17632_v57  ;;  %9448 = vmatprep.subr.bf16.mxu1 %v14414_v30  ;;  %v14466_v37 = vpop.eup %10336  ;;  %v17644_v57 = vld [vmem:[#allocation84_spill] sm:$0xff] }
 0x710   : > { %3745 = vadd.xlane.f32.xlu1 %v17633_v28  ;;  %v14468_v58 = vpop.eup %10338  ;;  %v17645_v28 = vld [vmem:[#allocation66_spill] sm:$0xff] }
 0x711   : > { %v14470_v47 = vpop.eup %10340 }
 0x712   : > { %9449 = vmatpush3.bf16.msra.mxu1 %v14414_v30  ;;  %v3942_v30 = vpack.c.bf16 %v14463_v25, %v14468_v58  ;;  %v3943_v24 = vpack.c.bf16 %v14466_v37, %v14470_v47 }
 0x713   : > { %3719 = vadd.xlane.f32.xlu0 %v17634_v2  ;;  %9450 = vmatprep.subr.bf16.mxu1 %v1768_v12  ;;  %v17647_v2 = vld [vmem:[#allocation75_spill] sm:$0xff] }
 0x714   : > { %3685 = vadd.xlane.f32.xlu1 %v17635_v32  ;;  %v17648_v32 = vld [vmem:[#allocation20_spill] sm:$0xff] }
 0x716   : > { %9451 = vmatpush3.bf16.msra.mxu1 %v1768_v12  ;;  %v17646_v12 = vld [vmem:[#allocation19_spill] sm:$0xff] }
 0x717   : > { %3723 = vadd.xlane.f32.xlu0 %v17636_v62  ;;  %v14485_v48 = vpop.eup %10342  ;;  %v17649_v62 = vld [vmem:[#allocation59_spill] sm:$0xff] }
 0x718   : > { %3689 = vadd.xlane.f32.xlu1 %v17637_v14  ;;  %v14490_v45 = vpop.eup %10344  ;;  %v17651_v14 = vld [vmem:[#allocation60_spill] sm:$0xff] }
 0x719   : > { %9453 = vmatmul.mubr.bf16.vlgmr.msra.gmra.mrb[176].mxu1 %v3942_v30  ;;  %v14478_v11 = vpop.f32.mrb[136].mxu0  ;;  %v3944_v31 = vpack.c.bf16 %v14485_v48, %v14490_v45  ;;  %v17650_v30 = vld [vmem:[#allocation52_spill] sm:$0xff] }
 0x71a   : > { %17638 = vst [vmem:[#allocation126_spill] sm:$0xff] %v14478_v11  ;;  %9456 = vmatprep.mubr.bf16.mxu1 %v3943_v24  ;;  %v14480_v40 = vpop.f32.mrb[137].mxu0 }
 0x71b   : > { %17639 = vst [vmem:[#allocation137_spill] sm:$0xff] %v14480_v40  ;;  %3751 = vadd.xlane.f32.xlu0 %v17640_v38  ;;  %v14483_v16 = vpop.f32.mrb[138].mxu0 }
 0x71c   : > { %17641 = vst [vmem:[#allocation129_spill] sm:$0xff] %v14483_v16  ;;  %3717 = vadd.xlane.f32.xlu1 %v17642_v23  ;;  %v14488_v10 = vpop.f32.mrb[139].mxu0 }
 0x71d   : > { %17643 = vst [vmem:[#allocation38_spill] sm:$0xff] %v14488_v10 }
 0x71f   : > { %3755 = vadd.xlane.f32.xlu0 %v17644_v57 }
 0x720   : > { %3721 = vadd.xlane.f32.xlu1 %v17645_v28 }
 0x721   : > { %9457 = vmatmul.mubr.bf16.gmra.mrb[180].mxu1 %v3944_v31  ;;  %v17652_v31 = vld [vmem:[#allocation77_spill] sm:$0xff] }
 0x723   : > { %3631 = vadd.xlane.f32.xlu0 %v17646_v12 }
 0x724   : > { %3749 = vadd.xlane.f32.xlu1 %v17647_v2  ;;  %v17653_v2 = vld [vmem:[#allocation89_spill] sm:$0xff] }
 0x727   : > { %3635 = vadd.xlane.f32.xlu0 %v17648_v32 }
 0x728   : > { %3753 = vadd.xlane.f32.xlu1 %v17649_v62 }
 0x72b   : > { %3791 = vadd.xlane.f32.xlu0 %v17650_v30 }
 0x72c   : > { %3629 = vadd.xlane.f32.xlu1 %v17651_v14  ;;  %v3198_v24 = vpop.xlane.xlu0 %3197 }
 0x72d   : > { %v14502_v38 = vpop.f32.mrb[160].mxu1 }
 0x72e   : > { %v14504_v23 = vpop.f32.mrb[161].mxu1 }
 0x72f   : > { %v14506_v57 = vpop.f32.mrb[162].mxu1  ;;  %3795 = vadd.xlane.f32.xlu0 %v14067_v34 }
 0x730   : > { %3633 = vadd.xlane.f32.xlu1 %v17652_v31  ;;  %v14510_v28 = vpop.f32.mrb[163].mxu1  ;;  %v3202_v12 = vpop.xlane.xlu0 %3201  ;;  %v3349_v31 = vsub.f32 %v14244_v21, %v3198_v24 }
 0x731   : > { %v3351_v40 = vsub.f32 %v14251_v49, %v3202_v12 }
 0x733   : > { %3823 = vadd.xlane.f32.xlu0 %v14224_v8 }
 0x734   : > { %3789 = vadd.xlane.f32.xlu1 %v17653_v2  ;;  %v3204_v32 = vpop.xlane.xlu0 %3203 }
 0x735   : > { %v14514_v62 = vpop.f32.mrb[164].mxu1  ;;  %v14516_v30 = vpop.f32.mrb[140].mxu0  ;;  %v3352_v11 = vsub.f32 %v14262_v18, %v3204_v32  ;;  %v3585_v18 = vmul.f32 1.442695, %v3351_v40  ;;  %v17661_v40 = vld [vmem:[#allocation21_spill] sm:$0xff] }
 0x736   : > { %17654 = vst [vmem:[#allocation130_spill] sm:$0xff] %v14514_v62  ;;  %17655 = vst [vmem:[#allocation37_spill] sm:$0xff] %v14516_v30  ;;  %v14518_v14 = vpop.f32.mrb[165].mxu1  ;;  %v14520_v10 = vpop.f32.mrb[141].mxu0 }
 0x737   : > { %17656 = vst [vmem:[#allocation48_spill] sm:$0xff] %v14520_v10  ;;  %v14522_v16 = vpop.f32.mrb[166].mxu1  ;;  %3827 = vadd.xlane.f32.xlu0 %v14419_v33  ;;  %v14525_v34 = vpop.f32.mrb[142].mxu0  ;;  %v3581_v10 = vmul.f32 1.442695, %v3349_v31 }
 0x738   : > { %17657 = vst [vmem:[#allocation74_spill] sm:$0xff] %v14522_v16  ;;  %17658 = vst [vmem:[#allocation50_spill] sm:$0xff] %v14525_v34  ;;  %3793 = vadd.xlane.f32.xlu1 %v14075_v60  ;;  %v14529_v8 = vpop.f32.mrb[167].mxu1  ;;  %v3232_v2 = vpop.xlane.xlu0 %3231  ;;  %v3587_v34 = vmul.f32 1.442695, %v3352_v11 }
 0x739   : > { %v14532_v30 = vpop.f32.mrb[143].mxu0  ;;  %v3366_v21 = vsub.f32 %v14267_v22, %v3232_v2  ;;  %10346 = vpow2.f32 %v3581_v10 }
 0x73a   : > { %17659 = vst [vmem:[#allocation142_spill] sm:$0xff] %v14532_v30  ;;  %10348 = vpow2.f32 %v3587_v34  ;;  %v17694_v30 = vld [vmem:[#allocation157_spill] sm:$0xff] }
 0x73b   : > { %3855 = vadd.xlane.f32.xlu0 %v14366_v0  ;;  %v3615_v22 = vmul.f32 1.442695, %v3366_v21 }
 0x73c   : > { %3821 = vadd.xlane.f32.xlu1 %v14226_v36  ;;  %v3236_v33 = vpop.xlane.xlu0 %3235 }
 0x73d   : > { %v3200_v24 = vpop.xlane.xlu1 %3199  ;;  %v14538_v60 = vpop.f32.mrb[168].mxu1  ;;  %v3368_v11 = vsub.f32 %v14280_v7, %v3236_v33  ;;  %v17665_v33 = vld [vmem:[#allocation46_spill] sm:$0xff] }
 0x73e   : > { %v3350_v16 = vsub.f32 %v14286_v13, %v3200_v24  ;;  %v14541_v62 = vpop.f32.mrb[169].mxu1 }
 0x73f   : > { %v14543_v32 = vpop.f32.mrb[170].mxu1  ;;  %3859 = vadd.xlane.f32.xlu0 %v14463_v25 }
 0x740   : > { %17660 = vst [vmem:[#allocation34_spill] sm:$0xff] %v14543_v32  ;;  %v3583_v49 = vmul.f32 1.442695, %v3350_v16  ;;  %v14546_v0 = vpop.f32.mrb[171].mxu1  ;;  %3825 = vadd.xlane.f32.xlu1 %v14422_v41  ;;  %v3208_v36 = vpop.xlane.xlu0 %3207  ;;  %v3619_v16 = vmul.f32 1.442695, %v3368_v11 }
 0x741   : > { %v3230_v12 = vpop.xlane.xlu1 %3229  ;;  %v3354_v41 = vsub.f32 %v14298_v54, %v3208_v36 }
 0x742   : > { %10350 = vpow2.f32 %v3583_v49  ;;  %v3365_v13 = vsub.f32 %v14302_v17, %v3230_v12 }
 0x743   : > { %10352 = vpow2.f32 %v3585_v18  ;;  %3639 = vadd.xlane.f32.xlu0 %v17661_v40  ;;  %v3591_v54 = vmul.f32 1.442695, %v3354_v41  ;;  %v14566_v36 = vpop.eup %10346 }
 0x744   : > { %v3613_v31 = vmul.f32 1.442695, %v3365_v13  ;;  %3853 = vadd.xlane.f32.xlu1 %v14370_v51  ;;  %v3212_v25 = vpop.xlane.xlu0 %3211  ;;  %10354 = vpow2.f32 %v3615_v22  ;;  %v14569_v22 = vpop.eup %10348  ;;  %v17667_v13 = vld [vmem:[#allocation68_spill] sm:$0xff] }
 0x745   : > { %v3234_v10 = vpop.xlane.xlu1 %3233  ;;  %v14554_v34 = vpop.f32.mrb[172].mxu1  ;;  %v3356_v18 = vsub.f32 %v14308_v1, %v3212_v25 }
 0x746   : > { %17662 = vst [vmem:[#allocation71_spill] sm:$0xff] %v14554_v34  ;;  %10356 = vpow2.f32 %v3613_v31  ;;  %v3367_v7 = vsub.f32 %v14312_v43, %v3234_v10  ;;  %v14557_v2 = vpop.f32.mrb[173].mxu1  ;;  %v17697_v34 = vld [vmem:[#allocation136_spill] sm:$0xff] }
 0x747   : > { %17663 = vst [vmem:[#allocation139_spill] sm:$0xff] %v14557_v2  ;;  %v14559_v17 = vpop.f32.mrb[174].mxu1  ;;  %3643 = vadd.xlane.f32.xlu0 %v17665_v33  ;;  %10358 = vpow2.f32 %v3619_v16  ;;  %v3595_v1 = vmul.f32 1.442695, %v3356_v18  ;;  %v17668_v33 = vld [vmem:[#allocation45_spill] sm:$0xff] }
 0x748   : > { %17664 = vst [vmem:[#allocation143_spill] sm:$0xff] %v14559_v17  ;;  %v3617_v21 = vmul.f32 1.442695, %v3367_v7  ;;  %v14562_v24 = vpop.f32.mrb[175].mxu1  ;;  %3857 = vadd.xlane.f32.xlu1 %v14468_v58  ;;  %v3240_v51 = vpop.xlane.xlu0 %3239 }
 0x749   : > { %17666 = vst [vmem:[#allocation78_spill] sm:$0xff] %v14562_v24  ;;  %v3206_v49 = vpop.xlane.xlu1 %3205  ;;  %v3370_v31 = vsub.f32 %v14319_v19, %v3240_v51  ;;  %v17700_v24 = vld [vmem:[#allocation103_spill] sm:$0xff] }
 0x74a   : > { %10360 = vpow2.f32 %v3617_v21  ;;  %v3353_v43 = vsub.f32 %v14323_v15, %v3206_v49 }
 0x74b   : > { %3799 = vadd.xlane.f32.xlu0 %v14072_v52  ;;  %10362 = vpow2.f32 %v3591_v54  ;;  %v3623_v51 = vmul.f32 1.442695, %v3370_v31 }
 0x74c   : > { %v14572_v11 = vpop.eup %10350  ;;  %v3589_v12 = vmul.f32 1.442695, %v3353_v43  ;;  %3637 = vadd.xlane.f32.xlu1 %v17667_v13  ;;  %v3244_v58 = vpop.xlane.xlu0 %3243 }
 0x74d   : > { %v14575_v40 = vpop.eup %10352  ;;  %v3210_v25 = vpop.xlane.xlu1 %3209  ;;  %v3937_v15 = vpack.c.bf16 %v14572_v11, %v14566_v36  ;;  %v3372_v7 = vsub.f32 %v14332_v55, %v3244_v58 }
 0x74e   : > { %10364 = vpow2.f32 %v3589_v12  ;;  %v3355_v16 = vsub.f32 %v14338_v29, %v3210_v25  ;;  %v3938_v52 = vpack.c.bf16 %v14569_v22, %v14575_v40  ;;  %v14583_v41 = vpop.eup %10354 }
 0x74f   : > { %3803 = vadd.xlane.f32.xlu0 %v14088_v6  ;;  %9428 = vmatprep.mubr.bf16.mxu0 %v3937_v15  ;;  %10366 = vpow2.f32 %v3595_v1  ;;  %v3627_v49 = vmul.f32 1.442695, %v3372_v7 }
 0x750   : > { %v14586_v10 = vpop.eup %10356  ;;  %v3593_v19 = vmul.f32 1.442695, %v3355_v16  ;;  %3641 = vadd.xlane.f32.xlu1 %v17668_v33  ;;  %9429 = vmatmul.mubr.bf16.gmra.mrb[152].mxu0 %v3938_v52  ;;  %v3664_v21 = vpop.xlane.xlu0 %3663 }
 0x751   : > { %v3238_v29 = vpop.xlane.xlu1 %3237  ;;  %v3945_v54 = vpack.c.bf16 %v14583_v41, %v14586_v10  ;;  %v14593_v6 = vpop.eup %10358 }
 0x752   : > { %10368 = vpow2.f32 %v3593_v19  ;;  %v3369_v18 = vsub.f32 %v14350_v56, %v3238_v29 }
 0x753   : > { %3831 = vadd.xlane.f32.xlu0 %v14430_v9  ;;  %9460 = vmatprep.mubr.bf16.mxu1 %v3945_v54  ;;  %10370 = vpow2.f32 %v3623_v51 }
 0x754   : > { %v14596_v55 = vpop.eup %10360  ;;  %v3621_v43 = vmul.f32 1.442695, %v3369_v18  ;;  %3797 = vadd.xlane.f32.xlu1 %v14077_v20  ;;  %v3668_v12 = vpop.xlane.xlu0 %3667 }
 0x755   : > { %v3242_v13 = vpop.xlane.xlu1 %3241  ;;  %v3946_v58 = vpack.c.bf16 %v14593_v6, %v14596_v55  ;;  %v14602_v1 = vpop.eup %10362 }
 0x756   : > { %10372 = vpow2.f32 %v3621_v43  ;;  %v3371_v56 = vsub.f32 %v14362_v44, %v3242_v13 }
 0x757   : > { %3835 = vadd.xlane.f32.xlu0 %v14448_v3  ;;  %9461 = vmatmul.mubr.bf16.gmra.mrb[184].mxu1 %v3946_v58  ;;  %10374 = vpow2.f32 %v3627_v49 }
 0x758   : > { %v14605_v9 = vpop.eup %10364  ;;  %v3625_v31 = vmul.f32 1.442695, %v3371_v56  ;;  %3801 = vadd.xlane.f32.xlu1 %v14086_v46  ;;  %v3696_v20 = vpop.xlane.xlu0 %3695  ;;  %10376 = vrcp.f32 %v3664_v21 }
 0x759   : > { %v3662_v25 = vpop.xlane.xlu1 %3661  ;;  %v3939_v15 = vpack.c.bf16 %v14602_v1, %v14605_v9  ;;  %v14610_v16 = vpop.eup %10366 }
 0x75a   : > { %10378 = vpow2.f32 %v3625_v31 }
 0x75b   : > { %10380 = vrcp.f32 %v3662_v25  ;;  %3863 = vadd.xlane.f32.xlu0 %v14466_v37  ;;  %9432 = vmatprep.mubr.bf16.mxu0 %v3939_v15 }
 0x75c   : > { %v14613_v44 = vpop.eup %10368  ;;  %10382 = vrcp.f32 %v3668_v12  ;;  %3829 = vadd.xlane.f32.xlu1 %v14432_v5  ;;  %v3700_v3 = vpop.xlane.xlu0 %3699 }
 0x75d   : > { %v3666_v46 = vpop.xlane.xlu1 %3665  ;;  %v3940_v52 = vpack.c.bf16 %v14610_v16, %v14613_v44  ;;  %v14618_v7 = vpop.eup %10370 }
 0x75e   : > { %10384 = vrcp.f32 %v3666_v46 }
 0x75f   : > { %3867 = vadd.xlane.f32.xlu0 %v14485_v48  ;;  %9433 = vmatmul.mubr.bf16.gmra.mrb[156].mxu0 %v3940_v52  ;;  %10386 = vrcp.f32 %v3696_v20 }
 0x760   : > { %v14621_v19 = vpop.eup %10372  ;;  %3833 = vadd.xlane.f32.xlu1 %v14446_v61  ;;  %v3728_v37 = vpop.xlane.xlu0 %3727 }
 0x761   : > { %v3694_v33 = vpop.xlane.xlu1 %3693  ;;  %v3947_v5 = vpack.c.bf16 %v14618_v7, %v14621_v19  ;;  %v14626_v21 = vpop.eup %10374 }
 0x762   : > { %10388 = vrcp.f32 %v3694_v33  ;;  %v10377_v51 = vpop.eup %10376 }
 0x763   : > { %9464 = vmatprep.mubr.bf16.mxu1 %v3947_v5  ;;  %10390 = vrcp.f32 %v3700_v3  ;;  %v4870_v12 = vmul.f32 %v10377_v51, %v14164_v59  ;;  %v9970_v3 = vld [vmem:[#allocation7] sm:$0xff]  }
 0x764   : > { %v14628_v29 = vpop.eup %10378  ;;  %3861 = vadd.xlane.f32.xlu1 %v14470_v47  ;;  %v3732_v48 = vpop.xlane.xlu0 %3731  ;;  %v17669_v47 = vmov 0   ;;  %9468 = vmatprep.subr.bf16.mxu0 %v9970_v3 }
 0x765   : > { %v10381_v54 = vpop.eup %10380  ;;  %v3698_v18 = vpop.xlane.xlu1 %3697  ;;  %v3948_v61 = vpack.c.bf16 %v14626_v21, %v14628_v29  ;;  %9469 = vmatpush3.bf16.msra.mxu0 %v9970_v3  ;;  %v17670_v3 = vld [vmem:[#allocation111_spill] sm:$0xff] }
 0x766   : > { %v10383_v49 = vpop.eup %10382  ;;  %10392 = vrcp.f32 %v3698_v18  ;;  %v4869_v43 = vmul.f32 %v10381_v54, %v14159_v63 }
 0x767   : > { %9465 = vmatmul.mubr.bf16.gmra.mrb[188].mxu1 %v3948_v61  ;;  %10394 = vrcp.f32 %v3728_v37  ;;  %v4872_v25 = vmul.f32 %v10383_v49, %v14161_v27  ;;  %v9972_v49 = vld [vmem:[#allocation7 + $0x10] sm:$0xff]  }
 0x768   : > { %v10385_v13 = vpop.eup %10384  ;;  %3865 = vadd.xlane.f32.xlu1 %v14490_v45  ;;  %v3672_v58 = vpop.xlane.xlu0 %3671  ;;  %v9698_v56 = vpack.i.bf16 %v4870_v12, %v4869_v43  ;;  %6357 = vmatprep.mubr.bf16.mxu1 %v17669_v47 }
 0x769   : > { %v3726_v31 = vpop.xlane.xlu1 %3725  ;;  %v4871_v20 = vmul.f32 %v10385_v13, %v14151_v4  ;;  %v10387_v15 = vpop.eup %10386  ;;  %v9971_v4 = vld [vmem:[#allocation7 + $0x8] sm:$0xff]  }
 0x76a   : > { %10396 = vrcp.f32 %v3726_v31  ;;  %v4886_v37 = vmul.f32 %v10387_v15, %v14136_v39  ;;  %9470 = vmatprep.subr.bf16.mxu0 %v9971_v4  ;;  %v9973_v31 = vld [vmem:[#allocation7 + $0x18] sm:$0xff]  }
 0x76b   : > { %v9703_v63 = vpack.i.bf16 %v4872_v25, %v4871_v20  ;;  %10398 = vrcp.f32 %v3732_v48  ;;  %9471 = vmatpush3.bf16.msra.mxu0 %v9971_v4  ;;  %v17672_v4 = vld [vmem:[#allocation148_spill] sm:$0xff] }
 0x76c   : > { %v10389_v46 = vpop.eup %10388  ;;  %v3676_v59 = vpop.xlane.xlu0 %3675  ;;  %9472 = vmatprep.subr.bf16.mxu0 %v9972_v49 }
 0x76d   : > { %v3730_v52 = vpop.xlane.xlu1 %3729  ;;  %v4885_v45 = vmul.f32 %v10389_v46, %v14129_v50  ;;  %v10391_v33 = vpop.eup %10390  ;;  %v17671_v46 = vld [vmem:[#allocation163_spill] sm:$0xff] }
 0x76e   : > { %10400 = vrcp.f32 %v3730_v52  ;;  %v4888_v48 = vmul.f32 %v10391_v33, %v14133_v53  ;;  %v9974_v52 = vld [vmem:[#allocation7 + $0x20] sm:$0xff]  }
 0x76f   : > { %v9708_v5 = vpack.i.bf16 %v4886_v37, %v4885_v45  ;;  %10402 = vrcp.f32 %v3672_v58  ;;  %9473 = vmatpush3.bf16.msra.mxu0 %v9972_v49 }
 0x770   : > { %v10393_v51 = vpop.eup %10392  ;;  %v3704_v27 = vpop.xlane.xlu0 %3703  ;;  %9474 = vmatprep.subr.bf16.mxu0 %v9973_v31 }
 0x771   : > { %v3670_v54 = vpop.xlane.xlu1 %3669  ;;  %v4887_v18 = vmul.f32 %v10393_v51, %v14121_v42  ;;  %v10395_v61 = vpop.eup %10394  ;;  %v17673_v51 = vld [vmem:[#allocation150_spill] sm:$0xff] }
 0x772   : > { %10404 = vrcp.f32 %v3670_v54  ;;  %v4902_v58 = vmul.f32 %v10395_v61, %v14276_v35 }
 0x773   : > { %v9713_v50 = vpack.i.bf16 %v4888_v48, %v4887_v18  ;;  %10406 = vrcp.f32 %v3676_v59  ;;  %9475 = vmatpush3.bf16.msra.mxu0 %v9973_v31  ;;  %v9975_v48 = vld [vmem:[#allocation7 + $0x28] sm:$0xff]  }
 0x774   : > { %v10397_v39 = vpop.eup %10396  ;;  %v3708_v43 = vpop.xlane.xlu0 %3707  ;;  %9476 = vmatprep.subr.bf16.mxu0 %v9974_v52 }
 0x775   : > { %v3674_v12 = vpop.xlane.xlu1 %3673  ;;  %9704 = vrot.lane.b32.xlu0 %v9703_v63, %s11220_s25  ;;  %v4901_v13 = vmul.f32 %v10397_v39, %v14271_v26  ;;  %v10399_v42 = vpop.eup %10398 }
 0x776   : > { %10408 = vrcp.f32 %v3674_v12  ;;  %v4904_v26 = vmul.f32 %v10399_v42, %v17671_v46  ;;  %v17675_v12 = vld [vmem:[#allocation149_spill] sm:$0xff]  ;;  %v17691_v42 = vld [vmem:[#allocation158_spill] sm:$0xff] }
 0x777   : > { %v9718_v53 = vpack.i.bf16 %v4902_v58, %v4901_v13  ;;  %10410 = vrcp.f32 %v3704_v27  ;;  %9477 = vmatpush3.bf16.msra.mxu0 %v9974_v52 }
 0x778   : > { %v10401_v20 = vpop.eup %10400  ;;  %v3736_v25 = vpop.xlane.xlu0 %3735  ;;  %9478 = vmatprep.subr.bf16.mxu0 %v9975_v48 }
 0x779   : > { %v3702_v15 = vpop.xlane.xlu1 %3701  ;;  %9699 = vrot.lane.b32.xlu1 %v9698_v56, %s11220_s25  ;;  %9719 = vrot.lane.b32.xlu0 %v9718_v53, %s11219_s22  ;;  %v4903_v63 = vmul.f32 %v10401_v20, %v17670_v3  ;;  %v10403_v59 = vpop.eup %10402  ;;  %v9976_v53 = vld [vmem:[#allocation7 + $0x30] sm:$0xff]   ;;  %v17677_v3 = vld [vmem:[#allocation146_spill] sm:$0xff] }
 0x77a   : > { %10412 = vrcp.f32 %v3702_v15  ;;  %v14655_v27 = vmul.f32 %v10403_v59, %v17673_v51  ;;  %v9977_v59 = vld [vmem:[#allocation7 + $0x38] sm:$0xff]  }
 0x77b   : > { %v9723_v35 = vpack.i.bf16 %v4904_v26, %v4903_v63  ;;  %10414 = vrcp.f32 %v3708_v43  ;;  %9479 = vmatpush3.bf16.msra.mxu0 %v9975_v48 }
 0x77c   : > { %v10405_v45 = vpop.eup %10404  ;;  %v3740_v37 = vpop.xlane.xlu0 %3739  ;;  %9480 = vmatprep.subr.bf16.mxu0 %v9976_v53 }
 0x77d   : > { %v3706_v33 = vpop.xlane.xlu1 %3705  ;;  %9709 = vrot.lane.b32.xlu1 %v9708_v5, %s11218_s18  ;;  %v14652_v56 = vmul.f32 %v10405_v45, %v17672_v4  ;;  %v10407_v54 = vpop.eup %10406  ;;  %v17674_v5 = vld [vmem:[#allocation147_spill] sm:$0xff]  ;;  %v17679_v4 = vld [vmem:[#allocation145_spill] sm:$0xff] }
 0x77e   : > { %10416 = vrcp.f32 %v3706_v33  ;;  %v14664_v13 = vmul.f32 %v10407_v54, %v17675_v12  ;;  %v17678_v33 = vld [vmem:[#allocation87_spill] sm:$0xff] }
 0x77f   : > { %10418 = vrcp.f32 %v3736_v25  ;;  %9481 = vmatpush3.bf16.msra.mxu0 %v9976_v53 }
 0x780   : > { %v10409_v61 = vpop.eup %10408  ;;  %v3680_v49 = vpop.xlane.xlu0 %3679  ;;  %9482 = vmatprep.subr.bf16.mxu0 %v9977_v59 }
 0x781   : > { %v3734_v39 = vpop.xlane.xlu1 %3733  ;;  %9714 = vrot.lane.b32.xlu1 %v9713_v50, %s11218_s18  ;;  %v14661_v43 = vmul.f32 %v10409_v61, %v17674_v5  ;;  %v10411_v58 = vpop.eup %10410  ;;  %v17676_v50 = vld [vmem:[#allocation144_spill] sm:$0xff] }
 0x782   : > { %10420 = vrcp.f32 %v3734_v39  ;;  %v14673_v63 = vmul.f32 %v10411_v58, %v17677_v3  ;;  %v17681_v58 = vld [vmem:[#allocation107_spill] sm:$0xff] }
 0x783   : > { %10422 = vrcp.f32 %v3740_v37  ;;  %9483 = vmatpush3.bf16.msra.mxu0 %v9977_v59  ;;  %v17682_v59 = vld [vmem:[#allocation65_spill] sm:$0xff] }
 0x784   : > { %v10413_v31 = vpop.eup %10412  ;;  %v3684_v20 = vpop.xlane.xlu0 %3683 }
 0x785   : > { %v3738_v25 = vpop.xlane.xlu1 %3737  ;;  %9724 = vrot.lane.b32.xlu1 %v9723_v35, %s11219_s22  ;;  %v14670_v15 = vmul.f32 %v10413_v31, %v17676_v50  ;;  %v10415_v46 = vpop.eup %10414 }
 0x786   : > { %10424 = vrcp.f32 %v3738_v25  ;;  %v14681_v51 = vmul.f32 %v10415_v46, %v17679_v4  ;;  %v17688_v25 = vld [vmem:[#allocation153_spill] sm:$0xff] }
 0x787   : > { %10426 = vrcp.f32 %v3680_v49  ;;  %v17680_v49 = vld [vmem:[#allocation104_spill] sm:$0xff] }
 0x788   : > { %v10417_v52 = vpop.eup %10416  ;;  %v3712_v45 = vpop.xlane.xlu0 %3711 }
 0x789   : > { %v3678_v37 = vpop.xlane.xlu1 %3677  ;;  %v14678_v35 = vmul.f32 %v10417_v52, %v17678_v33  ;;  %v10419_v54 = vpop.eup %10418 }
 0x78a   : > { %10428 = vrcp.f32 %v3678_v37  ;;  %v14689_v53 = vmul.f32 %v10419_v54, %v17681_v58 }
 0x78b   : > { %10430 = vrcp.f32 %v3684_v20  ;;  %v17683_v20 = vld [vmem:[#allocation115_spill] sm:$0xff] }
 0x78c   : > { %v10421_v61 = vpop.eup %10420  ;;  %v3716_v39 = vpop.xlane.xlu0 %3715 }
 0x78d   : > { %v3682_v5 = vpop.xlane.xlu1 %3681  ;;  %v14686_v12 = vmul.f32 %v10421_v61, %v17680_v49  ;;  %v10423_v31 = vpop.eup %10422  ;;  %v17684_v49 = vld [vmem:[#allocation152_spill] sm:$0xff] }
 0x78e   : > { %10432 = vrcp.f32 %v3682_v5  ;;  %v14697_v37 = vmul.f32 %v10423_v31, %v17683_v20 }
 0x78f   : > { %10434 = vrcp.f32 %v3712_v45  ;;  %v17685_v45 = vld [vmem:[#allocation154_spill] sm:$0xff] }
 0x790   : > { %v10425_v50 = vpop.eup %10424  ;;  %v3744_v3 = vpop.xlane.xlu0 %3743 }
 0x791   : > { %v3710_v46 = vpop.xlane.xlu1 %3709  ;;  %v14694_v52 = vmul.f32 %v10425_v50, %v17682_v59  ;;  %v10427_v33 = vpop.eup %10426 }
 0x792   : > { %10436 = vrcp.f32 %v3710_v46  ;;  %v14705_v48 = vmul.f32 %v10427_v33, %v17685_v45  ;;  %v17686_v46 = vld [vmem:[#allocation44_spill] sm:$0xff]  ;;  %v17689_v45 = vld [vmem:[#allocation54_spill] sm:$0xff] }
 0x793   : > { %10438 = vrcp.f32 %v3716_v39  ;;  %v17687_v39 = vld [vmem:[#allocation151_spill] sm:$0xff] }
 0x794   : > { %v10429_v54 = vpop.eup %10428  ;;  %v3748_v61 = vpop.xlane.xlu0 %3747 }
 0x795   : > { %v3714_v5 = vpop.xlane.xlu1 %3713  ;;  %v14702_v58 = vmul.f32 %v10429_v54, %v17684_v49  ;;  %v10431_v50 = vpop.eup %10430 }
 0x796   : > { %10440 = vrcp.f32 %v3714_v5  ;;  %v14714_v54 = vmul.f32 %v10431_v50, %v17688_v25  ;;  %v17692_v50 = vld [vmem:[#allocation63_spill] sm:$0xff] }
 0x797   : > { %10442 = vrcp.f32 %v3744_v3 }
 0x798   : > { %v10433_v59 = vpop.eup %10432  ;;  %3645 = vadd.xlane.f32.xlu0 %v17686_v46  ;;  %v3688_v20 = vpop.xlane.xlu0 %3687  ;;  %v17690_v46 = vld [vmem:[#allocation156_spill] sm:$0xff] }
 0x799   : > { %v3742_v4 = vpop.xlane.xlu1 %3741  ;;  %v14711_v26 = vmul.f32 %v10433_v59, %v17687_v39  ;;  %v10435_v49 = vpop.eup %10434 }
 0x79a   : > { %10444 = vrcp.f32 %v3742_v4  ;;  %v14723_v59 = vmul.f32 %v10435_v49, %v17691_v42  ;;  %v17695_v49 = vld [vmem:[#allocation82_spill] sm:$0xff] }
 0x79b   : > { %10446 = vrcp.f32 %v3748_v61 }
 0x79c   : > { %v10437_v5 = vpop.eup %10436  ;;  %3649 = vadd.xlane.f32.xlu0 %v17689_v45  ;;  %v3692_v3 = vpop.xlane.xlu0 %3691  ;;  %v17693_v45 = vld [vmem:[#allocation155_spill] sm:$0xff] }
 0x79d   : > { %v3746_v31 = vpop.xlane.xlu1 %3745  ;;  %v14720_v18 = vmul.f32 %v10437_v5, %v17690_v46  ;;  %v10439_v39 = vpop.eup %10438 }
 0x79e   : > { %10448 = vrcp.f32 %v3746_v31  ;;  %v14732_v5 = vmul.f32 %v10439_v39, %v17694_v30  ;;  %v17698_v39 = vld [vmem:[#allocation95_spill] sm:$0xff]  ;;  %v17702_v30 = vld [vmem:[#allocation94_spill] sm:$0xff] }
 0x79f   : > { %10450 = vrcp.f32 %v3688_v20 }
 0x7a0   : > { %v10441_v4 = vpop.eup %10440  ;;  %3651 = vadd.xlane.f32.xlu0 %v17692_v50  ;;  %v3720_v61 = vpop.xlane.xlu0 %3719  ;;  %v17696_v50 = vld [vmem:[#allocation114_spill] sm:$0xff] }
 0x7a1   : > { %v3686_v33 = vpop.xlane.xlu1 %3685  ;;  %v14729_v47 = vmul.f32 %v10441_v4, %v17693_v45  ;;  %v10443_v46 = vpop.eup %10442 }
 0x7a2   : > { %10452 = vrcp.f32 %v3686_v33  ;;  %v14741_v4 = vmul.f32 %v10443_v46, %v17697_v34 }
 0x7a3   : > { %10454 = vrcp.f32 %v3692_v3 }
 0x7a4   : > { %v10445_v31 = vpop.eup %10444  ;;  %3807 = vadd.xlane.f32.xlu0 %v17695_v49  ;;  %v3724_v20 = vpop.xlane.xlu0 %3723  ;;  %v17699_v49 = vld [vmem:[#allocation49_spill] sm:$0xff] }
 0x7a5   : > { %v3690_v25 = vpop.xlane.xlu1 %3689  ;;  %v14738_v17 = vmul.f32 %v10445_v31, %v17696_v50  ;;  %v10447_v45 = vpop.eup %10446  ;;  %v17701_v31 = vld [vmem:[#allocation42_spill] sm:$0xff] }
 0x7a6   : > { %10456 = vrcp.f32 %v3690_v25  ;;  %v14751_v50 = vmul.f32 %v10447_v45, %v17701_v31  ;;  %v17707_v25 = vld [vmem:[#allocation92_spill] sm:$0xff] }
 0x7a7   : > { %10458 = vrcp.f32 %v3720_v61 }
 0x7a8   : > { %v10449_v33 = vpop.eup %10448  ;;  %3811 = vadd.xlane.f32.xlu0 %v17698_v39  ;;  %v3752_v3 = vpop.xlane.xlu0 %3751 }
 0x7a9   : > { %v3718_v42 = vpop.xlane.xlu1 %3717  ;;  %3647 = vadd.xlane.f32.xlu1 %v17699_v49  ;;  %v14748_v2 = vmul.f32 %v10449_v33, %v17700_v24  ;;  %v10451_v34 = vpop.eup %10450  ;;  %v17703_v49 = vld [vmem:[#allocation160_spill] sm:$0xff]  ;;  %v17705_v24 = vld [vmem:[#allocation162_spill] sm:$0xff] }
 0x7aa   : > { %10460 = vrcp.f32 %v3718_v42  ;;  %v14761_v33 = vmul.f32 %v10451_v34, %v17705_v24 }
 0x7ab   : > { %10462 = vrcp.f32 %v3724_v20 }
 0x7ac   : > { %v10453_v46 = vpop.eup %10452  ;;  %3839 = vadd.xlane.f32.xlu0 %v14572_v11  ;;  %v3756_v61 = vpop.xlane.xlu0 %3755  ;;  %17706 = vst [vmem:[#allocation55_spill] sm:$0xff] %v14761_v33 }
 0x7ad   : > { %v3722_v39 = vpop.xlane.xlu1 %3721  ;;  %3805 = vadd.xlane.f32.xlu1 %v17702_v30  ;;  %v14758_v32 = vmul.f32 %v10453_v46, %v17703_v49  ;;  %v10455_v45 = vpop.eup %10454  ;;  %v17708_v30 = vld [vmem:[#allocation159_spill] sm:$0xff]  ;;  %v17710_v49 = vld [vmem:[#allocation161_spill] sm:$0xff] }
 0x7ae   : > { %10464 = vrcp.f32 %v3722_v39  ;;  %v14773_v34 = vmul.f32 %v10455_v45, %v17710_v49 }
 0x7af   : > { %17704 = vst [vmem:[#allocation32_spill] sm:$0xff] %v14758_v32  ;;  %10466 = vrcp.f32 %v3752_v3 }
 0x7b0   : > { %v10457_v31 = vpop.eup %10456  ;;  %3843 = vadd.xlane.f32.xlu0 %v14569_v22  ;;  %v14766_v11 = vpop.xlane.xlu0 %3631 }
 0x7b1   : > { %v3750_v20 = vpop.xlane.xlu1 %3749  ;;  %3809 = vadd.xlane.f32.xlu1 %v17707_v25  ;;  %v14770_v46 = vmul.f32 %v10457_v31, %v17708_v30  ;;  %v10459_v24 = vpop.eup %10458  ;;  %v17711_v25 = vld [vmem:[#allocation35_spill] sm:$0xff]  ;;  %v17713_v30 = vld [vmem:[#allocation100_spill] sm:$0xff] }
 0x7b2   : > { %10468 = vrcp.f32 %v3750_v20  ;;  %v14785_v45 = vmul.f32 %v10459_v24, %v17713_v30 }
 0x7b3   : > { %17709 = vst [vmem:[#allocation141_spill] sm:$0xff] %v14770_v46  ;;  %10470 = vrcp.f32 %v3756_v61 }
 0x7b4   : > { %v10461_v42 = vpop.eup %10460  ;;  %3871 = vadd.xlane.f32.xlu0 %v14583_v41  ;;  %v14778_v22 = vpop.xlane.xlu0 %3635  ;;  %17714 = vst [vmem:[#allocation108_spill] sm:$0xff] %v14785_v45 }
 0x7b5   : > { %v3754_v3 = vpop.xlane.xlu1 %3753  ;;  %3837 = vadd.xlane.f32.xlu1 %v14566_v36  ;;  %v14782_v31 = vmul.f32 %v10461_v42, %v17711_v25  ;;  %v10463_v49 = vpop.eup %10462  ;;  %v17715_v36 = vld [vmem:[#allocation102_spill] sm:$0xff]  ;;  %v17717_v42 = vld [vmem:[#allocation101_spill] sm:$0xff] }
 0x7b6   : > { %10472 = vrcp.f32 %v3754_v3  ;;  %v14797_v25 = vmul.f32 %v10463_v49, %v17717_v42 }
 0x7b7   : > { %17712 = vst [vmem:[#allocation39_spill] sm:$0xff] %v14782_v31 }
 0x7b8   : > { %v10465_v39 = vpop.eup %10464  ;;  %3875 = vadd.xlane.f32.xlu0 %v14593_v6  ;;  %v3792_v41 = vpop.xlane.xlu0 %3791  ;;  %17718 = vst [vmem:[#allocation64_spill] sm:$0xff] %v14797_v25  ;;  %v17719_v6 = vld [vmem:[#allocation135_spill] sm:$0xff] }
 0x7b9   : > { %v14790_v61 = vpop.xlane.xlu1 %3629  ;;  %3841 = vadd.xlane.f32.xlu1 %v14575_v40  ;;  %v14794_v32 = vmul.f32 %v10465_v39, %v17715_v36  ;;  %v10467_v24 = vpop.eup %10466  ;;  %v17721_v40 = vld [vmem:[#allocation134_spill] sm:$0xff]  ;;  %10474 = vrcp.f32 %v3792_v41 }
 0x7ba   : > { %v14808_v33 = vmul.f32 %v10467_v24, %v17721_v40 }
 0x7bb   : > { %17716 = vst [vmem:[#allocation72_spill] sm:$0xff] %v14794_v32  ;;  %v17722_v32 = vld [vmem:[#allocation96_spill] sm:$0xff] }
 0x7bc   : > { %v10469_v30 = vpop.eup %10468  ;;  %v3796_v20 = vpop.xlane.xlu0 %3795 }
 0x7bd   : > { %v14801_v31 = vpop.xlane.xlu1 %3633  ;;  %3869 = vadd.xlane.f32.xlu1 %v14586_v10  ;;  %v14805_v45 = vmul.f32 %v10469_v30, %v17719_v6  ;;  %v10471_v39 = vpop.eup %10470  ;;  %v17723_v10 = vld [vmem:[#allocation128_spill] sm:$0xff] }
 0x7be   : > { %v14817_v46 = vmul.f32 %v10471_v39, %v17723_v10 }
 0x7bf   : > { %17720 = vst [vmem:[#allocation40_spill] sm:$0xff] %v14805_v45 }
 0x7c0   : > { %v10473_v36 = vpop.eup %10472  ;;  %v3824_v42 = vpop.xlane.xlu0 %3823 }
 0x7c1   : > { %v3790_v3 = vpop.xlane.xlu1 %3789  ;;  %3873 = vadd.xlane.f32.xlu1 %v14596_v55  ;;  %v14814_v25 = vmul.f32 %v10473_v36, %v17722_v32 }
 0x7c2   : > { %10476 = vrcp.f32 %v3790_v3 }
 0x7c3   : > { %10478 = vrcp.f32 %v3796_v20  ;;  %v10475_v49 = vpop.eup %10474  ;;  %v17724_v20 = vpack.i.bf16 %v14664_v13, %v14661_v43  ;;  %v17725_v43 = vpack.i.bf16 %v14655_v27, %v14652_v56  ;;  %v17726_v13 = vpack.i.bf16 %v14689_v53, %v14686_v12 }
 0x7c4   : > { %v3828_v30 = vpop.xlane.xlu0 %3827  ;;  %v14825_v3 = vmul.f32 %v10475_v49, %v14510_v28  ;;  %v17729_v56 = vpack.i.bf16 %v14673_v63, %v14670_v15 }
 0x7c5   : > { %v3794_v6 = vpop.xlane.xlu1 %3793 }
 0x7c6   : > { %10480 = vrcp.f32 %v3794_v6 }
 0x7c7   : > { %10482 = vrcp.f32 %v3824_v42 }
 0x7c8   : > { %v3856_v40 = vpop.xlane.xlu0 %3855 }
 0x7c9   : > { %v3822_v41 = vpop.xlane.xlu1 %3821 }
 0x7ca   : > { %10484 = vrcp.f32 %v3822_v41 }
 0x7cb   : > { %10486 = vrcp.f32 %v3828_v30 }
 0x7cc   : > { %v10477_v55 = vpop.eup %10476  ;;  %v3860_v45 = vpop.xlane.xlu0 %3859 }
 0x7cd   : > { %v3826_v32 = vpop.xlane.xlu1 %3825  ;;  %v14822_v39 = vmul.f32 %v10477_v55, %v14504_v23  ;;  %v10479_v36 = vpop.eup %10478 }
 0x7ce   : > { %10488 = vrcp.f32 %v3826_v32  ;;  %9734 = vrot.lane.b32.xlu0 %v17724_v20, %s11220_s25  ;;  %v9422_v42 = vpop.f32.mrb[144].mxu0  ;;  %v14839_v49 = vmul.f32 %v10479_v36, %v14506_v57 }
 0x7cf   : > { %v4565_v10 = vpop.f32.mrb[145].mxu0  ;;  %10490 = vrcp.f32 %v3856_v40 }
 0x7d0   : > { %v10481_v30 = vpop.eup %10480  ;;  %v14833_v41 = vpop.xlane.xlu0 %3639 }
 0x7d1   : > { %v9423_v23 = vpop.f32.mrb[146].mxu0  ;;  %v3854_v55 = vpop.xlane.xlu1 %3853  ;;  %v14836_v28 = vmul.f32 %v10481_v30, %v14502_v38 }
 0x7d2   : > { %v4568_v24 = vpop.f32.mrb[147].mxu0  ;;  %9729 = vrot.lane.b32.xlu1 %v17725_v43, %s11220_s25  ;;  %9749 = vrot.lane.b32.xlu0 %v17726_v13, %s11219_s22  ;;  %v10483_v32 = vpop.eup %10482 }
 0x7d3   : > { %v14855_v57 = vmul.f32 %v10483_v32, %v4568_v24  ;;  %v17732_v24 = vpack.i.bf16 %v14681_v51, %v14678_v35 }
 0x7d4   : > { %v10485_v6 = vpop.eup %10484  ;;  %v14851_v38 = vpop.xlane.xlu0 %3643 }
 0x7d5   : > { %v14853_v30 = vmul.f32 %v10485_v6, %v4565_v10  ;;  %17728 = vst [vmem:[#allocation36_spill] sm:$0xff] %v14855_v57  ;;  %v3858_v36 = vpop.xlane.xlu1 %3857  ;;  %v10487_v27 = vpop.eup %10486 }
 0x7d6   : > { %9739 = vrot.lane.b32.xlu1 %v17729_v56, %s11218_s18  ;;  %v14865_v20 = vmul.f32 %v10487_v27, %v9423_v23 }
 0x7d7   : > { %17727 = vst [vmem:[#allocation90_spill] sm:$0xff] %v14853_v30 }
 0x7d8   : > { %v10489_v53 = vpop.eup %10488  ;;  %v3800_v43 = vpop.xlane.xlu0 %3799  ;;  %17731 = vst [vmem:[#allocation67_spill] sm:$0xff] %v14865_v20 }
 0x7d9   : > { %v14863_v13 = vmul.f32 %v10489_v53, %v9422_v42  ;;  %v14867_v10 = vpop.xlane.xlu1 %3637  ;;  %v17733_v42 = vpack.i.bf16 %v14697_v37, %v14694_v52  ;;  %10492 = vrcp.f32 %v3800_v43  ;;  %v10491_v12 = vpop.eup %10490 }
 0x7da   : > { %9744 = vrot.lane.b32.xlu1 %v17732_v24, %s11218_s18  ;;  %10494 = vrcp.f32 %v3860_v45 }
 0x7db   : > { %17730 = vst [vmem:[#allocation25_spill] sm:$0xff] %v14863_v13 }
 0x7dc   : > { %v3804_v63 = vpop.xlane.xlu0 %3803 }
 0x7dd   : > { %v14875_v6 = vpop.xlane.xlu1 %3641  ;;  %v14877_v32 = vpop.f32.mrb[148].mxu0 }
 0x7de   : > { %v14879_v56 = vpop.f32.mrb[149].mxu0  ;;  %9754 = vrot.lane.b32.xlu1 %v17733_v42, %s11219_s22 }
 0x7df   : > { %v14885_v23 = vpop.f32.mrb[150].mxu0 }
 0x7e0   : > { %v4584_v35 = vpop.f32.mrb[151].mxu0  ;;  %v3832_v51 = vpop.xlane.xlu0 %3831 }
 0x7e1   : > { %v3798_v27 = vpop.xlane.xlu1 %3797 }
 0x7e2   : > { %10496 = vrcp.f32 %v3798_v27 }
 0x7e3   : > { %10498 = vrcp.f32 %v3858_v36  ;;  %v10493_v37 = vpop.eup %10492 }
 0x7e4   : > { %10500 = vrcp.f32 %v3804_v63  ;;  %v3836_v53 = vpop.xlane.xlu0 %3835  ;;  %v10495_v40 = vpop.eup %10494 }
 0x7e5   : > { %10502 = vrcp.f32 %v3854_v55  ;;  %v3802_v24 = vpop.xlane.xlu1 %3801  ;;  %v14891_v55 = vmul.f32 %v10493_v37, %v14529_v8 }
 0x7e6   : > { %10504 = vrcp.f32 %v3802_v24 }
 0x7e7   : > { %10506 = vrcp.f32 %v3832_v51  ;;  %17735 = vst [vmem:[#allocation86_spill] sm:$0xff] %v14891_v55 }
 0x7e8   : > { %v3864_v15 = vpop.xlane.xlu0 %3863 }
 0x7e9   : > { %v3830_v52 = vpop.xlane.xlu1 %3829 }
 0x7ea   : > { %10508 = vrcp.f32 %v3830_v52 }
 0x7eb   : > { %10510 = vrcp.f32 %v3836_v53 }
 0x7ec   : > { %v10497_v42 = vpop.eup %10496  ;;  %v9454_v43 = vpop.f32.mrb[176].mxu1 }
 0x7ed   : > { %v10499_v13 = vpop.eup %10498  ;;  %v3834_v45 = vpop.xlane.xlu1 %3833  ;;  %v14888_v36 = vmul.f32 %v10497_v42, %v14518_v14 }
 0x7ee   : > { %v4662_v20 = vpop.f32.mrb[177].mxu1  ;;  %v10501_v63 = vpop.eup %10500  ;;  %10512 = vrcp.f32 %v3834_v45  ;;  %v14894_v52 = vmul.f32 %v10499_v13, %v9454_v43  ;;  %v17739_v13 = vld [vmem:[#allocation53_spill] sm:$0xff]  ;;  %v17742_v45 = vld [vmem:[#allocation74_spill] sm:$0xff] }
 0x7ef   : > { %17734 = vst [vmem:[#allocation24_spill] sm:$0xff] %v14888_v36  ;;  %v3868_v51 = vpop.xlane.xlu0 %3867  ;;  %v9455_v27 = vpop.f32.mrb[178].mxu1  ;;  %10514 = vrcp.f32 %v14766_v11  ;;  %v17747_v36 = vld [vmem:[#allocation22_spill] sm:$0xff] }
 0x7f0   : > { %v10503_v24 = vpop.eup %10502  ;;  %17736 = vst [vmem:[#allocation81_spill] sm:$0xff] %v14894_v52  ;;  %v14896_v53 = vmul.f32 %v10495_v40, %v9455_v27  ;;  %v4665_v30 = vpop.f32.mrb[179].mxu1  ;;  %10516 = vrcp.f32 %v14790_v61  ;;  %v17740_v40 = vld [vmem:[#allocation130_spill] sm:$0xff]  ;;  %v14912_v27 = vmul.f32 %v10501_v63, %v17742_v45 }
 0x7f1   : > { %v10505_v14 = vpop.eup %10504  ;;  %v14901_v8 = vmul.f32 %v10503_v24, %v4662_v20  ;;  %v14903_v37 = vmul.f32 %v10491_v12, %v4665_v30  ;;  %10518 = vrcp.f32 %v3864_v15  ;;  %v3862_v11 = vpop.xlane.xlu1 %3861  ;;  %3653 = vadd.xlane.f32.xlu0 %v17739_v13  ;;  %v17744_v13 = vld [vmem:[#allocation23_spill] sm:$0xff] }
 0x7f2   : > { %17737 = vst [vmem:[#allocation27_spill] sm:$0xff] %v14896_v53  ;;  %v14909_v43 = vmul.f32 %v10505_v14, %v17740_v40  ;;  %17743 = vst [vmem:[#allocation69_spill] sm:$0xff] %v14912_v27  ;;  %v10507_v57 = vpop.eup %10506  ;;  %10520 = vrcp.f32 %v3862_v11 }
 0x7f3   : > { %17738 = vst [vmem:[#allocation109_spill] sm:$0xff] %v14901_v8  ;;  %10522 = vrcp.f32 %v3868_v51  ;;  %v14918_v12 = vpop.permute.xlu0 %9704  ;;  %v14925_v40 = vmul.f32 %v10507_v57, %v4584_v35 }
 0x7f4   : > { %17741 = vst [vmem:[#allocation105_spill] sm:$0xff] %v14909_v43  ;;  %v10509_v30 = vpop.eup %10508  ;;  %v9458_v15 = vpop.f32.mrb[180].mxu1  ;;  %10524 = vrcp.f32 %v14778_v22 }
 0x7f5   : > { %v3866_v24 = vpop.xlane.xlu1 %3865  ;;  %v4678_v14 = vpop.f32.mrb[181].mxu1  ;;  %3657 = vadd.xlane.f32.xlu0 %v17744_v13  ;;  %v14923_v63 = vmul.f32 %v10509_v30, %v14879_v56  ;;  %17746 = vst [vmem:[#allocation88_spill] sm:$0xff] %v14925_v40 }
 0x7f6   : > { %v10511_v11 = vpop.eup %10510  ;;  %10526 = vrcp.f32 %v3866_v24  ;;  %v9459_v45 = vpop.f32.mrb[182].mxu1 }
 0x7f7   : > { %17745 = vst [vmem:[#allocation85_spill] sm:$0xff] %v14923_v63  ;;  %10528 = vrcp.f32 %v14801_v31  ;;  %v4681_v51 = vpop.f32.mrb[183].mxu1  ;;  %v14935_v57 = vmul.f32 %v10511_v11, %v14885_v23  ;;  %v9720_v30 = vpop.permute.xlu0 %9719  ;;  %v17751_v11 = vld [vmem:[#allocation116_spill] sm:$0xff] }
 0x7f8   : > { %v10513_v42 = vpop.eup %10512  ;;  %v9722_v52 = vunpack.i.h.bf16 %v9720_v30  ;;  %v9721_v55 = vunpack.i.l.bf16 %v9720_v30 }
 0x7f9   : > { %v10515_v22 = vpop.eup %10514  ;;  %v9700_v61 = vpop.permute.xlu1 %9699  ;;  %3659 = vadd.xlane.f32.xlu0 %v17747_v36  ;;  %v14932_v13 = vmul.f32 %v10513_v42, %v14877_v32  ;;  %v17749_v36 = vld [vmem:[#allocation120_spill] sm:$0xff]  ;;  %v17750_v42 = vld [vmem:[#allocation122_spill] sm:$0xff] }
 0x7fa   : > { %v10517_v56 = vpop.eup %10516  ;;  %v9702_v24 = vunpack.i.h.bf16 %v9700_v61  ;;  %v9701_v31 = vunpack.i.l.bf16 %v9700_v61  ;;  %v4854_v43 = vmul.f32 %v10515_v22, %v17750_v42 }
 0x7fb   : > { %17748 = vst [vmem:[#allocation26_spill] sm:$0xff] %v14932_v13  ;;  %v10519_v35 = vpop.eup %10518  ;;  %v4853_v32 = vmul.f32 %v10517_v56, %v17749_v36  ;;  %v17752_v13 = vld [vmem:[#allocation99_spill] sm:$0xff] }
 0x7fc   : > { %v10521_v20 = vpop.eup %10520  ;;  %v14941_v40 = vmul.f32 %v10519_v35, %v4681_v51  ;;  %v5174_v51 = vsel %vm1828_vm0, %v4854_v43, %v9702_v24  ;;  %v9706_v43 = vunpack.i.l.bf16 %v14918_v12  ;;  %v17753_v24 = vld [vmem:[#allocation57_spill] sm:$0xff] }
 0x7fd   : > { %v14939_v63 = vmul.f32 %v10521_v20, %v4678_v14  ;;  %v9710_v23 = vpop.permute.xlu1 %9709  ;;  %3815 = vadd.xlane.f32.xlu0 %v17751_v11  ;;  %v10523_v27 = vpop.eup %10522  ;;  %v5173_v14 = vsel %vm1828_vm0, %v4853_v32, %v9701_v31  ;;  %v9707_v31 = vunpack.i.h.bf16 %v14918_v12 }
 0x7fe   : > { %v9712_v53 = vunpack.i.h.bf16 %v9710_v23  ;;  %v9711_v61 = vunpack.i.l.bf16 %v9710_v23  ;;  %v10525_v8 = vpop.eup %10524  ;;  %v14954_v11 = vmul.f32 %v10523_v27, %v9459_v45  ;;  %v17754_v45 = vld [vmem:[#allocation119_spill] sm:$0xff] }
 0x800   : > { %v10527_v56 = vpop.eup %10526  ;;  %v5190_v22 = vsel %vm5189_vm2, %v5173_v14, %v9711_v61  ;;  %v5191_v35 = vsel %vm5189_vm2, %v5174_v51, %v9712_v53  ;;  %v17755_v14 = vld [vmem:[#allocation121_spill] sm:$0xff] }
 0x801   : > { %v10529_v36 = vpop.eup %10528  ;;  %v14952_v42 = vmul.f32 %v10527_v56, %v9458_v15  ;;  %v9715_v23 = vpop.permute.xlu1 %9714  ;;  %3819 = vadd.xlane.f32.xlu0 %v17752_v13  ;;  %v5207_v30 = vsel %vm5206_vm3, %v5190_v22, %v9721_v55  ;;  %v5208_v20 = vsel %vm5206_vm3, %v5191_v35, %v9722_v52  ;;  %v4856_v13 = vmul.f32 %v10525_v8, %v17755_v14 }
 0x802   : > { %3655 = vadd.xlane.f32.xlu1 %v17753_v24  ;;  %v5463_v32 = vpack.c.bf16 %v5208_v20, %v5207_v30  ;;  %v9717_v15 = vunpack.i.h.bf16 %v9715_v23  ;;  %v9716_v27 = vunpack.i.l.bf16 %v9715_v23  ;;  %v4855_v61 = vmul.f32 %v10529_v36, %v17754_v45  ;;  %v17756_v20 = vld [vmem:[#allocation113_spill] sm:$0xff] }
 0x803   : > { %v9873_v53 = vpack.i.bf16 %v14954_v11, %v14952_v42  ;;  %v5176_v52 = vsel %vm1828_vm0, %v4856_v13, %v9707_v31  ;;  %v17835_v11 = vld [vmem:[#allocation76_spill] sm:$0xff] }
 0x804   : > { %9484 = vmatprep.mubr.bf16.mxu0 %v5463_v32  ;;  %v5175_v12 = vsel %vm1828_vm0, %v4855_v61, %v9706_v43  ;;  %v5193_v35 = vsel %vm5189_vm2, %v5176_v52, %v9717_v15  ;;  %v17761_v15 = vpack.i.bf16 %v14723_v59, %v14720_v18  ;;  %v17763_v18 = vpack.i.bf16 %v14751_v50, %v14748_v2 }
 0x805   : > { %v9725_v55 = vpop.permute.xlu1 %9724  ;;  %3847 = vadd.xlane.f32.xlu0 %v14602_v1  ;;  %v5192_v22 = vsel %vm5189_vm2, %v5175_v12, %v9716_v27  ;;  %v17757_v1 = vld [vmem:[#allocation31_spill] sm:$0xff] }
 0x806   : > { %v9727_v51 = vunpack.i.h.bf16 %v9725_v55  ;;  %v9726_v56 = vunpack.i.l.bf16 %v9725_v55  ;;  %3813 = vadd.xlane.f32.xlu1 %v17756_v20 }
 0x808   : > { %v5209_v36 = vsel %vm5206_vm3, %v5192_v22, %v9726_v56  ;;  %v5210_v8 = vsel %vm5206_vm3, %v5193_v35, %v9727_v51 }
 0x809   : > { %v5464_v23 = vpack.c.bf16 %v5210_v8, %v5209_v36  ;;  %3851 = vadd.xlane.f32.xlu0 %v14610_v16 }
 0x80a   : > { %3817 = vadd.xlane.f32.xlu1 %v17757_v1 }
 0x80b   : > { %9485 = vmatmul.mubr.bf16.vlgmr.msra.gmra.mrb[160].mxu0 %v5464_v23 }
 0x80d   : > { %3879 = vadd.xlane.f32.xlu0 %v14618_v7 }
 0x80e   : > { %3845 = vadd.xlane.f32.xlu1 %v14605_v9  ;;  %v17758_v9 = vpack.i.bf16 %v14714_v54, %v14711_v26 }
 0x811   : > { %3883 = vadd.xlane.f32.xlu0 %v14626_v21  ;;  %v17759_v21 = vpack.i.bf16 %v14705_v48, %v14702_v58 }
 0x812   : > { %3849 = vadd.xlane.f32.xlu1 %v14613_v44 }
 0x816   : > { %3877 = vadd.xlane.f32.xlu1 %v14621_v19 }
 0x81a   : > { %3881 = vadd.xlane.f32.xlu1 %v14628_v29  ;;  %v17760_v29 = vpack.i.bf16 %v14741_v4, %v14738_v17  ;;  %v17762_v17 = vpack.i.bf16 %v14732_v5, %v14729_v47 }
 0x823   : > { %v14982_v30 = vpop.f32.mrb[152].mxu0 }
 0x824   : > { %v14984_v31 = vpop.f32.mrb[153].mxu0 }
 0x825   : > { %v14986_v16 = vpop.f32.mrb[154].mxu0  ;;  %v14988_v43 = vpop.xlane.xlu0 %3645 }
 0x826   : > { %v14990_v24 = vpop.f32.mrb[155].mxu0 }
 0x827   : > { %9764 = vrot.lane.b32.xlu0 %v17758_v9, %s11220_s25 }
 0x829   : > { %v14996_v44 = vpop.xlane.xlu0 %3649 }
 0x82a   : > { %v14998_v7 = vpop.f32.mrb[184].mxu1 }
 0x82b   : > { %v15000_v19 = vpop.f32.mrb[185].mxu1  ;;  %9759 = vrot.lane.b32.xlu1 %v17759_v21, %s11220_s25  ;;  %9779 = vrot.lane.b32.xlu0 %v17760_v29, %s11219_s22  ;;  %v17764_v29 = vld [vmem:[#allocation29_spill] sm:$0xff] }
 0x82c   : > { %v15010_v32 = vpop.f32.mrb[186].mxu1 }
 0x82d   : > { %v15012_v26 = vpop.f32.mrb[187].mxu1  ;;  %v15014_v54 = vpop.xlane.xlu0 %3651 }
 0x82f   : > { %9769 = vrot.lane.b32.xlu1 %v17761_v15, %s11218_s18 }
 0x831   : > { %v3808_v27 = vpop.xlane.xlu0 %3807 }
 0x832   : > { %v15020_v45 = vpop.f32.mrb[156].mxu0  ;;  %10530 = vrcp.f32 %v3808_v27 }
 0x833   : > { %v15022_v48 = vpop.f32.mrb[157].mxu0  ;;  %9774 = vrot.lane.b32.xlu1 %v17762_v17, %s11218_s18 }
 0x834   : > { %v15028_v58 = vpop.f32.mrb[158].mxu0 }
 0x835   : > { %v15030_v4 = vpop.f32.mrb[159].mxu0  ;;  %v3812_v61 = vpop.xlane.xlu0 %3811 }
 0x836   : > { %v15032_v14 = vpop.xlane.xlu1 %3647 }
 0x837   : > { %9784 = vrot.lane.b32.xlu1 %v17763_v18, %s11219_s22  ;;  %v17766_v18 = vld [vmem:[#allocation28_spill] sm:$0xff] }
 0x839   : > { %v3840_v59 = vpop.xlane.xlu0 %3839 }
 0x83a   : > { %v15038_v13 = vpop.f32.mrb[188].mxu1  ;;  %v3806_v55 = vpop.xlane.xlu1 %3805 }
 0x83b   : > { %10532 = vrcp.f32 %v3806_v55  ;;  %v15040_v47 = vpop.f32.mrb[189].mxu1 }
 0x83c   : > { %v15042_v5 = vpop.f32.mrb[190].mxu1  ;;  %10534 = vrcp.f32 %v3812_v61  ;;  %v10531_v50 = vpop.eup %10530 }
 0x83d   : > { %v15044_v52 = vpop.f32.mrb[191].mxu1  ;;  %v3844_v12 = vpop.xlane.xlu0 %3843  ;;  %v15051_v36 = vmul.f32 %v10531_v50, %v14546_v0  ;;  %v17767_v50 = vld [vmem:[#allocation58_spill] sm:$0xff] }
 0x83e   : > { %v3810_v51 = vpop.xlane.xlu1 %3809 }
 0x83f   : > { %10536 = vrcp.f32 %v3810_v51 }
 0x840   : > { %10538 = vrcp.f32 %v3840_v59 }
 0x841   : > { %v3872_v56 = vpop.xlane.xlu0 %3871 }
 0x842   : > { %v3838_v2 = vpop.xlane.xlu1 %3837 }
 0x843   : > { %10540 = vrcp.f32 %v3838_v2 }
 0x844   : > { %10542 = vrcp.f32 %v3844_v12 }
 0x845   : > { %v10533_v20 = vpop.eup %10532  ;;  %10544 = vrcp.f32 %v14833_v41  ;;  %v3876_v23 = vpop.xlane.xlu0 %3875 }
 0x846   : > { %v3842_v22 = vpop.xlane.xlu1 %3841  ;;  %v15048_v35 = vmul.f32 %v10533_v20, %v14541_v62  ;;  %v10535_v8 = vpop.eup %10534  ;;  %v17765_v62 = vld [vmem:[#allocation34_spill] sm:$0xff] }
 0x847   : > { %10546 = vrcp.f32 %v3842_v22  ;;  %v15061_v15 = vmul.f32 %v10535_v8, %v17765_v62  ;;  %v17769_v62 = vld [vmem:[#allocation127_spill] sm:$0xff] }
 0x848   : > { %10548 = vrcp.f32 %v14867_v10  ;;  %v9878_v1 = vpack.i.bf16 %v15051_v36, %v15048_v35 }
 0x849   : > { %v10537_v9 = vpop.eup %10536  ;;  %10550 = vrcp.f32 %v3872_v56  ;;  %v9735_v17 = vpop.permute.xlu0 %9734 }
 0x84a   : > { %v3870_v21 = vpop.xlane.xlu1 %3869  ;;  %3757 = vadd.xlane.f32.xlu0 %v17764_v29  ;;  %v15058_v41 = vmul.f32 %v10537_v9, %v14538_v60  ;;  %v10539_v0 = vpop.eup %10538 }
 0x84b   : > { %10552 = vrcp.f32 %v3870_v21  ;;  %v15071_v60 = vmul.f32 %v10539_v0, %v14990_v24  ;;  %v17768_v21 = vld [vmem:[#allocation124_spill] sm:$0xff] }
 0x84c   : > { %v9883_v10 = vpack.i.bf16 %v15061_v15, %v15058_v41  ;;  %10554 = vrcp.f32 %v3876_v23  ;;  %v17837_v15 = vld [vmem:[#allocation166_spill] sm:$0xff] }
 0x84d   : > { %v10541_v27 = vpop.eup %10540  ;;  %10556 = vrcp.f32 %v14851_v38  ;;  %v9750_v22 = vpop.permute.xlu0 %9749 }
 0x84e   : > { %v3874_v61 = vpop.xlane.xlu1 %3873  ;;  %3761 = vadd.xlane.f32.xlu0 %v17766_v18  ;;  %v15068_v59 = vmul.f32 %v10541_v27, %v14984_v31  ;;  %v10543_v55 = vpop.eup %10542  ;;  %v9752_v18 = vunpack.i.h.bf16 %v9750_v22 }
 0x84f   : > { %10558 = vrcp.f32 %v3874_v61  ;;  %v10545_v12 = vpop.eup %10544  ;;  %v15081_v31 = vmul.f32 %v10543_v55, %v14986_v16 }
 0x850   : > { %10560 = vrcp.f32 %v14875_v6  ;;  %v4858_v0 = vmul.f32 %v10545_v12, %v17769_v62  ;;  %v17839_v36 = vpack.i.bf16 %v15071_v60, %v15068_v59 }
 0x851   : > { %v10547_v56 = vpop.eup %10546 }
 0x852   : > { %v10549_v38 = vpop.eup %10548  ;;  %v9730_v2 = vpop.permute.xlu1 %9729  ;;  %3763 = vadd.xlane.f32.xlu0 %v17767_v50  ;;  %v15078_v20 = vmul.f32 %v10547_v56, %v14982_v30  ;;  %v9751_v50 = vunpack.i.l.bf16 %v9750_v22 }
 0x853   : > { %v10551_v24 = vpop.eup %10550  ;;  %v9732_v8 = vunpack.i.h.bf16 %v9730_v2  ;;  %v9731_v23 = vunpack.i.l.bf16 %v9730_v2  ;;  %v4857_v29 = vmul.f32 %v10549_v38, %v17768_v21 }
 0x854   : > { %v15091_v30 = vmul.f32 %v10551_v24, %v15012_v26 }
 0x855   : > { %v10553_v9 = vpop.eup %10552  ;;  %v5177_v6 = vsel %vm1828_vm0, %v4857_v29, %v9731_v23  ;;  %v5178_v51 = vsel %vm1828_vm0, %v4858_v0, %v9732_v8  ;;  %v9737_v8 = vunpack.i.h.bf16 %v9735_v17  ;;  %v9736_v29 = vunpack.i.l.bf16 %v9735_v17  ;;  %v17770_v0 = vld [vmem:[#allocation73_spill] sm:$0xff] }
 0x856   : > { %v9740_v27 = vpop.permute.xlu1 %9739  ;;  %v15088_v61 = vmul.f32 %v10553_v9, %v15000_v19  ;;  %v10555_v16 = vpop.eup %10554 }
 0x857   : > { %v9742_v55 = vunpack.i.h.bf16 %v9740_v27  ;;  %v9741_v56 = vunpack.i.l.bf16 %v9740_v27  ;;  %v10557_v2 = vpop.eup %10556  ;;  %v15105_v23 = vmul.f32 %v10555_v16, %v15010_v32 }
 0x858   : > { %v9898_v12 = vpack.i.bf16 %v15091_v30, %v15088_v61 }
 0x859   : > { %v10559_v38 = vpop.eup %10558  ;;  %v5194_v19 = vsel %vm5189_vm2, %v5177_v6, %v9741_v56  ;;  %v5195_v9 = vsel %vm5189_vm2, %v5178_v51, %v9742_v55  ;;  %v17771_v55 = vld [vmem:[#allocation123_spill] sm:$0xff] }
 0x85a   : > { %v10561_v26 = vpop.eup %10560  ;;  %v9745_v24 = vpop.permute.xlu1 %9744  ;;  %v5211_v21 = vsel %vm5206_vm3, %v5194_v19, %v9751_v50  ;;  %v5212_v62 = vsel %vm5206_vm3, %v5195_v9, %v9752_v18  ;;  %v15102_v22 = vmul.f32 %v10559_v38, %v14998_v7  ;;  %v17772_v19 = vld [vmem:[#allocation125_spill] sm:$0xff] }
 0x85b   : > { %3759 = vadd.xlane.f32.xlu1 %v17770_v0  ;;  %v5465_v27 = vpack.c.bf16 %v5212_v62, %v5211_v21  ;;  %v9747_v6 = vunpack.i.h.bf16 %v9745_v24  ;;  %v9746_v56 = vunpack.i.l.bf16 %v9745_v24  ;;  %v4859_v50 = vmul.f32 %v10561_v26, %v17771_v55  ;;  %v17780_v55 = vld [vmem:[#allocation108_spill] sm:$0xff] }
 0x85c   : > { %v4860_v18 = vmul.f32 %v10557_v2, %v17772_v19  ;;  %v17773_v2 = vld [vmem:[#allocation141_spill] sm:$0xff] }
 0x85d   : > { %9488 = vmatprep.mubr.bf16.mxu0 %v5465_v27  ;;  %v5179_v32 = vsel %vm1828_vm0, %v4859_v50, %v9736_v29  ;;  %v17774_v26 = vpack.i.bf16 %v14773_v34, %v17773_v2  ;;  %v17776_v29 = vld [vmem:[#allocation32_spill] sm:$0xff]  ;;  %v17781_v50 = vld [vmem:[#allocation39_spill] sm:$0xff] }
 0x85e   : > { %v9755_v7 = vpop.permute.xlu1 %9754  ;;  %v5180_v38 = vsel %vm1828_vm0, %v4860_v18, %v9737_v8  ;;  %v5196_v9 = vsel %vm5189_vm2, %v5179_v32, %v9746_v56  ;;  %v17775_v8 = vld [vmem:[#allocation55_spill] sm:$0xff]  ;;  %v17778_v56 = vld [vmem:[#allocation40_spill] sm:$0xff]  ;;  %v17782_v19 = vpack.i.bf16 %v17780_v55, %v17781_v50 }
 0x85f   : > { %v9757_v16 = vunpack.i.h.bf16 %v9755_v7  ;;  %v9756_v17 = vunpack.i.l.bf16 %v9755_v7  ;;  %v5197_v21 = vsel %vm5189_vm2, %v5180_v38, %v9747_v6  ;;  %v17777_v27 = vpack.i.bf16 %v17775_v8, %v17776_v29  ;;  %v17783_v18 = vld [vmem:[#allocation64_spill] sm:$0xff]  ;;  %v17791_v50 = vld [vmem:[#allocation139_spill] sm:$0xff] }
 0x860   : > { %v17779_v6 = vpack.i.bf16 %v14808_v33, %v17778_v56  ;;  %v17784_v7 = vld [vmem:[#allocation72_spill] sm:$0xff]  ;;  %v17786_v38 = vpack.i.bf16 %v14817_v46, %v14814_v25  ;;  %v17790_v56 = vld [vmem:[#allocation106_spill] sm:$0xff] }
 0x861   : > { %v5213_v24 = vsel %vm5206_vm3, %v5196_v9, %v9756_v17  ;;  %v5214_v62 = vsel %vm5206_vm3, %v5197_v21, %v9757_v16  ;;  %v17785_v34 = vpack.i.bf16 %v17783_v18, %v17784_v7  ;;  %v17787_v9 = vld [vmem:[#allocation47_spill] sm:$0xff]  ;;  %v17792_v18 = vld [vmem:[#allocation78_spill] sm:$0xff] }
 0x862   : > { %v5466_v0 = vpack.c.bf16 %v5214_v62, %v5213_v24  ;;  %v17788_v62 = vld [vmem:[#allocation70_spill] sm:$0xff] }
 0x864   : > { %9489 = vmatmul.mubr.bf16.gmra.mrb[164].mxu0 %v5466_v0 }
 0x868   : > { %9794 = vrot.lane.b32.xlu0 %v17774_v26, %s11220_s25  ;;  %v17789_v26 = vld [vmem:[#allocation56_spill] sm:$0xff] }
 0x86c   : > { %9789 = vrot.lane.b32.xlu1 %v17777_v27, %s11220_s25  ;;  %9809 = vrot.lane.b32.xlu0 %v17779_v6, %s11219_s22 }
 0x870   : > { %9799 = vrot.lane.b32.xlu1 %v17782_v19, %s11218_s18 }
 0x874   : > { %9804 = vrot.lane.b32.xlu1 %v17785_v34, %s11218_s18 }
 0x878   : > { %9814 = vrot.lane.b32.xlu1 %v17786_v38, %s11219_s22 }
 0x87e   : > { %v15142_v32 = vpop.xlane.xlu0 %3653 }
 0x882   : > { %v15144_v16 = vpop.xlane.xlu0 %3657 }
 0x886   : > { %v15146_v33 = vpop.xlane.xlu0 %3659 }
 0x88a   : > { %v3816_v17 = vpop.xlane.xlu0 %3815 }
 0x88b   : > { %3765 = vadd.xlane.f32.xlu0 %v17787_v9  ;;  %10562 = vrcp.f32 %v3816_v17 }
 0x88e   : > { %v3820_v21 = vpop.xlane.xlu0 %3819 }
 0x88f   : > { %v15149_v24 = vpop.xlane.xlu1 %3655  ;;  %3769 = vadd.xlane.f32.xlu0 %v17788_v62  ;;  %v17793_v62 = vld [vmem:[#allocation71_spill] sm:$0xff] }
 0x892   : > { %v3848_v0 = vpop.xlane.xlu0 %3847 }
 0x893   : > { %v3814_v2 = vpop.xlane.xlu1 %3813  ;;  %3771 = vadd.xlane.f32.xlu0 %v17789_v26 }
 0x894   : > { %10564 = vrcp.f32 %v3814_v2 }
 0x895   : > { %10566 = vrcp.f32 %v3820_v21  ;;  %v10563_v27 = vpop.eup %10562 }
 0x896   : > { %v3852_v46 = vpop.xlane.xlu0 %3851  ;;  %v15159_v7 = vmul.f32 %v10563_v27, %v17792_v18 }
 0x897   : > { %v3818_v25 = vpop.xlane.xlu1 %3817 }
 0x898   : > { %10568 = vrcp.f32 %v3818_v25 }
 0x899   : > { %10570 = vrcp.f32 %v3848_v0  ;;  %v17794_v0 = vld [vmem:[#allocation143_spill] sm:$0xff] }
 0x89a   : > { %v3880_v8 = vpop.xlane.xlu0 %3879 }
 0x89b   : > { %v3846_v29 = vpop.xlane.xlu1 %3845 }
 0x89c   : > { %10572 = vrcp.f32 %v3846_v29  ;;  %3767 = vadd.xlane.f32.xlu1 %v17790_v56 }
 0x89d   : > { %10574 = vrcp.f32 %v3852_v46 }
 0x89e   : > { %v10565_v6 = vpop.eup %10564  ;;  %10576 = vrcp.f32 %v14988_v43  ;;  %v3884_v38 = vpop.xlane.xlu0 %3883 }
 0x89f   : > { %v3850_v55 = vpop.xlane.xlu1 %3849  ;;  %v15156_v19 = vmul.f32 %v10565_v6, %v17791_v50  ;;  %v10567_v34 = vpop.eup %10566 }
 0x8a0   : > { %10578 = vrcp.f32 %v3850_v55  ;;  %v15168_v2 = vmul.f32 %v10567_v34, %v17794_v0  ;;  %v17795_v55 = vpack.i.bf16 %v14839_v49, %v14836_v28  ;;  %v17796_v28 = vpack.i.bf16 %v14825_v3, %v14822_v39  ;;  %v17797_v49 = vld [vmem:[#allocation109_spill] sm:$0xff] }
 0x8a1   : > { %10580 = vrcp.f32 %v15032_v14  ;;  %v9908_v17 = vpack.i.bf16 %v15159_v7, %v15156_v19  ;;  %v17840_v19 = vpack.i.bf16 %v15081_v31, %v15078_v20 }
 0x8a2   : > { %v10569_v9 = vpop.eup %10568  ;;  %10582 = vrcp.f32 %v3880_v8  ;;  %v9765_v14 = vpop.permute.xlu0 %9764 }
 0x8a3   : > { %v3878_v21 = vpop.xlane.xlu1 %3877  ;;  %v15165_v43 = vmul.f32 %v10569_v9, %v17793_v62  ;;  %v10571_v26 = vpop.eup %10570  ;;  %v17798_v62 = vpack.i.bf16 %v14903_v37, %v17797_v49 }
 0x8a4   : > { %10584 = vrcp.f32 %v3878_v21  ;;  %v15177_v27 = vmul.f32 %v10571_v26, %v15030_v4 }
 0x8a5   : > { %10586 = vrcp.f32 %v3884_v38 }
 0x8a6   : > { %v10573_v25 = vpop.eup %10572  ;;  %10588 = vrcp.f32 %v14996_v44  ;;  %v9780_v9 = vpop.permute.xlu0 %9779 }
 0x8a7   : > { %v3882_v29 = vpop.xlane.xlu1 %3881  ;;  %v15174_v8 = vmul.f32 %v10573_v25, %v15022_v48  ;;  %v10575_v56 = vpop.eup %10574  ;;  %v17800_v25 = vld [vmem:[#allocation132_spill] sm:$0xff]  ;;  %v9781_v49 = vunpack.i.l.bf16 %v9780_v9 }
 0x8a8   : > { %10590 = vrcp.f32 %v3882_v29  ;;  %v10577_v6 = vpop.eup %10576  ;;  %v15190_v4 = vmul.f32 %v10575_v56, %v15028_v58  ;;  %v17799_v58 = vld [vmem:[#allocation30_spill] sm:$0xff] }
 0x8a9   : > { %10592 = vrcp.f32 %v15014_v54  ;;  %9824 = vrot.lane.b32.xlu0 %v17795_v55, %s11220_s25  ;;  %v9918_v44 = vpack.i.bf16 %v15177_v27, %v15174_v8  ;;  %v4861_v29 = vmul.f32 %v10577_v6, %v17800_v25  ;;  %v17802_v6 = vld [vmem:[#allocation90_spill] sm:$0xff] }
 0x8aa   : > { %v10579_v50 = vpop.eup %10578  ;;  %10594 = vrcp.f32 %v15142_v32 }
 0x8ab   : > { %v10581_v18 = vpop.eup %10580  ;;  %v9760_v48 = vpop.permute.xlu1 %9759  ;;  %v15187_v34 = vmul.f32 %v10579_v50, %v15020_v45  ;;  %v9782_v50 = vunpack.i.h.bf16 %v9780_v9  ;;  %10596 = vrcp.f32 %v15149_v24  ;;  %v17819_v24 = vld [vmem:[#allocation86_spill] sm:$0xff] }
 0x8ac   : > { %v10583_v38 = vpop.eup %10582  ;;  %v9762_v54 = vunpack.i.h.bf16 %v9760_v48  ;;  %v9761_v21 = vunpack.i.l.bf16 %v9760_v48  ;;  %v4862_v26 = vmul.f32 %v10581_v18, %v17799_v58  ;;  %v17801_v18 = vld [vmem:[#allocation36_spill] sm:$0xff]  ;;  %10598 = vrcp.f32 %v15144_v16 }
 0x8ad   : > { %9819 = vrot.lane.b32.xlu1 %v17796_v28, %s11220_s25  ;;  %9839 = vrot.lane.b32.xlu0 %v17798_v62, %s11219_s22  ;;  %v15208_v39 = vmul.f32 %v10583_v38, %v15044_v52  ;;  %v17803_v58 = vpack.i.bf16 %v17801_v18, %v17802_v6  ;;  %v9766_v18 = vunpack.i.l.bf16 %v9765_v14  ;;  %10600 = vrcp.f32 %v15146_v33 }
 0x8ae   : > { %v10585_v0 = vpop.eup %10584  ;;  %v5182_v62 = vsel %vm1828_vm0, %v4862_v26, %v9762_v54  ;;  %v5181_v45 = vsel %vm1828_vm0, %v4861_v29, %v9761_v21  ;;  %v9767_v29 = vunpack.i.h.bf16 %v9765_v14  ;;  %v17822_v16 = vpack.i.bf16 %v14941_v40, %v14939_v63 }
 0x8af   : > { %v9770_v56 = vpop.permute.xlu1 %9769  ;;  %v15205_v55 = vmul.f32 %v10585_v0, %v15040_v47  ;;  %v10587_v3 = vpop.eup %10586 }
 0x8b0   : > { %v9772_v48 = vunpack.i.h.bf16 %v9770_v56  ;;  %v9771_v37 = vunpack.i.l.bf16 %v9770_v56  ;;  %v10589_v28 = vpop.eup %10588  ;;  %v15226_v26 = vmul.f32 %v10587_v3, %v15042_v5 }
 0x8b1   : > { %9829 = vrot.lane.b32.xlu1 %v17803_v58, %s11218_s18 }
 0x8b2   : > { %v10591_v52 = vpop.eup %10590  ;;  %v5198_v38 = vsel %vm5189_vm2, %v5181_v45, %v9771_v37  ;;  %v5199_v0 = vsel %vm5189_vm2, %v5182_v62, %v9772_v48  ;;  %v17804_v45 = vld [vmem:[#allocation67_spill] sm:$0xff]  ;;  %v17805_v48 = vld [vmem:[#allocation25_spill] sm:$0xff] }
 0x8b3   : > { %v10593_v25 = vpop.eup %10592  ;;  %v9775_v56 = vpop.permute.xlu1 %9774  ;;  %v5215_v9 = vsel %vm5206_vm3, %v5198_v38, %v9781_v49  ;;  %v5216_v54 = vsel %vm5206_vm3, %v5199_v0, %v9782_v50  ;;  %v15223_v21 = vmul.f32 %v10591_v52, %v15038_v13  ;;  %v17806_v37 = vpack.i.bf16 %v17804_v45, %v17805_v48  ;;  %v17807_v50 = vld [vmem:[#allocation131_spill] sm:$0xff]  ;;  %v17808_v13 = vld [vmem:[#allocation133_spill] sm:$0xff] }
 0x8b4   : > { %v5467_v6 = vpack.c.bf16 %v5216_v54, %v5215_v9  ;;  %v9777_v58 = vunpack.i.h.bf16 %v9775_v56  ;;  %v9776_v46 = vunpack.i.l.bf16 %v9775_v56  ;;  %v4863_v62 = vmul.f32 %v10589_v28, %v17807_v50  ;;  %v17809_v56 = vld [vmem:[#allocation27_spill] sm:$0xff]  ;;  %v17810_v9 = vld [vmem:[#allocation81_spill] sm:$0xff] }
 0x8b5   : > { %9834 = vrot.lane.b32.xlu1 %v17806_v37, %s11218_s18  ;;  %v4864_v52 = vmul.f32 %v10593_v25, %v17808_v13  ;;  %v17811_v54 = vpack.i.bf16 %v17809_v56, %v17810_v9  ;;  %v17814_v37 = vld [vmem:[#allocation43_spill] sm:$0xff]  ;;  %v17815_v13 = vld [vmem:[#allocation97_spill] sm:$0xff] }
 0x8b6   : > { %9492 = vmatprep.mubr.bf16.mxu0 %v5467_v6  ;;  %v5183_v14 = vsel %vm1828_vm0, %v4863_v62, %v9766_v18  ;;  %v17813_v18 = vld [vmem:[#allocation83_spill] sm:$0xff]  ;;  %v17817_v56 = vld [vmem:[#allocation105_spill] sm:$0xff] }
 0x8b7   : > { %v9785_v5 = vpop.permute.xlu1 %9784  ;;  %v5184_v3 = vsel %vm1828_vm0, %v4864_v52, %v9767_v29  ;;  %v5200_v45 = vsel %vm5189_vm2, %v5183_v14, %v9776_v46  ;;  %v17812_v29 = vld [vmem:[#allocation61_spill] sm:$0xff] }
 0x8b8   : > { %v9787_v38 = vunpack.i.h.bf16 %v9785_v5  ;;  %v9786_v0 = vunpack.i.l.bf16 %v9785_v5  ;;  %v5201_v48 = vsel %vm5189_vm2, %v5184_v3, %v9777_v58 }
 0x8b9   : > { %9844 = vrot.lane.b32.xlu1 %v17811_v54, %s11219_s22  ;;  %v10595_v54 = vpop.eup %10594 }
 0x8ba   : > { %v5217_v28 = vsel %vm5206_vm3, %v5200_v45, %v9786_v0  ;;  %v5218_v25 = vsel %vm5206_vm3, %v5201_v48, %v9787_v38  ;;  %v17816_v0 = vld [vmem:[#allocation69_spill] sm:$0xff]  ;;  %v10597_v48 = vpop.eup %10596 }
 0x8bb   : > { %v5468_v6 = vpack.c.bf16 %v5218_v25, %v5217_v28  ;;  %v17818_v9 = vpack.i.bf16 %v17816_v0, %v17817_v56  ;;  %v17820_v25 = vld [vmem:[#allocation24_spill] sm:$0xff]  ;;  %v10599_v63 = vpop.eup %10598 }
 0x8bd   : > { %9493 = vmatmul.mubr.bf16.gmra.mrb[168].mxu0 %v5468_v6  ;;  %v17821_v6 = vpack.i.bf16 %v17819_v24, %v17820_v25  ;;  %v17825_v25 = vld [vmem:[#allocation88_spill] sm:$0xff] }
 0x8cc   : > { %3773 = vadd.xlane.f32.xlu0 %v17812_v29  ;;  %v17823_v29 = vld [vmem:[#allocation62_spill] sm:$0xff] }
 0x8d0   : > { %3777 = vadd.xlane.f32.xlu0 %v17813_v18  ;;  %v4866_v18 = vmul.f32 %v10597_v48, %v17823_v29 }
 0x8d4   : > { %3779 = vadd.xlane.f32.xlu0 %v17814_v37  ;;  %v17824_v37 = vld [vmem:[#allocation138_spill] sm:$0xff] }
 0x8d7   : > { %v15249_v50 = vpop.xlane.xlu0 %3757 }
 0x8db   : > { %v15251_v62 = vpop.xlane.xlu0 %3761 }
 0x8dd   : > { %3775 = vadd.xlane.f32.xlu1 %v17815_v13  ;;  %v4865_v13 = vmul.f32 %v10595_v54, %v17824_v37  ;;  %v10601_v54 = vpop.eup %10600 }
 0x8de   : > { %v15254_v46 = vpop.f32.mrb[160].mxu0 }
 0x8df   : > { %v15256_v58 = vpop.f32.mrb[161].mxu0  ;;  %v15264_v3 = vpop.xlane.xlu0 %3763 }
 0x8e0   : > { %v15258_v52 = vpop.f32.mrb[162].mxu0 }
 0x8e1   : > { %v15260_v5 = vpop.f32.mrb[163].mxu0 }
 0x8e3   : > { %v9795_v38 = vpop.permute.xlu0 %9794 }
 0x8e4   : > { %v9797_v37 = vunpack.i.h.bf16 %v9795_v38 }
 0x8e7   : > { %v9810_v33 = vpop.permute.xlu0 %9809 }
 0x8e8   : > { %v3760_v14 = vpop.xlane.xlu1 %3759  ;;  %v9812_v49 = vunpack.i.h.bf16 %v9810_v33 }
 0x8ea   : > { %9854 = vrot.lane.b32.xlu0 %v17818_v9, %s11220_s25 }
 0x8ec   : > { %v9790_v45 = vpop.permute.xlu1 %9789 }
 0x8ed   : > { %v9792_v28 = vunpack.i.h.bf16 %v9790_v45  ;;  %v9791_v32 = vunpack.i.l.bf16 %v9790_v45  ;;  %v9811_v45 = vunpack.i.l.bf16 %v9810_v33 }
 0x8ee   : > { %9849 = vrot.lane.b32.xlu1 %v17821_v6, %s11220_s25  ;;  %9869 = vrot.lane.b32.xlu0 %v17822_v16, %s11219_s22  ;;  %v17826_v6 = vld [vmem:[#allocation85_spill] sm:$0xff] }
 0x8ef   : > { %v5186_v47 = vsel %vm1828_vm0, %v4866_v18, %v9792_v28  ;;  %v5185_v24 = vsel %vm1828_vm0, %v4865_v13, %v9791_v32  ;;  %v17827_v51 = vpack.i.bf16 %v17825_v25, %v17826_v6  ;;  %v9796_v28 = vunpack.i.l.bf16 %v9795_v38  ;;  %v17830_v25 = vld [vmem:[#allocation33_spill] sm:$0xff] }
 0x8f0   : > { %v9800_v0 = vpop.permute.xlu1 %9799 }
 0x8f1   : > { %v9802_v56 = vunpack.i.h.bf16 %v9800_v0  ;;  %v9801_v9 = vunpack.i.l.bf16 %v9800_v0  ;;  %v17828_v0 = vld [vmem:[#allocation26_spill] sm:$0xff] }
 0x8f2   : > { %9859 = vrot.lane.b32.xlu1 %v17827_v51, %s11218_s18  ;;  %v17829_v51 = vpack.i.bf16 %v14935_v57, %v17828_v0 }
 0x8f3   : > { %v5202_v40 = vsel %vm5189_vm2, %v5185_v24, %v9801_v9  ;;  %v5203_v48 = vsel %vm5189_vm2, %v5186_v47, %v9802_v56  ;;  %v4867_v9 = vmul.f32 %v10599_v63, %v17830_v25  ;;  %v17831_v24 = vld [vmem:[#allocation140_spill] sm:$0xff] }
 0x8f4   : > { %v9805_v16 = vpop.permute.xlu1 %9804  ;;  %v5219_v29 = vsel %vm5206_vm3, %v5202_v40, %v9811_v45  ;;  %v5220_v33 = vsel %vm5206_vm3, %v5203_v48, %v9812_v49  ;;  %v4868_v47 = vmul.f32 %v10601_v54, %v17831_v24 }
 0x8f5   : > { %v5469_v18 = vpack.c.bf16 %v5220_v33, %v5219_v29  ;;  %v9807_v32 = vunpack.i.h.bf16 %v9805_v16  ;;  %v9806_v13 = vunpack.i.l.bf16 %v9805_v16  ;;  %v5187_v49 = vsel %vm1828_vm0, %v4867_v9, %v9796_v28  ;;  %v17832_v16 = vld [vmem:[#allocation93_spill] sm:$0xff]  ;;  %v17833_v29 = vld [vmem:[#allocation110_spill] sm:$0xff] }
 0x8f6   : > { %9864 = vrot.lane.b32.xlu1 %v17829_v51, %s11218_s18  ;;  %v5188_v45 = vsel %vm1828_vm0, %v4868_v47, %v9797_v37  ;;  %v17834_v33 = vld [vmem:[#allocation41_spill] sm:$0xff] }
 0x8f7   : > { %9496 = vmatprep.mubr.bf16.mxu0 %v5469_v18  ;;  %v5204_v57 = vsel %vm5189_vm2, %v5187_v49, %v9806_v13  ;;  %v5205_v40 = vsel %vm5189_vm2, %v5188_v45, %v9807_v32  ;;  %v17836_v13 = vld [vmem:[#allocation98_spill] sm:$0xff] }
 0x8f8   : > { %v9815_v56 = vpop.permute.xlu1 %9814 }
 0x8f9   : > { %v9817_v6 = vunpack.i.h.bf16 %v9815_v56  ;;  %v9816_v38 = vunpack.i.l.bf16 %v9815_v56 }
 0x8fa   : > { %9874 = vrot.lane.b32.xlu1 %v9873_v53, %s11219_s22 }
 0x8fb   : > { %v5221_v63 = vsel %vm5206_vm3, %v5204_v57, %v9816_v38  ;;  %v5222_v48 = vsel %vm5206_vm3, %v5205_v40, %v9817_v6 }
 0x8fc   : > { %v5470_v54 = vpack.c.bf16 %v5222_v48, %v5221_v63 }
 0x8fe   : > { %9497 = vmatmul.mubr.bf16.gmra.mrb[172].mxu0 %v5470_v54 }
 0x90d   : > { %3781 = vadd.xlane.f32.xlu0 %v17832_v16 }
 0x911   : > { %3785 = vadd.xlane.f32.xlu0 %v17833_v29  ;;  %v17842_v29 = vld [vmem:[#allocation165_spill] sm:$0xff] }
 0x915   : > { %3787 = vadd.xlane.f32.xlu0 %v17834_v33 }
 0x918   : > { %v15311_v37 = vpop.xlane.xlu0 %3765 }
 0x91c   : > { %v15313_v42 = vpop.xlane.xlu0 %3769 }
 0x91e   : > { %3783 = vadd.xlane.f32.xlu1 %v17835_v11 }
 0x920   : > { %v3772_v53 = vpop.xlane.xlu0 %3771 }
 0x921   : > { %10602 = vrcp.f32 %v3772_v53 }
 0x922   : > { %10604 = vrcp.f32 %v15249_v50 }
 0x923   : > { %10606 = vrcp.f32 %v3760_v14 }
 0x924   : > { %10608 = vrcp.f32 %v15251_v62  ;;  %v9825_v18 = vpop.permute.xlu0 %9824  ;;  %v17838_v62 = vld [vmem:[#allocation112_spill] sm:$0xff] }
 0x925   : > { %10610 = vrcp.f32 %v15264_v3  ;;  %v9827_v63 = vunpack.i.h.bf16 %v9825_v18  ;;  %v9826_v48 = vunpack.i.l.bf16 %v9825_v18 }
 0x928   : > { %v9840_v41 = vpop.permute.xlu0 %9839 }
 0x929   : > { %v15317_v28 = vpop.xlane.xlu1 %3767  ;;  %v9842_v45 = vunpack.i.h.bf16 %v9840_v41  ;;  %v9841_v49 = vunpack.i.l.bf16 %v9840_v41  ;;  %v17845_v41 = vpack.i.bf16 %v15168_v2, %v15165_v43 }
 0x92b   : > { %v10603_v32 = vpop.eup %10602  ;;  %9884 = vrot.lane.b32.xlu0 %v9883_v10, %s11220_s25 }
 0x92c   : > { %v15326_v0 = vmul.f32 %v10603_v32, %v17836_v13  ;;  %v10605_v51 = vpop.eup %10604 }
 0x92d   : > { %v9820_v25 = vpop.permute.xlu1 %9819  ;;  %v10607_v50 = vpop.eup %10606  ;;  %v4917_v3 = vmul.f32 %v10605_v51, %v17838_v62 }
 0x92e   : > { %v9822_v14 = vunpack.i.h.bf16 %v9820_v25  ;;  %v9821_v9 = vunpack.i.l.bf16 %v9820_v25  ;;  %v4918_v10 = vmul.f32 %v10607_v50, %v17837_v15  ;;  %v17844_v25 = vpack.i.bf16 %v15208_v39, %v15205_v55  ;;  %v15393_v55 = vld [vmem:[%s16797_s4] ss:$0 sm:$0xff] }
 0x92f   : > { %9879 = vrot.lane.b32.xlu1 %v9878_v1, %s11220_s25  ;;  %9899 = vrot.lane.b32.xlu0 %v9898_v12, %s11219_s22  ;;  %v10609_v1 = vpop.eup %10608  ;;  %v5585_v43 = vadd.f32 %v15393_v55, %v15256_v58  ;;  %v5593_v2 = vadd.f32 %v15254_v46, %v15393_v55  ;;  %v10954_v39 = vld [vmem:[%s11489_s29] sm:$0xff]  ;;  %v5596_v15 = vadd.f32 %v15258_v52, %v15393_v55  ;;  %v10956_v58 = vld [vmem:[%s11489_s29 + $0x18] sm:$0xff] }
 0x930   : > { %v5416_v6 = vsel %vm1828_vm0, %v4918_v10, %v9822_v14  ;;  %v5415_v35 = vsel %vm1828_vm0, %v4917_v3, %v9821_v9  ;;  %v10611_v12 = vpop.eup %10610 }
 0x931   : > { %v9830_v24 = vpop.permute.xlu1 %9829  ;;  %v4920_v33 = vmul.f32 %v10611_v12, %v17842_v29  ;;  %v15410_v46 = vadd.f32 %v10956_v58, %v5596_v15  ;;  %v17855_v12 = vld [vmem:[#allocation126_spill] sm:$0xff] }
 0x932   : > { %v9832_v47 = vunpack.i.h.bf16 %v9830_v24  ;;  %v9831_v56 = vunpack.i.l.bf16 %v9830_v24 }
 0x933   : > { %9889 = vrot.lane.b32.xlu1 %v17839_v36, %s11218_s18  ;;  %9909 = vrot.lane.b32.xlu0 %v9908_v17, %s11220_s25  ;;  %v17841_v17 = vld [vmem:[#allocation164_spill] sm:$0xff]  ;;  %v5418_v32 = vsel %vm1828_vm0, %v4920_v33, %v9827_v63  ;;  %17850 = vst [vmem:[#allocation51_spill] sm:$0xff] %v15410_v46  ;;  %v10958_v36 = vld [vmem:[%s11489_s29 + $0x38] sm:$0xff]  ;;  %v10960_v63 = vld [vmem:[%s11489_s29 + $0x20] sm:$0xff] }
 0x934   : > { %v5432_v61 = vsel %vm5189_vm2, %v5416_v6, %v9832_v47  ;;  %v5431_v30 = vsel %vm5189_vm2, %v5415_v35, %v9831_v56  ;;  %v4919_v16 = vmul.f32 %v10609_v1, %v17841_v17  ;;  %v10957_v47 = vld [vmem:[%s11489_s29 + $0x28] sm:$0xff]  ;;  %v10961_v33 = vld [vmem:[%s11489_s29 + $0x30] sm:$0xff] }
 0x935   : > { %v9835_v38 = vpop.permute.xlu1 %9834  ;;  %v5447_v57 = vsel %vm5206_vm3, %v5431_v30, %v9841_v49  ;;  %v5448_v40 = vsel %vm5206_vm3, %v5432_v61, %v9842_v45  ;;  %v5588_v45 = vadd.f32 %v15393_v55, %v15260_v5  ;;  %v17852_v49 = vld [vmem:[#allocation137_spill] sm:$0xff] }
 0x936   : > { %v5471_v59 = vpack.c.bf16 %v5448_v40, %v5447_v57  ;;  %v9837_v60 = vunpack.i.h.bf16 %v9835_v38  ;;  %v9836_v54 = vunpack.i.l.bf16 %v9835_v38  ;;  %v5417_v20 = vsel %vm1828_vm0, %v4919_v16, %v9826_v48 }
 0x937   : > { %9894 = vrot.lane.b32.xlu1 %v17840_v19, %s11218_s18  ;;  %9919 = vrot.lane.b32.xlu0 %v9918_v44, %s11218_s18  ;;  %v15360_v7 = vpop.f32.mrb[164].mxu0  ;;  %v17843_v44 = vpack.i.bf16 %v15105_v23, %v15102_v22  ;;  %v17846_v22 = vpack.i.bf16 %v15190_v4, %v15187_v34  ;;  %v17847_v23 = vpack.i.bf16 %v15226_v26, %v15223_v21  ;;  %v10955_v21 = vld [vmem:[%s11489_s29 + $0x10] sm:$0xff] }
 0x938   : > { %v5600_v11 = vpop.f32.mrb[165].mxu0  ;;  %9500 = vmatprep.mubr.bf16.mxu0 %v5471_v59  ;;  %v5433_v8 = vsel %vm5189_vm2, %v5417_v20, %v9836_v54  ;;  %v5434_v27 = vsel %vm5189_vm2, %v5418_v32, %v9837_v60  ;;  %v15400_v34 = vadd.f32 %v10954_v39, %v5585_v43  ;;  %v15404_v26 = vadd.f32 %v10955_v21, %v5593_v2  ;;  %v17857_v59 = vld [vmem:[#allocation129_spill] sm:$0xff]  ;;  %v17861_v21 = vld [vmem:[#allocation118_spill] sm:$0xff] }
 0x939   : > { %v9845_v53 = vpop.permute.xlu1 %9844  ;;  %v9491_v18 = vpop.f32.mrb[166].mxu0  ;;  %v5601_v30 = vadd.f32 %v15393_v55, %v5600_v11  ;;  %v5609_v40 = vadd.f32 %v15360_v7, %v15393_v55  ;;  %v17860_v7 = vld [vmem:[#allocation91_spill] sm:$0xff] }
 0x93a   : > { %v9847_v31 = vunpack.i.h.bf16 %v9845_v53  ;;  %v9846_v13 = vunpack.i.l.bf16 %v9845_v53  ;;  %v5603_v51 = vpop.f32.mrb[167].mxu0  ;;  %17848 = vst [vmem:[#allocation80_spill] sm:$0xff] %v15400_v34  ;;  %17849 = vst [vmem:[#allocation79_spill] sm:$0xff] %v15404_v26  ;;  %v5612_v52 = vadd.f32 %v9491_v18, %v15393_v55  ;;  %v17859_v53 = vld [vmem:[#allocation117_spill] sm:$0xff] }
 0x93b   : > { %9904 = vrot.lane.b32.xlu1 %v17843_v44, %s11219_s22  ;;  %9929 = vrot.lane.b32.xlu0 %v17844_v25, %s11219_s22  ;;  %v5604_v62 = vadd.f32 %v15393_v55, %v5603_v51  ;;  %v15444_v48 = vadd.f32 %v10960_v63, %v5601_v30  ;;  %v15451_v11 = vadd.f32 %v10961_v33, %v5609_v40 }
 0x93c   : > { %v5449_v50 = vsel %vm5206_vm3, %v5433_v8, %v9846_v13  ;;  %v5450_v14 = vsel %vm5206_vm3, %v5434_v27, %v9847_v31  ;;  %v15427_v1 = vadd.f32 %v10958_v36, %v5612_v52 }
 0x93d   : > { %v5472_v9 = vpack.c.bf16 %v5450_v14, %v5449_v50  ;;  %v15417_v56 = vadd.f32 %v10957_v47, %v5604_v62  ;;  %17856 = vst [vmem:[#allocation75_spill] sm:$0xff] %v15444_v48  ;;  %17858 = vst [vmem:[#allocation20_spill] sm:$0xff] %v15451_v11 }
 0x93e   : > { %17853 = vst [vmem:[#allocation66_spill] sm:$0xff] %v15427_v1 }
 0x93f   : > { %9914 = vrot.lane.b32.xlu1 %v17845_v41, %s11220_s25  ;;  %9501 = vmatmul.mubr.bf16.gmra.mrb[176].mxu0 %v5472_v9  ;;  %17851 = vst [vmem:[#allocation84_spill] sm:$0xff] %v15417_v56  ;;  %s11222_s25 = smov [#allocation11]  }
 0x940   : > { %s11132_s1 = sshll.u32 %s11222_s25, 4  ;;  %s11133_s1 = int_to_ptr.vmem [resolvable:$false] %s11132_s1 }
 0x941   : > { %s11134_s24 = scalar_lea.vmem %s11133_s1, 8192 }
 0x943   : > { %9924 = vrot.lane.b32.xlu1 %v17846_v22, %s11218_s18  ;;  %s16744_s18 = scalar_lea.hbm %s16802_s9, %s8379_s16 }
 0x947   : > { %9934 = vrot.lane.b32.xlu1 %v17847_v23, %s11219_s22  ;;  %s8065_s22 = scalar_lea.sflag [#allocation4], %s11483_s14 }
 0x959   : > { %v3774_v4 = vpop.xlane.xlu0 %3773 }
 0x95a   : > { %10612 = vrcp.f32 %v3774_v4  ;;  %5743 = vadd.xlane.f32.xlu0 %v15400_v34 }
 0x95d   : > { %v3778_v10 = vpop.xlane.xlu0 %3777 }
 0x95e   : > { %10614 = vrcp.f32 %v3778_v10  ;;  %5747 = vadd.xlane.f32.xlu0 %v15404_v26 }
 0x961   : > { %v3780_v3 = vpop.xlane.xlu0 %3779 }
 0x962   : > { %10616 = vrcp.f32 %v3780_v3  ;;  %5749 = vadd.xlane.f32.xlu0 %v15410_v46 }
 0x963   : > { %10618 = vrcp.f32 %v15311_v37  ;;  %v10959_v37 = vld [vmem:[%s11489_s29 + $0x8] sm:$0xff] }
 0x964   : > { %v10613_v24 = vpop.eup %10612  ;;  %10620 = vrcp.f32 %v15317_v28  ;;  %v15430_v61 = vadd.f32 %v10959_v37, %v5588_v45 }
 0x965   : > { %v15423_v6 = vmul.f32 %v10613_v24, %v17852_v49  ;;  %v9855_v28 = vpop.permute.xlu0 %9854  ;;  %10622 = vrcp.f32 %v15313_v42 }
 0x966   : > { %5753 = vadd.xlane.f32.xlu0 %v15417_v56  ;;  %17854 = vst [vmem:[#allocation19_spill] sm:$0xff] %v15430_v61  ;;  %v9857_v23 = vunpack.i.h.bf16 %v9855_v28  ;;  %v9856_v43 = vunpack.i.l.bf16 %v9855_v28 }
 0x968   : > { %v10615_v35 = vpop.eup %10614  ;;  %v5422_v58 = vsel %vm1828_vm0, %v15326_v0, %v9857_v23 }
 0x969   : > { %v15434_v38 = vmul.f32 %v10615_v35, %v17855_v12  ;;  %v9870_v42 = vpop.permute.xlu0 %9869 }
 0x96a   : > { %v15436_v5 = vpop.xlane.xlu1 %3775  ;;  %5757 = vadd.xlane.f32.xlu0 %v15427_v1  ;;  %v9872_v51 = vunpack.i.h.bf16 %v9870_v42  ;;  %v9871_v8 = vunpack.i.l.bf16 %v9870_v42 }
 0x96b   : > { %5745 = vadd.xlane.f32.xlu1 %v15430_v61  ;;  %10624 = vrcp.f32 %v15436_v5 }
 0x96c   : > { %v10617_v57 = vpop.eup %10616 }
 0x96d   : > { %v15447_v60 = vmul.f32 %v10617_v57, %v17857_v59  ;;  %v10619_v54 = vpop.eup %10618  ;;  %v10962_v57 = vld [vmem:[%s11489_s29 + $0x40] sm:$0xff] }
 0x96e   : > { %v9850_v19 = vpop.permute.xlu1 %9849  ;;  %v10621_v17 = vpop.eup %10620  ;;  %v4921_v32 = vmul.f32 %v10619_v54, %v17860_v7  ;;  %v10963_v54 = vld [vmem:[%s11489_s29 + $0x48] sm:$0xff] }
 0x96f   : > { %5751 = vadd.xlane.f32.xlu1 %v15444_v48  ;;  %v9852_v16 = vunpack.i.h.bf16 %v9850_v19  ;;  %v9851_v29 = vunpack.i.l.bf16 %v9850_v19  ;;  %v4922_v18 = vmul.f32 %v10621_v17, %v17859_v53  ;;  %v10623_v14 = vpop.eup %10622  ;;  %v10964_v17 = vld [vmem:[%s11489_s29 + $0x50] sm:$0xff] }
 0x970   : > { %v4923_v15 = vmul.f32 %v10623_v14, %v17861_v21 }
 0x971   : > { %v5420_v27 = vsel %vm1828_vm0, %v4922_v18, %v9852_v16  ;;  %v5419_v44 = vsel %vm1828_vm0, %v4921_v32, %v9851_v29  ;;  %v10965_v29 = vld [vmem:[%s11489_s29 + $0x58] sm:$0xff] }
 0x972   : > { %v9860_v20 = vpop.permute.xlu1 %9859  ;;  %v5421_v62 = vsel %vm1828_vm0, %v4923_v15, %v9856_v43 }
 0x973   : > { %v9862_v31 = vunpack.i.h.bf16 %v9860_v20  ;;  %v9861_v13 = vunpack.i.l.bf16 %v9860_v20  ;;  %5755 = vadd.xlane.f32.xlu1 %v15451_v11 }
 0x975   : > { %v5436_v25 = vsel %vm5189_vm2, %v5420_v27, %v9862_v31  ;;  %v5435_v50 = vsel %vm5189_vm2, %v5419_v44, %v9861_v13  ;;  %v10625_v13 = vpop.eup %10624 }
 0x976   : > { %v9865_v9 = vpop.permute.xlu1 %9864  ;;  %v5451_v41 = vsel %vm5206_vm3, %v5435_v50, %v9871_v8  ;;  %v5452_v22 = vsel %vm5206_vm3, %v5436_v25, %v9872_v51  ;;  %v17866_v50 = vld [vmem:[#allocation48_spill] sm:$0xff] }
 0x977   : > { %v5473_v2 = vpack.c.bf16 %v5452_v22, %v5451_v41  ;;  %v9867_v39 = vunpack.i.h.bf16 %v9865_v9  ;;  %v9866_v4 = vunpack.i.l.bf16 %v9865_v9  ;;  %v17867_v9 = vld [vmem:[#allocation38_spill] sm:$0xff] }
 0x978   : > { %v4926_v41 = vmul.f32 %v10625_v13, %v17867_v9 }
 0x979   : > { %9504 = vmatprep.mubr.bf16.mxu0 %v5473_v2  ;;  %v5437_v52 = vsel %vm5189_vm2, %v5421_v62, %v9866_v4  ;;  %v5438_v47 = vsel %vm5189_vm2, %v5422_v58, %v9867_v39 }
 0x97a   : > { %v9875_v10 = vpop.permute.xlu1 %9874 }
 0x97b   : > { %v9877_v3 = vunpack.i.h.bf16 %v9875_v10  ;;  %v9876_v24 = vunpack.i.l.bf16 %v9875_v10 }
 0x97d   : > { %v5453_v45 = vsel %vm5206_vm3, %v5437_v52, %v9876_v24  ;;  %v5454_v49 = vsel %vm5206_vm3, %v5438_v47, %v9877_v3  ;;  %v17868_v47 = vld [vmem:[#allocation142_spill] sm:$0xff] }
 0x97e   : > { %v5474_v35 = vpack.c.bf16 %v5454_v49, %v5453_v45 }
 0x980   : > { %9505 = vmatmul.mubr.bf16.gmra.mrb[180].mxu0 %v5474_v35 }
 0x990   : > { %v9494_v36 = vpop.f32.mrb[168].mxu0 }
 0x991   : > { %v5616_v0 = vpop.f32.mrb[169].mxu0  ;;  %v5625_v28 = vadd.f32 %v9494_v36, %v15393_v55 }
 0x992   : > { %v5617_v37 = vadd.f32 %v15393_v55, %v5616_v0  ;;  %v9495_v30 = vpop.f32.mrb[170].mxu0 }
 0x993   : > { %v5619_v12 = vpop.f32.mrb[171].mxu0  ;;  %v5628_v59 = vadd.f32 %v9495_v30, %v15393_v55  ;;  %v15482_v16 = vadd.f32 %v10964_v17, %v5625_v28 }
 0x994   : > { %v15473_v40 = vadd.f32 %v10962_v57, %v5617_v37  ;;  %v5620_v63 = vadd.f32 %v15393_v55, %v5619_v12 }
 0x995   : > { %17864 = vst [vmem:[#allocation60_spill] sm:$0xff] %v15482_v16  ;;  %v15486_v33 = vadd.f32 %v10965_v29, %v5628_v59 }
 0x996   : > { %17862 = vst [vmem:[#allocation59_spill] sm:$0xff] %v15473_v40  ;;  %v15478_v19 = vadd.f32 %v10963_v54, %v5620_v63  ;;  %5759 = vadd.xlane.f32.xlu1 %v15473_v40 }
 0x997   : > { %17865 = vst [vmem:[#allocation77_spill] sm:$0xff] %v15486_v33 }
 0x998   : > { %17863 = vst [vmem:[#allocation52_spill] sm:$0xff] %v15478_v19  ;;  %5761 = vadd.xlane.f32.xlu0 %v15478_v19 }
 0x99a   : > { %v3782_v42 = vpop.xlane.xlu0 %3781  ;;  %5763 = vadd.xlane.f32.xlu1 %v15482_v16 }
 0x99b   : > { %10626 = vrcp.f32 %v3782_v42 }
 0x99c   : > { %5765 = vadd.xlane.f32.xlu0 %v15486_v33 }
 0x99e   : > { %v3786_v53 = vpop.xlane.xlu0 %3785 }
 0x9a2   : > { %v3788_v18 = vpop.xlane.xlu0 %3787 }
 0x9a5   : > { %v10627_v8 = vpop.eup %10626 }
 0x9a6   : > { %v9885_v7 = vpop.permute.xlu0 %9884  ;;  %v4929_v14 = vmul.f32 %v10627_v8, %v17866_v50 }
 0x9a7   : > { %v9887_v5 = vunpack.i.h.bf16 %v9885_v7  ;;  %v9886_v39 = vunpack.i.l.bf16 %v9885_v7 }
 0x9a9   : > { %v5426_v29 = vsel %vm1828_vm0, %v15447_v60, %v9887_v5  ;;  %v17869_v5 = vld [vmem:[#allocation37_spill] sm:$0xff] }
 0x9aa   : > { %v9900_v32 = vpop.permute.xlu0 %9899 }
 0x9ab   : > { %v3784_v20 = vpop.xlane.xlu1 %3783  ;;  %v9901_v4 = vunpack.i.l.bf16 %v9900_v32  ;;  %v9902_v58 = vunpack.i.h.bf16 %v9900_v32  ;;  %v5425_v32 = vsel %vm1828_vm0, %v15434_v38, %v9886_v39 }
 0x9ac   : > { %10628 = vrcp.f32 %v3784_v20 }
 0x9ad   : > { %10630 = vrcp.f32 %v3786_v53 }
 0x9ae   : > { %v9910_v31 = vpop.permute.xlu0 %9909  ;;  %10632 = vrcp.f32 %v3788_v18 }
 0x9af   : > { %v9880_v51 = vpop.permute.xlu1 %9879  ;;  %v9911_v23 = vunpack.i.l.bf16 %v9910_v31  ;;  %v9912_v49 = vunpack.i.h.bf16 %v9910_v31 }
 0x9b0   : > { %v9882_v27 = vunpack.i.h.bf16 %v9880_v51  ;;  %v9881_v44 = vunpack.i.l.bf16 %v9880_v51 }
 0x9b1   : > { %v5427_v37 = vsel %vm1828_vm0, %v4929_v14, %v9911_v23 }
 0x9b2   : > { %v9920_v25 = vpop.permute.xlu0 %9919  ;;  %v5424_v21 = vsel %vm1828_vm0, %v4926_v41, %v9882_v27  ;;  %v5423_v15 = vsel %vm1828_vm0, %v15423_v6, %v9881_v44 }
 0x9b3   : > { %v9890_v22 = vpop.permute.xlu1 %9889  ;;  %v9921_v62 = vunpack.i.l.bf16 %v9920_v25  ;;  %v9922_v30 = vunpack.i.h.bf16 %v9920_v25 }
 0x9b4   : > { %v9892_v43 = vunpack.i.h.bf16 %v9890_v22  ;;  %v9891_v2 = vunpack.i.l.bf16 %v9890_v22 }
 0x9b5   : > { %v5443_v54 = vsel %vm5189_vm2, %v5427_v37, %v9921_v62 }
 0x9b6   : > { %v10629_v10 = vpop.eup %10628  ;;  %v5440_v3 = vsel %vm5189_vm2, %v5424_v21, %v9892_v43  ;;  %v5439_v24 = vsel %vm5189_vm2, %v5423_v15, %v9891_v2  ;;  %v9930_v52 = vpop.permute.xlu0 %9929  ;;  %v17870_v43 = vld [vmem:[#allocation50_spill] sm:$0xff] }
 0x9b7   : > { %v4930_v45 = vmul.f32 %v10629_v10, %v17868_v47  ;;  %v9931_v35 = vunpack.i.l.bf16 %v9930_v52  ;;  %v9895_v36 = vpop.permute.xlu1 %9894  ;;  %v5455_v0 = vsel %vm5206_vm3, %v5439_v24, %v9901_v4  ;;  %v9932_v12 = vunpack.i.h.bf16 %v9930_v52  ;;  %v10631_v7 = vpop.eup %10630 }
 0x9b8   : > { %v5456_v6 = vsel %vm5206_vm3, %v5440_v3, %v9902_v58  ;;  %v9897_v57 = vunpack.i.h.bf16 %v9895_v36  ;;  %v9896_v63 = vunpack.i.l.bf16 %v9895_v36  ;;  %v10633_v51 = vpop.eup %10632  ;;  %v4931_v23 = vmul.f32 %v10631_v7, %v17869_v5  ;;  %v10973_v5 = vld [vmem:[%s11489_s29 + $0x98] sm:$0xff] }
 0x9b9   : > { %v5428_v28 = vsel %vm1828_vm0, %v4930_v45, %v9912_v49  ;;  %v5475_v59 = vpack.c.bf16 %v5456_v6, %v5455_v0  ;;  %v5459_v53 = vsel %vm5206_vm3, %v5443_v54, %v9931_v35  ;;  %v4932_v2 = vmul.f32 %v10633_v51, %v17870_v43 }
 0x9ba   : > { %v5444_v17 = vsel %vm5189_vm2, %v5428_v28, %v9922_v30  ;;  %v5441_v8 = vsel %vm5189_vm2, %v5425_v32, %v9896_v63  ;;  %v5442_v27 = vsel %vm5189_vm2, %v5426_v29, %v9897_v57  ;;  %v17871_v47 = vmov 0   ;;  %v10966_v30 = vld [vmem:[%s11489_s29 + $0x60] sm:$0xff]  ;;  %v10967_v57 = vld [vmem:[%s11489_s29 + $0x68] sm:$0xff] }
 0x9bb   : > { %9508 = vmatprep.mubr.bf16.mxu0 %v5475_v59  ;;  %v9905_v42 = vpop.permute.xlu1 %9904  ;;  %v5460_v18 = vsel %vm5206_vm3, %v5444_v17, %v9932_v12  ;;  %v10968_v59 = vld [vmem:[%s11489_s29 + $0x70] sm:$0xff]  ;;  %v10969_v17 = vld [vmem:[%s11489_s29 + $0x78] sm:$0xff] }
 0x9bc   : > { %v9907_v20 = vunpack.i.h.bf16 %v9905_v42  ;;  %v9906_v31 = vunpack.i.l.bf16 %v9905_v42  ;;  %v5477_v13 = vpack.c.bf16 %v5460_v18, %v5459_v53 }
 0x9be   : > { %v5457_v60 = vsel %vm5206_vm3, %v5441_v8, %v9906_v31  ;;  %v5458_v44 = vsel %vm5206_vm3, %v5442_v27, %v9907_v20  ;;  %v10970_v8 = vld [vmem:[%s11489_s29 + $0x80] sm:$0xff] }
 0x9bf   : > { %v9915_v25 = vpop.permute.xlu1 %9914  ;;  %v5476_v50 = vpack.c.bf16 %v5458_v44, %v5457_v60 }
 0x9c0   : > { %v9917_v9 = vunpack.i.h.bf16 %v9915_v25  ;;  %v9916_v41 = vunpack.i.l.bf16 %v9915_v25 }
 0x9c1   : > { %9509 = vmatmul.mubr.bf16.gmra.mrb[184].mxu0 %v5476_v50  ;;  %v10971_v50 = vld [vmem:[%s11489_s29 + $0x88] sm:$0xff] }
 0x9c2   : > { %9512 = vmatprep.mubr.bf16.mxu0 %v5477_v13  ;;  %v5429_v4 = vsel %vm1828_vm0, %v4931_v23, %v9916_v41  ;;  %v5430_v21 = vsel %vm1828_vm0, %v4932_v2, %v9917_v9  ;;  %v10972_v41 = vld [vmem:[%s11489_s29 + $0x90] sm:$0xff] }
 0x9c3   : > { %v9925_v14 = vpop.permute.xlu1 %9924 }
 0x9c4   : > { %v9927_v38 = vunpack.i.h.bf16 %v9925_v14  ;;  %v9926_v22 = vunpack.i.l.bf16 %v9925_v14 }
 0x9c6   : > { %v5445_v58 = vsel %vm5189_vm2, %v5429_v4, %v9926_v22  ;;  %v5446_v62 = vsel %vm5189_vm2, %v5430_v21, %v9927_v38  ;;  %v9983_v4 = vld [vmem:[#allocation8 + $0xc] ss:$16 sps:$4 sm:$0xff]   ;;  %v9978_v21 = vld [vmem:[#allocation8] ss:$16 sps:$4 sm:$0xff]  }
 0x9c7   : > { %v9935_v39 = vpop.permute.xlu1 %9934  ;;  %6518 = vmatprep.subr.bf16.mxu0 %v9983_v4 }
 0x9c8   : > { %v9937_v15 = vunpack.i.h.bf16 %v9935_v39  ;;  %v9936_v10 = vunpack.i.l.bf16 %v9935_v39  ;;  %v9980_v39 = vld [vmem:[#allocation8 + $0x4] ss:$16 sps:$4 sm:$0xff]  }
 0x9c9   : > { %6325 = vmatprep.subr.bf16.mxu1 %v9980_v39 }
 0x9ca   : > { %v5461_v3 = vsel %vm5206_vm3, %v5445_v58, %v9936_v10  ;;  %v5462_v24 = vsel %vm5206_vm3, %v5446_v62, %v9937_v15  ;;  %v9981_v15 = vld [vmem:[#allocation8 + $0x8] ss:$16 sps:$4 sm:$0xff]   ;;  %6326 = vmatpush1.bf16.msra.mxu1 %v9978_v21  ;;  %v9986_v10 = vld [vmem:[#allocation8 + $0x24] ss:$16 sps:$4 sm:$0xff]   ;;  %v9989_v58 = vld [vmem:[#allocation8 + $0x2c] ss:$16 sps:$4 sm:$0xff]  }
 0x9cb   : > { %v5478_v52 = vpack.c.bf16 %v5462_v24, %v5461_v3  ;;  %6519 = vmatpush1.bf16.msra.mxu0 %v9981_v15  ;;  %v9984_v62 = vld [vmem:[#allocation8 + $0x20] ss:$16 sps:$4 sm:$0xff]   ;;  %v9987_v3 = vld [vmem:[#allocation8 + $0x28] ss:$16 sps:$4 sm:$0xff]   ;;  %6327 = vmatprep.subr.bf16.mxu1 %v9986_v10  ;;  %v9992_v24 = vld [vmem:[#allocation8 + $0x44] ss:$16 sps:$4 sm:$0xff]  }
 0x9cc   : > { %6520 = vmatprep.subr.bf16.mxu0 %v9989_v58  ;;  %v10974_v21 = vld [vmem:[%s11489_s29 + $0xa0] sm:$0xff] }
 0x9cd   : > { %9513 = vmatmul.mubr.bf16.gmra.mrb[188].mxu0 %v5478_v52  ;;  %v9995_v52 = vld [vmem:[#allocation8 + $0x4c] ss:$16 sps:$4 sm:$0xff]  }
 0x9ce   : > { %6550 = vmatprep.mubr.bf16.mxu0 %v17871_v47  ;;  %6328 = vmatpush1.bf16.msra.mxu1 %v9984_v62 }
 0x9cf   : > { %6521 = vmatpush1.bf16.msra.mxu0 %v9987_v3  ;;  %6329 = vmatprep.subr.bf16.mxu1 %v9992_v24  ;;  %v10975_v3 = vld [vmem:[%s11489_s29 + $0xa8] sm:$0xff] }
 0x9d0   : > { %6522 = vmatprep.subr.bf16.mxu0 %v9995_v52 }
 0x9d1   : > { %v9498_v45 = vpop.f32.mrb[172].mxu0 }
 0x9d2   : > { %v5632_v49 = vpop.f32.mrb[173].mxu0  ;;  %v5641_v37 = vadd.f32 %v9498_v45, %v15393_v55  ;;  %v9990_v45 = vld [vmem:[#allocation8 + $0x40] ss:$16 sps:$4 sm:$0xff]  }
 0x9d3   : > { %v5633_v35 = vadd.f32 %v15393_v55, %v5632_v49  ;;  %v9499_v36 = vpop.f32.mrb[174].mxu0  ;;  %v9993_v49 = vld [vmem:[#allocation8 + $0x48] ss:$16 sps:$4 sm:$0xff]   ;;  %6330 = vmatpush1.bf16.msra.mxu1 %v9990_v45 }
 0x9d4   : > { %v5635_v0 = vpop.f32.mrb[175].mxu0  ;;  %v5644_v28 = vadd.f32 %v9499_v36, %v15393_v55  ;;  %v15536_v54 = vadd.f32 %v10968_v59, %v5641_v37  ;;  %6523 = vmatpush1.bf16.msra.mxu0 %v9993_v49  ;;  %v10001_v36 = vld [vmem:[#allocation8 + $0x6c] ss:$16 sps:$4 sm:$0xff]   ;;  %v9999_v37 = vld [vmem:[#allocation8 + $0x68] ss:$16 sps:$4 sm:$0xff]  }
 0x9d5   : > { %v15527_v12 = vadd.f32 %v10966_v30, %v5633_v35  ;;  %v5636_v6 = vadd.f32 %v15393_v55, %v5635_v0  ;;  %v9998_v35 = vld [vmem:[#allocation8 + $0x64] ss:$16 sps:$4 sm:$0xff]   ;;  %v9996_v0 = vld [vmem:[#allocation8 + $0x60] ss:$16 sps:$4 sm:$0xff]   ;;  %6524 = vmatprep.subr.bf16.mxu0 %v10001_v36 }
 0x9d6   : > { %17874 = vst [vmem:[#allocation46_spill] sm:$0xff] %v15536_v54  ;;  %v15540_v29 = vadd.f32 %v10969_v17, %v5644_v28  ;;  %6331 = vmatprep.subr.bf16.mxu1 %v9998_v35  ;;  %v10004_v30 = vld [vmem:[#allocation8 + $0x84] ss:$16 sps:$4 sm:$0xff]   ;;  %v10002_v28 = vld [vmem:[#allocation8 + $0x80] ss:$16 sps:$4 sm:$0xff]  }
 0x9d7   : > { %17872 = vst [vmem:[#allocation89_spill] sm:$0xff] %v15527_v12  ;;  %v15532_v63 = vadd.f32 %v10967_v57, %v5636_v6  ;;  %5767 = vadd.xlane.f32.xlu1 %v15527_v12  ;;  %6332 = vmatpush1.bf16.msra.mxu1 %v9996_v0  ;;  %v10007_v6 = vld [vmem:[#allocation8 + $0x8c] ss:$16 sps:$4 sm:$0xff]   ;;  %v10005_v57 = vld [vmem:[#allocation8 + $0x88] ss:$16 sps:$4 sm:$0xff]  }
 0x9d8   : > { %17875 = vst [vmem:[#allocation68_spill] sm:$0xff] %v15540_v29  ;;  %6525 = vmatpush1.bf16.msra.mxu0 %v9999_v37  ;;  %6333 = vmatprep.subr.bf16.mxu1 %v10004_v30  ;;  %v10010_v59 = vld [vmem:[#allocation8 + $0xa4] ss:$16 sps:$4 sm:$0xff]   ;;  %v10013_v17 = vld [vmem:[#allocation8 + $0xac] ss:$16 sps:$4 sm:$0xff]  }
 0x9d9   : > { %17873 = vst [vmem:[#allocation21_spill] sm:$0xff] %v15532_v63  ;;  %5769 = vadd.xlane.f32.xlu0 %v15532_v63  ;;  %6526 = vmatprep.subr.bf16.mxu0 %v10007_v6  ;;  %v10976_v6 = vld [vmem:[%s11489_s29 + $0xb0] sm:$0xff] }
 0x9db   : > { %5771 = vadd.xlane.f32.xlu1 %v15536_v54  ;;  %6334 = vmatpush1.bf16.msra.mxu1 %v10002_v28 }
 0x9dc   : > { %6527 = vmatpush1.bf16.msra.mxu0 %v10005_v57  ;;  %6335 = vmatprep.subr.bf16.mxu1 %v10010_v59  ;;  %v10977_v59 = vld [vmem:[%s11489_s29 + $0xb8] sm:$0xff] }
 0x9dd   : > { %5773 = vadd.xlane.f32.xlu0 %v15540_v29  ;;  %6528 = vmatprep.subr.bf16.mxu0 %v10013_v17 }
 0x9e7   : > { %v5744_v53 = vpop.xlane.xlu0 %5743 }
 0x9e8   : > { %v5807_v13 = vmul.f32 0.0078125, %v5744_v53  ;;  %v10011_v53 = vld [vmem:[#allocation8 + $0xa8] ss:$16 sps:$4 sm:$0xff]  }
 0x9e9   : > { %6529 = vmatpush1.bf16.msra.mxu0 %v10011_v53 }
 0x9ea   : > { %v15556_v9 = vsub.f32 %v15400_v34, %v5807_v13  ;;  %v10022_v13 = vld [vmem:[#allocation8 + $0xe4] ss:$16 sps:$4 sm:$0xff]  }
 0x9ec   : > { %v5871_v43 = vmul.f32 %v15556_v9, %v15556_v9 }
 0x9f8   : > { %v5746_v20 = vpop.xlane.xlu1 %5745 }
 0x9f9   : > { %v5808_v44 = vmul.f32 0.0078125, %v5746_v20  ;;  %v10017_v20 = vld [vmem:[#allocation8 + $0xc8] ss:$16 sps:$4 sm:$0xff]  }
 0x9fb   : > { %v15563_v22 = vsub.f32 %v15430_v61, %v5808_v44 }
 0x9fc   : > { %v5752_v58 = vpop.xlane.xlu1 %5751 }
 0x9fd   : > { %v5872_v2 = vmul.f32 %v15563_v22, %v15563_v22  ;;  %v5811_v45 = vmul.f32 0.0078125, %v5752_v58 }
 0x9ff   : > { %v15597_v30 = vsub.f32 %v15444_v48, %v5811_v45 }
 0xa12   : > { %v9502_v42 = vpop.f32.mrb[176].mxu0 }
 0xa13   : > { %v5648_v18 = vpop.f32.mrb[177].mxu0  ;;  %v5657_v51 = vadd.f32 %v9502_v42, %v15393_v55  ;;  %v10008_v42 = vld [vmem:[#allocation8 + $0xa0] ss:$16 sps:$4 sm:$0xff]  }
 0xa14   : > { %v5649_v7 = vadd.f32 %v15393_v55, %v5648_v18  ;;  %v9503_v32 = vpop.f32.mrb[178].mxu0  ;;  %6336 = vmatpush1.bf16.msra.mxu1 %v10008_v42  ;;  %v10016_v18 = vld [vmem:[#allocation8 + $0xc4] ss:$16 sps:$4 sm:$0xff]   ;;  %v5875_v42 = vmul.f32 %v15597_v30, %v15597_v30 }
 0xa15   : > { %v5651_v31 = vpop.f32.mrb[179].mxu0  ;;  %v5660_v25 = vadd.f32 %v9503_v32, %v15393_v55  ;;  %v15559_v38 = vadd.f32 %v10972_v41, %v5657_v51  ;;  %v10014_v32 = vld [vmem:[#allocation8 + $0xc0] ss:$16 sps:$4 sm:$0xff]   ;;  %6337 = vmatprep.subr.bf16.mxu1 %v10016_v18  ;;  %v10023_v51 = vld [vmem:[#allocation8 + $0xe8] ss:$16 sps:$4 sm:$0xff]   ;;  %v5756_v18 = vpop.xlane.xlu1 %5755 }
 0xa16   : > { %v15547_v27 = vadd.f32 %v10970_v8, %v5649_v7  ;;  %v5652_v60 = vadd.f32 %v15393_v55, %v5651_v31  ;;  %v10019_v7 = vld [vmem:[#allocation8 + $0xcc] ss:$16 sps:$4 sm:$0xff]   ;;  %v10020_v31 = vld [vmem:[#allocation8 + $0xe0] ss:$16 sps:$4 sm:$0xff]  }
 0xa17   : > { %17878 = vst [vmem:[#allocation163_spill] sm:$0xff] %v15559_v38  ;;  %v15566_v23 = vadd.f32 %v10973_v5, %v5660_v25  ;;  %6530 = vmatprep.subr.bf16.mxu0 %v10019_v7  ;;  %v10025_v8 = vld [vmem:[#allocation8 + $0xec] ss:$16 sps:$4 sm:$0xff]  }
 0xa18   : > { %17876 = vst [vmem:[#allocation45_spill] sm:$0xff] %v15547_v27  ;;  %v15552_v14 = vadd.f32 %v10971_v50, %v5652_v60  ;;  %5775 = vadd.xlane.f32.xlu1 %v15547_v27  ;;  %6338 = vmatpush1.bf16.msra.mxu1 %v10014_v32  ;;  %v5748_v60 = vpop.xlane.xlu0 %5747 }
 0xa19   : > { %17879 = vst [vmem:[#allocation148_spill] sm:$0xff] %v15566_v23  ;;  %6531 = vmatpush1.bf16.msra.mxu0 %v10017_v20  ;;  %6339 = vmatprep.subr.bf16.mxu1 %v10022_v13  ;;  %v5809_v25 = vmul.f32 0.0078125, %v5748_v60 }
 0xa1a   : > { %17877 = vst [vmem:[#allocation111_spill] sm:$0xff] %v15552_v14  ;;  %5777 = vadd.xlane.f32.xlu0 %v15552_v14  ;;  %6532 = vmatprep.subr.bf16.mxu0 %v10025_v8 }
 0xa1b   : > { %v15576_v4 = vsub.f32 %v15404_v26, %v5809_v25 }
 0xa1c   : > { %5779 = vadd.xlane.f32.xlu1 %v15559_v38  ;;  %6340 = vmatpush1.bf16.msra.mxu1 %v10020_v31  ;;  %v5750_v44 = vpop.xlane.xlu0 %5749  ;;  %v5813_v31 = vmul.f32 0.0078125, %v5756_v18 }
 0xa1d   : > { %6533 = vmatpush1.bf16.msra.mxu0 %v10023_v51  ;;  %v5810_v5 = vmul.f32 0.0078125, %v5750_v44  ;;  %v5873_v35 = vmul.f32 %v15576_v4, %v15576_v4 }
 0xa1e   : > { %5781 = vadd.xlane.f32.xlu0 %v15566_v23 }
 0xa1f   : > { %v15583_v62 = vsub.f32 %v15410_v46, %v5810_v5  ;;  %v10978_v5 = vld [vmem:[%s11489_s29 + $0xc0] sm:$0xff] }
 0xa20   : > { %5903 = vadd.xlane.f32.xlu1 %v5871_v43  ;;  %v5754_v52 = vpop.xlane.xlu0 %5753 }
 0xa21   : > { %v5812_v36 = vmul.f32 0.0078125, %v5754_v52  ;;  %v5874_v37 = vmul.f32 %v15583_v62, %v15583_v62 }
 0xa22   : > { %5905 = vadd.xlane.f32.xlu0 %v5872_v2 }
 0xa23   : > { %v15603_v57 = vsub.f32 %v15417_v56, %v5812_v36  ;;  %v5760_v32 = vpop.xlane.xlu1 %5759 }
 0xa24   : > { %v5758_v7 = vpop.xlane.xlu0 %5757  ;;  %v5815_v52 = vmul.f32 0.0078125, %v5760_v32 }
 0xa25   : > { %v5876_v53 = vmul.f32 %v15603_v57, %v15603_v57  ;;  %v5814_v8 = vmul.f32 0.0078125, %v5758_v7 }
 0xa27   : > { %v5764_v25 = vpop.xlane.xlu1 %5763 }
 0xa28   : > { %v5762_v20 = vpop.xlane.xlu0 %5761 }
 0xa29   : > { %v5816_v36 = vmul.f32 0.0078125, %v5762_v20  ;;  %v10981_v20 = vld [vmem:[%s11489_s29 + $0xd8] sm:$0xff] }
 0xa2b   : > { %v15643_v32 = vsub.f32 %v15478_v19, %v5816_v36 }
 0xa53   : > { %v9506_v50 = vpop.f32.mrb[180].mxu0 }
 0xa54   : > { %v5664_v41 = vpop.f32.mrb[181].mxu0  ;;  %v5673_v49 = vadd.f32 %v9506_v50, %v15393_v55 }
 0xa55   : > { %v5665_v43 = vadd.f32 %v15393_v55, %v5664_v41  ;;  %v9507_v2 = vpop.f32.mrb[182].mxu0  ;;  %v15616_v41 = vsub.f32 %v15451_v11, %v5813_v31 }
 0xa56   : > { %v5667_v39 = vpop.f32.mrb[183].mxu0  ;;  %v5676_v0 = vadd.f32 %v9507_v2, %v15393_v55  ;;  %v15600_v28 = vadd.f32 %v10976_v6, %v5673_v49  ;;  %v15637_v6 = vsub.f32 %v15473_v40, %v5815_v52  ;;  %v5880_v52 = vmul.f32 %v15643_v32, %v15643_v32 }
 0xa57   : > { %v15579_v15 = vadd.f32 %v10974_v21, %v5665_v43  ;;  %v5668_v10 = vadd.f32 %v15393_v55, %v5667_v39  ;;  %v5766_v39 = vpop.xlane.xlu0 %5765  ;;  %v15623_v21 = vsub.f32 %v15427_v1, %v5814_v8  ;;  %v5877_v49 = vmul.f32 %v15616_v41, %v15616_v41 }
 0xa58   : > { %17882 = vst [vmem:[#allocation149_spill] sm:$0xff] %v15600_v28  ;;  %v15606_v17 = vadd.f32 %v10977_v59, %v5676_v0  ;;  %v10980_v59 = vld [vmem:[%s11489_s29 + $0xd0] sm:$0xff] }
 0xa59   : > { %17880 = vst [vmem:[#allocation150_spill] sm:$0xff] %v15579_v15  ;;  %v15586_v24 = vadd.f32 %v10975_v3, %v5668_v10  ;;  %5783 = vadd.xlane.f32.xlu1 %v15579_v15  ;;  %v10979_v10 = vld [vmem:[%s11489_s29 + $0xc8] sm:$0xff] }
 0xa5a   : > { %17883 = vst [vmem:[#allocation144_spill] sm:$0xff] %v15606_v17 }
 0xa5b   : > { %17881 = vst [vmem:[#allocation147_spill] sm:$0xff] %v15586_v24  ;;  %5785 = vadd.xlane.f32.xlu0 %v15586_v24 }
 0xa5d   : > { %5907 = vadd.xlane.f32.xlu1 %v5873_v35 }
 0xa5f   : > { %5909 = vadd.xlane.f32.xlu0 %v5874_v37  ;;  %v5878_v37 = vmul.f32 %v15623_v21, %v15623_v21 }
 0xa61   : > { %5787 = vadd.xlane.f32.xlu1 %v15600_v28 }
 0xa63   : > { %5789 = vadd.xlane.f32.xlu0 %v15606_v17 }
 0xa64   : > { %v5768_v3 = vpop.xlane.xlu1 %5767 }
 0xa65   : > { %5911 = vadd.xlane.f32.xlu1 %v5875_v42 }
 0xa66   : > { %v5770_v35 = vpop.xlane.xlu0 %5769 }
 0xa67   : > { %5913 = vadd.xlane.f32.xlu0 %v5876_v53 }
 0xa68   : > { %v5772_v18 = vpop.xlane.xlu1 %5771 }
 0xa94   : > { %v9510_v13 = vpop.f32.mrb[184].mxu0 }
 0xa95   : > { %v5680_v51 = vpop.f32.mrb[185].mxu0  ;;  %v5689_v45 = vadd.f32 %v9510_v13, %v15393_v55 }
 0xa96   : > { %v5681_v60 = vadd.f32 %v15393_v55, %v5680_v51  ;;  %v9511_v44 = vpop.f32.mrb[186].mxu0  ;;  %v5774_v51 = vpop.xlane.xlu0 %5773 }
 0xa97   : > { %v5683_v50 = vpop.f32.mrb[187].mxu0  ;;  %v5692_v0 = vadd.f32 %v9511_v44, %v15393_v55  ;;  %v15640_v42 = vadd.f32 %v10980_v59, %v5689_v45  ;;  %v10983_v59 = vld [vmem:[%s11489_s29 + $0xe8] sm:$0xff] }
 0xa98   : > { %v15619_v43 = vadd.f32 %v10978_v5, %v5681_v60  ;;  %v5684_v2 = vadd.f32 %v15393_v55, %v5683_v50  ;;  %v5817_v60 = vmul.f32 0.0078125, %v5764_v25  ;;  %v5879_v50 = vmul.f32 %v15637_v6, %v15637_v6  ;;  %v10982_v25 = vld [vmem:[%s11489_s29 + $0xe0] sm:$0xff] }
 0xa99   : > { %17886 = vst [vmem:[#allocation145_spill] sm:$0xff] %v15640_v42  ;;  %v15646_v31 = vadd.f32 %v10981_v20, %v5692_v0 }
 0xa9a   : > { %17884 = vst [vmem:[#allocation146_spill] sm:$0xff] %v15619_v43  ;;  %v15626_v58 = vadd.f32 %v10979_v10, %v5684_v2  ;;  %5791 = vadd.xlane.f32.xlu1 %v15619_v43  ;;  %v5818_v2 = vmul.f32 0.0078125, %v5766_v39 }
 0xa9b   : > { %17887 = vst [vmem:[#allocation104_spill] sm:$0xff] %v15646_v31 }
 0xa9c   : > { %17885 = vst [vmem:[#allocation87_spill] sm:$0xff] %v15626_v58  ;;  %5793 = vadd.xlane.f32.xlu0 %v15626_v58 }
 0xa9e   : > { %5915 = vadd.xlane.f32.xlu1 %v5877_v49  ;;  %v15657_v49 = vsub.f32 %v15482_v16, %v5817_v60 }
 0xaa0   : > { %v9514_v53 = vpop.f32.mrb[188].mxu0  ;;  %5917 = vadd.xlane.f32.xlu0 %v5878_v37  ;;  %v15663_v37 = vsub.f32 %v15486_v33, %v5818_v2  ;;  %v5881_v60 = vmul.f32 %v15657_v49, %v15657_v49 }
 0xaa1   : > { %v5696_v7 = vpop.f32.mrb[189].mxu0 }
 0xaa2   : > { %v9515_v13 = vpop.f32.mrb[190].mxu0  ;;  %5795 = vadd.xlane.f32.xlu1 %v15640_v42  ;;  %v5697_v44 = vadd.f32 %v15393_v55, %v5696_v7  ;;  %v5819_v7 = vmul.f32 0.0078125, %v5768_v3 }
 0xaa3   : > { %v5699_v8 = vpop.f32.mrb[191].mxu0  ;;  %v5708_v2 = vadd.f32 %v9515_v13, %v15393_v55  ;;  %v10985_v13 = vld [vmem:[%s11489_s29 + $0xf8] sm:$0xff] }
 0xaa4   : > { %5797 = vadd.xlane.f32.xlu0 %v15646_v31  ;;  %v5700_v10 = vadd.f32 %v15393_v55, %v5699_v8  ;;  %v15660_v36 = vadd.f32 %v10982_v25, %v5697_v44  ;;  %v5705_v8 = vadd.f32 %v9514_v53, %v15393_v55  ;;  %v5820_v44 = vmul.f32 0.0078125, %v5770_v35 }
 0xaa5   : > { %v5776_v5 = vpop.xlane.xlu1 %5775  ;;  %v15677_v3 = vsub.f32 %v15527_v12, %v5819_v7  ;;  %v5821_v53 = vmul.f32 0.0078125, %v5772_v18  ;;  %v5822_v55 = vmul.f32 0.0078125, %v5774_v51 }
 0xaa6   : > { %5919 = vadd.xlane.f32.xlu1 %v5879_v50  ;;  %17888 = vst [vmem:[#allocation107_spill] sm:$0xff] %v15660_v36  ;;  %v15666_v39 = vadd.f32 %v10983_v59, %v5700_v10  ;;  %v5882_v10 = vmul.f32 %v15663_v37, %v15663_v37  ;;  %v10984_v59 = vld [vmem:[%s11489_s29 + $0xf0] sm:$0xff]  ;;  %v15683_v35 = vsub.f32 %v15532_v63, %v5820_v44  ;;  %v5823_v18 = vmul.f32 0.0078125, %v5776_v5  ;;  %s8079_s29 = sshll.u32 %s16637_s30, 4  ;;  %s16746_s29 = int_to_ptr.vmem [resolvable:$true] %s8079_s29 }
 0xaa7   : > { %v5778_v45 = vpop.xlane.xlu0 %5777  ;;  %v15680_v33 = vadd.f32 %v10984_v59, %v5705_v8  ;;  %v15690_v7 = vsub.f32 %v15536_v54, %v5821_v53  ;;  %v5883_v8 = vmul.f32 %v15677_v3, %v15677_v3  ;;  %v15696_v44 = vsub.f32 %v15540_v29, %v5822_v55  ;;  %s11128_s13 = scalar_lea.vmem %s16746_s29, 4096  ;;  %p11135_p12 = scmp.lt.s32.totalorder %s16746_s29, %s11133_s1 }
 0xaa8   : > { %5921 = vadd.xlane.f32.xlu0 %v5880_v52  ;;  %17889 = vst [vmem:[#allocation65_spill] sm:$0xff] %v15666_v39  ;;  %v5824_v51 = vmul.f32 0.0078125, %v5778_v45  ;;  %p11129_p3 = scmp.ne.s32.totalorder %s16746_s29, %s11128_s13  ;;  %p11136_p2 = scmp.lt.s32.totalorder %s11134_s24, %s11128_s13 }
 0xaa9   : > { %v5780_v0 = vpop.xlane.xlu1 %5779  ;;  %17890 = vst [vmem:[#allocation115_spill] sm:$0xff] %v15680_v33  ;;  %v5885_v5 = vmul.f32 %v15690_v7, %v15690_v7  ;;  %v5886_v45 = vmul.f32 %v15696_v44, %v15696_v44 }
 0xaaa   : > { %5799 = vadd.xlane.f32.xlu1 %v15660_v36  ;;  %p11130_p5 = pnand %p11129_p3, %p11431_p10  ;;  %p11137_p1 = por %p11136_p2, %p11135_p12 }
 0xaab   : > { %v5782_v20 = vpop.xlane.xlu0 %5781 }
 0xaac   : > { %5801 = vadd.xlane.f32.xlu0 %v15666_v39  ;;  %p11131_p7 = pneg %p11130_p5 }
 0xaad   : > { %v5904_v50 = vpop.xlane.xlu1 %5903 }
 0xaae   : > { %v5967_v52 = vmul.f32 0.0078125, %v5904_v50  ;;  %5923 = vadd.xlane.f32.xlu1 %v5881_v60  ;;  %v15686_v60 = vadd.f32 %v10985_v13, %v5708_v2  ;;  %v5825_v2 = vmul.f32 0.0078125, %v5780_v0  ;;  %p11138_p13 = pnand %p11137_p1, %p11131_p7 }
 0xaaf   : > { %v5906_v25 = vpop.xlane.xlu0 %5905 }
 0xab0   : > { %v5999_v16 = vadd.f32 1e-05, %v5967_v52  ;;  %v5968_v19 = vmul.f32 0.0078125, %v5906_v25  ;;  %5925 = vadd.xlane.f32.xlu0 %v5882_v10  ;;  %17891 = vst [vmem:[#allocation152_spill] sm:$0xff] %v15686_v60  ;;  %v15706_v52 = vsub.f32 %v15552_v14, %v5824_v51  ;;  %v5826_v10 = vmul.f32 0.0078125, %v5782_v20 }
 0xab1   : > { %v15711_v53 = vsub.f32 %v15559_v38, %v5825_v2 }
 0xab2   : > { %10634 = vrsqrt.f32 %v5999_v16  ;;  %v6000_v50 = vadd.f32 1e-05, %v5968_v19  ;;  %5803 = vadd.xlane.f32.xlu1 %v15680_v33  ;;  %v5884_v19 = vmul.f32 %v15683_v35, %v15683_v35  ;;  %v15701_v16 = vsub.f32 %v15547_v27, %v5823_v18 }
 0xab3   : > { %v15716_v55 = vsub.f32 %v15566_v23, %v5826_v10  ;;  %v5888_v20 = vmul.f32 %v15706_v52, %v15706_v52  ;;  %v5889_v18 = vmul.f32 %v15711_v53, %v15711_v53 }
 0xab4   : > { %10636 = vrsqrt.f32 %v6000_v50  ;;  %5805 = vadd.xlane.f32.xlu0 %v15686_v60  ;;  %v5887_v0 = vmul.f32 %v15701_v16, %v15701_v16 }
 0xab5   : > { %v5890_v51 = vmul.f32 %v15716_v55, %v15716_v55 }
 0xab6   : > { %5927 = vadd.xlane.f32.xlu1 %v5883_v8 }
 0xab8   : > { %5929 = vadd.xlane.f32.xlu0 %v5884_v19 }
 0xaba   : > { %5931 = vadd.xlane.f32.xlu1 %v5885_v5 }
 0xabc   : > { %v10635_v25 = vpop.eup %10634  ;;  %5933 = vadd.xlane.f32.xlu0 %v5886_v45 }
 0xabd   : > { %v6063_v13 = vmul.f32 %v10635_v25, %v15556_v9 }
 0xabe   : > { %v10637_v59 = vpop.eup %10636  ;;  %5935 = vadd.xlane.f32.xlu1 %v5887_v0 }
 0xabf   : > { %v6064_v50 = vmul.f32 %v10637_v59, %v15563_v22 }
 0xac0   : > { %5937 = vadd.xlane.f32.xlu0 %v5888_v20 }
 0xac1   : > { %v6095_v8 = vpack.c.bf16 %v6064_v50, %v6063_v13 }
 0xac2   : > { %5939 = vadd.xlane.f32.xlu1 %v5889_v18 }
 0xac3   : > { %6358 = vmatmul.mubr.bf16.vlgmr.msra.gmra.mrb[192].mxu1 %v6095_v8  ;;  %6551 = vmatmul.mubr.bf16.vlgmr.msra.gmra.mrb[192].mxu0 %v6095_v8 }
 0xac4   : > { %5941 = vadd.xlane.f32.xlu0 %v5890_v51  ;;  %6367 = vmatprep.mubr.bf16.mxu1 %v17871_v47 }
 0xac5   : > { %6560 = vmatprep.mubr.bf16.mxu0 %v17871_v47 }
 0xae6   : > { %v5784_v19 = vpop.xlane.xlu1 %5783 }
 0xae7   : > { %v5827_v9 = vmul.f32 0.0078125, %v5784_v19 }
 0xae8   : > { %v5786_v2 = vpop.xlane.xlu0 %5785 }
 0xae9   : > { %v15729_v22 = vsub.f32 %v15579_v15, %v5827_v9  ;;  %v5828_v5 = vmul.f32 0.0078125, %v5786_v2 }
 0xaea   : > { %v5908_v10 = vpop.xlane.xlu1 %5907 }
 0xaeb   : > { %v15732_v45 = vsub.f32 %v15586_v24, %v5828_v5  ;;  %v5969_v25 = vmul.f32 0.0078125, %v5908_v10  ;;  %v5891_v0 = vmul.f32 %v15729_v22, %v15729_v22 }
 0xaec   : > { %v5910_v59 = vpop.xlane.xlu0 %5909 }
 0xaed   : > { %v6001_v20 = vadd.f32 1e-05, %v5969_v25  ;;  %v5970_v13 = vmul.f32 0.0078125, %v5910_v59  ;;  %5943 = vadd.xlane.f32.xlu1 %v5891_v0  ;;  %v5892_v50 = vmul.f32 %v15732_v45, %v15732_v45 }
 0xaee   : > { %v5788_v18 = vpop.xlane.xlu1 %5787 }
 0xaef   : > { %10638 = vrsqrt.f32 %v6001_v20  ;;  %v6002_v8 = vadd.f32 1e-05, %v5970_v13  ;;  %v5829_v51 = vmul.f32 0.0078125, %v5788_v18  ;;  %5945 = vadd.xlane.f32.xlu0 %v5892_v50 }
 0xaf0   : > { %v5790_v19 = vpop.xlane.xlu0 %5789 }
 0xaf1   : > { %10640 = vrsqrt.f32 %v6002_v8  ;;  %v15739_v9 = vsub.f32 %v15600_v28, %v5829_v51  ;;  %v5830_v2 = vmul.f32 0.0078125, %v5790_v19 }
 0xaf2   : > { %v5912_v5 = vpop.xlane.xlu1 %5911 }
 0xaf3   : > { %v15742_v10 = vsub.f32 %v15606_v17, %v5830_v2  ;;  %v5971_v25 = vmul.f32 0.0078125, %v5912_v5  ;;  %v5893_v0 = vmul.f32 %v15739_v9, %v15739_v9 }
 0xaf4   : > { %v5914_v59 = vpop.xlane.xlu0 %5913 }
 0xaf5   : > { %v6003_v24 = vadd.f32 1e-05, %v5971_v25  ;;  %v5972_v20 = vmul.f32 0.0078125, %v5914_v59  ;;  %5947 = vadd.xlane.f32.xlu1 %v5893_v0  ;;  %v5894_v13 = vmul.f32 %v15742_v10, %v15742_v10 }
 0xaf7   : > { %10642 = vrsqrt.f32 %v6003_v24  ;;  %v6004_v50 = vadd.f32 1e-05, %v5972_v20  ;;  %5949 = vadd.xlane.f32.xlu0 %v5894_v13 }
 0xaf9   : > { %v10639_v18 = vpop.eup %10638  ;;  %10644 = vrsqrt.f32 %v6004_v50 }
 0xafa   : > { %v6065_v51 = vmul.f32 %v10639_v18, %v15576_v4 }
 0xafb   : > { %v10641_v8 = vpop.eup %10640 }
 0xafc   : > { %v6066_v19 = vmul.f32 %v10641_v8, %v15583_v62 }
 0xafe   : > { %v6096_v2 = vpack.c.bf16 %v6066_v19, %v6065_v51 }
 0xb00   : > { %6368 = vmatmul.mubr.bf16.gmra.mrb[196].mxu1 %v6096_v2  ;;  %6561 = vmatmul.mubr.bf16.gmra.mrb[196].mxu0 %v6096_v2 }
 0xb01   : > { %v10643_v5 = vpop.eup %10642  ;;  %6377 = vmatprep.mubr.bf16.mxu1 %v17871_v47  ;;  %6570 = vmatprep.mubr.bf16.mxu0 %v17871_v47 }
 0xb02   : > { %v6067_v24 = vmul.f32 %v10643_v5, %v15597_v30 }
 0xb03   : > { %v10645_v25 = vpop.eup %10644 }
 0xb04   : > { %v6068_v0 = vmul.f32 %v10645_v25, %v15603_v57 }
 0xb06   : > { %v6097_v59 = vpack.c.bf16 %v6068_v0, %v6067_v24 }
 0xb08   : > { %6378 = vmatmul.mubr.bf16.gmra.mrb[200].mxu1 %v6097_v59  ;;  %6571 = vmatmul.mubr.bf16.gmra.mrb[200].mxu0 %v6097_v59 }
 0xb09   : > { %6387 = vmatprep.mubr.bf16.mxu1 %v17871_v47  ;;  %6580 = vmatprep.mubr.bf16.mxu0 %v17871_v47 }
 0xb27   : > { %v5792_v4 = vpop.xlane.xlu1 %5791 }
 0xb28   : > { %v5831_v62 = vmul.f32 0.0078125, %v5792_v4 }
 0xb29   : > { %v5794_v20 = vpop.xlane.xlu0 %5793 }
 0xb2a   : > { %v15757_v13 = vsub.f32 %v15619_v43, %v5831_v62  ;;  %v5832_v50 = vmul.f32 0.0078125, %v5794_v20 }
 0xb2b   : > { %v5916_v18 = vpop.xlane.xlu1 %5915 }
 0xb2c   : > { %v15760_v8 = vsub.f32 %v15626_v58, %v5832_v50  ;;  %v5973_v30 = vmul.f32 0.0078125, %v5916_v18  ;;  %v5895_v57 = vmul.f32 %v15757_v13, %v15757_v13 }
 0xb2d   : > { %v5918_v51 = vpop.xlane.xlu0 %5917 }
 0xb2e   : > { %v6005_v19 = vadd.f32 1e-05, %v5973_v30  ;;  %v5974_v2 = vmul.f32 0.0078125, %v5918_v51  ;;  %5951 = vadd.xlane.f32.xlu1 %v5895_v57  ;;  %v5896_v5 = vmul.f32 %v15760_v8, %v15760_v8 }
 0xb2f   : > { %v5796_v25 = vpop.xlane.xlu1 %5795 }
 0xb30   : > { %10646 = vrsqrt.f32 %v6005_v19  ;;  %v6006_v24 = vadd.f32 1e-05, %v5974_v2  ;;  %v5833_v0 = vmul.f32 0.0078125, %v5796_v25  ;;  %5953 = vadd.xlane.f32.xlu0 %v5896_v5 }
 0xb31   : > { %v5798_v59 = vpop.xlane.xlu0 %5797 }
 0xb32   : > { %10648 = vrsqrt.f32 %v6006_v24  ;;  %v15767_v4 = vsub.f32 %v15640_v42, %v5833_v0  ;;  %v5834_v62 = vmul.f32 0.0078125, %v5798_v59 }
 0xb33   : > { %v5920_v20 = vpop.xlane.xlu1 %5919 }
 0xb34   : > { %v15770_v50 = vsub.f32 %v15646_v31, %v5834_v62  ;;  %v5975_v18 = vmul.f32 0.0078125, %v5920_v20  ;;  %v5897_v30 = vmul.f32 %v15767_v4, %v15767_v4 }
 0xb35   : > { %v5922_v57 = vpop.xlane.xlu0 %5921 }
 0xb36   : > { %v6007_v51 = vadd.f32 1e-05, %v5975_v18  ;;  %v5976_v19 = vmul.f32 0.0078125, %v5922_v57  ;;  %5955 = vadd.xlane.f32.xlu1 %v5897_v30  ;;  %v5898_v2 = vmul.f32 %v15770_v50, %v15770_v50 }
 0xb37   : > { %v5800_v5 = vpop.xlane.xlu1 %5799 }
 0xb38   : > { %10650 = vrsqrt.f32 %v6007_v51  ;;  %v6008_v25 = vadd.f32 1e-05, %v5976_v19  ;;  %v5835_v24 = vmul.f32 0.0078125, %v5800_v5  ;;  %5957 = vadd.xlane.f32.xlu0 %v5898_v2 }
 0xb39   : > { %v5802_v0 = vpop.xlane.xlu0 %5801 }
 0xb3a   : > { %v10647_v59 = vpop.eup %10646  ;;  %10652 = vrsqrt.f32 %v6008_v25  ;;  %v15777_v62 = vsub.f32 %v15660_v36, %v5835_v24  ;;  %v5836_v20 = vmul.f32 0.0078125, %v5802_v0 }
 0xb3b   : > { %v5924_v31 = vpop.xlane.xlu1 %5923  ;;  %v6069_v19 = vmul.f32 %v10647_v59, %v15616_v41 }
 0xb3c   : > { %v10649_v42 = vpop.eup %10648  ;;  %v15780_v18 = vsub.f32 %v15666_v39, %v5836_v20  ;;  %v5977_v30 = vmul.f32 0.0078125, %v5924_v31  ;;  %v5899_v57 = vmul.f32 %v15777_v62, %v15777_v62 }
 0xb3d   : > { %v5926_v51 = vpop.xlane.xlu0 %5925  ;;  %v6070_v2 = vmul.f32 %v10649_v42, %v15623_v21 }
 0xb3e   : > { %v6009_v5 = vadd.f32 1e-05, %v5977_v30  ;;  %v5978_v25 = vmul.f32 0.0078125, %v5926_v51  ;;  %5959 = vadd.xlane.f32.xlu1 %v5899_v57  ;;  %v5900_v24 = vmul.f32 %v15780_v18, %v15780_v18 }
 0xb3f   : > { %v5804_v0 = vpop.xlane.xlu1 %5803  ;;  %v6098_v36 = vpack.c.bf16 %v6070_v2, %v6069_v19 }
 0xb40   : > { %10654 = vrsqrt.f32 %v6009_v5  ;;  %v6010_v20 = vadd.f32 1e-05, %v5978_v25  ;;  %v5837_v39 = vmul.f32 0.0078125, %v5804_v0  ;;  %5961 = vadd.xlane.f32.xlu0 %v5900_v24 }
 0xb41   : > { %6388 = vmatmul.mubr.bf16.gmra.mrb[204].mxu1 %v6098_v36  ;;  %6581 = vmatmul.mubr.bf16.gmra.mrb[204].mxu0 %v6098_v36  ;;  %v5806_v31 = vpop.xlane.xlu0 %5805 }
 0xb42   : > { %v10651_v58 = vpop.eup %10650  ;;  %10656 = vrsqrt.f32 %v6010_v20  ;;  %v15789_v41 = vsub.f32 %v15680_v33, %v5837_v39  ;;  %v5838_v21 = vmul.f32 0.0078125, %v5806_v31  ;;  %6397 = vmatprep.mubr.bf16.mxu1 %v17871_v47  ;;  %6590 = vmatprep.mubr.bf16.mxu0 %v17871_v47 }
 0xb43   : > { %v5928_v42 = vpop.xlane.xlu1 %5927  ;;  %v6071_v19 = vmul.f32 %v10651_v58, %v15637_v6 }
 0xb44   : > { %v10653_v59 = vpop.eup %10652  ;;  %v15794_v30 = vsub.f32 %v15686_v60, %v5838_v21  ;;  %v5979_v57 = vmul.f32 0.0078125, %v5928_v42  ;;  %v5901_v36 = vmul.f32 %v15789_v41, %v15789_v41 }
 0xb45   : > { %v5930_v51 = vpop.xlane.xlu0 %5929  ;;  %v6072_v39 = vmul.f32 %v10653_v59, %v15643_v32 }
 0xb46   : > { %v6011_v2 = vadd.f32 1e-05, %v5979_v57  ;;  %v5980_v5 = vmul.f32 0.0078125, %v5930_v51  ;;  %5963 = vadd.xlane.f32.xlu1 %v5901_v36  ;;  %v5902_v25 = vmul.f32 %v15794_v30, %v15794_v30 }
 0xb47   : > { %v5932_v24 = vpop.xlane.xlu1 %5931  ;;  %v6099_v0 = vpack.c.bf16 %v6072_v39, %v6071_v19 }
 0xb48   : > { %10658 = vrsqrt.f32 %v6011_v2  ;;  %v6012_v20 = vadd.f32 1e-05, %v5980_v5  ;;  %v5981_v31 = vmul.f32 0.0078125, %v5932_v24  ;;  %5965 = vadd.xlane.f32.xlu0 %v5902_v25 }
 0xb49   : > { %6398 = vmatmul.mubr.bf16.gmra.mrb[208].mxu1 %v6099_v0  ;;  %6591 = vmatmul.mubr.bf16.gmra.mrb[208].mxu0 %v6099_v0  ;;  %v5934_v21 = vpop.xlane.xlu0 %5933  ;;  %v10026_v0 = vld [vmem:[#allocation10 + $0x40] sm:$0xff]  }
 0xb4a   : > { %v10655_v42 = vpop.eup %10654  ;;  %10660 = vrsqrt.f32 %v6012_v20  ;;  %v5982_v58 = vmul.f32 0.0078125, %v5934_v21  ;;  %6407 = vmatprep.mubr.bf16.mxu1 %v17871_v47  ;;  %6600 = vmatprep.mubr.bf16.mxu0 %v17871_v47  ;;  %v6013_v32 = vadd.f32 1e-05, %v5981_v31  ;;  %v10027_v20 = vld [vmem:[#allocation10 + $0xc0] sm:$0xff]  }
 0xb4b   : > { %v5936_v57 = vpop.xlane.xlu1 %5935  ;;  %v6073_v51 = vmul.f32 %v10655_v42, %v15657_v49  ;;  %v10028_v31 = vld [vmem:[#allocation10] sm:$0xff]   ;;  %8684 = vmatprep.subr.bf16.mxu1 %v10026_v0  ;;  %8796 = vmatprep.subr.bf16.mxu0 %v10027_v20  ;;  %v10034_v20 = vld [vmem:[#allocation10 + $0x50] sm:$0xff]  }
 0xb4c   : > { %v10657_v6 = vpop.eup %10656  ;;  %v6014_v59 = vadd.f32 1e-05, %v5982_v58  ;;  %v5983_v5 = vmul.f32 0.0078125, %v5936_v57  ;;  %v10029_v49 = vld [vmem:[#allocation10 + $0x80] sm:$0xff]   ;;  %8685 = vmatpush3.bf16.msra.mxu1 %v10028_v31  ;;  %v10035_v31 = vld [vmem:[#allocation10 + $0xd0] sm:$0xff]  }
 0xb4d   : > { %v5938_v36 = vpop.xlane.xlu0 %5937  ;;  %v6074_v19 = vmul.f32 %v10657_v6, %v15663_v37  ;;  %8797 = vmatpush3.bf16.msra.mxu0 %v10029_v49  ;;  %v10037_v49 = vld [vmem:[#allocation10 + $0x90] sm:$0xff]  }
 0xb4e   : > { %10662 = vrsqrt.f32 %v6014_v59  ;;  %v5984_v39 = vmul.f32 0.0078125, %v5938_v36  ;;  %v6015_v37 = vadd.f32 1e-05, %v5983_v5  ;;  %v10030_v36 = vld [vmem:[#allocation10 + $0x48] sm:$0xff]  }
 0xb4f   : > { %v6100_v2 = vpack.c.bf16 %v6074_v19, %v6073_v51  ;;  %10664 = vrsqrt.f32 %v6013_v32  ;;  %v5940_v58 = vpop.xlane.xlu1 %5939  ;;  %v10031_v51 = vld [vmem:[#allocation10 + $0xc8] sm:$0xff]   ;;  %8686 = vmatprep.subr.bf16.mxu1 %v10030_v36 }
 0xb50   : > { %v6016_v24 = vadd.f32 1e-05, %v5984_v39  ;;  %v5985_v39 = vmul.f32 0.0078125, %v5940_v58  ;;  %8798 = vmatprep.subr.bf16.mxu0 %v10031_v51  ;;  %v10039_v58 = vld [vmem:[#allocation10 + $0xd8] sm:$0xff]  }
 0xb51   : > { %6408 = vmatmul.mubr.bf16.gmra.mrb[212].mxu1 %v6100_v2  ;;  %6601 = vmatmul.mubr.bf16.gmra.mrb[212].mxu0 %v6100_v2  ;;  %v5942_v21 = vpop.xlane.xlu0 %5941 }
 0xb52   : > { %v10659_v25 = vpop.eup %10658  ;;  %6417 = vmatprep.mubr.bf16.mxu1 %v17871_v47  ;;  %6610 = vmatprep.mubr.bf16.mxu0 %v17871_v47  ;;  %10666 = vrsqrt.f32 %v6016_v24  ;;  %v5986_v59 = vmul.f32 0.0078125, %v5942_v21  ;;  %v6017_v24 = vadd.f32 1e-05, %v5985_v39  ;;  %v10036_v21 = vld [vmem:[#allocation10 + $0x10] sm:$0xff]   ;;  %v10042_v39 = vld [vmem:[#allocation10 + $0x60] sm:$0xff]  }
 0xb53   : > { %v6075_v6 = vmul.f32 %v10659_v25, %v15677_v3  ;;  %10668 = vrsqrt.f32 %v6015_v37  ;;  %v10032_v3 = vld [vmem:[#allocation10 + $0x8] sm:$0xff]  }
 0xb54   : > { %v10661_v42 = vpop.eup %10660  ;;  %v6018_v5 = vadd.f32 1e-05, %v5986_v59  ;;  %8687 = vmatpush3.bf16.msra.mxu1 %v10032_v3  ;;  %v10045_v3 = vld [vmem:[#allocation10 + $0xa0] sm:$0xff]  }
 0xb55   : > { %v6076_v32 = vmul.f32 %v10661_v42, %v15683_v35  ;;  %v10033_v35 = vld [vmem:[#allocation10 + $0x88] sm:$0xff]   ;;  %8688 = vmatprep.subr.bf16.mxu1 %v10034_v20 }
 0xb56   : > { %8799 = vmatpush3.bf16.msra.mxu0 %v10033_v35  ;;  %10670 = vrsqrt.f32 %v6018_v5  ;;  %v10049_v20 = vld [vmem:[#allocation10 + $0xa8] sm:$0xff]  }
 0xb57   : > { %v6101_v57 = vpack.c.bf16 %v6076_v32, %v6075_v6  ;;  %8800 = vmatprep.subr.bf16.mxu0 %v10035_v31  ;;  %10672 = vrsqrt.f32 %v6017_v24  ;;  %v10041_v32 = vld [vmem:[#allocation10 + $0x98] sm:$0xff]   ;;  %v10051_v31 = vld [vmem:[#allocation10 + $0xf0] sm:$0xff]  }
 0xb58   : > { %v10663_v19 = vpop.eup %10662  ;;  %8689 = vmatpush3.bf16.msra.mxu1 %v10036_v21  ;;  %v10053_v21 = vld [vmem:[#allocation10 + $0xb0] sm:$0xff]  }
 0xb59   : > { %6418 = vmatmul.mubr.bf16.gmra.mrb[216].mxu1 %v6101_v57  ;;  %6611 = vmatmul.mubr.bf16.gmra.mrb[216].mxu0 %v6101_v57  ;;  %v10665_v2 = vpop.eup %10664  ;;  %v6078_v25 = vmul.f32 %v10663_v19, %v15696_v44  ;;  %v10038_v44 = vld [vmem:[#allocation10 + $0x58] sm:$0xff]  }
 0xb5a   : > { %6427 = vmatprep.mubr.bf16.mxu1 %v17871_v47  ;;  %6620 = vmatprep.mubr.bf16.mxu0 %v17871_v47  ;;  %v6077_v0 = vmul.f32 %v10665_v2, %v15690_v7  ;;  %v10040_v7 = vld [vmem:[#allocation10 + $0x18] sm:$0xff]   ;;  %v10043_v2 = vld [vmem:[#allocation10 + $0xe0] sm:$0xff]  }
 0xb5b   : > { %8801 = vmatpush3.bf16.msra.mxu0 %v10037_v49  ;;  %8690 = vmatprep.subr.bf16.mxu1 %v10038_v44  ;;  %v10054_v49 = vld [vmem:[#allocation10 + $0x78] sm:$0xff]  }
 0xb5c   : > { %v6102_v42 = vpack.c.bf16 %v6078_v25, %v6077_v0  ;;  %v10667_v37 = vpop.eup %10666  ;;  %8802 = vmatprep.subr.bf16.mxu0 %v10039_v58  ;;  %8691 = vmatpush3.bf16.msra.mxu1 %v10040_v7  ;;  %v10047_v25 = vld [vmem:[#allocation10 + $0xe8] sm:$0xff]   ;;  %v10057_v44 = vld [vmem:[#allocation10 + $0xb8] sm:$0xff]  }
 0xb5d   : > { %v10669_v6 = vpop.eup %10668  ;;  %v6080_v59 = vmul.f32 %v10667_v37, %v15706_v52  ;;  %v10044_v52 = vld [vmem:[#allocation10 + $0x20] sm:$0xff]   ;;  %8692 = vmatprep.subr.bf16.mxu1 %v10042_v39  ;;  %v10048_v0 = vld [vmem:[#allocation10 + $0x28] sm:$0xff]   ;;  %v10056_v37 = vld [vmem:[#allocation10 + $0x38] sm:$0xff]  }
 0xb5e   : > { %v6079_v57 = vmul.f32 %v10669_v6, %v15701_v16  ;;  %v10046_v16 = vld [vmem:[#allocation10 + $0x68] sm:$0xff]  }
 0xb5f   : > { %8803 = vmatpush3.bf16.msra.mxu0 %v10041_v32 }
 0xb60   : > { %v6103_v36 = vpack.c.bf16 %v6080_v59, %v6079_v57  ;;  %v10671_v51 = vpop.eup %10670  ;;  %8804 = vmatprep.subr.bf16.mxu0 %v10043_v2  ;;  %8693 = vmatpush3.bf16.msra.mxu1 %v10044_v52 }
 0xb61   : > { %6428 = vmatmul.mubr.bf16.gmra.mrb[220].mxu1 %v6102_v42  ;;  %6621 = vmatmul.mubr.bf16.gmra.mrb[220].mxu0 %v6102_v42  ;;  %v10673_v19 = vpop.eup %10672  ;;  %v6082_v5 = vmul.f32 %v10671_v51, %v15716_v55  ;;  %v10050_v55 = vld [vmem:[#allocation10 + $0x70] sm:$0xff]   ;;  %v10055_v42 = vld [vmem:[#allocation10 + $0xf8] sm:$0xff]  }
 0xb62   : > { %6437 = vmatprep.mubr.bf16.mxu1 %v17871_v47  ;;  %6630 = vmatprep.mubr.bf16.mxu0 %v17871_v47  ;;  %v6081_v35 = vmul.f32 %v10673_v19, %v15711_v53  ;;  %v10052_v53 = vld [vmem:[#allocation10 + $0x30] sm:$0xff]  }
 0xb63   : > { %8805 = vmatpush3.bf16.msra.mxu0 %v10045_v3  ;;  %8694 = vmatprep.subr.bf16.mxu1 %v10046_v16 }
 0xb64   : > { %v6104_v24 = vpack.c.bf16 %v6082_v5, %v6081_v35  ;;  %8806 = vmatprep.subr.bf16.mxu0 %v10047_v25  ;;  %8695 = vmatpush3.bf16.msra.mxu1 %v10048_v0  ;;  %v17892_v0 = vld [vmem:[#allocation18_spill] sm:$0xff] }
 0xb65   : > { %8696 = vmatprep.subr.bf16.mxu1 %v10050_v55 }
 0xb67   : > { %8807 = vmatpush3.bf16.msra.mxu0 %v10049_v20  ;;  %v6159_v20 = vsub.s32 3, %v17892_v0 }
 0xb68   : > { %8808 = vmatprep.subr.bf16.mxu0 %v10051_v31  ;;  %8697 = vmatpush3.bf16.msra.mxu1 %v10052_v53  ;;  %v17893_v53 = vsub.s32 0, %v17892_v0 }
 0xb69   : > { %6438 = vmatmul.mubr.bf16.gmra.mrb[224].mxu1 %v6103_v36  ;;  %6631 = vmatmul.mubr.bf16.gmra.mrb[224].mxu0 %v6103_v36 }
 0xb6a   : > { %6447 = vmatprep.mubr.bf16.mxu1 %v17871_v47  ;;  %6640 = vmatprep.mubr.bf16.mxu0 %v17871_v47 }
 0xb6b   : > { %8809 = vmatpush3.bf16.msra.mxu0 %v10053_v21  ;;  %8698 = vmatprep.subr.bf16.mxu1 %v10054_v49  ;;  %v17895_v49 = vsub.s32 1, %v17892_v0 }
 0xb6c   : > { %8810 = vmatprep.subr.bf16.mxu0 %v10055_v42  ;;  %8699 = vmatpush3.bf16.msra.mxu1 %v10056_v37 }
 0xb6f   : > { %8811 = vmatpush3.bf16.msra.mxu0 %v10057_v44 }
 0xb71   : > { %6448 = vmatmul.mubr.bf16.gmra.mrb[228].mxu1 %v6104_v24  ;;  %6641 = vmatmul.mubr.bf16.gmra.mrb[228].mxu0 %v6104_v24  ;;  %v6143_v24 = vld [vmem:[%s16799_s6] sm:$0xf] }
 0xb72   : > { %6457 = vmatprep.mubr.bf16.mxu1 %v17871_v47  ;;  %6650 = vmatprep.mubr.bf16.mxu0 %v17871_v47  ;;  %v15842_v42 = vrot.slane %v6143_v24, %v17895_v49  ;;  %v15844_v37 = vrot.slane %v6143_v24, %v6159_v20 }
 0xb7a   : > { %v5944_v58 = vpop.xlane.xlu1 %5943 }
 0xb7b   : > { %v5987_v6 = vmul.f32 0.0078125, %v5944_v58 }
 0xb7c   : > { %v5946_v7 = vpop.xlane.xlu0 %5945 }
 0xb7d   : > { %v6019_v32 = vadd.f32 1e-05, %v5987_v6  ;;  %v5988_v59 = vmul.f32 0.0078125, %v5946_v7 }
 0xb7f   : > { %10674 = vrsqrt.f32 %v6019_v32  ;;  %v6020_v57 = vadd.f32 1e-05, %v5988_v59 }
 0xb81   : > { %10676 = vrsqrt.f32 %v6020_v57 }
 0xb82   : > { %v5948_v36 = vpop.xlane.xlu1 %5947 }
 0xb83   : > { %v5989_v51 = vmul.f32 0.0078125, %v5948_v36 }
 0xb84   : > { %v5950_v19 = vpop.xlane.xlu0 %5949 }
 0xb85   : > { %v6021_v39 = vadd.f32 1e-05, %v5989_v51  ;;  %v5990_v2 = vmul.f32 0.0078125, %v5950_v19 }
 0xb87   : > { %10678 = vrsqrt.f32 %v6021_v39  ;;  %v6022_v5 = vadd.f32 1e-05, %v5990_v2 }
 0xb89   : > { %v10675_v52 = vpop.eup %10674  ;;  %10680 = vrsqrt.f32 %v6022_v5 }
 0xb8a   : > { %v6083_v35 = vmul.f32 %v10675_v52, %v15729_v22  ;;  %v15834_v22 = vrot.slane %v6143_v24, %v17893_v53 }
 0xb8b   : > { %v10677_v3 = vpop.eup %10676 }
 0xb8c   : > { %v6084_v16 = vmul.f32 %v10677_v3, %v15732_v45  ;;  %v17894_v45 = vsub.s32 2, %v17892_v0 }
 0xb8e   : > { %v6105_v25 = vpack.c.bf16 %v6084_v16, %v6083_v35  ;;  %v15838_v21 = vrot.slane %v6143_v24, %v17894_v45 }
 0xb90   : > { %6458 = vmatmul.mubr.bf16.gmra.mrb[232].mxu1 %v6105_v25  ;;  %6651 = vmatmul.mubr.bf16.gmra.mrb[232].mxu0 %v6105_v25 }
 0xb91   : > { %v10679_v55 = vpop.eup %10678  ;;  %6467 = vmatprep.mubr.bf16.mxu1 %v17871_v47  ;;  %6660 = vmatprep.mubr.bf16.mxu0 %v17871_v47 }
 0xb92   : > { %v6085_v44 = vmul.f32 %v10679_v55, %v15739_v9 }
 0xb93   : > { %v10681_v31 = vpop.eup %10680 }
 0xb94   : > { %v6086_v58 = vmul.f32 %v10681_v31, %v15742_v10 }
 0xb96   : > { %v6359_v6 = vpop.f32.mrb[192].mxu1  ;;  %v6552_v7 = vpop.f32.mrb[192].mxu0  ;;  %v6106_v32 = vpack.c.bf16 %v6086_v58, %v6085_v44 }
 0xb97   : > { %v6360_v59 = vadd.f32 %v6359_v6, %v15834_v22  ;;  %v6553_v57 = vadd.f32 %v6552_v7, %v15838_v21  ;;  %v6361_v36 = vpop.f32.mrb[193].mxu1  ;;  %v6554_v51 = vpop.f32.mrb[193].mxu0 }
 0xb98   : > { %v6362_v19 = vadd.f32 %v6361_v36, %v15842_v42  ;;  %v6555_v39 = vadd.f32 %v6554_v51, %v15844_v37  ;;  %v6363_v2 = vpop.f32.mrb[194].mxu1  ;;  %6468 = vmatmul.mubr.bf16.gmra.mrb[236].mxu1 %v6106_v32  ;;  %v6556_v5 = vpop.f32.mrb[194].mxu0  ;;  %6661 = vmatmul.mubr.bf16.gmra.mrb[236].mxu0 %v6106_v32 }
 0xb99   : > { %v6839_v9 = vmul.f32 0.70710677, %v6360_v59  ;;  %v6841_v52 = vmul.f32 0.70710677, %v6553_v57  ;;  %6477 = vmatprep.mubr.bf16.mxu1 %v17871_v47  ;;  %6670 = vmatprep.mubr.bf16.mxu0 %v17871_v47  ;;  %v6364_v35 = vadd.f32 %v6363_v2, %v15834_v22  ;;  %v6557_v16 = vadd.f32 %v6556_v5, %v15838_v21  ;;  %v6365_v25 = vpop.f32.mrb[195].mxu1  ;;  %v6558_v24 = vpop.f32.mrb[195].mxu0 }
 0xb9a   : > { %v6840_v10 = vmul.f32 0.70710677, %v6362_v19  ;;  %v6842_v3 = vmul.f32 0.70710677, %v6555_v39  ;;  %v6366_v0 = vadd.f32 %v6365_v25, %v15842_v42  ;;  %v6559_v20 = vadd.f32 %v6558_v24, %v15844_v37 }
 0xb9b   : > { %10682 = verf.f32 %v6839_v9  ;;  %v6843_v55 = vmul.f32 0.70710677, %v6364_v35  ;;  %v6845_v31 = vmul.f32 0.70710677, %v6557_v16  ;;  %v6711_v36 = vmul.f32 0.5, %v6360_v59 }
 0xb9c   : > { %10684 = verf.f32 %v6841_v52  ;;  %v6844_v53 = vmul.f32 0.70710677, %v6366_v0  ;;  %v6846_v45 = vmul.f32 0.70710677, %v6559_v20  ;;  %v6713_v51 = vmul.f32 0.5, %v6553_v57 }
 0xb9d   : > { %10686 = verf.f32 %v6840_v10  ;;  %v6712_v9 = vmul.f32 0.5, %v6362_v19  ;;  %v6715_v10 = vmul.f32 0.5, %v6364_v35  ;;  %v6714_v24 = vmul.f32 0.5, %v6555_v39 }
 0xb9e   : > { %10688 = verf.f32 %v6842_v3  ;;  %v6718_v19 = vmul.f32 0.5, %v6559_v20 }
 0xb9f   : > { %10690 = verf.f32 %v6843_v55 }
 0xba0   : > { %10692 = verf.f32 %v6845_v31  ;;  %v6717_v31 = vmul.f32 0.5, %v6557_v16 }
 0xba1   : > { %10694 = verf.f32 %v6844_v53 }
 0xba2   : > { %10696 = verf.f32 %v6846_v45 }
 0xba5   : > { %v10683_v49 = vpop.eup %10682 }
 0xba6   : > { %v10685_v44 = vpop.eup %10684  ;;  %v7095_v7 = vadd.f32 1.0, %v10683_v49  ;;  %v6716_v49 = vmul.f32 0.5, %v6366_v0 }
 0xba7   : > { %v10687_v58 = vpop.eup %10686  ;;  %v7097_v2 = vadd.f32 1.0, %v10685_v44 }
 0xba8   : > { %v10689_v6 = vpop.eup %10688  ;;  %v7096_v52 = vadd.f32 1.0, %v10687_v58  ;;  %v15858_v60 = vmul.f32 %v7095_v7, %v6711_v36 }
 0xba9   : > { %v10691_v32 = vpop.eup %10690  ;;  %v7098_v55 = vadd.f32 1.0, %v10689_v6  ;;  %v15862_v59 = vmul.f32 %v7097_v2, %v6713_v51 }
 0xbaa   : > { %v10693_v5 = vpop.eup %10692  ;;  %v7099_v3 = vadd.f32 1.0, %v10691_v32  ;;  %v15866_v35 = vmul.f32 %v7096_v52, %v6712_v9 }
 0xbab   : > { %v10695_v25 = vpop.eup %10694  ;;  %v7101_v53 = vadd.f32 1.0, %v10693_v5  ;;  %v15872_v58 = vmul.f32 %v7098_v55, %v6714_v24 }
 0xbac   : > { %v10697_v45 = vpop.eup %10696  ;;  %v15860_v33 = vmul.f32 %v7099_v3, %v6715_v10  ;;  %v7100_v43 = vadd.f32 1.0, %v10695_v25 }
 0xbad   : > { %v15864_v57 = vmul.f32 %v7101_v53, %v6717_v31  ;;  %v7102_v44 = vadd.f32 1.0, %v10697_v45 }
 0xbae   : > { %v15870_v16 = vmul.f32 %v7100_v43, %v6716_v49 }
 0xbaf   : > { %v15876_v0 = vmul.f32 %v7102_v44, %v6718_v19 }
 0xbbb   : > { %v5952_v32 = vpop.xlane.xlu1 %5951 }
 0xbbc   : > { %v5991_v36 = vmul.f32 0.0078125, %v5952_v32 }
 0xbbd   : > { %v5954_v51 = vpop.xlane.xlu0 %5953 }
 0xbbe   : > { %v6023_v2 = vadd.f32 1e-05, %v5991_v36  ;;  %v5992_v5 = vmul.f32 0.0078125, %v5954_v51 }
 0xbc0   : > { %10698 = vrsqrt.f32 %v6023_v2  ;;  %v6024_v43 = vadd.f32 1e-05, %v5992_v5 }
 0xbc2   : > { %10700 = vrsqrt.f32 %v6024_v43 }
 0xbc3   : > { %v5956_v9 = vpop.xlane.xlu1 %5955 }
 0xbc4   : > { %v5993_v10 = vmul.f32 0.0078125, %v5956_v9 }
 0xbc5   : > { %v5958_v52 = vpop.xlane.xlu0 %5957 }
 0xbc6   : > { %v5994_v3 = vmul.f32 0.0078125, %v5958_v52  ;;  %v6025_v55 = vadd.f32 1e-05, %v5993_v10 }
 0xbc8   : > { %v6026_v25 = vadd.f32 1e-05, %v5994_v3 }
 0xbca   : > { %v10699_v24 = vpop.eup %10698  ;;  %10702 = vrsqrt.f32 %v6026_v25 }
 0xbcb   : > { %v5960_v31 = vpop.xlane.xlu1 %5959  ;;  %v6087_v49 = vmul.f32 %v10699_v24, %v15757_v13  ;;  %10704 = vrsqrt.f32 %v6025_v55 }
 0xbcc   : > { %v10701_v53 = vpop.eup %10700  ;;  %v5995_v44 = vmul.f32 0.0078125, %v5960_v31 }
 0xbcd   : > { %v5962_v45 = vpop.xlane.xlu0 %5961  ;;  %v6088_v19 = vmul.f32 %v10701_v53, %v15760_v8 }
 0xbce   : > { %v5996_v32 = vmul.f32 0.0078125, %v5962_v45  ;;  %v6027_v51 = vadd.f32 1e-05, %v5995_v44 }
 0xbcf   : > { %v6107_v36 = vpack.c.bf16 %v6088_v19, %v6087_v49 }
 0xbd0   : > { %v6028_v2 = vadd.f32 1e-05, %v5996_v32  ;;  %10706 = vrsqrt.f32 %v6027_v51 }
 0xbd1   : > { %6478 = vmatmul.mubr.bf16.gmra.mrb[240].mxu1 %v6107_v36  ;;  %6671 = vmatmul.mubr.bf16.gmra.mrb[240].mxu0 %v6107_v36 }
 0xbd2   : > { %6487 = vmatprep.mubr.bf16.mxu1 %v17871_v47  ;;  %6680 = vmatprep.mubr.bf16.mxu0 %v17871_v47  ;;  %10708 = vrsqrt.f32 %v6028_v2 }
 0xbd3   : > { %v5964_v5 = vpop.xlane.xlu1 %5963  ;;  %v6369_v43 = vpop.f32.mrb[196].mxu1 }
 0xbd4   : > { %v5997_v9 = vmul.f32 0.0078125, %v5964_v5  ;;  %v15887_v52 = vadd.f32 %v6369_v43, %v15834_v22  ;;  %v6562_v13 = vpop.f32.mrb[196].mxu0  ;;  %v6371_v8 = vpop.f32.mrb[197].mxu1 }
 0xbd5   : > { %v10703_v10 = vpop.eup %10702  ;;  %v15890_v3 = vadd.f32 %v6562_v13, %v15838_v21  ;;  %v15893_v25 = vadd.f32 %v6371_v8, %v15842_v42  ;;  %v6564_v24 = vpop.f32.mrb[197].mxu0 }
 0xbd6   : > { %v6373_v55 = vpop.f32.mrb[198].mxu1  ;;  %v6029_v31 = vadd.f32 1e-05, %v5997_v9  ;;  %v6847_v53 = vmul.f32 0.70710677, %v15887_v52  ;;  %v15897_v45 = vadd.f32 %v6564_v24, %v15844_v37  ;;  %v6566_v49 = vpop.f32.mrb[198].mxu0  ;;  %v6090_v13 = vmul.f32 %v10703_v10, %v15770_v50 }
 0xbd7   : > { %v5966_v19 = vpop.xlane.xlu0 %5965  ;;  %v6849_v44 = vmul.f32 0.70710677, %v15890_v3  ;;  %v6848_v32 = vmul.f32 0.70710677, %v15893_v25  ;;  %v10705_v36 = vpop.eup %10704  ;;  %v15903_v43 = vadd.f32 %v6373_v55, %v15834_v22  ;;  %v15907_v8 = vadd.f32 %v6566_v49, %v15838_v21 }
 0xbd8   : > { %10710 = vrsqrt.f32 %v6029_v31  ;;  %v6850_v5 = vmul.f32 0.70710677, %v15897_v45  ;;  %v6375_v51 = vpop.f32.mrb[199].mxu1  ;;  %v6568_v9 = vpop.f32.mrb[199].mxu0  ;;  %v5998_v2 = vmul.f32 0.0078125, %v5966_v19  ;;  %v6089_v50 = vmul.f32 %v10705_v36, %v15767_v4 }
 0xbd9   : > { %10712 = verf.f32 %v6847_v53  ;;  %v15910_v24 = vadd.f32 %v6375_v51, %v15842_v42  ;;  %v6851_v31 = vmul.f32 0.70710677, %v15903_v43  ;;  %v15914_v6 = vadd.f32 %v6568_v9, %v15844_v37 }
 0xbda   : > { %10714 = verf.f32 %v6849_v44  ;;  %v6853_v55 = vmul.f32 0.70710677, %v15907_v8  ;;  %v6030_v39 = vadd.f32 1e-05, %v5998_v2  ;;  %v6108_v51 = vpack.c.bf16 %v6090_v13, %v6089_v50 }
 0xbdb   : > { %10716 = verf.f32 %v6848_v32  ;;  %v6379_v10 = vpop.f32.mrb[200].mxu1  ;;  %v6852_v53 = vmul.f32 0.70710677, %v15910_v24  ;;  %v6572_v49 = vpop.f32.mrb[200].mxu0  ;;  %v6854_v44 = vmul.f32 0.70710677, %v15914_v6 }
 0xbdc   : > { %10718 = verf.f32 %v6850_v5  ;;  %v6381_v19 = vpop.f32.mrb[201].mxu1  ;;  %v15921_v20 = vadd.f32 %v6379_v10, %v15834_v22  ;;  %v6574_v9 = vpop.f32.mrb[201].mxu0  ;;  %v15924_v2 = vadd.f32 %v6572_v49, %v15838_v21  ;;  %6488 = vmatmul.mubr.bf16.gmra.mrb[244].mxu1 %v6108_v51  ;;  %6681 = vmatmul.mubr.bf16.gmra.mrb[244].mxu0 %v6108_v51  ;;  %v6721_v38 = vmul.f32 0.5, %v15890_v3 }
 0xbdd   : > { %10720 = verf.f32 %v6851_v31  ;;  %v6383_v32 = vpop.f32.mrb[202].mxu1  ;;  %v15927_v4 = vadd.f32 %v6381_v19, %v15842_v42  ;;  %v15930_v36 = vadd.f32 %v6574_v9, %v15844_v37  ;;  %v6576_v5 = vpop.f32.mrb[202].mxu0  ;;  %6497 = vmatprep.mubr.bf16.mxu1 %v17871_v47  ;;  %6690 = vmatprep.mubr.bf16.mxu0 %v17871_v47  ;;  %v6722_v27 = vmul.f32 0.5, %v15897_v45 }
 0xbde   : > { %10722 = verf.f32 %v6853_v55  ;;  %v6385_v31 = vpop.f32.mrb[203].mxu1  ;;  %v6855_v13 = vmul.f32 0.70710677, %v15921_v20  ;;  %v15934_v50 = vadd.f32 %v6383_v32, %v15834_v22  ;;  %v6578_v55 = vpop.f32.mrb[203].mxu0  ;;  %v6857_v49 = vmul.f32 0.70710677, %v15924_v2 }
 0xbdf   : > { %10724 = vrsqrt.f32 %v6030_v39  ;;  %v10707_v10 = vpop.eup %10706  ;;  %v6856_v39 = vmul.f32 0.70710677, %v15927_v4  ;;  %v6858_v51 = vmul.f32 0.70710677, %v15930_v36  ;;  %v15943_v7 = vadd.f32 %v6576_v5, %v15838_v21 }
 0xbe0   : > { %10726 = verf.f32 %v6852_v53  ;;  %v10709_v19 = vpop.eup %10708  ;;  %v6859_v32 = vmul.f32 0.70710677, %v15934_v50  ;;  %v15946_v17 = vadd.f32 %v6385_v31, %v15842_v42  ;;  %v15949_v28 = vadd.f32 %v6578_v55, %v15844_v37 }
 0xbe1   : > { %10728 = verf.f32 %v6854_v44  ;;  %v6861_v15 = vmul.f32 0.70710677, %v15943_v7  ;;  %v6720_v31 = vmul.f32 0.5, %v15893_v25  ;;  %v6091_v3 = vmul.f32 %v10707_v10, %v15777_v62 }
 0xbe2   : > { %v10711_v9 = vpop.eup %10710  ;;  %10730 = verf.f32 %v6855_v13  ;;  %v6719_v13 = vmul.f32 0.5, %v15887_v52  ;;  %v6860_v5 = vmul.f32 0.70710677, %v15946_v17  ;;  %v6862_v54 = vmul.f32 0.70710677, %v15949_v28 }
 0xbe3   : > { %v10713_v53 = vpop.eup %10712  ;;  %10732 = verf.f32 %v6857_v49  ;;  %v6725_v25 = vmul.f32 0.5, %v15907_v8  ;;  %v6724_v62 = vmul.f32 0.5, %v15910_v24 }
 0xbe4   : > { %v10715_v44 = vpop.eup %10714  ;;  %10734 = verf.f32 %v6856_v39  ;;  %v7103_v49 = vadd.f32 1.0, %v10713_v53  ;;  %v6723_v39 = vmul.f32 0.5, %v15903_v43 }
 0xbe5   : > { %v10717_v23 = vpop.eup %10716  ;;  %10736 = verf.f32 %v6858_v51  ;;  %v7105_v29 = vadd.f32 1.0, %v10715_v44  ;;  %v6092_v51 = vmul.f32 %v10709_v19, %v15780_v18 }
 0xbe6   : > { %v10719_v14 = vpop.eup %10718  ;;  %10738 = verf.f32 %v6859_v32  ;;  %v7104_v12 = vadd.f32 1.0, %v10717_v23  ;;  %v15962_v44 = vmul.f32 %v7103_v49, %v6719_v13 }
 0xbe7   : > { %v10721_v55 = vpop.eup %10720  ;;  %10740 = verf.f32 %v6861_v15  ;;  %v7106_v43 = vadd.f32 1.0, %v10719_v14  ;;  %v6109_v40 = vpack.c.bf16 %v6092_v51, %v6091_v3 }
 0xbe8   : > { %v10723_v52 = vpop.eup %10722  ;;  %v7107_v63 = vadd.f32 1.0, %v10721_v55  ;;  %10742 = verf.f32 %v6860_v5  ;;  %v15966_v55 = vmul.f32 %v7105_v29, %v6721_v38  ;;  %v7232_v19 = vmul.f32 %v7104_v12, %v6720_v31 }
 0xbe9   : > { %v10725_v53 = vpop.eup %10724  ;;  %v7109_v45 = vadd.f32 1.0, %v10723_v52  ;;  %10744 = verf.f32 %v6862_v54  ;;  %v6726_v54 = vmul.f32 0.5, %v15914_v6  ;;  %6498 = vmatmul.mubr.bf16.gmra.mrb[248].mxu1 %v6109_v40  ;;  %6691 = vmatmul.mubr.bf16.gmra.mrb[248].mxu0 %v6109_v40  ;;  %v7234_v13 = vmul.f32 %v7106_v43, %v6722_v27 }
 0xbea   : > { %v10727_v32 = vpop.eup %10726  ;;  %v15964_v15 = vmul.f32 %v7107_v63, %v6723_v39  ;;  %v6094_v63 = vmul.f32 %v10725_v53, %v15794_v30  ;;  %6507 = vmatprep.mubr.bf16.mxu1 %v17871_v47  ;;  %6700 = vmatprep.mubr.bf16.mxu0 %v17871_v47  ;;  %v6093_v6 = vmul.f32 %v10711_v9, %v15789_v41  ;;  %v6727_v40 = vmul.f32 0.5, %v15921_v20 }
 0xbeb   : > { %v10729_v1 = vpop.eup %10728  ;;  %v15968_v5 = vmul.f32 %v7109_v45, %v6725_v25  ;;  %v7108_v18 = vadd.f32 1.0, %v10727_v32  ;;  %v6729_v12 = vmul.f32 0.5, %v15924_v2  ;;  %v6728_v25 = vmul.f32 0.5, %v15927_v4 }
 0xbec   : > { %v10731_v23 = vpop.eup %10730  ;;  %v7355_v8 = vpack.c.bf16 %v15964_v15, %v15962_v44  ;;  %v7110_v10 = vadd.f32 1.0, %v10729_v1  ;;  %v6110_v3 = vpack.c.bf16 %v6094_v63, %v6093_v6  ;;  %v6731_v27 = vmul.f32 0.5, %v15934_v50 }
 0xbed   : > { %v10733_v14 = vpop.eup %10732  ;;  %v7357_v29 = vpack.c.bf16 %v15968_v5, %v15966_v55  ;;  %v7236_v38 = vmul.f32 %v7108_v18, %v6724_v62  ;;  %v7111_v39 = vadd.f32 1.0, %v10731_v23  ;;  %v6730_v41 = vmul.f32 0.5, %v15930_v36 }
 0xbee   : > { %v10735_v24 = vpop.eup %10734  ;;  %v7238_v49 = vmul.f32 %v7110_v10, %v6726_v54  ;;  %v7113_v31 = vadd.f32 1.0, %v10733_v14  ;;  %v6733_v20 = vmul.f32 0.5, %v15943_v7  ;;  %v6732_v55 = vmul.f32 0.5, %v15946_v17 }
 0xbef   : > { %v10737_v1 = vpop.eup %10736  ;;  %v7356_v30 = vpack.c.bf16 %v7236_v38, %v7232_v19  ;;  %v7112_v47 = vadd.f32 1.0, %v10735_v24  ;;  %v7239_v15 = vmul.f32 %v7111_v39, %v6727_v40  ;;  %v6734_v4 = vmul.f32 0.5, %v15949_v28 }
 0xbf0   : > { %v10739_v52 = vpop.eup %10738  ;;  %v7358_v51 = vpack.c.bf16 %v7238_v49, %v7234_v13  ;;  %v7114_v9 = vadd.f32 1.0, %v10737_v1  ;;  %v7241_v62 = vmul.f32 %v7113_v31, %v6729_v12  ;;  %v17896_v7 = vpack.c.bf16 %v15870_v16, %v15866_v35 }
 0xbf1   : > { %v10741_v53 = vpop.eup %10740  ;;  %v7115_v45 = vadd.f32 1.0, %v10739_v52  ;;  %6508 = vmatmul.mubr.bf16.gmra.mrb[252].mxu1 %v6110_v3  ;;  %6701 = vmatmul.mubr.bf16.gmra.mrb[252].mxu0 %v6110_v3  ;;  %v7240_v50 = vmul.f32 %v7112_v47, %v6728_v25  ;;  %v17897_v10 = vpack.c.bf16 %v15876_v0, %v15872_v58  ;;  %v17898_v28 = vpack.c.bf16 %v15860_v33, %v15858_v60 }
 0xbf2   : > { %v10743_v32 = vpop.eup %10742  ;;  %v7117_v44 = vadd.f32 1.0, %v10741_v53  ;;  %7710 = vmatprep.mubr.bf16.mxu1 %v17896_v7  ;;  %v7242_v17 = vmul.f32 %v7114_v9, %v6730_v41  ;;  %v17899_v24 = vpack.c.bf16 %v15864_v57, %v15862_v59 }
 0xbf3   : > { %v10745_v43 = vpop.eup %10744  ;;  %v7243_v2 = vmul.f32 %v7115_v45, %v6731_v27  ;;  %v7116_v5 = vadd.f32 1.0, %v10743_v32  ;;  %7871 = vmatprep.mubr.bf16.mxu0 %v17897_v10 }
 0xbf4   : > { %v7245_v18 = vmul.f32 %v7117_v44, %v6733_v20  ;;  %v7118_v23 = vadd.f32 1.0, %v10745_v43 }
 0xbf5   : > { %v7359_v54 = vpack.c.bf16 %v7243_v2, %v7239_v15  ;;  %v7244_v36 = vmul.f32 %v7116_v5, %v6732_v55 }
 0xbf6   : > { %v7361_v63 = vpack.c.bf16 %v7245_v18, %v7241_v62  ;;  %v7246_v14 = vmul.f32 %v7118_v23, %v6734_v4 }
 0xbf7   : > { %v7360_v19 = vpack.c.bf16 %v7244_v36, %v7240_v50 }
 0xbf8   : > { %v7362_v38 = vpack.c.bf16 %v7246_v14, %v7242_v17 }
 0xbf9   : > { %7711 = vmatmul.mubr.bf16.vlgmr.msra.gmra.mrb[0].mxu1 %v17898_v28  ;;  %7872 = vmatmul.mubr.bf16.vlgmr.msra.gmra.mrb[0].mxu0 %v17899_v24 }
 0xbfa   : > { %7718 = vmatprep.mubr.bf16.mxu1 %v7356_v30  ;;  %7879 = vmatprep.mubr.bf16.mxu0 %v7358_v51 }
 0xc01   : > { %7719 = vmatmul.mubr.bf16.gmra.mrb[4].mxu1 %v7355_v8  ;;  %7880 = vmatmul.mubr.bf16.gmra.mrb[4].mxu0 %v7357_v29 }
 0xc02   : > { %7726 = vmatprep.mubr.bf16.mxu1 %v7360_v19  ;;  %7887 = vmatprep.mubr.bf16.mxu0 %v7362_v38 }
 0xc09   : > { %7727 = vmatmul.mubr.bf16.gmra.mrb[8].mxu1 %v7359_v54  ;;  %7888 = vmatmul.mubr.bf16.gmra.mrb[8].mxu0 %v7361_v63 }
 0xc14   : > { %v6389_v35 = vpop.f32.mrb[204].mxu1  ;;  %v6582_v16 = vpop.f32.mrb[204].mxu0 }
 0xc15   : > { %v6390_v58 = vadd.f32 %v6389_v35, %v15834_v22  ;;  %v6583_v0 = vadd.f32 %v6582_v16, %v15838_v21  ;;  %v6391_v33 = vpop.f32.mrb[205].mxu1  ;;  %v6584_v60 = vpop.f32.mrb[205].mxu0 }
 0xc16   : > { %v6392_v13 = vadd.f32 %v6391_v33, %v15842_v42  ;;  %v6585_v59 = vadd.f32 %v6584_v60, %v15844_v37  ;;  %v6393_v57 = vpop.f32.mrb[206].mxu1  ;;  %v6586_v49 = vpop.f32.mrb[206].mxu0 }
 0xc17   : > { %v6863_v8 = vmul.f32 0.70710677, %v6390_v58  ;;  %v6865_v29 = vmul.f32 0.70710677, %v6583_v0  ;;  %v6394_v40 = vadd.f32 %v6393_v57, %v15834_v22  ;;  %v6587_v39 = vadd.f32 %v6586_v49, %v15838_v21  ;;  %v6395_v30 = vpop.f32.mrb[207].mxu1  ;;  %v6588_v52 = vpop.f32.mrb[207].mxu0 }
 0xc18   : > { %v6864_v6 = vmul.f32 0.70710677, %v6392_v13  ;;  %v6866_v1 = vmul.f32 0.70710677, %v6585_v59  ;;  %v6396_v12 = vadd.f32 %v6395_v30, %v15842_v42  ;;  %v6589_v31 = vadd.f32 %v6588_v52, %v15844_v37 }
 0xc19   : > { %10746 = verf.f32 %v6863_v8  ;;  %v6867_v3 = vmul.f32 0.70710677, %v6394_v40  ;;  %v6869_v51 = vmul.f32 0.70710677, %v6587_v39  ;;  %v6735_v5 = vmul.f32 0.5, %v6390_v58 }
 0xc1a   : > { %10748 = verf.f32 %v6865_v29  ;;  %v6868_v53 = vmul.f32 0.70710677, %v6396_v12  ;;  %v6870_v47 = vmul.f32 0.70710677, %v6589_v31  ;;  %v6737_v4 = vmul.f32 0.5, %v6583_v0 }
 0xc1b   : > { %10750 = verf.f32 %v6864_v6  ;;  %v16015_v17 = vmul.f32 0.5, %v6392_v13  ;;  %v16017_v63 = vmul.f32 0.5, %v6585_v59  ;;  %v6739_v14 = vmul.f32 0.5, %v6394_v40 }
 0xc1c   : > { %10752 = verf.f32 %v6866_v1  ;;  %v6399_v25 = vpop.f32.mrb[208].mxu1  ;;  %v6592_v45 = vpop.f32.mrb[208].mxu0  ;;  %v6741_v19 = vmul.f32 0.5, %v6587_v39  ;;  %v16020_v33 = vmul.f32 0.5, %v6396_v12  ;;  %v16022_v60 = vmul.f32 0.5, %v6589_v31 }
 0xc1d   : > { %10754 = verf.f32 %v6867_v3  ;;  %v6400_v27 = vadd.f32 %v6399_v25, %v15834_v22  ;;  %v6401_v32 = vpop.f32.mrb[209].mxu1  ;;  %v6593_v41 = vadd.f32 %v6592_v45, %v15838_v21  ;;  %v6594_v20 = vpop.f32.mrb[209].mxu0 }
 0xc1e   : > { %10756 = verf.f32 %v6869_v51  ;;  %v6402_v9 = vadd.f32 %v6401_v32, %v15842_v42  ;;  %v6403_v44 = vpop.f32.mrb[210].mxu1  ;;  %v6595_v15 = vadd.f32 %v6594_v20, %v15844_v37  ;;  %v6596_v2 = vpop.f32.mrb[210].mxu0 }
 0xc1f   : > { %10758 = verf.f32 %v6868_v53  ;;  %v6871_v43 = vmul.f32 0.70710677, %v6400_v27  ;;  %v6405_v55 = vpop.f32.mrb[211].mxu1  ;;  %v6873_v62 = vmul.f32 0.70710677, %v6593_v41  ;;  %v6598_v18 = vpop.f32.mrb[211].mxu0  ;;  %v6404_v54 = vadd.f32 %v6403_v44, %v15834_v22 }
 0xc20   : > { %10760 = verf.f32 %v6870_v47  ;;  %v6872_v23 = vmul.f32 0.70710677, %v6402_v9  ;;  %v6874_v50 = vmul.f32 0.70710677, %v6595_v15  ;;  %v6597_v36 = vadd.f32 %v6596_v2, %v15838_v21 }
 0xc21   : > { %10762 = verf.f32 %v6871_v43  ;;  %v6406_v7 = vadd.f32 %v6405_v55, %v15842_v42  ;;  %v6875_v24 = vmul.f32 0.70710677, %v6404_v54  ;;  %v6599_v35 = vadd.f32 %v6598_v18, %v15844_v37 }
 0xc22   : > { %10764 = verf.f32 %v6873_v62  ;;  %v6877_v13 = vmul.f32 0.70710677, %v6597_v36  ;;  %v16024_v49 = vmul.f32 0.5, %v6400_v27  ;;  %v16026_v8 = vmul.f32 0.5, %v6593_v41 }
 0xc23   : > { %v10747_v10 = vpop.eup %10746  ;;  %10766 = verf.f32 %v6872_v23  ;;  %v6876_v29 = vmul.f32 0.70710677, %v6406_v7  ;;  %v16028_v30 = vmul.f32 0.5, %v6402_v9  ;;  %v16030_v52 = vmul.f32 0.5, %v6595_v15 }
 0xc24   : > { %v10749_v38 = vpop.eup %10748  ;;  %v7119_v28 = vadd.f32 1.0, %v10747_v10  ;;  %v6409_v16 = vpop.f32.mrb[212].mxu1  ;;  %10768 = verf.f32 %v6874_v50  ;;  %v6747_v25 = vmul.f32 0.5, %v6404_v54  ;;  %v6878_v47 = vmul.f32 0.70710677, %v6599_v35 }
 0xc25   : > { %v6602_v58 = vpop.f32.mrb[212].mxu0  ;;  %v10751_v0 = vpop.eup %10750  ;;  %10770 = verf.f32 %v6875_v24  ;;  %v7121_v39 = vadd.f32 1.0, %v10749_v38  ;;  %v6410_v9 = vadd.f32 %v6409_v16, %v15834_v22  ;;  %v6749_v10 = vmul.f32 0.5, %v6597_v36 }
 0xc26   : > { %v6411_v57 = vpop.f32.mrb[213].mxu1  ;;  %v10753_v59 = vpop.eup %10752  ;;  %10772 = verf.f32 %v6877_v13  ;;  %v16034_v51 = vmul.f32 %v7119_v28, %v6735_v5  ;;  %v7120_v32 = vadd.f32 1.0, %v10751_v0  ;;  %v6603_v15 = vadd.f32 %v6602_v58, %v15838_v21 }
 0xc27   : > { %v6604_v6 = vpop.f32.mrb[213].mxu0  ;;  %v6413_v1 = vpop.f32.mrb[214].mxu1  ;;  %10774 = verf.f32 %v6876_v29  ;;  %v7122_v44 = vadd.f32 1.0, %v10753_v59  ;;  %v16042_v55 = vmul.f32 %v7121_v39, %v6737_v4  ;;  %v6879_v62 = vmul.f32 0.70710677, %v6410_v9 }
 0xc28   : > { %v10755_v40 = vpop.eup %10754  ;;  %v6606_v12 = vpop.f32.mrb[214].mxu0  ;;  %10776 = verf.f32 %v6878_v47  ;;  %v6412_v18 = vadd.f32 %v6411_v57, %v15842_v42  ;;  %v16049_v38 = vmul.f32 0.5, %v6406_v7  ;;  %v16062_v13 = vmul.f32 %v7120_v32, %v16015_v17 }
 0xc29   : > { %v16032_v31 = vpop.f32.mrb[215].mxu1  ;;  %v10757_v3 = vpop.eup %10756  ;;  %v7123_v53 = vadd.f32 1.0, %v10755_v40  ;;  %10778 = verf.f32 %v6879_v62  ;;  %v16065_v36 = vmul.f32 %v7122_v44, %v16017_v63  ;;  %v16067_v7 = vmul.f32 0.5, %v6599_v35 }
 0xc2a   : > { %v16036_v27 = vpop.f32.mrb[215].mxu0  ;;  %v10759_v45 = vpop.eup %10758  ;;  %v7125_v41 = vadd.f32 1.0, %v10757_v3  ;;  %v6881_v57 = vmul.f32 0.70710677, %v6603_v15  ;;  %v16073_v3 = vmul.f32 0.5, %v6410_v9  ;;  %v6605_v47 = vadd.f32 %v6604_v6, %v15844_v37 }
 0xc2b   : > { %v10761_v20 = vpop.eup %10760  ;;  %v16039_v43 = vmul.f32 %v7123_v53, %v6739_v14  ;;  %v7124_v54 = vadd.f32 1.0, %v10759_v45  ;;  %v6880_v53 = vmul.f32 0.70710677, %v6412_v18  ;;  %v16083_v32 = vmul.f32 0.5, %v6603_v15 }
 0xc2c   : > { %v10763_v2 = vpop.eup %10762  ;;  %v16044_v5 = vmul.f32 %v7125_v41, %v6741_v19  ;;  %v16051_v14 = vpop.f32.mrb[216].mxu1  ;;  %v7126_v39 = vadd.f32 1.0, %v10761_v20  ;;  %v6414_v41 = vadd.f32 %v6413_v1, %v15834_v22  ;;  %v6607_v44 = vadd.f32 %v6606_v12, %v15838_v21 }
 0xc2d   : > { %v10765_v23 = vpop.eup %10764  ;;  %v16053_v28 = vpop.f32.mrb[216].mxu0  ;;  %v7127_v19 = vadd.f32 1.0, %v10763_v2  ;;  %v16081_v35 = vmul.f32 %v7124_v54, %v16020_v33  ;;  %10780 = verf.f32 %v6881_v57  ;;  %v6882_v4 = vmul.f32 0.70710677, %v6605_v47 }
 0xc2e   : > { %v7129_v24 = vadd.f32 1.0, %v10765_v23  ;;  %v16057_v16 = vpop.f32.mrb[217].mxu1  ;;  %v16059_v58 = vpop.f32.mrb[217].mxu0  ;;  %v6883_v33 = vmul.f32 0.70710677, %v6414_v41  ;;  %10782 = verf.f32 %v6880_v53  ;;  %v16108_v57 = vmul.f32 0.5, %v6412_v18 }
 0xc2f   : > { %v10767_v0 = vpop.eup %10766  ;;  %v16069_v59 = vpop.f32.mrb[218].mxu1  ;;  %v16088_v9 = vmul.f32 %v7127_v19, %v16024_v49  ;;  %v6885_v1 = vmul.f32 0.70710677, %v6607_v44  ;;  %10784 = verf.f32 %v6882_v4  ;;  %v6416_v49 = vadd.f32 %v16032_v31, %v15842_v42 }
 0xc30   : > { %v16071_v29 = vpop.f32.mrb[218].mxu0  ;;  %v10769_v40 = vpop.eup %10768  ;;  %v16091_v6 = vmul.f32 %v7129_v24, %v16026_v8  ;;  %v7128_v2 = vadd.f32 1.0, %v10767_v0  ;;  %v6609_v8 = vadd.f32 %v16036_v27, %v15844_v37  ;;  %v7254_v0 = vmul.f32 %v7126_v39, %v16022_v60 }
 0xc31   : > { %v16076_v45 = vpop.f32.mrb[219].mxu1  ;;  %v16078_v17 = vpop.f32.mrb[219].mxu0  ;;  %v7130_v15 = vadd.f32 1.0, %v10769_v40  ;;  %10786 = verf.f32 %v6883_v33  ;;  %v6884_v40 = vmul.f32 0.70710677, %v6416_v49  ;;  %v6613_v33 = vadd.f32 %v16053_v28, %v15838_v21 }
 0xc32   : > { %v10771_v63 = vpop.eup %10770  ;;  %v16115_v31 = vmul.f32 %v7128_v2, %v16028_v30  ;;  %10788 = verf.f32 %v6885_v1  ;;  %v6422_v1 = vadd.f32 %v16057_v16, %v15842_v42  ;;  %v6757_v56 = vmul.f32 0.5, %v6607_v44 }
 0xc33   : > { %v10773_v20 = vpop.eup %10772  ;;  %v7131_v62 = vadd.f32 1.0, %v10771_v63  ;;  %v16130_v2 = vmul.f32 %v7130_v15, %v16030_v52  ;;  %10790 = verf.f32 %v6884_v40  ;;  %v6889_v48 = vmul.f32 0.70710677, %v6613_v33 }
 0xc34   : > { %v7133_v23 = vadd.f32 1.0, %v10773_v20  ;;  %v10775_v54 = vpop.eup %10774  ;;  %v16101_v19 = vpop.f32.mrb[220].mxu1  ;;  %v6886_v20 = vmul.f32 0.70710677, %v6609_v8  ;;  %v16146_v28 = vmul.f32 0.5, %v6416_v49  ;;  %v16148_v40 = vmul.f32 0.5, %v6609_v8 }
 0xc35   : > { %v16093_v50 = vmul.f32 %v7131_v62, %v6747_v25  ;;  %v10777_v12 = vpop.eup %10776  ;;  %v16103_v24 = vpop.f32.mrb[220].mxu0  ;;  %v7132_v18 = vadd.f32 1.0, %v10775_v54  ;;  %v6420_v62 = vadd.f32 %v16051_v14, %v15834_v22  ;;  %v16136_v54 = vmul.f32 0.5, %v6605_v47 }
 0xc36   : > { %v16095_v11 = vmul.f32 %v7133_v23, %v6749_v10  ;;  %v16110_v10 = vpop.f32.mrb[221].mxu1  ;;  %v16112_v4 = vpop.f32.mrb[221].mxu0  ;;  %v7134_v63 = vadd.f32 1.0, %v10777_v12  ;;  %10792 = verf.f32 %v6886_v20  ;;  %v6615_v14 = vadd.f32 %v16059_v58, %v15844_v37 }
 0xc37   : > { %v16119_v53 = vpop.f32.mrb[222].mxu1  ;;  %v16121_v60 = vpop.f32.mrb[222].mxu0  ;;  %v6887_v12 = vmul.f32 0.70710677, %v6420_v62  ;;  %v6755_v25 = vmul.f32 0.5, %v6414_v41  ;;  %v16141_v52 = vmul.f32 %v7132_v18, %v16049_v38  ;;  %v7364_v58 = vpack.c.bf16 %v16081_v35, %v16062_v13 }
 0xc38   : > { %v10779_v39 = vpop.eup %10778  ;;  %v16125_v23 = vpop.f32.mrb[223].mxu1  ;;  %v16144_v15 = vmul.f32 %v7134_v63, %v16067_v7  ;;  %v6888_v16 = vmul.f32 0.70710677, %v6422_v1  ;;  %v6890_v20 = vmul.f32 0.70710677, %v6615_v14  ;;  %v7366_v7 = vpack.c.bf16 %v7254_v0, %v16065_v36 }
 0xc39   : > { %v16127_v30 = vpop.f32.mrb[223].mxu0  ;;  %v7135_v27 = vadd.f32 1.0, %v10779_v39  ;;  %v10781_v47 = vpop.eup %10780  ;;  %10794 = verf.f32 %v6887_v12  ;;  %v16156_v39 = vmul.f32 0.5, %v6420_v62  ;;  %v6424_v49 = vadd.f32 %v16069_v59, %v15834_v22  ;;  %7734 = vmatprep.mubr.bf16.mxu1 %v7364_v58 }
 0xc3a   : > { %v10783_v38 = vpop.eup %10782  ;;  %10796 = verf.f32 %v6889_v48  ;;  %v6617_v35 = vadd.f32 %v16071_v29, %v15838_v21  ;;  %v6426_v48 = vadd.f32 %v16076_v45, %v15842_v42  ;;  %v7137_v62 = vadd.f32 1.0, %v10781_v47  ;;  %7895 = vmatprep.mubr.bf16.mxu0 %v7366_v7 }
 0xc3b   : > { %v10785_v63 = vpop.eup %10784  ;;  %v16166_v13 = vmul.f32 %v7135_v27, %v16073_v3  ;;  %10798 = verf.f32 %v6888_v16  ;;  %v6891_v12 = vmul.f32 0.70710677, %v6424_v49  ;;  %v17900_v3 = vpack.c.bf16 %v16039_v43, %v16034_v51 }
 0xc3c   : > { %v16152_v41 = vpop.f32.mrb[224].mxu1  ;;  %v16154_v44 = vpop.f32.mrb[224].mxu0  ;;  %10800 = verf.f32 %v6890_v20  ;;  %v6619_v27 = vadd.f32 %v16078_v17, %v15844_v37  ;;  %v16185_v46 = vmul.f32 0.5, %v6613_v33  ;;  %v16187_v26 = vmul.f32 0.5, %v6422_v1 }
 0xc3d   : > { %v16161_v8 = vpop.f32.mrb[225].mxu1  ;;  %v16163_v18 = vpop.f32.mrb[225].mxu0  ;;  %7735 = vmatmul.mubr.bf16.gmra.mrb[12].mxu1 %v17900_v3  ;;  %v6893_v47 = vmul.f32 0.70710677, %v6617_v35  ;;  %v17902_v20 = vpack.c.bf16 %v16044_v5, %v16042_v55  ;;  %v16192_v43 = vmul.f32 0.5, %v6615_v14  ;;  %10802 = verf.f32 %v6891_v12 }
 0xc3e   : > { %v16172_v36 = vpop.f32.mrb[226].mxu1  ;;  %v16174_v0 = vpop.f32.mrb[226].mxu0  ;;  %v6892_v17 = vmul.f32 0.70710677, %v6426_v48  ;;  %v7136_v3 = vadd.f32 1.0, %v10783_v38  ;;  %v16197_v1 = vmul.f32 %v7137_v62, %v16083_v32  ;;  %v7138_v34 = vadd.f32 1.0, %v10785_v63 }
 0xc3f   : > { %v10787_v59 = vpop.eup %10786  ;;  %v16181_v29 = vpop.f32.mrb[227].mxu1  ;;  %7896 = vmatmul.mubr.bf16.gmra.mrb[12].mxu0 %v17902_v20  ;;  %10804 = verf.f32 %v6893_v47  ;;  %v6430_v55 = vadd.f32 %v16101_v19, %v15834_v22  ;;  %v6763_v47 = vmul.f32 0.5, %v6424_v49  ;;  %v16224_v32 = vmul.f32 0.5, %v6426_v48 }
 0xc40   : > { %v16183_v16 = vpop.f32.mrb[227].mxu0  ;;  %v10789_v45 = vpop.eup %10788  ;;  %v7139_v58 = vadd.f32 1.0, %v10787_v59  ;;  %v6894_v59 = vmul.f32 0.70710677, %v6619_v27  ;;  %10806 = verf.f32 %v6892_v17  ;;  %v16240_v48 = vmul.f32 0.5, %v6619_v27 }
 0xc41   : > { %17901 = vst [vmem:[#allocation154_spill] sm:$0xff] %v16183_v16  ;;  %v7141_v51 = vadd.f32 1.0, %v10789_v45  ;;  %v10791_v7 = vpop.eup %10790  ;;  %v6895_v63 = vmul.f32 0.70710677, %v6430_v55 }
 0xc42   : > { %v16194_v61 = vmul.f32 %v7139_v58, %v6755_v25  ;;  %v10793_v33 = vpop.eup %10792  ;;  %v7140_v14 = vadd.f32 1.0, %v10791_v7  ;;  %v6623_v25 = vadd.f32 %v16103_v24, %v15838_v21  ;;  %10808 = verf.f32 %v6894_v59 }
 0xc43   : > { %v16199_v16 = vmul.f32 %v7141_v51, %v6757_v56  ;;  %v7142_v56 = vadd.f32 1.0, %v10793_v33  ;;  %v10795_v45 = vpop.eup %10794  ;;  %v16218_v58 = vmul.f32 %v7136_v3, %v16108_v57  ;;  %v6765_v24 = vmul.f32 0.5, %v6617_v35 }
 0xc44   : > { %v16207_v38 = vpop.f32.mrb[228].mxu1  ;;  %v16209_v12 = vpop.f32.mrb[228].mxu0  ;;  %v6897_v20 = vmul.f32 0.70710677, %v6623_v25  ;;  %10810 = verf.f32 %v6895_v63  ;;  %v6432_v59 = vadd.f32 %v16110_v10, %v15842_v42  ;;  %v6625_v33 = vadd.f32 %v16112_v4, %v15844_v37 }
 0xc45   : > { %v16213_v62 = vpop.f32.mrb[229].mxu1  ;;  %v16215_v19 = vpop.f32.mrb[229].mxu0  ;;  %v16235_v35 = vmul.f32 %v7138_v34, %v16136_v54  ;;  %v16238_v3 = vmul.f32 %v7140_v14, %v16146_v28  ;;  %v7368_v63 = vpack.c.bf16 %v16141_v52, %v16115_v31  ;;  %v7143_v4 = vadd.f32 1.0, %v10795_v45 }
 0xc46   : > { %v16220_v51 = vpop.f32.mrb[230].mxu1  ;;  %v16222_v17 = vpop.f32.mrb[230].mxu0  ;;  %10812 = verf.f32 %v6897_v20  ;;  %v6898_v34 = vmul.f32 0.70710677, %v6625_v33  ;;  %v7370_v54 = vpack.c.bf16 %v16144_v15, %v16130_v2  ;;  %v16251_v14 = vmul.f32 0.5, %v6623_v25 }
 0xc47   : > { %17903 = vst [vmem:[#allocation44_spill] sm:$0xff] %v16220_v51  ;;  %17904 = vst [vmem:[#allocation151_spill] sm:$0xff] %v16222_v17  ;;  %v10797_v7 = vpop.eup %10796  ;;  %v16230_v5 = vpop.f32.mrb[231].mxu1  ;;  %v16245_v17 = vmul.f32 %v7142_v56, %v16148_v40  ;;  %7742 = vmatprep.mubr.bf16.mxu1 %v7368_v63  ;;  %v6434_v31 = vadd.f32 %v16119_v53, %v15834_v22  ;;  %v6627_v52 = vadd.f32 %v16121_v60, %v15838_v21 }
 0xc48   : > { %17905 = vst [vmem:[#allocation153_spill] sm:$0xff] %v16230_v5  ;;  %v16232_v57 = vpop.f32.mrb[231].mxu0  ;;  %v10799_v49 = vpop.eup %10798  ;;  %v16247_v5 = vmul.f32 0.5, %v6430_v55  ;;  %v7145_v51 = vadd.f32 1.0, %v10797_v7  ;;  %v17907_v40 = vpack.c.bf16 %v16093_v50, %v16088_v9  ;;  %7903 = vmatprep.mubr.bf16.mxu0 %v7370_v54  ;;  %v6436_v2 = vadd.f32 %v16125_v23, %v15842_v42 }
 0xc49   : > { %17906 = vst [vmem:[#allocation54_spill] sm:$0xff] %v16232_v57  ;;  %v10801_v10 = vpop.eup %10800  ;;  %v6896_v57 = vmul.f32 0.70710677, %v6432_v59  ;;  %v7144_v27 = vadd.f32 1.0, %v10799_v49  ;;  %v6899_v25 = vmul.f32 0.70710677, %v6434_v31  ;;  %v17908_v53 = vpack.c.bf16 %v16095_v11, %v16091_v6 }
 0xc4a   : > { %v10803_v28 = vpop.eup %10802  ;;  %7743 = vmatmul.mubr.bf16.gmra.mrb[16].mxu1 %v17907_v40  ;;  %v7146_v56 = vadd.f32 1.0, %v10801_v10  ;;  %v6629_v60 = vadd.f32 %v16127_v30, %v15844_v37  ;;  %v16268_v9 = vmul.f32 %v7143_v4, %v16156_v39  ;;  %v16271_v20 = vmul.f32 %v7145_v51, %v16185_v46 }
 0xc4b   : > { %v10805_v55 = vpop.eup %10804  ;;  %v7147_v45 = vadd.f32 1.0, %v10803_v28  ;;  %10814 = verf.f32 %v6896_v57  ;;  %7904 = vmatmul.mubr.bf16.gmra.mrb[16].mxu0 %v17908_v53  ;;  %v6901_v23 = vmul.f32 0.70710677, %v6627_v52  ;;  %v16277_v63 = vmul.f32 0.5, %v6432_v59 }
 0xc4c   : > { %v7149_v15 = vadd.f32 1.0, %v10805_v55  ;;  %10816 = verf.f32 %v6898_v34  ;;  %v10807_v50 = vpop.eup %10806  ;;  %v6900_v11 = vmul.f32 0.70710677, %v6436_v2  ;;  %v16280_v6 = vmul.f32 %v7144_v27, %v16187_v26 }
 0xc4d   : > { %v16273_v7 = vmul.f32 %v7147_v45, %v6763_v47  ;;  %v10809_v57 = vpop.eup %10808  ;;  %10818 = verf.f32 %v6899_v25  ;;  %v16284_v39 = vmul.f32 0.5, %v6625_v33  ;;  %v16287_v47 = vmul.f32 %v7146_v56, %v16192_v43 }
 0xc4e   : > { %v16275_v49 = vmul.f32 %v7149_v15, %v6765_v24  ;;  %10820 = verf.f32 %v6901_v23  ;;  %v10811_v46 = vpop.eup %10810  ;;  %v7148_v51 = vadd.f32 1.0, %v10807_v50  ;;  %v6902_v59 = vmul.f32 0.70710677, %v6629_v60 }
 0xc4f   : > { %v7375_v30 = vpack.c.bf16 %v16273_v7, %v16268_v9  ;;  %v7150_v10 = vadd.f32 1.0, %v10809_v57  ;;  %v6440_v26 = vadd.f32 %v16152_v41, %v15834_v22  ;;  %v6633_v4 = vadd.f32 %v16154_v44, %v15838_v21  ;;  %v17913_v7 = vld [vmem:[#allocation151_spill] sm:$0xff] }
 0xc50   : > { %v7377_v24 = vpack.c.bf16 %v16275_v49, %v16271_v20  ;;  %v6442_v33 = vadd.f32 %v16161_v8, %v15842_v42  ;;  %v6771_v34 = vmul.f32 0.5, %v6434_v31  ;;  %10822 = verf.f32 %v6900_v11  ;;  %v10813_v28 = vpop.eup %10812  ;;  %v17911_v11 = vld [vmem:[#allocation154_spill] sm:$0xff] }
 0xc51   : > { %v6635_v43 = vadd.f32 %v16163_v18, %v15844_v37  ;;  %v7372_v54 = vpack.c.bf16 %v16238_v3, %v16218_v58  ;;  %v7151_v27 = vadd.f32 1.0, %v10811_v46  ;;  %v6773_v40 = vmul.f32 0.5, %v6627_v52 }
 0xc52   : > { %v16301_v55 = vmul.f32 0.5, %v6436_v2  ;;  %v6903_v41 = vmul.f32 0.70710677, %v6440_v26  ;;  %v16304_v56 = vmul.f32 %v7148_v51, %v16224_v32  ;;  %10824 = verf.f32 %v6902_v59 }
 0xc53   : > { %v6905_v44 = vmul.f32 0.70710677, %v6633_v4  ;;  %v6904_v8 = vmul.f32 0.70710677, %v6442_v33  ;;  %7750 = vmatprep.mubr.bf16.mxu1 %v7372_v54  ;;  %v16307_v45 = vmul.f32 %v7150_v10, %v16240_v48  ;;  %v16309_v18 = vmul.f32 0.5, %v6629_v60 }
 0xc54   : > { %10826 = verf.f32 %v6903_v41  ;;  %v6906_v58 = vmul.f32 0.70710677, %v6635_v43  ;;  %v17909_v3 = vpack.c.bf16 %v16194_v61, %v16166_v13  ;;  %v7153_v2 = vadd.f32 1.0, %v10813_v28 }
 0xc55   : > { %v10815_v31 = vpop.eup %10814  ;;  %10828 = verf.f32 %v6905_v44  ;;  %v7374_v32 = vpack.c.bf16 %v16245_v17, %v16235_v35  ;;  %v6444_v15 = vadd.f32 %v16172_v36, %v15834_v22  ;;  %v16319_v48 = vmul.f32 %v7151_v27, %v16247_v5 }
 0xc56   : > { %7751 = vmatmul.mubr.bf16.gmra.mrb[20].mxu1 %v17909_v3  ;;  %v10817_v52 = vpop.eup %10816  ;;  %10830 = verf.f32 %v6904_v8  ;;  %v6637_v25 = vadd.f32 %v16174_v0, %v15838_v21  ;;  %v6446_v61 = vadd.f32 %v16181_v29, %v15842_v42  ;;  %v7152_v53 = vadd.f32 1.0, %v10815_v31 }
 0xc57   : > { %v10819_v13 = vpop.eup %10818  ;;  %v16325_v60 = vmul.f32 0.5, %v6440_v26  ;;  %v16327_v50 = vmul.f32 0.5, %v6633_v4  ;;  %7911 = vmatprep.mubr.bf16.mxu0 %v7374_v32  ;;  %v6907_v17 = vmul.f32 0.70710677, %v6444_v15  ;;  %v7154_v36 = vadd.f32 1.0, %v10817_v52 }
 0xc58   : > { %v10821_v35 = vpop.eup %10820  ;;  %v7155_v23 = vadd.f32 1.0, %v10819_v13  ;;  %10832 = verf.f32 %v6906_v58  ;;  %v6909_v5 = vmul.f32 0.70710677, %v6637_v25  ;;  %v17910_v57 = vpack.c.bf16 %v16199_v16, %v16197_v1 }
 0xc59   : > { %v7157_v0 = vadd.f32 1.0, %v10821_v35  ;;  %10834 = verf.f32 %v6907_v17  ;;  %v6908_v29 = vmul.f32 0.70710677, %v6446_v61  ;;  %v6639_v46 = vadd.f32 %v17911_v11, %v15844_v37 }
 0xc5a   : > { %7912 = vmatmul.mubr.bf16.gmra.mrb[20].mxu0 %v17910_v57  ;;  %v16335_v51 = vmul.f32 %v7153_v2, %v16251_v14  ;;  %v16337_v59 = vmul.f32 %v7155_v23, %v6771_v34  ;;  %10836 = verf.f32 %v6909_v5  ;;  %v6450_v10 = vadd.f32 %v16207_v38, %v15834_v22  ;;  %v10823_v26 = vpop.eup %10822  ;;  %v17912_v57 = vld [vmem:[#allocation44_spill] sm:$0xff] }
 0xc5b   : > { %v16341_v4 = vmul.f32 %v7157_v0, %v6773_v40  ;;  %v16343_v16 = vmul.f32 0.5, %v6442_v33  ;;  %10838 = verf.f32 %v6908_v29  ;;  %v6910_v1 = vmul.f32 0.70710677, %v6639_v46 }
 0xc5c   : > { %v16346_v54 = vmul.f32 %v7152_v53, %v16277_v63  ;;  %v16349_v28 = vmul.f32 %v7154_v36, %v16284_v39  ;;  %v7379_v14 = vpack.c.bf16 %v16337_v59, %v16319_v48  ;;  %v16353_v34 = vmul.f32 0.5, %v6635_v43  ;;  %v10825_v27 = vpop.eup %10824 }
 0xc5d   : > { %v7381_v38 = vpack.c.bf16 %v16341_v4, %v16335_v51  ;;  %10840 = verf.f32 %v6910_v1  ;;  %v6911_v33 = vmul.f32 0.70710677, %v6450_v10  ;;  %v16359_v40 = vadd.f32 %v16209_v12, %v15838_v21 }
 0xc5e   : > { %v10827_v63 = vpop.eup %10826  ;;  %v7156_v41 = vadd.f32 1.0, %v10823_v26  ;;  %v16363_v39 = vadd.f32 %v16213_v62, %v15842_v42  ;;  %v16367_v43 = vadd.f32 %v16215_v19, %v15844_v37  ;;  %v7376_v44 = vpack.c.bf16 %v16304_v56, %v16280_v6 }
 0xc5f   : > { %v10829_v8 = vpop.eup %10828  ;;  %v6779_v31 = vmul.f32 0.5, %v6444_v15  ;;  %v6781_v58 = vmul.f32 0.5, %v6637_v25  ;;  %v6780_v3 = vmul.f32 0.5, %v6446_v61  ;;  %v6913_v12 = vmul.f32 0.70710677, %v16359_v40 }
 0xc60   : > { %v10831_v52 = vpop.eup %10830  ;;  %v7158_v2 = vadd.f32 1.0, %v10825_v27  ;;  %v7159_v32 = vadd.f32 1.0, %v10827_v63  ;;  %10842 = verf.f32 %v6911_v33  ;;  %v6912_v62 = vmul.f32 0.70710677, %v16363_v39  ;;  %7758 = vmatprep.mubr.bf16.mxu1 %v7376_v44 }
 0xc61   : > { %v7161_v13 = vadd.f32 1.0, %v10829_v8  ;;  %v6782_v53 = vmul.f32 0.5, %v6639_v46  ;;  %10844 = verf.f32 %v6913_v12  ;;  %v6914_v19 = vmul.f32 0.70710677, %v16367_v43  ;;  %7759 = vmatmul.mubr.bf16.gmra.mrb[24].mxu1 %v7375_v30  ;;  %v17914_v46 = vld [vmem:[#allocation153_spill] sm:$0xff] }
 0xc62   : > { %v10833_v15 = vpop.eup %10832  ;;  %v7284_v25 = vmul.f32 %v7156_v41, %v16301_v55  ;;  %v16378_v61 = vmul.f32 0.5, %v6450_v10  ;;  %10846 = verf.f32 %v6912_v62  ;;  %v7378_v17 = vpack.c.bf16 %v16307_v45, %v16287_v47 }
 0xc63   : > { %v6459_v6 = vpop.f32.mrb[232].mxu1  ;;  %v6652_v56 = vpop.f32.mrb[232].mxu0  ;;  %v7160_v5 = vadd.f32 1.0, %v10831_v52  ;;  %10848 = verf.f32 %v6914_v19  ;;  %v6454_v9 = vadd.f32 %v17912_v57, %v15834_v22  ;;  %v6647_v30 = vadd.f32 %v17913_v7, %v15838_v21 }
 0xc64   : > { %v6461_v35 = vpop.f32.mrb[233].mxu1  ;;  %v6654_v36 = vpop.f32.mrb[233].mxu0  ;;  %v7286_v11 = vmul.f32 %v7158_v2, %v16309_v18  ;;  %v16392_v47 = vmul.f32 %v7159_v32, %v16325_v60  ;;  %7919 = vmatprep.mubr.bf16.mxu0 %v7378_v17  ;;  %v6456_v10 = vadd.f32 %v17914_v46, %v15842_v42  ;;  %v16401_v33 = vmul.f32 %v7161_v13, %v16327_v50  ;;  %v17915_v18 = vld [vmem:[#allocation54_spill] sm:$0xff] }
 0xc65   : > { %v10835_v23 = vpop.eup %10834  ;;  %v16386_v0 = vpop.f32.mrb[234].mxu1  ;;  %v6915_v41 = vmul.f32 0.70710677, %v6454_v9  ;;  %7920 = vmatmul.mubr.bf16.gmra.mrb[24].mxu0 %v7377_v24  ;;  %v6649_v60 = vadd.f32 %v17915_v18, %v15844_v37  ;;  %v7162_v44 = vadd.f32 1.0, %v10833_v15  ;;  %v6917_v52 = vmul.f32 0.70710677, %v6647_v30 }
 0xc66   : > { %v16388_v55 = vpop.f32.mrb[234].mxu0  ;;  %v10837_v29 = vpop.eup %10836  ;;  %v7163_v45 = vadd.f32 1.0, %v10835_v23  ;;  %v7288_v32 = vmul.f32 %v7160_v5, %v16343_v16  ;;  %v6916_v50 = vmul.f32 0.70710677, %v6456_v10  ;;  %v7380_v19 = vpack.c.bf16 %v7284_v25, %v16346_v54 }
 0xc67   : > { %v16396_v26 = vpop.f32.mrb[235].mxu1  ;;  %v16398_v1 = vpop.f32.mrb[235].mxu0  ;;  %v7165_v63 = vadd.f32 1.0, %v10837_v29  ;;  %10850 = verf.f32 %v6915_v41  ;;  %v7290_v17 = vmul.f32 %v7162_v44, %v16353_v34  ;;  %v7382_v5 = vpack.c.bf16 %v7286_v11, %v16349_v28 }
 0xc68   : > { %v10839_v27 = vpop.eup %10838  ;;  %v16408_v8 = vmul.f32 %v7163_v45, %v6779_v31  ;;  %10852 = verf.f32 %v6917_v52  ;;  %v6918_v31 = vmul.f32 0.70710677, %v6649_v60  ;;  %7766 = vmatprep.mubr.bf16.mxu1 %v7380_v19  ;;  %v16429_v54 = vadd.f32 %v6459_v6, %v15834_v22 }
 0xc69   : > { %v7164_v12 = vadd.f32 1.0, %v10839_v27  ;;  %v10841_v2 = vpop.eup %10840  ;;  %v16411_v62 = vmul.f32 %v7165_v63, %v6781_v58  ;;  %10854 = verf.f32 %v6916_v50  ;;  %v16432_v25 = vadd.f32 %v6652_v56, %v15838_v21  ;;  %7927 = vmatprep.mubr.bf16.mxu0 %v7382_v5  ;;  %7767 = vmatmul.mubr.bf16.gmra.mrb[28].mxu1 %v7379_v14 }
 0xc6a   : > { %v7383_v13 = vpack.c.bf16 %v16408_v8, %v16392_v47  ;;  %v7166_v49 = vadd.f32 1.0, %v10841_v2  ;;  %v10843_v58 = vpop.eup %10842  ;;  %10856 = verf.f32 %v6918_v31  ;;  %v16435_v45 = vadd.f32 %v6461_v35, %v15842_v42 }
 0xc6b   : > { %v7292_v20 = vmul.f32 %v7164_v12, %v6780_v3  ;;  %v7385_v24 = vpack.c.bf16 %v16411_v62, %v16401_v33  ;;  %v16418_v15 = vpop.f32.mrb[236].mxu1  ;;  %v16420_v16 = vpop.f32.mrb[236].mxu0  ;;  %v6785_v11 = vmul.f32 0.5, %v16359_v40  ;;  %v6784_v46 = vmul.f32 0.5, %v16363_v39 }
 0xc6c   : > { %v7294_v23 = vmul.f32 %v7166_v49, %v6782_v53  ;;  %v16424_v57 = vpop.f32.mrb[237].mxu1  ;;  %v16426_v7 = vpop.f32.mrb[237].mxu0  ;;  %v16447_v56 = vadd.f32 %v6654_v36, %v15844_v37  ;;  %v6786_v41 = vmul.f32 0.5, %v16367_v43  ;;  %v6787_v18 = vmul.f32 0.5, %v6454_v9 }
 0xc6d   : > { %v7384_v3 = vpack.c.bf16 %v7292_v20, %v7288_v32  ;;  %v10845_v29 = vpop.eup %10844  ;;  %v16437_v34 = vpop.f32.mrb[238].mxu1  ;;  %v6789_v40 = vmul.f32 0.5, %v6647_v30  ;;  %7928 = vmatmul.mubr.bf16.gmra.mrb[28].mxu0 %v7381_v38  ;;  %v6919_v48 = vmul.f32 0.70710677, %v16429_v54  ;;  %v7167_v59 = vadd.f32 1.0, %v10843_v58 }
 0xc6e   : > { %v16439_v28 = vpop.f32.mrb[238].mxu0  ;;  %v10847_v53 = vpop.eup %10846  ;;  %v7386_v6 = vpack.c.bf16 %v7294_v23, %v7290_v17  ;;  %v6788_v14 = vmul.f32 0.5, %v6456_v10  ;;  %v6790_v39 = vmul.f32 0.5, %v6649_v60  ;;  %v6921_v36 = vmul.f32 0.70710677, %v16432_v25 }
 0xc6f   : > { %v16449_v35 = vpop.f32.mrb[239].mxu1  ;;  %v16451_v27 = vpop.f32.mrb[239].mxu0  ;;  %7774 = vmatprep.mubr.bf16.mxu1 %v7384_v3  ;;  %v7169_v44 = vadd.f32 1.0, %v10845_v29  ;;  %v7168_v12 = vadd.f32 1.0, %v10847_v53  ;;  %10858 = verf.f32 %v6919_v48  ;;  %v6920_v43 = vmul.f32 0.70710677, %v16435_v45 }
 0xc70   : > { %v10849_v63 = vpop.eup %10848  ;;  %7935 = vmatprep.mubr.bf16.mxu0 %v7386_v6  ;;  %10860 = verf.f32 %v6921_v36  ;;  %v6922_v30 = vmul.f32 0.70710677, %v16447_v56  ;;  %v6464_v51 = vadd.f32 %v16386_v0, %v15834_v22  ;;  %v6657_v38 = vadd.f32 %v16388_v55, %v15838_v21 }
 0xc71   : > { %v7170_v9 = vadd.f32 1.0, %v10849_v63  ;;  %v10851_v4 = vpop.eup %10850  ;;  %10862 = verf.f32 %v6920_v43  ;;  %v6466_v10 = vadd.f32 %v16396_v26, %v15842_v42  ;;  %v6659_v60 = vadd.f32 %v16398_v1, %v15844_v37  ;;  %7775 = vmatmul.mubr.bf16.gmra.mrb[32].mxu1 %v7383_v13 }
 0xc72   : > { %v10853_v52 = vpop.eup %10852  ;;  %v7295_v2 = vmul.f32 %v7167_v59, %v16378_v61  ;;  %v7171_v32 = vadd.f32 1.0, %v10851_v4  ;;  %10864 = verf.f32 %v6922_v30  ;;  %v6923_v50 = vmul.f32 0.70710677, %v6464_v51 }
 0xc73   : > { %v10855_v20 = vpop.eup %10854  ;;  %v7297_v49 = vmul.f32 %v7169_v44, %v6785_v11  ;;  %v7296_v0 = vmul.f32 %v7168_v12, %v6784_v46  ;;  %v7173_v31 = vadd.f32 1.0, %v10853_v52  ;;  %v6925_v19 = vmul.f32 0.70710677, %v6657_v38 }
 0xc74   : > { %v7299_v58 = vmul.f32 %v7171_v32, %v6787_v18  ;;  %v7172_v17 = vadd.f32 1.0, %v10855_v20  ;;  %10866 = verf.f32 %v6923_v50  ;;  %v6924_v55 = vmul.f32 0.70710677, %v6466_v10  ;;  %v10857_v26 = vpop.eup %10856 }
 0xc75   : > { %v7298_v1 = vmul.f32 %v7170_v9, %v6786_v41  ;;  %v7301_v23 = vmul.f32 %v7173_v31, %v6789_v40  ;;  %7936 = vmatmul.mubr.bf16.gmra.mrb[32].mxu0 %v7385_v24  ;;  %10868 = verf.f32 %v6925_v19  ;;  %v6926_v61 = vmul.f32 0.70710677, %v6659_v60 }
 0xc76   : > { %v7387_v5 = vpack.c.bf16 %v7299_v58, %v7295_v2  ;;  %v7300_v3 = vmul.f32 %v7172_v17, %v6788_v14  ;;  %v7174_v29 = vadd.f32 1.0, %v10857_v26  ;;  %10870 = verf.f32 %v6924_v55 }
 0xc77   : > { %v7389_v53 = vpack.c.bf16 %v7301_v23, %v7297_v49  ;;  %10872 = verf.f32 %v6926_v61  ;;  %v16478_v47 = vadd.f32 %v16418_v15, %v15834_v22  ;;  %v16482_v8 = vadd.f32 %v16420_v16, %v15838_v21 }
 0xc78   : > { %v7302_v13 = vmul.f32 %v7174_v29, %v6790_v39  ;;  %v7388_v11 = vpack.c.bf16 %v7300_v3, %v7296_v0  ;;  %v16486_v33 = vadd.f32 %v16424_v57, %v15842_v42  ;;  %v16490_v62 = vadd.f32 %v16426_v7, %v15844_v37 }
 0xc79   : > { %v10859_v24 = vpop.eup %10858  ;;  %v6927_v46 = vmul.f32 0.70710677, %v16478_v47  ;;  %v6929_v15 = vmul.f32 0.70710677, %v16482_v8  ;;  %v6791_v16 = vmul.f32 0.5, %v16429_v54  ;;  %v6793_v41 = vmul.f32 0.5, %v16432_v25 }
 0xc7a   : > { %v10861_v6 = vpop.eup %10860  ;;  %7782 = vmatprep.mubr.bf16.mxu1 %v7388_v11  ;;  %v7390_v63 = vpack.c.bf16 %v7302_v13, %v7298_v1  ;;  %v6928_v18 = vmul.f32 0.70710677, %v16486_v33  ;;  %v6792_v40 = vmul.f32 0.5, %v16435_v45  ;;  %v6794_v7 = vmul.f32 0.5, %v16447_v56 }
 0xc7b   : > { %v10863_v57 = vpop.eup %10862  ;;  %v6795_v48 = vmul.f32 0.5, %v6464_v51  ;;  %v6930_v59 = vmul.f32 0.70710677, %v16490_v62  ;;  %7783 = vmatmul.mubr.bf16.gmra.mrb[36].mxu1 %v7387_v5  ;;  %v6797_v39 = vmul.f32 0.5, %v6657_v38  ;;  %v6796_v36 = vmul.f32 0.5, %v6466_v10 }
 0xc7c   : > { %v10865_v14 = vpop.eup %10864  ;;  %7943 = vmatprep.mubr.bf16.mxu0 %v7390_v63  ;;  %10874 = verf.f32 %v6927_v46  ;;  %v6474_v54 = vadd.f32 %v16437_v34, %v15834_v22  ;;  %v7175_v25 = vadd.f32 1.0, %v10859_v24  ;;  %v6798_v44 = vmul.f32 0.5, %v6659_v60 }
 0xc7d   : > { %7944 = vmatmul.mubr.bf16.gmra.mrb[36].mxu0 %v7389_v53  ;;  %10876 = verf.f32 %v6929_v15  ;;  %v6667_v45 = vadd.f32 %v16439_v28, %v15838_v21  ;;  %v7177_v12 = vadd.f32 1.0, %v10861_v6  ;;  %v7176_v43 = vadd.f32 1.0, %v10863_v57 }
 0xc7e   : > { %v10867_v56 = vpop.eup %10866  ;;  %10878 = verf.f32 %v6928_v18  ;;  %v6931_v9 = vmul.f32 0.70710677, %v6474_v54  ;;  %v7178_v51 = vadd.f32 1.0, %v10865_v14  ;;  %v6476_v34 = vadd.f32 %v16449_v35, %v15842_v42 }
 0xc7f   : > { %v10869_v30 = vpop.eup %10868  ;;  %v7179_v4 = vadd.f32 1.0, %v10867_v56  ;;  %10880 = verf.f32 %v6930_v59  ;;  %v6933_v38 = vmul.f32 0.70710677, %v6667_v45  ;;  %v6669_v60 = vadd.f32 %v16451_v27, %v15844_v37 }
 0xc80   : > { %v10871_v10 = vpop.eup %10870  ;;  %v7181_v52 = vadd.f32 1.0, %v10869_v30  ;;  %10882 = verf.f32 %v6931_v9  ;;  %v7303_v2 = vmul.f32 %v7175_v25, %v6791_v16  ;;  %v7305_v20 = vmul.f32 %v7177_v12, %v6793_v41 }
 0xc81   : > { %v10873_v28 = vpop.eup %10872  ;;  %v7307_v32 = vmul.f32 %v7179_v4, %v6795_v48  ;;  %v7180_v50 = vadd.f32 1.0, %v10871_v10  ;;  %10884 = verf.f32 %v6933_v38  ;;  %v6932_v31 = vmul.f32 0.70710677, %v6476_v34 }
 0xc82   : > { %v7309_v49 = vmul.f32 %v7181_v52, %v6797_v39  ;;  %v7182_v0 = vadd.f32 1.0, %v10873_v28  ;;  %v7304_v19 = vmul.f32 %v7176_v43, %v6792_v40  ;;  %v6934_v55 = vmul.f32 0.70710677, %v6669_v60 }
 0xc83   : > { %v7391_v58 = vpack.c.bf16 %v7307_v32, %v7303_v2  ;;  %v7308_v17 = vmul.f32 %v7180_v50, %v6796_v36  ;;  %v7306_v26 = vmul.f32 %v7178_v51, %v6794_v7  ;;  %10886 = verf.f32 %v6932_v31 }
 0xc84   : > { %v7393_v1 = vpack.c.bf16 %v7309_v49, %v7305_v20  ;;  %v7310_v23 = vmul.f32 %v7182_v0, %v6798_v44  ;;  %10888 = verf.f32 %v6934_v55  ;;  %v6799_v46 = vmul.f32 0.5, %v16478_v47 }
 0xc85   : > { %v7392_v35 = vpack.c.bf16 %v7308_v17, %v7304_v19  ;;  %v6803_v15 = vmul.f32 0.5, %v6474_v54  ;;  %v6801_v63 = vmul.f32 0.5, %v16482_v8  ;;  %v6805_v16 = vmul.f32 0.5, %v6667_v45 }
 0xc86   : > { %v10875_v27 = vpop.eup %10874  ;;  %v7394_v61 = vpack.c.bf16 %v7310_v23, %v7306_v26  ;;  %v6800_v36 = vmul.f32 0.5, %v16486_v33  ;;  %v6804_v44 = vmul.f32 0.5, %v6476_v34  ;;  %v6802_v47 = vmul.f32 0.5, %v16490_v62 }
 0xc87   : > { %v10877_v5 = vpop.eup %10876  ;;  %7790 = vmatprep.mubr.bf16.mxu1 %v7392_v35  ;;  %v7183_v53 = vadd.f32 1.0, %v10875_v27  ;;  %v6806_v12 = vmul.f32 0.5, %v6669_v60 }
 0xc88   : > { %v10879_v3 = vpop.eup %10878  ;;  %7951 = vmatprep.mubr.bf16.mxu0 %v7394_v61  ;;  %7791 = vmatmul.mubr.bf16.gmra.mrb[40].mxu1 %v7391_v58  ;;  %v7185_v11 = vadd.f32 1.0, %v10877_v5 }
 0xc89   : > { %v10881_v29 = vpop.eup %10880  ;;  %7952 = vmatmul.mubr.bf16.gmra.mrb[40].mxu0 %v7393_v1  ;;  %v7311_v18 = vmul.f32 %v7183_v53, %v6799_v46  ;;  %v7184_v57 = vadd.f32 1.0, %v10879_v3 }
 0xc8a   : > { %v10883_v13 = vpop.eup %10882  ;;  %v7313_v48 = vmul.f32 %v7185_v11, %v6801_v63  ;;  %v7186_v59 = vadd.f32 1.0, %v10881_v29 }
 0xc8b   : > { %v10885_v24 = vpop.eup %10884  ;;  %v7187_v6 = vadd.f32 1.0, %v10883_v13  ;;  %v7312_v45 = vmul.f32 %v7184_v57, %v6800_v36 }
 0xc8c   : > { %v7189_v41 = vadd.f32 1.0, %v10885_v24  ;;  %v7314_v9 = vmul.f32 %v7186_v59, %v6802_v47 }
 0xc8d   : > { %v7315_v40 = vmul.f32 %v7187_v6, %v6803_v15  ;;  %v10887_v7 = vpop.eup %10886 }
 0xc8e   : > { %v7317_v14 = vmul.f32 %v7189_v41, %v6805_v16  ;;  %v10889_v39 = vpop.eup %10888  ;;  %v7188_v56 = vadd.f32 1.0, %v10887_v7 }
 0xc8f   : > { %v7395_v25 = vpack.c.bf16 %v7315_v40, %v7311_v18  ;;  %v7190_v8 = vadd.f32 1.0, %v10889_v39 }
 0xc90   : > { %v7397_v54 = vpack.c.bf16 %v7317_v14, %v7313_v48  ;;  %v7316_v43 = vmul.f32 %v7188_v56, %v6804_v44 }
 0xc91   : > { %v7318_v30 = vmul.f32 %v7190_v8, %v6806_v12 }
 0xc92   : > { %v7396_v51 = vpack.c.bf16 %v7316_v43, %v7312_v45 }
 0xc93   : > { %v7398_v4 = vpack.c.bf16 %v7318_v30, %v7314_v9 }
 0xc94   : > { %7798 = vmatprep.mubr.bf16.mxu1 %v7396_v51 }
 0xc95   : > { %7959 = vmatprep.mubr.bf16.mxu0 %v7398_v4  ;;  %7799 = vmatmul.mubr.bf16.gmra.mrb[44].mxu1 %v7395_v25 }
 0xc96   : > { %7960 = vmatmul.mubr.bf16.gmra.mrb[44].mxu0 %v7397_v54 }
 0xca4   : > { %v6479_v38 = vpop.f32.mrb[240].mxu1  ;;  %v6672_v33 = vpop.f32.mrb[240].mxu0 }
 0xca5   : > { %v6480_v10 = vadd.f32 %v6479_v38, %v15834_v22  ;;  %v6673_v52 = vadd.f32 %v6672_v33, %v15838_v21  ;;  %v6481_v62 = vpop.f32.mrb[241].mxu1  ;;  %v6674_v34 = vpop.f32.mrb[241].mxu0 }
 0xca6   : > { %v6482_v60 = vadd.f32 %v6481_v62, %v15842_v42  ;;  %v6675_v28 = vadd.f32 %v6674_v34, %v15844_v37  ;;  %v6483_v2 = vpop.f32.mrb[242].mxu1  ;;  %v6676_v32 = vpop.f32.mrb[242].mxu0 }
 0xca7   : > { %v6935_v50 = vmul.f32 0.70710677, %v6480_v10  ;;  %v6937_v20 = vmul.f32 0.70710677, %v6673_v52  ;;  %v6484_v31 = vadd.f32 %v6483_v2, %v15834_v22  ;;  %v6677_v19 = vadd.f32 %v6676_v32, %v15838_v21  ;;  %v6485_v58 = vpop.f32.mrb[243].mxu1  ;;  %v6678_v17 = vpop.f32.mrb[243].mxu0 }
 0xca8   : > { %v6936_v49 = vmul.f32 0.70710677, %v6482_v60  ;;  %v6938_v0 = vmul.f32 0.70710677, %v6675_v28  ;;  %v6486_v55 = vadd.f32 %v6485_v58, %v15842_v42  ;;  %v6679_v26 = vadd.f32 %v6678_v17, %v15844_v37 }
 0xca9   : > { %10890 = verf.f32 %v6935_v50  ;;  %v6939_v1 = vmul.f32 0.70710677, %v6484_v31  ;;  %v6941_v23 = vmul.f32 0.70710677, %v6677_v19  ;;  %v6807_v29 = vmul.f32 0.5, %v6480_v10 }
 0xcaa   : > { %10892 = verf.f32 %v6937_v20  ;;  %v6940_v35 = vmul.f32 0.70710677, %v6486_v55  ;;  %v6942_v27 = vmul.f32 0.70710677, %v6679_v26  ;;  %v6809_v6 = vmul.f32 0.5, %v6673_v52 }
 0xcab   : > { %10894 = verf.f32 %v6936_v49  ;;  %v6808_v63 = vmul.f32 0.5, %v6482_v60  ;;  %v6810_v7 = vmul.f32 0.5, %v6675_v28  ;;  %v6811_v36 = vmul.f32 0.5, %v6484_v31 }
 0xcac   : > { %10896 = verf.f32 %v6938_v0  ;;  %v6813_v25 = vmul.f32 0.5, %v6677_v19  ;;  %v6812_v44 = vmul.f32 0.5, %v6486_v55  ;;  %v6814_v8 = vmul.f32 0.5, %v6679_v26 }
 0xcad   : > { %10898 = verf.f32 %v6939_v1 }
 0xcae   : > { %10900 = verf.f32 %v6941_v23 }
 0xcaf   : > { %10902 = verf.f32 %v6940_v35  ;;  %v6489_v61 = vpop.f32.mrb[244].mxu1  ;;  %v6682_v5 = vpop.f32.mrb[244].mxu0 }
 0xcb0   : > { %10904 = verf.f32 %v6942_v27  ;;  %v6490_v53 = vadd.f32 %v6489_v61, %v15834_v22  ;;  %v6683_v13 = vadd.f32 %v6682_v5, %v15838_v21  ;;  %v6491_v11 = vpop.f32.mrb[245].mxu1  ;;  %v6684_v24 = vpop.f32.mrb[245].mxu0 }
 0xcb1   : > { %v6492_v16 = vadd.f32 %v6491_v11, %v15842_v42  ;;  %v6493_v41 = vpop.f32.mrb[246].mxu1  ;;  %v6686_v18 = vpop.f32.mrb[246].mxu0  ;;  %v6685_v59 = vadd.f32 %v6684_v24, %v15844_v37 }
 0xcb2   : > { %v6943_v48 = vmul.f32 0.70710677, %v6490_v53  ;;  %v6495_v14 = vpop.f32.mrb[247].mxu1  ;;  %v6945_v56 = vmul.f32 0.70710677, %v6683_v13  ;;  %v6688_v47 = vpop.f32.mrb[247].mxu0  ;;  %v6494_v60 = vadd.f32 %v6493_v41, %v15834_v22  ;;  %v6687_v28 = vadd.f32 %v6686_v18, %v15838_v21 }
 0xcb3   : > { %v10891_v3 = vpop.eup %10890  ;;  %v6944_v45 = vmul.f32 0.70710677, %v6492_v16  ;;  %v6946_v10 = vmul.f32 0.70710677, %v6685_v59  ;;  %v6496_v50 = vadd.f32 %v6495_v14, %v15842_v42  ;;  %v6815_v26 = vmul.f32 0.5, %v6490_v53 }
 0xcb4   : > { %v10893_v46 = vpop.eup %10892  ;;  %v7191_v15 = vadd.f32 1.0, %v10891_v3  ;;  %10906 = verf.f32 %v6943_v48  ;;  %v6947_v31 = vmul.f32 0.70710677, %v6494_v60  ;;  %v6949_v55 = vmul.f32 0.70710677, %v6687_v28 }
 0xcb5   : > { %v10895_v57 = vpop.eup %10894  ;;  %v7193_v40 = vadd.f32 1.0, %v10893_v46  ;;  %10908 = verf.f32 %v6945_v56  ;;  %v6948_v1 = vmul.f32 0.70710677, %v6496_v50  ;;  %v6689_v23 = vadd.f32 %v6688_v47, %v15844_v37 }
 0xcb6   : > { %v10897_v39 = vpop.eup %10896  ;;  %v16524_v12 = vmul.f32 %v7191_v15, %v6807_v29  ;;  %v7192_v30 = vadd.f32 1.0, %v10895_v57  ;;  %10910 = verf.f32 %v6944_v45  ;;  %v6817_v35 = vmul.f32 0.5, %v6683_v13 }
 0xcb7   : > { %v10899_v54 = vpop.eup %10898  ;;  %v7321_v9 = vmul.f32 %v7193_v40, %v6809_v6  ;;  %v7194_v38 = vadd.f32 1.0, %v10897_v39  ;;  %10912 = verf.f32 %v6946_v10  ;;  %v6816_v29 = vmul.f32 0.5, %v6492_v16 }
 0xcb8   : > { %v10901_v43 = vpop.eup %10900  ;;  %v7195_v51 = vadd.f32 1.0, %v10899_v54  ;;  %v7320_v20 = vmul.f32 %v7192_v30, %v6808_v63  ;;  %10914 = verf.f32 %v6947_v31  ;;  %v6950_v11 = vmul.f32 0.70710677, %v6689_v23 }
 0xcb9   : > { %v10903_v4 = vpop.eup %10902  ;;  %v7197_v33 = vadd.f32 1.0, %v10901_v43  ;;  %v7322_v19 = vmul.f32 %v7194_v38, %v6810_v7  ;;  %10916 = verf.f32 %v6949_v55  ;;  %v6818_v63 = vmul.f32 0.5, %v6685_v59 }
 0xcba   : > { %v10905_v52 = vpop.eup %10904  ;;  %v7323_v62 = vmul.f32 %v7195_v51, %v6811_v36  ;;  %v7196_v34 = vadd.f32 1.0, %v10903_v4  ;;  %10918 = verf.f32 %v6948_v1  ;;  %v6819_v16 = vmul.f32 0.5, %v6494_v60 }
 0xcbb   : > { %v7325_v2 = vmul.f32 %v7197_v33, %v6813_v25  ;;  %v7198_v32 = vadd.f32 1.0, %v10905_v52  ;;  %v6821_v7 = vmul.f32 0.5, %v6687_v28  ;;  %10920 = verf.f32 %v6950_v11 }
 0xcbc   : > { %v7399_v49 = vpack.c.bf16 %v7323_v62, %v16524_v12  ;;  %v7324_v0 = vmul.f32 %v7196_v34, %v6812_v44  ;;  %v6499_v27 = vpop.f32.mrb[248].mxu1  ;;  %v6692_v61 = vpop.f32.mrb[248].mxu0  ;;  %v16535_v25 = vmul.f32 0.5, %v6496_v50  ;;  %v16537_v44 = vmul.f32 0.5, %v6689_v23 }
 0xcbd   : > { %v7401_v58 = vpack.c.bf16 %v7325_v2, %v7321_v9  ;;  %v7326_v17 = vmul.f32 %v7198_v32, %v6814_v8  ;;  %v6500_v24 = vadd.f32 %v6499_v27, %v15834_v22  ;;  %v6501_v46 = vpop.f32.mrb[249].mxu1  ;;  %v6694_v15 = vpop.f32.mrb[249].mxu0  ;;  %v6693_v53 = vadd.f32 %v6692_v61, %v15838_v21 }
 0xcbe   : > { %v7400_v5 = vpack.c.bf16 %v7324_v0, %v7320_v20  ;;  %v10907_v6 = vpop.eup %10906  ;;  %v6502_v41 = vadd.f32 %v6501_v46, %v15842_v42  ;;  %v6695_v13 = vadd.f32 %v6694_v15, %v15844_v37  ;;  %v6503_v18 = vpop.f32.mrb[250].mxu1 }
 0xcbf   : > { %v7402_v3 = vpack.c.bf16 %v7326_v17, %v7322_v19  ;;  %v6696_v57 = vpop.f32.mrb[250].mxu0  ;;  %v10909_v40 = vpop.eup %10908  ;;  %v6951_v48 = vmul.f32 0.70710677, %v6500_v24  ;;  %v7199_v36 = vadd.f32 1.0, %v10907_v6  ;;  %v6953_v56 = vmul.f32 0.70710677, %v6693_v53 }
 0xcc0   : > { %7806 = vmatprep.mubr.bf16.mxu1 %v7400_v5  ;;  %v6505_v14 = vpop.f32.mrb[251].mxu1  ;;  %v6698_v39 = vpop.f32.mrb[251].mxu0  ;;  %v7201_v47 = vadd.f32 1.0, %v10909_v40  ;;  %v16539_v54 = vmul.f32 0.5, %v6500_v24  ;;  %v6952_v12 = vmul.f32 0.70710677, %v6502_v41  ;;  %v6504_v4 = vadd.f32 %v6503_v18, %v15834_v22 }
 0xcc1   : > { %7967 = vmatprep.mubr.bf16.mxu0 %v7402_v3  ;;  %7807 = vmatmul.mubr.bf16.gmra.mrb[48].mxu1 %v7399_v49  ;;  %v10911_v59 = vpop.eup %10910  ;;  %10922 = verf.f32 %v6951_v48  ;;  %v16541_v43 = vmul.f32 0.5, %v6693_v53  ;;  %v6954_v9 = vmul.f32 0.70710677, %v6695_v13  ;;  %v16543_v51 = vmul.f32 0.5, %v6502_v41 }
 0xcc2   : > { %7968 = vmatmul.mubr.bf16.gmra.mrb[48].mxu0 %v7401_v58  ;;  %v10913_v8 = vpop.eup %10912  ;;  %v7200_v45 = vadd.f32 1.0, %v10911_v59  ;;  %10924 = verf.f32 %v6953_v56  ;;  %v6697_v38 = vadd.f32 %v6696_v57, %v15838_v21  ;;  %v6506_v33 = vadd.f32 %v6505_v14, %v15842_v42 }
 0xcc3   : > { %v7202_v30 = vadd.f32 1.0, %v10913_v8  ;;  %10926 = verf.f32 %v6952_v12  ;;  %v6699_v10 = vadd.f32 %v6698_v39, %v15844_v37  ;;  %v10915_v34 = vpop.eup %10914  ;;  %v16549_v60 = vmul.f32 %v7199_v36, %v6815_v26 }
 0xcc4   : > { %10928 = verf.f32 %v6954_v9  ;;  %v6509_v52 = vpop.f32.mrb[252].mxu1  ;;  %v6702_v62 = vpop.f32.mrb[252].mxu0  ;;  %v16551_v28 = vmul.f32 %v7201_v47, %v6817_v35  ;;  %v6955_v2 = vmul.f32 0.70710677, %v6504_v4  ;;  %v16554_v0 = vmul.f32 %v7200_v45, %v6816_v29 }
 0xcc5   : > { %v6510_v32 = vadd.f32 %v6509_v52, %v15834_v22  ;;  %v6511_v50 = vpop.f32.mrb[253].mxu1  ;;  %v6704_v20 = vpop.f32.mrb[253].mxu0  ;;  %v7203_v31 = vadd.f32 1.0, %v10915_v34  ;;  %v16556_v19 = vmul.f32 0.5, %v6695_v13  ;;  %v6957_v58 = vmul.f32 0.70710677, %v6697_v38 }
 0xcc6   : > { %v10917_v49 = vpop.eup %10916  ;;  %v6513_v17 = vpop.f32.mrb[254].mxu1  ;;  %v16558_v1 = vmul.f32 %v7202_v30, %v6818_v63  ;;  %10930 = verf.f32 %v6955_v2  ;;  %v6956_v23 = vmul.f32 0.70710677, %v6506_v33  ;;  %v16562_v5 = vmul.f32 0.5, %v6504_v4 }
 0xcc7   : > { %v10919_v55 = vpop.eup %10918  ;;  %v7205_v26 = vadd.f32 1.0, %v10917_v49  ;;  %v6706_v35 = vpop.f32.mrb[254].mxu0  ;;  %v16560_v61 = vmul.f32 %v7203_v31, %v6819_v16  ;;  %10932 = verf.f32 %v6957_v58  ;;  %v6958_v3 = vmul.f32 0.70710677, %v6699_v10 }
 0xcc8   : > { %v6515_v27 = vpop.f32.mrb[255].mxu1  ;;  %v6708_v29 = vpop.f32.mrb[255].mxu0  ;;  %v7204_v46 = vadd.f32 1.0, %v10919_v55  ;;  %10934 = verf.f32 %v6956_v23  ;;  %v6959_v15 = vmul.f32 0.70710677, %v6510_v32  ;;  %v6829_v53 = vmul.f32 0.5, %v6697_v38 }
 0xcc9   : > { %v10921_v11 = vpop.eup %10920  ;;  %v16564_v24 = vmul.f32 %v7205_v26, %v6821_v7  ;;  %v7403_v6 = vpack.c.bf16 %v16560_v61, %v16549_v60  ;;  %10936 = verf.f32 %v6958_v3  ;;  %v6703_v18 = vadd.f32 %v6702_v62, %v15838_v21 }
 0xcca   : > { %v7206_v63 = vadd.f32 1.0, %v10921_v11  ;;  %10938 = verf.f32 %v6959_v15  ;;  %v6512_v57 = vadd.f32 %v6511_v50, %v15842_v42  ;;  %v6828_v7 = vmul.f32 0.5, %v6506_v33 }
 0xccb   : > { %v10923_v41 = vpop.eup %10922  ;;  %v7405_v13 = vpack.c.bf16 %v16564_v24, %v16551_v28  ;;  %v6705_v48 = vadd.f32 %v6704_v20, %v15844_v37  ;;  %v6514_v14 = vadd.f32 %v6513_v17, %v15834_v22  ;;  %v16577_v56 = vmul.f32 %v7204_v46, %v16535_v25 }
 0xccc   : > { %v10925_v40 = vpop.eup %10924  ;;  %v7207_v16 = vadd.f32 1.0, %v10923_v41  ;;  %v8700_v39 = vpop.f32.mrb[0].mxu1  ;;  %v6830_v47 = vmul.f32 0.5, %v6699_v10  ;;  %v16579_v12 = vmul.f32 0.5, %v6510_v32  ;;  %v6961_v8 = vmul.f32 0.70710677, %v6703_v18 }
 0xccd   : > { %v16574_v59 = vpop.f32.mrb[0].mxu0  ;;  %v10927_v36 = vpop.eup %10926  ;;  %v16582_v30 = vmul.f32 %v7206_v63, %v16537_v44  ;;  %v7209_v4 = vadd.f32 1.0, %v10925_v40  ;;  %v16584_v38 = vmul.f32 0.5, %v6703_v18  ;;  %v6960_v22 = vmul.f32 0.70710677, %v6512_v57 }
 0xcce   : > { %v8701_v45 = vpop.f32.mrb[1].mxu1  ;;  %v10929_v9 = vpop.eup %10928  ;;  %v7208_v62 = vadd.f32 1.0, %v10927_v36  ;;  %10940 = verf.f32 %v6961_v8  ;;  %v16586_v34 = vmul.f32 0.5, %v6512_v57  ;;  %v6962_v25 = vmul.f32 0.70710677, %v6705_v48 }
 0xccf   : > { %v8813_v33 = vpop.f32.mrb[1].mxu0  ;;  %v8703_v52 = vpop.f32.mrb[2].mxu1  ;;  %v16589_v32 = vmul.f32 %v7207_v16, %v16539_v54  ;;  %10942 = verf.f32 %v6960_v22  ;;  %v16591_v50 = vmul.f32 0.5, %v6705_v48  ;;  %v6963_v44 = vmul.f32 0.70710677, %v6514_v14 }
 0xcd0   : > { %v8815_v10 = vpop.f32.mrb[2].mxu0  ;;  %v8704_v2 = vpop.f32.mrb[3].mxu1  ;;  %v7210_v31 = vadd.f32 1.0, %v10929_v9  ;;  %10944 = verf.f32 %v6962_v25  ;;  %v6707_v58 = vadd.f32 %v6706_v35, %v15838_v21  ;;  %v6516_v17 = vadd.f32 %v6515_v27, %v15842_v42  ;;  %v16603_v21 = vld [vmem:[%s16801_s8] ss:$0 sm:$0xff] }
 0xcd1   : > { %v8816_v20 = vpop.f32.mrb[3].mxu0  ;;  %v10931_v49 = vpop.eup %10930  ;;  %10946 = verf.f32 %v6963_v44  ;;  %v6709_v23 = vadd.f32 %v6708_v29, %v15844_v37  ;;  %v8702_v3 = vadd.f32 %v8701_v45, %v8700_v39  ;;  %v16597_v11 = vmul.f32 %v7209_v4, %v16541_v43 }
 0xcd2   : > { %v10933_v55 = vpop.eup %10932  ;;  %v7211_v26 = vadd.f32 1.0, %v10931_v49  ;;  %v7336_v46 = vmul.f32 %v7208_v62, %v16543_v51  ;;  %v6965_v63 = vmul.f32 0.70710677, %v6707_v58  ;;  %v16608_v37 = vmul.f32 0.5, %v6514_v14 }
 0xcd3   : > { %v10935_v54 = vpop.eup %10934  ;;  %v7213_v15 = vadd.f32 1.0, %v10933_v55  ;;  %v6964_v29 = vmul.f32 0.70710677, %v6516_v17  ;;  %v6966_v40 = vmul.f32 0.70710677, %v6709_v23  ;;  %v7338_v39 = vmul.f32 %v7210_v31, %v16556_v19 }
 0xcd4   : > { %v10937_v42 = vpop.eup %10936  ;;  %v16606_v35 = vmul.f32 %v7211_v26, %v16562_v5  ;;  %v7212_v27 = vadd.f32 1.0, %v10935_v54  ;;  %v8706_v41 = vpop.f32.mrb[4].mxu1  ;;  %10948 = verf.f32 %v6965_v63  ;;  %v7404_v19 = vpack.c.bf16 %v16577_v56, %v16554_v0 }
 0xcd5   : > { %v8818_v43 = vpop.f32.mrb[4].mxu0  ;;  %v10939_v18 = vpop.eup %10938  ;;  %v16610_v57 = vmul.f32 %v7213_v15, %v6829_v53  ;;  %v7214_v51 = vadd.f32 1.0, %v10937_v42  ;;  %10950 = verf.f32 %v6964_v29  ;;  %v7713_v53 = vadd.f32 %v8702_v3, %v16603_v21 }
 0xcd6   : > { %v8707_v16 = vpop.f32.mrb[5].mxu1  ;;  %v8819_v48 = vpop.f32.mrb[5].mxu0  ;;  %v7407_v5 = vpack.c.bf16 %v16606_v35, %v16589_v32  ;;  %v7340_v36 = vmul.f32 %v7212_v27, %v6828_v7  ;;  %10952 = verf.f32 %v6966_v40  ;;  %v7215_v62 = vadd.f32 1.0, %v10939_v18  ;;  %7814 = vmatprep.mubr.bf16.mxu1 %v7404_v19  ;;  %v17917_v40 = vld [vmem:[#allocation19_spill] sm:$0xff]  ;;  %v17921_v32 = vld [vmem:[#allocation84_spill] sm:$0xff] }
 0xcd7   : > { %v8709_v14 = vpop.f32.mrb[6].mxu1  ;;  %v8821_v8 = vpop.f32.mrb[6].mxu0  ;;  %v7409_v45 = vpack.c.bf16 %v16610_v57, %v16597_v11  ;;  %v7342_v9 = vmul.f32 %v7214_v51, %v6830_v47  ;;  %v8814_v25 = vadd.f32 %v8813_v33, %v16574_v59  ;;  %v7406_v7 = vpack.c.bf16 %v16582_v30, %v16558_v1  ;;  %7815 = vmatmul.mubr.bf16.gmra.mrb[52].mxu1 %v7403_v6 }
 0xcd8   : > { %v8710_v4 = vpop.f32.mrb[7].mxu1  ;;  %v8822_v22 = vpop.f32.mrb[7].mxu0  ;;  %v8705_v49 = vadd.f32 %v8704_v2, %v8703_v52  ;;  %v8817_v31 = vadd.f32 %v8816_v20, %v8815_v10  ;;  %v8708_v55 = vadd.f32 %v8707_v16, %v8706_v41  ;;  %v7408_v26 = vpack.c.bf16 %v7340_v36, %v7336_v46  ;;  %v17916_v52 = vld [vmem:[#allocation80_spill] sm:$0xff] }
 0xcd9   : > { %v10941_v44 = vpop.eup %10940  ;;  %v6837_v54 = vmul.f32 0.5, %v6707_v58  ;;  %v7874_v3 = vadd.f32 %v8814_v25, %v7713_v53  ;;  %7975 = vmatprep.mubr.bf16.mxu0 %v7406_v7  ;;  %v8820_v15 = vadd.f32 %v8819_v48, %v8818_v43  ;;  %v7410_v63 = vpack.c.bf16 %v7342_v9, %v7338_v39  ;;  %v17918_v48 = vld [vmem:[#allocation79_spill] sm:$0xff] }
 0xcda   : > { %v10943_v47 = vpop.eup %10942  ;;  %v6836_v27 = vmul.f32 0.5, %v6516_v17  ;;  %7976 = vmatmul.mubr.bf16.gmra.mrb[52].mxu0 %v7405_v13  ;;  %v7716_v0 = vadd.f32 %v8705_v49, %v16603_v21  ;;  %v7721_v1 = vadd.f32 %v8708_v55, %v16603_v21  ;;  %v8711_v59 = vadd.f32 %v8710_v4, %v8709_v14  ;;  %7822 = vmatprep.mubr.bf16.mxu1 %v7408_v26 }
 0xcdb   : > { %v10945_v42 = vpop.eup %10944  ;;  %v16632_v30 = vmul.f32 %v7215_v62, %v16579_v12  ;;  %v6838_v33 = vmul.f32 0.5, %v6709_v23  ;;  %v8000_v10 = vadd.f32 %v7874_v3, %v17916_v52  ;;  %7983 = vmatprep.mubr.bf16.mxu0 %v7410_v63  ;;  %v8823_v60 = vadd.f32 %v8822_v22, %v8821_v8 }
 0xcdc   : > { %v10947_v56 = vpop.eup %10946  ;;  %v8712_v61 = vpop.f32.mrb[8].mxu1  ;;  %v7217_v28 = vadd.f32 1.0, %v10941_v44  ;;  %v7877_v13 = vadd.f32 %v8817_v31, %v7716_v0  ;;  %v7882_v2 = vadd.f32 %v8820_v15, %v7721_v1  ;;  %v7216_v17 = vadd.f32 1.0, %v10943_v47  ;;  %v17919_v31 = vld [vmem:[#allocation51_spill] sm:$0xff] }
 0xcdd   : > { %v8824_v6 = vpop.f32.mrb[8].mxu0  ;;  %v7219_v24 = vadd.f32 1.0, %v10947_v56  ;;  %v8713_v20 = vpop.f32.mrb[9].mxu1  ;;  %8032 = vst [vmem:[%s16637_s30] sm:$0xff] %v8000_v10  ;;  %v7724_v12 = vadd.f32 %v8711_v59, %v16603_v21  ;;  %v7218_v18 = vadd.f32 1.0, %v10945_v42  ;;  %v17920_v42 = vld [vmem:[#allocation75_spill] sm:$0xff] }
 0xcde   : > { %v8825_v58 = vpop.f32.mrb[9].mxu0  ;;  %v8714_v23 = vadd.f32 %v8713_v20, %v8712_v61  ;;  %v8715_v29 = vpop.f32.mrb[10].mxu1  ;;  %v8001_v16 = vadd.f32 %v7877_v13, %v17917_v40  ;;  %v8002_v39 = vadd.f32 %v7882_v2, %v17918_v48  ;;  %v7345_v19 = vmul.f32 %v7217_v28, %v16584_v38  ;;  %v17923_v20 = vld [vmem:[#allocation66_spill] sm:$0xff] }
 0xcdf   : > { %v8826_v46 = vadd.f32 %v8825_v58, %v8824_v6  ;;  %v8827_v41 = vpop.f32.mrb[10].mxu0  ;;  %v10949_v43 = vpop.eup %10948  ;;  %v7347_v51 = vmul.f32 %v7219_v24, %v16608_v37  ;;  %v7885_v53 = vadd.f32 %v8823_v60, %v7724_v12  ;;  %v7344_v47 = vmul.f32 %v7216_v17, %v16586_v34  ;;  %7823 = vmatmul.mubr.bf16.gmra.mrb[56].mxu1 %v7407_v5  ;;  %v17922_v24 = vld [vmem:[#allocation20_spill] sm:$0xff] }
 0xce0   : > { %v8716_v36 = vpop.f32.mrb[11].mxu1  ;;  %v8828_v14 = vpop.f32.mrb[11].mxu0  ;;  %v7221_v9 = vadd.f32 1.0, %v10949_v43  ;;  %v7729_v4 = vadd.f32 %v8714_v23, %v16603_v21  ;;  %8033 = vst [vmem:[%s16637_s30 + $0x8] sm:$0xff] %v8001_v16  ;;  %8034 = vst [vmem:[%s16637_s30 + $0x10] sm:$0xff] %v8002_v39 }
 0xce1   : > { %v10951_v8 = vpop.eup %10950  ;;  %v8717_v22 = vadd.f32 %v8716_v36, %v8715_v29  ;;  %v7411_v25 = vpack.c.bf16 %v7347_v51, %v16632_v30  ;;  %v8829_v37 = vadd.f32 %v8828_v14, %v8827_v41  ;;  %v8003_v55 = vadd.f32 %v7885_v53, %v17919_v31 }
 0xce2   : > { %v10953_v62 = vpop.eup %10952  ;;  %v7220_v7 = vadd.f32 1.0, %v10951_v8  ;;  %v7349_v44 = vmul.f32 %v7221_v9, %v6837_v54  ;;  %v7890_v26 = vadd.f32 %v8826_v46, %v7729_v4  ;;  %7984 = vmatmul.mubr.bf16.gmra.mrb[56].mxu0 %v7409_v45  ;;  %v7346_v54 = vmul.f32 %v7218_v18, %v16591_v50  ;;  %v17924_v8 = vld [vmem:[#allocation59_spill] sm:$0xff]  ;;  %v17925_v4 = vld [vmem:[#allocation52_spill] sm:$0xff] }
 0xce3   : > { %v7222_v49 = vadd.f32 1.0, %v10953_v62  ;;  %v7732_v38 = vadd.f32 %v8717_v22, %v16603_v21  ;;  %8035 = vst [vmem:[%s16637_s30 + $0x18] sm:$0xff] %v8003_v55 }
 0xce4   : > { %v7348_v3 = vmul.f32 %v7220_v7, %v6836_v27  ;;  %v7413_v15 = vpack.c.bf16 %v7349_v44, %v7345_v19  ;;  %v8004_v0 = vadd.f32 %v7890_v26, %v17920_v42 }
 0xce5   : > { %v7350_v63 = vmul.f32 %v7222_v49, %v6838_v33  ;;  %v7893_v27 = vadd.f32 %v8829_v37, %v7732_v38 }
 0xce6   : > { %v7412_v34 = vpack.c.bf16 %v7348_v3, %v7344_v47  ;;  %8036 = vst [vmem:[%s16637_s30 + $0x20] sm:$0xff] %v8004_v0 }
 0xce7   : > { %v7414_v1 = vpack.c.bf16 %v7350_v63, %v7346_v54  ;;  %v8005_v35 = vadd.f32 %v7893_v27, %v17921_v32  ;;  %v17926_v63 = vld [vmem:[#allocation60_spill] sm:$0xff] }
 0xce8   : > { %7830 = vmatprep.mubr.bf16.mxu1 %v7412_v34  ;;  %v17927_v34 = vld [vmem:[#allocation77_spill] sm:$0xff] }
 0xce9   : > { %7991 = vmatprep.mubr.bf16.mxu0 %v7414_v1  ;;  %8037 = vst [vmem:[%s16637_s30 + $0x28] sm:$0xff] %v8005_v35  ;;  %7831 = vmatmul.mubr.bf16.gmra.mrb[60].mxu1 %v7411_v25 }
 0xcea   : > { %7992 = vmatmul.mubr.bf16.gmra.mrb[60].mxu0 %v7413_v15 }
 0xd10   : > { %v8718_v11 = vpop.f32.mrb[12].mxu1 }
 0xd11   : > { %v8719_v50 = vpop.f32.mrb[13].mxu1 }
 0xd12   : > { %v8830_v57 = vpop.f32.mrb[12].mxu0  ;;  %v8720_v5 = vadd.f32 %v8719_v50, %v8718_v11  ;;  %v8721_v59 = vpop.f32.mrb[14].mxu1 }
 0xd13   : > { %v8831_v45 = vpop.f32.mrb[13].mxu0  ;;  %v8722_v33 = vpop.f32.mrb[15].mxu1 }
 0xd14   : > { %v8832_v56 = vadd.f32 %v8831_v45, %v8830_v57  ;;  %v8833_v30 = vpop.f32.mrb[14].mxu0  ;;  %v7737_v52 = vadd.f32 %v8720_v5, %v16603_v21  ;;  %v8723_v10 = vadd.f32 %v8722_v33, %v8721_v59 }
 0xd15   : > { %v8834_v60 = vpop.f32.mrb[15].mxu0 }
 0xd16   : > { %v8835_v61 = vadd.f32 %v8834_v60, %v8833_v30  ;;  %v7898_v6 = vadd.f32 %v8832_v56, %v7737_v52  ;;  %v7740_v28 = vadd.f32 %v8723_v10, %v16603_v21 }
 0xd18   : > { %v8006_v13 = vadd.f32 %v7898_v6, %v17922_v24  ;;  %v7901_v2 = vadd.f32 %v8835_v61, %v7740_v28  ;;  %v17928_v61 = vld [vmem:[#allocation89_spill] sm:$0xff] }
 0xd1a   : > { %8038 = vst [vmem:[%s16637_s30 + $0x30] sm:$0xff] %v8006_v13  ;;  %v8007_v58 = vadd.f32 %v7901_v2, %v17923_v20  ;;  %v17929_v13 = vld [vmem:[#allocation21_spill] sm:$0xff] }
 0xd1c   : > { %8039 = vst [vmem:[%s16637_s30 + $0x38] sm:$0xff] %v8007_v58 }
 0xd1d   : > { %v8724_v17 = vpop.f32.mrb[16].mxu1 }
 0xd1e   : > { %v8725_v12 = vpop.f32.mrb[17].mxu1  ;;  %v8836_v23 = vpop.f32.mrb[16].mxu0 }
 0xd1f   : > { %v8726_v46 = vadd.f32 %v8725_v12, %v8724_v17  ;;  %v8727_v29 = vpop.f32.mrb[18].mxu1  ;;  %v8837_v41 = vpop.f32.mrb[17].mxu0 }
 0xd20   : > { %v8728_v43 = vpop.f32.mrb[19].mxu1  ;;  %v8838_v51 = vadd.f32 %v8837_v41, %v8836_v23  ;;  %v8839_v40 = vpop.f32.mrb[18].mxu0 }
 0xd21   : > { %v7745_v18 = vadd.f32 %v8726_v46, %v16603_v21  ;;  %v8729_v16 = vadd.f32 %v8728_v43, %v8727_v29  ;;  %v8840_v48 = vpop.f32.mrb[19].mxu0 }
 0xd22   : > { %v8841_v14 = vadd.f32 %v8840_v48, %v8839_v40 }
 0xd23   : > { %v7906_v39 = vadd.f32 %v8838_v51, %v7745_v18  ;;  %v7748_v36 = vadd.f32 %v8729_v16, %v16603_v21 }
 0xd25   : > { %v8008_v9 = vadd.f32 %v7906_v39, %v17924_v8  ;;  %v7909_v53 = vadd.f32 %v8841_v14, %v7748_v36  ;;  %v17930_v39 = vld [vmem:[#allocation46_spill] sm:$0xff] }
 0xd27   : > { %8040 = vst [vmem:[%s16637_s30 + $0x40] sm:$0xff] %v8008_v9  ;;  %v8009_v22 = vadd.f32 %v7909_v53, %v17925_v4  ;;  %v17931_v4 = vld [vmem:[#allocation68_spill] sm:$0xff] }
 0xd29   : > { %v8730_v62 = vpop.f32.mrb[20].mxu1  ;;  %8041 = vst [vmem:[%s16637_s30 + $0x48] sm:$0xff] %v8009_v22 }
 0xd2a   : > { %v8731_v19 = vpop.f32.mrb[21].mxu1 }
 0xd2b   : > { %v8732_v25 = vadd.f32 %v8731_v19, %v8730_v62  ;;  %v8733_v7 = vpop.f32.mrb[22].mxu1 }
 0xd2c   : > { %v8734_v37 = vpop.f32.mrb[23].mxu1 }
 0xd2d   : > { %v8842_v44 = vpop.f32.mrb[20].mxu0  ;;  %v7753_v49 = vadd.f32 %v8732_v25, %v16603_v21  ;;  %v8735_v31 = vadd.f32 %v8734_v37, %v8733_v7 }
 0xd2e   : > { %v8843_v55 = vpop.f32.mrb[21].mxu0 }
 0xd2f   : > { %v8844_v26 = vadd.f32 %v8843_v55, %v8842_v44  ;;  %v8845_v47 = vpop.f32.mrb[22].mxu0  ;;  %v7756_v3 = vadd.f32 %v8735_v31, %v16603_v21 }
 0xd30   : > { %v8846_v38 = vpop.f32.mrb[23].mxu0 }
 0xd31   : > { %v7914_v54 = vadd.f32 %v8844_v26, %v7753_v49  ;;  %v8847_v15 = vadd.f32 %v8846_v38, %v8845_v47  ;;  %v17932_v38 = vld [vmem:[#allocation45_spill] sm:$0xff] }
 0xd33   : > { %v8010_v42 = vadd.f32 %v7914_v54, %v17926_v63  ;;  %v7917_v0 = vadd.f32 %v8847_v15, %v7756_v3 }
 0xd34   : > { %v8736_v1 = vpop.f32.mrb[24].mxu1 }
 0xd35   : > { %8042 = vst [vmem:[%s16637_s30 + $0x50] sm:$0xff] %v8010_v42  ;;  %v8011_v27 = vadd.f32 %v7917_v0, %v17927_v34  ;;  %v8737_v32 = vpop.f32.mrb[25].mxu1  ;;  %v17933_v34 = vld [vmem:[#allocation111_spill] sm:$0xff] }
 0xd36   : > { %v8738_v35 = vadd.f32 %v8737_v32, %v8736_v1  ;;  %v8739_v11 = vpop.f32.mrb[26].mxu1 }
 0xd37   : > { %8043 = vst [vmem:[%s16637_s30 + $0x58] sm:$0xff] %v8011_v27  ;;  %v8740_v57 = vpop.f32.mrb[27].mxu1 }
 0xd38   : > { %v8848_v50 = vpop.f32.mrb[24].mxu0  ;;  %v7761_v5 = vadd.f32 %v8738_v35, %v16603_v21  ;;  %v8741_v45 = vadd.f32 %v8740_v57, %v8739_v11 }
 0xd39   : > { %v8849_v59 = vpop.f32.mrb[25].mxu0 }
 0xd3a   : > { %v8850_v56 = vadd.f32 %v8849_v59, %v8848_v50  ;;  %v8851_v30 = vpop.f32.mrb[26].mxu0  ;;  %v7764_v33 = vadd.f32 %v8741_v45, %v16603_v21 }
 0xd3b   : > { %v8852_v52 = vpop.f32.mrb[27].mxu0 }
 0xd3c   : > { %v7922_v10 = vadd.f32 %v8850_v56, %v7761_v5  ;;  %v8853_v60 = vadd.f32 %v8852_v52, %v8851_v30  ;;  %v8742_v24 = vpop.f32.mrb[28].mxu1  ;;  %v17934_v52 = vld [vmem:[#allocation163_spill] sm:$0xff] }
 0xd3d   : > { %v8743_v58 = vpop.f32.mrb[29].mxu1 }
 0xd3e   : > { %v8012_v6 = vadd.f32 %v7922_v10, %v17928_v61  ;;  %v7925_v28 = vadd.f32 %v8853_v60, %v7764_v33  ;;  %v8744_v17 = vadd.f32 %v8743_v58, %v8742_v24  ;;  %v8745_v23 = vpop.f32.mrb[30].mxu1  ;;  %v17935_v61 = vld [vmem:[#allocation148_spill] sm:$0xff] }
 0xd3f   : > { %v8746_v41 = vpop.f32.mrb[31].mxu1 }
 0xd40   : > { %8044 = vst [vmem:[%s16637_s30 + $0x60] sm:$0xff] %v8012_v6  ;;  %v8013_v2 = vadd.f32 %v7925_v28, %v17929_v13  ;;  %v8854_v20 = vpop.f32.mrb[28].mxu0  ;;  %v7769_v43 = vadd.f32 %v8744_v17, %v16603_v21  ;;  %v8747_v18 = vadd.f32 %v8746_v41, %v8745_v23 }
 0xd41   : > { %v8855_v12 = vpop.f32.mrb[29].mxu0 }
 0xd42   : > { %8045 = vst [vmem:[%s16637_s30 + $0x68] sm:$0xff] %v8013_v2  ;;  %v8856_v46 = vadd.f32 %v8855_v12, %v8854_v20  ;;  %v8857_v29 = vpop.f32.mrb[30].mxu0  ;;  %v7772_v48 = vadd.f32 %v8747_v18, %v16603_v21 }
 0xd43   : > { %v8858_v51 = vpop.f32.mrb[31].mxu0 }
 0xd44   : > { %v8859_v40 = vadd.f32 %v8858_v51, %v8857_v29  ;;  %v7930_v16 = vadd.f32 %v8856_v46, %v7769_v43  ;;  %v8748_v8 = vpop.f32.mrb[32].mxu1 }
 0xd45   : > { %v8749_v53 = vpop.f32.mrb[33].mxu1 }
 0xd46   : > { %v8014_v36 = vadd.f32 %v7930_v16, %v17930_v39  ;;  %v7933_v14 = vadd.f32 %v8859_v40, %v7772_v48  ;;  %v8750_v62 = vadd.f32 %v8749_v53, %v8748_v8  ;;  %v8751_v25 = vpop.f32.mrb[34].mxu1  ;;  %v17936_v40 = vld [vmem:[#allocation150_spill] sm:$0xff]  ;;  %v17937_v39 = vld [vmem:[#allocation147_spill] sm:$0xff] }
 0xd47   : > { %v8752_v44 = vpop.f32.mrb[35].mxu1 }
 0xd48   : > { %v8860_v9 = vpop.f32.mrb[32].mxu0  ;;  %8046 = vst [vmem:[%s16637_s30 + $0x70] sm:$0xff] %v8014_v36  ;;  %v8015_v22 = vadd.f32 %v7933_v14, %v17931_v4  ;;  %v7777_v49 = vadd.f32 %v8750_v62, %v16603_v21  ;;  %v8753_v31 = vadd.f32 %v8752_v44, %v8751_v25 }
 0xd49   : > { %v8861_v19 = vpop.f32.mrb[33].mxu0 }
 0xd4a   : > { %v8862_v7 = vadd.f32 %v8861_v19, %v8860_v9  ;;  %v8863_v37 = vpop.f32.mrb[34].mxu0  ;;  %8047 = vst [vmem:[%s16637_s30 + $0x78] sm:$0xff] %v8015_v22  ;;  %v7780_v3 = vadd.f32 %v8753_v31, %v16603_v21 }
 0xd4b   : > { %v8864_v55 = vpop.f32.mrb[35].mxu0 }
 0xd4c   : > { %v8865_v26 = vadd.f32 %v8864_v55, %v8863_v37  ;;  %v7938_v47 = vadd.f32 %v8862_v7, %v7777_v49 }
 0xd4e   : > { %v8016_v54 = vadd.f32 %v7938_v47, %v17932_v38  ;;  %v7941_v15 = vadd.f32 %v8865_v26, %v7780_v3  ;;  %v8754_v63 = vpop.f32.mrb[36].mxu1  ;;  %v17938_v26 = vld [vmem:[#allocation149_spill] sm:$0xff]  ;;  %v17939_v38 = vld [vmem:[#allocation144_spill] sm:$0xff] }
 0xd4f   : > { %v8755_v0 = vpop.f32.mrb[37].mxu1 }
 0xd50   : > { %v8866_v42 = vpop.f32.mrb[36].mxu0  ;;  %8048 = vst [vmem:[%s16637_s30 + $0x80] sm:$0xff] %v8016_v54  ;;  %v8017_v27 = vadd.f32 %v7941_v15, %v17933_v34  ;;  %v8756_v1 = vadd.f32 %v8755_v0, %v8754_v63  ;;  %v8757_v35 = vpop.f32.mrb[38].mxu1 }
 0xd51   : > { %v8867_v32 = vpop.f32.mrb[37].mxu0  ;;  %v8758_v50 = vpop.f32.mrb[39].mxu1 }
 0xd52   : > { %v8868_v11 = vadd.f32 %v8867_v32, %v8866_v42  ;;  %v8869_v57 = vpop.f32.mrb[38].mxu0  ;;  %8049 = vst [vmem:[%s16637_s30 + $0x88] sm:$0xff] %v8017_v27  ;;  %v7785_v5 = vadd.f32 %v8756_v1, %v16603_v21  ;;  %v8759_v45 = vadd.f32 %v8758_v50, %v8757_v35 }
 0xd53   : > { %v8870_v59 = vpop.f32.mrb[39].mxu0 }
 0xd54   : > { %v8871_v56 = vadd.f32 %v8870_v59, %v8869_v57  ;;  %v7946_v30 = vadd.f32 %v8868_v11, %v7785_v5  ;;  %v7788_v33 = vadd.f32 %v8759_v45, %v16603_v21 }
 0xd56   : > { %v8018_v10 = vadd.f32 %v7946_v30, %v17934_v52  ;;  %v7949_v60 = vadd.f32 %v8871_v56, %v7788_v33  ;;  %v17940_v56 = vld [vmem:[#allocation146_spill] sm:$0xff]  ;;  %v17941_v52 = vld [vmem:[#allocation87_spill] sm:$0xff] }
 0xd58   : > { %8050 = vst [vmem:[%s16637_s30 + $0x90] sm:$0xff] %v8018_v10  ;;  %v8019_v6 = vadd.f32 %v7949_v60, %v17935_v61 }
 0xd5a   : > { %8051 = vst [vmem:[%s16637_s30 + $0x98] sm:$0xff] %v8019_v6 }
 0xd5b   : > { %v8760_v28 = vpop.f32.mrb[40].mxu1 }
 0xd5c   : > { %v8872_v24 = vpop.f32.mrb[40].mxu0  ;;  %v8761_v13 = vpop.f32.mrb[41].mxu1 }
 0xd5d   : > { %v8762_v2 = vadd.f32 %v8761_v13, %v8760_v28  ;;  %v8873_v20 = vpop.f32.mrb[41].mxu0  ;;  %v8763_v58 = vpop.f32.mrb[42].mxu1 }
 0xd5e   : > { %v8874_v17 = vadd.f32 %v8873_v20, %v8872_v24  ;;  %v8875_v12 = vpop.f32.mrb[42].mxu0  ;;  %v8764_v23 = vpop.f32.mrb[43].mxu1 }
 0xd5f   : > { %v7793_v46 = vadd.f32 %v8762_v2, %v16603_v21  ;;  %v8765_v29 = vadd.f32 %v8764_v23, %v8763_v58  ;;  %v8876_v41 = vpop.f32.mrb[43].mxu0 }
 0xd60   : > { %v8877_v43 = vadd.f32 %v8876_v41, %v8875_v12 }
 0xd61   : > { %v7954_v18 = vadd.f32 %v8874_v17, %v7793_v46  ;;  %v7796_v51 = vadd.f32 %v8765_v29, %v16603_v21 }
 0xd63   : > { %v8020_v16 = vadd.f32 %v7954_v18, %v17936_v40  ;;  %v7957_v48 = vadd.f32 %v8877_v43, %v7796_v51  ;;  %v17942_v43 = vld [vmem:[#allocation145_spill] sm:$0xff] }
 0xd65   : > { %8052 = vst [vmem:[%s16637_s30 + $0xa0] sm:$0xff] %v8020_v16  ;;  %v8021_v36 = vadd.f32 %v7957_v48, %v17937_v39 }
 0xd67   : > { %8053 = vst [vmem:[%s16637_s30 + $0xa8] sm:$0xff] %v8021_v36  ;;  %v17943_v36 = vld [vmem:[#allocation104_spill] sm:$0xff] }
 0xd68   : > { %v8766_v14 = vpop.f32.mrb[44].mxu1 }
 0xd69   : > { %v8878_v8 = vpop.f32.mrb[44].mxu0  ;;  %v8767_v9 = vpop.f32.mrb[45].mxu1 }
 0xd6a   : > { %v8768_v53 = vadd.f32 %v8767_v9, %v8766_v14  ;;  %v8879_v4 = vpop.f32.mrb[45].mxu0  ;;  %v8769_v22 = vpop.f32.mrb[46].mxu1 }
 0xd6b   : > { %v8880_v62 = vadd.f32 %v8879_v4, %v8878_v8  ;;  %v8881_v19 = vpop.f32.mrb[46].mxu0  ;;  %v8770_v25 = vpop.f32.mrb[47].mxu1 }
 0xd6c   : > { %v7801_v7 = vadd.f32 %v8768_v53, %v16603_v21  ;;  %v8771_v37 = vadd.f32 %v8770_v25, %v8769_v22  ;;  %v8882_v44 = vpop.f32.mrb[47].mxu0 }
 0xd6d   : > { %v8883_v49 = vadd.f32 %v8882_v44, %v8881_v19 }
 0xd6e   : > { %v7962_v31 = vadd.f32 %v8880_v62, %v7801_v7  ;;  %v7804_v55 = vadd.f32 %v8771_v37, %v16603_v21 }
 0xd70   : > { %v8022_v47 = vadd.f32 %v7962_v31, %v17938_v26  ;;  %v7965_v3 = vadd.f32 %v8883_v49, %v7804_v55  ;;  %v17944_v49 = vld [vmem:[#allocation107_spill] sm:$0xff] }
 0xd72   : > { %8054 = vst [vmem:[%s16637_s30 + $0xb0] sm:$0xff] %v8022_v47  ;;  %v8023_v54 = vadd.f32 %v7965_v3, %v17939_v38 }
 0xd74   : > { %8055 = vst [vmem:[%s16637_s30 + $0xb8] sm:$0xff] %v8023_v54  ;;  %v17945_v54 = vld [vmem:[#allocation65_spill] sm:$0xff] }
 0xd94   : > { %v8772_v15 = vpop.f32.mrb[48].mxu1 }
 0xd95   : > { %v8884_v63 = vpop.f32.mrb[48].mxu0  ;;  %v8773_v42 = vpop.f32.mrb[49].mxu1 }
 0xd96   : > { %v8885_v0 = vpop.f32.mrb[49].mxu0  ;;  %v8774_v34 = vadd.f32 %v8773_v42, %v8772_v15  ;;  %v8775_v1 = vpop.f32.mrb[50].mxu1 }
 0xd97   : > { %v8886_v27 = vadd.f32 %v8885_v0, %v8884_v63  ;;  %v8887_v32 = vpop.f32.mrb[50].mxu0  ;;  %v8776_v35 = vpop.f32.mrb[51].mxu1 }
 0xd98   : > { %v8888_v11 = vpop.f32.mrb[51].mxu0  ;;  %v7809_v57 = vadd.f32 %v8774_v34, %v16603_v21  ;;  %v8777_v50 = vadd.f32 %v8776_v35, %v8775_v1 }
 0xd99   : > { %v8889_v5 = vadd.f32 %v8888_v11, %v8887_v32 }
 0xd9a   : > { %v7970_v45 = vadd.f32 %v8886_v27, %v7809_v57  ;;  %v7812_v59 = vadd.f32 %v8777_v50, %v16603_v21 }
 0xd9c   : > { %v8024_v30 = vadd.f32 %v7970_v45, %v17940_v56  ;;  %v7973_v33 = vadd.f32 %v8889_v5, %v7812_v59  ;;  %v17946_v5 = vld [vmem:[#allocation115_spill] sm:$0xff]  ;;  %v17947_v56 = vld [vmem:[#allocation152_spill] sm:$0xff] }
 0xd9e   : > { %8056 = vst [vmem:[%s16637_s30 + $0xc0] sm:$0xff] %v8024_v30  ;;  %v8025_v10 = vadd.f32 %v7973_v33, %v17941_v52 }
 0xda0   : > { %8057 = vst [vmem:[%s16637_s30 + $0xc8] sm:$0xff] %v8025_v10 }
 0xdaa   : > { %v8778_v60 = vpop.f32.mrb[52].mxu1 }
 0xdab   : > { %v8779_v6 = vpop.f32.mrb[53].mxu1 }
 0xdac   : > { %v8780_v24 = vadd.f32 %v8779_v6, %v8778_v60  ;;  %v8781_v2 = vpop.f32.mrb[54].mxu1 }
 0xdad   : > { %v8890_v61 = vpop.f32.mrb[52].mxu0  ;;  %v8782_v58 = vpop.f32.mrb[55].mxu1 }
 0xdae   : > { %v8891_v28 = vpop.f32.mrb[53].mxu0  ;;  %v7817_v12 = vadd.f32 %v8780_v24, %v16603_v21  ;;  %v8783_v23 = vadd.f32 %v8782_v58, %v8781_v2 }
 0xdaf   : > { %v8892_v13 = vadd.f32 %v8891_v28, %v8890_v61  ;;  %v8893_v20 = vpop.f32.mrb[54].mxu0 }
 0xdb0   : > { %v8894_v17 = vpop.f32.mrb[55].mxu0  ;;  %v7820_v41 = vadd.f32 %v8783_v23, %v16603_v21 }
 0xdb1   : > { %v8895_v46 = vadd.f32 %v8894_v17, %v8893_v20  ;;  %v7978_v29 = vadd.f32 %v8892_v13, %v7817_v12 }
 0xdb2   : > { %v8784_v40 = vpop.f32.mrb[56].mxu1 }
 0xdb3   : > { %v8026_v18 = vadd.f32 %v7978_v29, %v17942_v43  ;;  %v7981_v51 = vadd.f32 %v8895_v46, %v7820_v41  ;;  %v8785_v48 = vpop.f32.mrb[57].mxu1 }
 0xdb4   : > { %v8786_v8 = vadd.f32 %v8785_v48, %v8784_v40  ;;  %v8787_v53 = vpop.f32.mrb[58].mxu1 }
 0xdb5   : > { %v8896_v16 = vpop.f32.mrb[56].mxu0  ;;  %8058 = vst [vmem:[%s16637_s30 + $0xd0] sm:$0xff] %v8026_v18  ;;  %v8027_v14 = vadd.f32 %v7981_v51, %v17943_v36  ;;  %v8788_v22 = vpop.f32.mrb[59].mxu1 }
 0xdb6   : > { %v8897_v39 = vpop.f32.mrb[57].mxu0  ;;  %v7825_v19 = vadd.f32 %v8786_v8, %v16603_v21  ;;  %v8789_v25 = vadd.f32 %v8788_v22, %v8787_v53 }
 0xdb7   : > { %v8898_v9 = vadd.f32 %v8897_v39, %v8896_v16  ;;  %v8899_v4 = vpop.f32.mrb[58].mxu0  ;;  %8059 = vst [vmem:[%s16637_s30 + $0xd8] sm:$0xff] %v8027_v14 }
 0xdb8   : > { %v8900_v62 = vpop.f32.mrb[59].mxu0  ;;  %v7828_v44 = vadd.f32 %v8789_v25, %v16603_v21 }
 0xdb9   : > { %v8901_v7 = vadd.f32 %v8900_v62, %v8899_v4  ;;  %v7986_v37 = vadd.f32 %v8898_v9, %v7825_v19 }
 0xdbb   : > { %v8028_v31 = vadd.f32 %v7986_v37, %v17944_v49  ;;  %v7989_v55 = vadd.f32 %v8901_v7, %v7828_v44 }
 0xdbc   : > { %v8790_v26 = vpop.f32.mrb[60].mxu1 }
 0xdbd   : > { %v8902_v47 = vpop.f32.mrb[60].mxu0  ;;  %v8791_v3 = vpop.f32.mrb[61].mxu1  ;;  %8060 = vst [vmem:[%s16637_s30 + $0xe0] sm:$0xff] %v8028_v31  ;;  %v8029_v15 = vadd.f32 %v7989_v55, %v17945_v54 }
 0xdbe   : > { %v8903_v38 = vpop.f32.mrb[61].mxu0  ;;  %v8792_v63 = vadd.f32 %v8791_v3, %v8790_v26  ;;  %v8793_v0 = vpop.f32.mrb[62].mxu1 }
 0xdbf   : > { %v8904_v42 = vadd.f32 %v8903_v38, %v8902_v47  ;;  %v8905_v34 = vpop.f32.mrb[62].mxu0  ;;  %v8794_v27 = vpop.f32.mrb[63].mxu1  ;;  %8061 = vst [vmem:[%s16637_s30 + $0xe8] sm:$0xff] %v8029_v15 }
 0xdc0   : > { %v8906_v1 = vpop.f32.mrb[63].mxu0  ;;  %v7833_v32 = vadd.f32 %v8792_v63, %v16603_v21  ;;  %v8795_v35 = vadd.f32 %v8794_v27, %v8793_v0 }
 0xdc1   : > { %v8907_v11 = vadd.f32 %v8906_v1, %v8905_v34 }
 0xdc2   : > { %v7994_v57 = vadd.f32 %v8904_v42, %v7833_v32  ;;  %v7836_v50 = vadd.f32 %v8795_v35, %v16603_v21 }
 0xdc4   : > { %v8030_v45 = vadd.f32 %v7994_v57, %v17946_v5  ;;  %v7997_v59 = vadd.f32 %v8907_v11, %v7836_v50 }
 0xdc6   : > { %8062 = vst [vmem:[%s16637_s30 + $0xf0] sm:$0xff] %v8030_v45  ;;  %v8031_v30 = vadd.f32 %v7997_v59, %v17947_v56 }
 0xdc8   : > { %8063 = vst [vmem:[%s16637_s30 + $0xf8] sm:$0xff] %v8031_v30 }
 0xdc9   : > { %11141 = shalt.err (!%p11138_p13)
}
 0xdca   : > { %s11142_s19 = scalar_lea.hbm %s16744_s18, 4096  ;;  %s11146_s20 = scalar_lea.hbm %s16802_s9, 8192 }
 0xdcb   : > { %p11143_p9 = scmp.ne.s32.totalorder %s16744_s18, %s11142_s19  ;;  %p11147_p4 = scmp.lt.u32.totalorder %s16744_s18, %s16802_s9 }
 0xdcc   : > { %p11148_p8 = scmp.lt.u32.totalorder %s11146_s20, %s11142_s19  ;;  %p11150_p3 = scmp.lt.u32.totalorder %s11142_s19, %s16744_s18 }
 0xdcd   : > { %p11144_p0 = pnand %p11143_p9, %p11431_p10 }
 0xdce   : > { %p11149_p6 = por %p11148_p8, %p11147_p4 }
 0xdcf   : > { %p11145_p11 = pneg %p11144_p0 }
 0xdd0   : > { %p11151_p5 = por %p11150_p3, %p11149_p6 }
 0xdd2   : > { %p11152_p7 = pnand %p11151_p5, %p11145_p11 }
 0xdd4   : > { %11155 = shalt.err (!%p11152_p7)
}
 0xdd5   : > { %s11223_s15 = smov 128   ;;  %s11224_s17 = smov 8  }
 0xdd6   : > { %9614 = dma.vmem_to_hbm [thread:$0]  (%p11431_p10), %s16746_s29, 4096, %s16744_s18, %s8065_s22, %s11223_s15, %s11223_s15, %s11224_s17  }
 0xdd7 PF: > { %s17948_s13 = sld [smem:[#allocation16_spill]]  ;;  %s17949_s25 = sld [smem:[#allocation17_spill]] }
 0xdd8   : > { %p17951_p2 = scmp.ge.s32.totalorder %s11202_s12, 2 }
 0xddd   : > { %s8094_s1 = sand.u32 1, %s17948_s13   ;;  %p17950_p12 = scmp.ne.s32.totalorder %s17949_s25, 0 }
 0xdde   : > { %s8095_s24 = scalar_lea.sflag [#allocation4], %s8094_s1 }
 0xddf   : > { %p9634_p1 = pnand %p17951_p2, %p17950_p12 }
 0xde1   : > { %11185 = dma.done.wait (!%p9634_p1), %s8095_s24, 4096  }
 0xde2   : > { %11187 = vsyncadd (!%p9634_p1), %s8095_s24, 4294963200  ;;  %p24_p13 = scmp.ge.s32.totalorder %s11421_s28, 4   ;;  %s17952_s30 = smov %s11194_s10 }
 0xde3   : > { %s17953_s10 = smov %s11198_s11  ;;  %s17954_s11 = smov %s11437_s27 }
 0xde4   : > { %s17955_s12 = smov %s11421_s28  ;;  %26 = sbr.rel (!%p24_p13) target bundleno = 9 (0x9), region = 117 }
 0xdeb   :  { %8100 = vsyncpa [#allocation3], 1 }
 0xdec   :  { %8102 = vsyncpa [#allocation3 + $0x1], 1 }
 0xded   :  { %8103 = vsyncpa [#allocation6], 1 }
 0xdee   :  { %8104 = vsyncpa [#allocation9], 1 }
 0xdef   :  { %8105 = vsyncpa [#allocation4], 1 }
 0xdf0   :  { %8107 = vsyncpa [#allocation4 + $0x1], 1 }

</bundles_post_ra>
